<compile_context>
chip_gen: v6e
topology: v6e:2x2x1
jax: 0.10.0
libtpu: 0.0.40
codegen_flags: <defaults>
</compile_context>

<pallas_src>
import numpy as np
import jax
import jax.numpy as jnp
from jax.experimental import pallas as pl
from jax.experimental.pallas import tpu as pltpu

NV = 169          # valid positions (13 * 13), hard-coded by the module
NP = 256          # position axis padded to 2 * 128 lanes
PC = 128          # per-projection channel pad for f/g (64 -> 128)


def _ceil_to(n, m):
    return ((n + m - 1) // m) * m


# ----------------------------- Pallas kernel --------------------------------

def self_attn_kernel(xt_ref, xres_ref, f5_ref, z_ref,
                     wfg_ref, bfg_ref, rt_ref, wh_ref, wu_ref, bhu_ref,
                     wc_ref, bc_ref, gamma_ref, out_ref):
    xt = xt_ref[0]            # (NP, 512)  bf16, position-major input
    xres = xres_ref[0]        # (512, NP)  f32, residual copy of x
    f5 = f5_ref[0]            # (128, KP)  bf16, flattened fifth-maxpool feats
    z = z_ref[0]              # (256, NP)  bf16, eighth-maxpool feats

    # Fused f/g 1x1 convs: a single (NP,512)@(512,2*PC) matmul (bf16 -> f32).
    fg = jnp.dot(xt, wfg_ref[...], preferred_element_type=jnp.float32)
    fg = fg + bfg_ref[...]                                # (NP, 2*PC)
    ft = fg[:, :PC].astype(jnp.bfloat16)                  # queries (NP, PC)
    gt = fg[:, PC:].astype(jnp.bfloat16)                  # keys    (NP, PC)
    # (channels 64..127 of each half are exactly zero -> no effect on energy)

    # energy[n, m] = sum_c f[c,n] * g[c,m]  ==  ft @ gt^T (contract last dims)
    energy = jax.lax.dot_general(ft, gt, (((1,), (1,)), ((), ())),
                                 preferred_element_type=jnp.float32)  # (NP, NP)

    # softmax over keys; padded key columns masked out
    key_valid = jax.lax.broadcasted_iota(jnp.int32, (NP, NP), 1) < NV
    energy = jnp.where(key_valid, energy, -1e30)
    m = jnp.max(energy, axis=-1, keepdims=True)
    e = jnp.exp(energy - m)
    attn = e * pl.reciprocal(jnp.sum(e, axis=-1, keepdims=True), approx=True)

    # Bilinear resize fused in: y13 = feat5_flat @ R^T, where R is the
    # Kronecker product of the two separable bilinear weight matrices.
    y13 = jnp.dot(f5, rt_ref[...],
                  preferred_element_type=jnp.float32).astype(jnp.bfloat16)  # (128, NP)

    # h_conv / u_conv (output-channel axis pre-padded 169 -> NP rows)
    h = jnp.dot(wh_ref[...], y13, preferred_element_type=jnp.float32)  # (NP, NP)
    u = jnp.dot(wu_ref[...], z, preferred_element_type=jnp.float32)    # (NP, NP)

    pre = (attn + h + u + bhu_ref[...]).astype(jnp.bfloat16)           # (NP, NP)

    # channel_conv 169 -> 512 (padded channel columns of wc are zero)
    out = jnp.dot(wc_ref[...], pre, preferred_element_type=jnp.float32)
    out = out + bc_ref[...]                                            # (512, NP)

    out_ref[0] = gamma_ref[0, 0] * out + xres


def self_attn_pallas(xt, xres, f5, z, prepared):
    """xt: (B,NP,512) bf16, xres: (B,512,NP) f32, f5: (B,128,KP) bf16,
    z: (B,256,NP) bf16; prepared = packed/padded weights."""
    wfg, bfg, rt, wh_p, wu_p, bhu, wc_p, bc, gamma = prepared
    B = xt.shape[0]

    def batched(a):
        return pl.BlockSpec((1,) + a.shape[1:], lambda b: (b, 0, 0))

    def full2d(a):
        return pl.BlockSpec(a.shape, lambda b: (0, 0))

    return pl.pallas_call(
        self_attn_kernel,
        out_shape=jax.ShapeDtypeStruct((B, 512, NP), jnp.float32),
        grid=(B,),
        in_specs=[batched(xt), batched(xres), batched(f5), batched(z),
                  full2d(wfg), full2d(bfg), full2d(rt), full2d(wh_p),
                  full2d(wu_p), full2d(bhu), full2d(wc_p), full2d(bc),
                  pl.BlockSpec(memory_space=pltpu.MemorySpace.SMEM)],
        out_specs=pl.BlockSpec((1, 512, NP), lambda b: (b, 0, 0)),
        compiler_params=pltpu.CompilerParams(
            dimension_semantics=("parallel",)),
    )(xt, xres, f5, z, wfg, bfg, rt, wh_p, wu_p, bhu, wc_p, bc, gamma)


# ----------------------------- host-side prep --------------------------------

def _resize_matrix(in_size, out_size):
    """Bilinear interpolation weights matching PyTorch align_corners=False."""
    scale = in_size / out_size
    dst = np.arange(out_size, dtype=np.float64)
    src = np.maximum((dst + 0.5) * scale - 0.5, 0.0)
    i0 = np.minimum(np.floor(src).astype(np.int64), in_size - 1)
    i1 = np.minimum(i0 + 1, in_size - 1)
    lam = (src - i0).astype(np.float32)
    M = np.zeros((out_size, in_size), dtype=np.float32)
    idx = dst.astype(np.int64)
    M[idx, i0] += 1.0 - lam
    M[idx, i1] += lam
    return M


def prepare_params(params, feat5_hw):
    """Pack/pad the module parameters into the kernel's bf16/f32 layout (once)."""
    wf, bf, wg, bg, wh, bh, wu, bu, wc, bc, gamma = params
    C = wf.shape[1]            # 512
    CP = wf.shape[0]           # 64

    # Fused & transposed f/g weight, each half padded to PC lanes.
    wfg_t = jnp.zeros((C, 2 * PC), jnp.float32)
    wfg_t = wfg_t.at[:, :CP].set(wf.T).at[:, PC:PC + CP].set(wg.T)
    bfg = jnp.zeros((1, 2 * PC), jnp.float32)
    bfg = bfg.at[0, :CP].set(bf[:, 0]).at[0, PC:PC + CP].set(bg[:, 0])

    # Kronecker bilinear-resize matrix, transposed & padded (KP, NP).
    hy, wy = feat5_hw
    kp = _ceil_to(hy * wy, 128)
    rh = _resize_matrix(hy, 13)
    rw = _resize_matrix(wy, 13)
    rk = np.einsum('oi,pj->opij', rh, rw).reshape(NV, hy * wy)
    rt = np.zeros((kp, NP), np.float32)
    rt[:hy * wy, :NV] = rk.T

    # h/u conv weights: output channels padded 169 -> NP; biases pre-summed.
    wh_p = jnp.zeros((NP, wh.shape[1]), jnp.float32).at[:NV].set(wh)
    wu_p = jnp.zeros((NP, wu.shape[1]), jnp.float32).at[:NV].set(wu)
    bhu = jnp.zeros((NP, 1), jnp.float32).at[:NV].set(bh + bu)

    # channel_conv: input channels padded 169 -> NP with zero columns.
    wc_p = jnp.zeros((wc.shape[0], NP), jnp.float32).at[:, :NV].set(wc)

    return (wfg_t.astype(jnp.bfloat16), bfg,
            jnp.asarray(rt, jnp.bfloat16),
            wh_p.astype(jnp.bfloat16), wu_p.astype(jnp.bfloat16), bhu,
            wc_p.astype(jnp.bfloat16), bc.astype(jnp.float32),
            gamma.astype(jnp.float32))


def self_attn_forward(x, feat5, feat8, prepared):
    B, C, H, W = x.shape
    n = H * W                       # 169 (hard-coded by the module)
    kp = _ceil_to(feat5.shape[2] * feat5.shape[3], 128)

    x2 = x.reshape(B, C, n)
    xres = jnp.pad(x2, ((0, 0), (0, 0), (0, NP - n)))                       # f32
    xt = jnp.pad(jnp.swapaxes(x2, 1, 2),
                 ((0, 0), (0, NP - n), (0, 0))).astype(jnp.bfloat16)
    f5 = feat5.reshape(B, feat5.shape[1], -1)
    f5 = jnp.pad(f5, ((0, 0), (0, 0), (0, kp - f5.shape[2]))).astype(jnp.bfloat16)
    z = jnp.pad(feat8.reshape(B, feat8.shape[1], n),
                ((0, 0), (0, 0), (0, NP - n))).astype(jnp.bfloat16)

    out = self_attn_pallas(xt, xres, f5, z, prepared)       # (B, 512, NP) f32
    return out[:, :, :n].reshape(B, 512, H, W)


# ----------------------------- pure-JAX reference -----------------------------

def self_attn_reference(x, feat5, feat8, params):
    """f32 reference of the PyTorch forward."""
    wf, bf, wg, bg, wh, bh, wu, bu, wc, bc, gamma = params
    B, C, H, W = x.shape
    n = H * W
    rh = jnp.asarray(_resize_matrix(feat5.shape[2], 13))
    rw = jnp.asarray(_resize_matrix(feat5.shape[3], 13))
    y13 = jnp.einsum('oi,pj,bcij->bcop', rh, rw, feat5).reshape(B, 128, n)
    x2 = x.reshape(B, C, n)
    f = jnp.einsum('oc,bcn->bon', wf, x2) + bf[None]
    g = jnp.einsum('oc,bcn->bon', wg, x2) + bg[None]
    energy = jnp.einsum('bcn,bcm->bnm', f, g)
    energy = energy - jnp.max(energy, axis=-1, keepdims=True)
    e = jnp.exp(energy)
    attn = e / jnp.sum(e, axis=-1, keepdims=True)
    h = jnp.einsum('oc,bcn->bon', wh, y13) + bh[None]
    u = jnp.einsum('oc,bcn->bon', wu, feat8.reshape(B, 256, n)) + bu[None]
    pre = attn + h + u
    out = jnp.einsum('oc,bcn->bon', wc, pre) + bc[None]
    out = gamma[0, 0] * out + x2
    return out.reshape(B, 512, H, W)


# ----------------------------- main -------------------------------------------

if __name__ == "__main__":
    key = jax.random.PRNGKey(0)
    ks = jax.random.split(key, 16)

    def w(k, shape, fan_in):
        return jax.random.normal(k, shape, jnp.float32) / np.sqrt(fan_in)

    in_dim = 512
    # Parameter shapes from Self_Attn.__init__ (1x1 convs -> (C_out, C_in) + bias)
    wf = w(ks[0], (in_dim // 8, in_dim), in_dim); bf = w(ks[1], (in_dim // 8, 1), in_dim)
    wg = w(ks[2], (in_dim // 8, in_dim), in_dim); bg = w(ks[3], (in_dim // 8, 1), in_dim)
    wh = w(ks[4], (169, 128), 128);               bh = w(ks[5], (169, 1), 128)
    wu = w(ks[6], (169, 256), 256);               bu = w(ks[7], (169, 1), 256)
    wc = w(ks[8], (512, 169), 169);               bc = w(ks[9], (512, 1), 169)
    # __init__ sets gamma = zeros(1); use a nonzero value so the attention path
    # actually contributes to the checked output.
    gamma = jnp.full((1, 1), 0.5, jnp.float32)
    params = (wf, bf, wg, bg, wh, bh, wu, bu, wc, bc, gamma)

    # Inputs (shapes dictated by the hard-coded 128/256/169/512 channel counts)
    x = jax.random.normal(ks[10], (2, 512, 13, 13), jnp.float32)
    feat5 = jax.random.normal(ks[11], (2, 128, 26, 26), jnp.float32)
    feat8 = jax.random.normal(ks[12], (2, 256, 13, 13), jnp.float32)

    prepared = prepare_params(params, (feat5.shape[2], feat5.shape[3]))

    fwd = jax.jit(self_attn_forward)
    out = jax.block_until_ready(fwd(x, feat5, feat8, prepared))
    ref = jax.block_until_ready(self_attn_reference(x, feat5, feat8, params))

    # bf16 MXU compute (f32 accumulation) vs the f32 reference -> 2e-2 tolerance.
    np.testing.assert_allclose(np.asarray(out), np.asarray(ref), rtol=2e-2, atol=2e-2)
    print("KERNEL_OK")
</pallas_src>

<mosaic_0001>
module attributes {stable_mosaic.version = 11 : i64} {
  func.func @self_attn_kernel(%arg0: i32, %arg1: memref<1x256x512xbf16, #tpu.memory_space<vmem>>, %arg2: memref<1x512x256xf32, #tpu.memory_space<vmem>>, %arg3: memref<1x128x768xbf16, #tpu.memory_space<vmem>>, %arg4: memref<1x256x256xbf16, #tpu.memory_space<vmem>>, %arg5: memref<512x256xbf16, #tpu.memory_space<vmem>>, %arg6: memref<1x256xf32, #tpu.memory_space<vmem>>, %arg7: memref<768x256xbf16, #tpu.memory_space<vmem>>, %arg8: memref<256x128xbf16, #tpu.memory_space<vmem>>, %arg9: memref<256x256xbf16, #tpu.memory_space<vmem>>, %arg10: memref<256x1xf32, #tpu.memory_space<vmem>>, %arg11: memref<512x256xbf16, #tpu.memory_space<vmem>>, %arg12: memref<512x1xf32, #tpu.memory_space<vmem>>, %arg13: memref<1x1xf32, #tpu.memory_space<smem>>, %arg14: memref<1x512x256xf32, #tpu.memory_space<vmem>>) attributes {dimension_semantics = [#tpu.dimension_semantics<parallel>], iteration_bounds = array<i64: 2>, scalar_prefetch = 0 : i64, scratch_operands = 0 : i64, tpu.core_type = #tpu.core_type<tc>, window_params = [{transform_indices = @transform_0, window_bounds = array<i64: 1, 256, 512>}, {transform_indices = @transform_1, window_bounds = array<i64: 1, 512, 256>}, {transform_indices = @transform_2, window_bounds = array<i64: 1, 128, 768>}, {transform_indices = @transform_3, window_bounds = array<i64: 1, 256, 256>}, {pipeline_mode = #tpu.pipeline_mode<synchronous>, transform_indices = @transform_4, window_bounds = array<i64: 512, 256>}, {pipeline_mode = #tpu.pipeline_mode<synchronous>, transform_indices = @transform_5, window_bounds = array<i64: 1, 256>}, {pipeline_mode = #tpu.pipeline_mode<synchronous>, transform_indices = @transform_6, window_bounds = array<i64: 768, 256>}, {pipeline_mode = #tpu.pipeline_mode<synchronous>, transform_indices = @transform_7, window_bounds = array<i64: 256, 128>}, {pipeline_mode = #tpu.pipeline_mode<synchronous>, transform_indices = @transform_8, window_bounds = array<i64: 256, 256>}, {pipeline_mode = #tpu.pipeline_mode<synchronous>, transform_indices = @transform_9, window_bounds = array<i64: 256, 1>}, {pipeline_mode = #tpu.pipeline_mode<synchronous>, transform_indices = @transform_10, window_bounds = array<i64: 512, 256>}, {pipeline_mode = #tpu.pipeline_mode<synchronous>, transform_indices = @transform_11, window_bounds = array<i64: 512, 1>}, {transform_indices = @transform_12, window_bounds = array<i64: 1, 1>}, {transform_indices = @transform_13, window_bounds = array<i64: 1, 512, 256>}]} {
    %c0 = arith.constant 0 : index
    %c0_0 = arith.constant 0 : index
    %c0_1 = arith.constant 0 : index
    %0 = vector.load %arg1[%c0, %c0_0, %c0_1] : memref<1x256x512xbf16, #tpu.memory_space<vmem>>, vector<1x256x512xbf16>
    %1 = vector.shape_cast %0 : vector<1x256x512xbf16> to vector<256x512xbf16>
    %c0_2 = arith.constant 0 : index
    %c0_3 = arith.constant 0 : index
    %c0_4 = arith.constant 0 : index
    %2 = vector.load %arg2[%c0_2, %c0_3, %c0_4] : memref<1x512x256xf32, #tpu.memory_space<vmem>>, vector<1x512x256xf32>
    %3 = vector.shape_cast %2 : vector<1x512x256xf32> to vector<512x256xf32>
    %c0_5 = arith.constant 0 : index
    %c0_6 = arith.constant 0 : index
    %c0_7 = arith.constant 0 : index
    %4 = vector.load %arg3[%c0_5, %c0_6, %c0_7] : memref<1x128x768xbf16, #tpu.memory_space<vmem>>, vector<1x128x768xbf16>
    %5 = vector.shape_cast %4 : vector<1x128x768xbf16> to vector<128x768xbf16>
    %c0_8 = arith.constant 0 : index
    %c0_9 = arith.constant 0 : index
    %c0_10 = arith.constant 0 : index
    %6 = vector.load %arg4[%c0_8, %c0_9, %c0_10] : memref<1x256x256xbf16, #tpu.memory_space<vmem>>, vector<1x256x256xbf16>
    %7 = vector.shape_cast %6 : vector<1x256x256xbf16> to vector<256x256xbf16>
    %c0_11 = arith.constant 0 : index
    %c0_12 = arith.constant 0 : index
    %8 = vector.load %arg5[%c0_11, %c0_12] : memref<512x256xbf16, #tpu.memory_space<vmem>>, vector<512x256xbf16>
    %cst = arith.constant dense<0.000000e+00> : vector<256x256xf32>
    %9 = tpu.matmul %1, %8, %cst {dimension_numbers = #tpu.dot_dimension_numbers<[1], [0], [0], [1], [0, 0, 1, 1], [], []>} : vector<256x512xbf16>, vector<512x256xbf16>, vector<256x256xf32> -> vector<256x256xf32>
    %c0_13 = arith.constant 0 : index
    %c0_14 = arith.constant 0 : index
    %10 = vector.load %arg6[%c0_13, %c0_14] : memref<1x256xf32, #tpu.memory_space<vmem>>, vector<1x256xf32>
    %11 = vector.broadcast %10 : vector<1x256xf32> to vector<256x256xf32>
    %12 = arith.addf %9, %11 : vector<256x256xf32>
    %13 = vector.extract_strided_slice %12 {offsets = [0, 0], sizes = [256, 128], strides = [1, 1]} : vector<256x256xf32> to vector<256x128xf32>
    %14 = arith.truncf %13 : vector<256x128xf32> to vector<256x128xbf16>
    %15 = vector.extract_strided_slice %12 {offsets = [0, 128], sizes = [256, 128], strides = [1, 1]} : vector<256x256xf32> to vector<256x128xf32>
    %16 = arith.truncf %15 : vector<256x128xf32> to vector<256x128xbf16>
    %cst_15 = arith.constant dense<0.000000e+00> : vector<256x256xf32>
    %17 = tpu.matmul %14, %16, %cst_15 {dimension_numbers = #tpu.dot_dimension_numbers<[1], [1], [0], [0], [0, 0, 1, 0], [], []>} : vector<256x128xbf16>, vector<256x128xbf16>, vector<256x256xf32> -> vector<256x256xf32>
    %18 = tpu.iota {dimensions = array<i32: 1>} : vector<256x256xi32>
    %c169_i32 = arith.constant 169 : i32
    %19 = vector.broadcast %c169_i32 : i32 to vector<256x256xi32>
    %20 = arith.cmpi slt, %18, %19 : vector<256x256xi32>
    %cst_16 = arith.constant -1.000000e+30 : f32
    %21 = vector.broadcast %cst_16 : f32 to vector<256x256xf32>
    %22 = arith.select %20, %17, %21 : vector<256x256xi1>, vector<256x256xf32>
    %cst_17 = arith.constant dense<0xFF800000> : vector<256xf32>
    %23 = vector.multi_reduction <maximumf>, %22, %cst_17 [1] : vector<256x256xf32> to vector<256xf32>
    %24 = vector.shape_cast %23 : vector<256xf32> to vector<256x1xf32>
    %25 = vector.broadcast %24 : vector<256x1xf32> to vector<256x256xf32>
    %26 = arith.subf %22, %25 : vector<256x256xf32>
    %27 = math.exp %26 : vector<256x256xf32>
    %cst_18 = arith.constant dense<0.000000e+00> : vector<256xf32>
    %28 = vector.multi_reduction <add>, %27, %cst_18 [1] : vector<256x256xf32> to vector<256xf32>
    %29 = vector.shape_cast %28 : vector<256xf32> to vector<256x1xf32>
    %30 = tpu.reciprocal %29 {approx = true} : vector<256x1xf32> -> vector<256x1xf32>
    %31 = vector.broadcast %30 : vector<256x1xf32> to vector<256x256xf32>
    %32 = arith.mulf %27, %31 : vector<256x256xf32>
    %c0_19 = arith.constant 0 : index
    %c0_20 = arith.constant 0 : index
    %33 = vector.load %arg7[%c0_19, %c0_20] : memref<768x256xbf16, #tpu.memory_space<vmem>>, vector<768x256xbf16>
    %cst_21 = arith.constant dense<0.000000e+00> : vector<128x256xf32>
    %34 = tpu.matmul %5, %33, %cst_21 {dimension_numbers = #tpu.dot_dimension_numbers<[1], [0], [0], [1], [0, 0, 1, 1], [], []>} : vector<128x768xbf16>, vector<768x256xbf16>, vector<128x256xf32> -> vector<128x256xf32>
    %35 = arith.truncf %34 : vector<128x256xf32> to vector<128x256xbf16>
    %c0_22 = arith.constant 0 : index
    %c0_23 = arith.constant 0 : index
    %36 = vector.load %arg8[%c0_22, %c0_23] : memref<256x128xbf16, #tpu.memory_space<vmem>>, vector<256x128xbf16>
    %cst_24 = arith.constant dense<0.000000e+00> : vector<256x256xf32>
    %37 = tpu.matmul %36, %35, %cst_24 {dimension_numbers = #tpu.dot_dimension_numbers<[1], [0], [0], [1], [0, 0, 1, 1], [], []>} : vector<256x128xbf16>, vector<128x256xbf16>, vector<256x256xf32> -> vector<256x256xf32>
    %c0_25 = arith.constant 0 : index
    %c0_26 = arith.constant 0 : index
    %38 = vector.load %arg9[%c0_25, %c0_26] : memref<256x256xbf16, #tpu.memory_space<vmem>>, vector<256x256xbf16>
    %cst_27 = arith.constant dense<0.000000e+00> : vector<256x256xf32>
    %39 = tpu.matmul %38, %7, %cst_27 {dimension_numbers = #tpu.dot_dimension_numbers<[1], [0], [0], [1], [0, 0, 1, 1], [], []>} : vector<256x256xbf16>, vector<256x256xbf16>, vector<256x256xf32> -> vector<256x256xf32>
    %40 = arith.addf %32, %37 : vector<256x256xf32>
    %41 = arith.addf %40, %39 : vector<256x256xf32>
    %c0_28 = arith.constant 0 : index
    %c0_29 = arith.constant 0 : index
    %42 = vector.load %arg10[%c0_28, %c0_29] : memref<256x1xf32, #tpu.memory_space<vmem>>, vector<256x1xf32>
    %43 = vector.broadcast %42 : vector<256x1xf32> to vector<256x256xf32>
    %44 = arith.addf %41, %43 : vector<256x256xf32>
    %45 = arith.truncf %44 : vector<256x256xf32> to vector<256x256xbf16>
    %c0_30 = arith.constant 0 : index
    %c0_31 = arith.constant 0 : index
    %46 = vector.load %arg11[%c0_30, %c0_31] : memref<512x256xbf16, #tpu.memory_space<vmem>>, vector<512x256xbf16>
    %cst_32 = arith.constant dense<0.000000e+00> : vector<512x256xf32>
    %47 = tpu.matmul %46, %45, %cst_32 {dimension_numbers = #tpu.dot_dimension_numbers<[1], [0], [0], [1], [0, 0, 1, 1], [], []>} : vector<512x256xbf16>, vector<256x256xbf16>, vector<512x256xf32> -> vector<512x256xf32>
    %c0_33 = arith.constant 0 : index
    %c0_34 = arith.constant 0 : index
    %48 = vector.load %arg12[%c0_33, %c0_34] : memref<512x1xf32, #tpu.memory_space<vmem>>, vector<512x1xf32>
    %49 = vector.broadcast %48 : vector<512x1xf32> to vector<512x256xf32>
    %50 = arith.addf %47, %49 : vector<512x256xf32>
    %c0_35 = arith.constant 0 : index
    %c0_36 = arith.constant 0 : index
    %51 = memref.load %arg13[%c0_35, %c0_36] : memref<1x1xf32, #tpu.memory_space<smem>>
    %52 = vector.broadcast %51 : f32 to vector<512x256xf32>
    %53 = arith.mulf %52, %50 : vector<512x256xf32>
    %54 = arith.addf %53, %3 : vector<512x256xf32>
    %c0_37 = arith.constant 0 : index
    %c0_38 = arith.constant 0 : index
    %c0_39 = arith.constant 0 : index
    %55 = vector.load %arg14[%c0_37, %c0_38, %c0_39] : memref<1x512x256xf32, #tpu.memory_space<vmem>>, vector<1x512x256xf32>
    %56 = vector.shape_cast %55 : vector<1x512x256xf32> to vector<512x256xf32>
    %57 = vector.shape_cast %54 : vector<512x256xf32> to vector<1x512x256xf32>
    tpu.vector_store %arg14[%c0_37, %c0_38, %c0_39], %57 {strides = array<i32>} : memref<1x512x256xf32, #tpu.memory_space<vmem>>, vector<1x512x256xf32>,
    return
  }
  func.func @transform_0(%arg0: i32) -> (i32, i32, i32) {
    %c0_i32 = arith.constant 0 : i32
    %c0_i32_0 = arith.constant 0 : i32
    %c0_i32_1 = arith.constant 0 : i32
    return %arg0, %c0_i32, %c0_i32_0 : i32, i32, i32
  }
  func.func @transform_1(%arg0: i32) -> (i32, i32, i32) {
    %c0_i32 = arith.constant 0 : i32
    %c0_i32_0 = arith.constant 0 : i32
    %c0_i32_1 = arith.constant 0 : i32
    return %arg0, %c0_i32, %c0_i32_0 : i32, i32, i32
  }
  func.func @transform_2(%arg0: i32) -> (i32, i32, i32) {
    %c0_i32 = arith.constant 0 : i32
    %c0_i32_0 = arith.constant 0 : i32
    %c0_i32_1 = arith.constant 0 : i32
    return %arg0, %c0_i32, %c0_i32_0 : i32, i32, i32
  }
  func.func @transform_3(%arg0: i32) -> (i32, i32, i32) {
    %c0_i32 = arith.constant 0 : i32
    %c0_i32_0 = arith.constant 0 : i32
    %c0_i32_1 = arith.constant 0 : i32
    return %arg0, %c0_i32, %c0_i32_0 : i32, i32, i32
  }
  func.func @transform_4(%arg0: i32) -> (i32, i32) {
    %c0_i32 = arith.constant 0 : i32
    %c0_i32_0 = arith.constant 0 : i32
    %c0_i32_1 = arith.constant 0 : i32
    return %c0_i32, %c0_i32_0 : i32, i32
  }
  func.func @transform_5(%arg0: i32) -> (i32, i32) {
    %c0_i32 = arith.constant 0 : i32
    %c0_i32_0 = arith.constant 0 : i32
    %c0_i32_1 = arith.constant 0 : i32
    return %c0_i32, %c0_i32_0 : i32, i32
  }
  func.func @transform_6(%arg0: i32) -> (i32, i32) {
    %c0_i32 = arith.constant 0 : i32
    %c0_i32_0 = arith.constant 0 : i32
    %c0_i32_1 = arith.constant 0 : i32
    return %c0_i32, %c0_i32_0 : i32, i32
  }
  func.func @transform_7(%arg0: i32) -> (i32, i32) {
    %c0_i32 = arith.constant 0 : i32
    %c0_i32_0 = arith.constant 0 : i32
    %c0_i32_1 = arith.constant 0 : i32
    return %c0_i32, %c0_i32_0 : i32, i32
  }
  func.func @transform_8(%arg0: i32) -> (i32, i32) {
    %c0_i32 = arith.constant 0 : i32
    %c0_i32_0 = arith.constant 0 : i32
    %c0_i32_1 = arith.constant 0 : i32
    return %c0_i32, %c0_i32_0 : i32, i32
  }
  func.func @transform_9(%arg0: i32) -> (i32, i32) {
    %c0_i32 = arith.constant 0 : i32
    %c0_i32_0 = arith.constant 0 : i32
    %c0_i32_1 = arith.constant 0 : i32
    return %c0_i32, %c0_i32_0 : i32, i32
  }
  func.func @transform_10(%arg0: i32) -> (i32, i32) {
    %c0_i32 = arith.constant 0 : i32
    %c0_i32_0 = arith.constant 0 : i32
    %c0_i32_1 = arith.constant 0 : i32
    return %c0_i32, %c0_i32_0 : i32, i32
  }
  func.func @transform_11(%arg0: i32) -> (i32, i32) {
    %c0_i32 = arith.constant 0 : i32
    %c0_i32_0 = arith.constant 0 : i32
    %c0_i32_1 = arith.constant 0 : i32
    return %c0_i32, %c0_i32_0 : i32, i32
  }
  func.func @transform_12(%arg0: i32) -> (i32, i32) {
    %c0_i32 = arith.constant 0 : i32
    %c0_i32_0 = arith.constant 0 : i32
    %c0_i32_1 = arith.constant 0 : i32
    return %c0_i32, %c0_i32_0 : i32, i32
  }
  func.func @transform_13(%arg0: i32) -> (i32, i32, i32) {
    %c0_i32 = arith.constant 0 : i32
    %c0_i32_0 = arith.constant 0 : i32
    %c0_i32_1 = arith.constant 0 : i32
    return %arg0, %c0_i32, %c0_i32_0 : i32, i32, i32
  }
}

</mosaic_0001>

<bundles_post_ra>
// kernel: self_attn_forward.1
= control target key start
LH: loop header
LB: loop body
LE: loop exit
PB: predicated region body
PF: predicated region fallthrough
CT: control target
= control target key end

     0   :  { %s8120_s27 = smov 0   ;;  %s11694_s0 = inlined_call_operand.vmem [shape: bf16[2,256,512], index: 0, kind: input, shape index: {}]   ;;  %s11695_s1 = inlined_call_operand.vmem [shape: f32[2,512,256], index: 1, kind: input, shape index: {}]   ;;  %s11696_s2 = inlined_call_operand.vmem [shape: bf16[2,128,768], index: 2, kind: input, shape index: {}]   ;;  %s11697_s3 = inlined_call_operand.vmem [shape: bf16[2,256,256], index: 3, kind: input, shape index: {}]   ;;  %s11698_s4 = inlined_call_operand.vmem [shape: bf16[512,256], index: 4, kind: input, shape index: {}]   ;;  %s11699_s5 = inlined_call_operand.vmem [shape: f32[1,256], index: 5, kind: input, shape index: {}]   ;;  %s11700_s6 = inlined_call_operand.vmem [shape: bf16[768,256], index: 6, kind: input, shape index: {}]   ;;  %s11701_s7 = inlined_call_operand.vmem [shape: bf16[256,128], index: 7, kind: input, shape index: {}]   ;;  %s11702_s8 = inlined_call_operand.vmem [shape: bf16[256,256], index: 8, kind: input, shape index: {}]   ;;  %s11703_s9 = inlined_call_operand.vmem [shape: f32[256,1], index: 9, kind: input, shape index: {}]   ;;  %s11704_s10 = inlined_call_operand.vmem [shape: bf16[512,256], index: 10, kind: input, shape index: {}]   ;;  %s11705_s11 = inlined_call_operand.vmem [shape: f32[512,1], index: 11, kind: input, shape index: {}]   ;;  %s11706_s12 = inlined_call_operand.<no memory space> [shape: f32[1,1], index: 12, kind: input, shape index: {}]   ;;  %s11707_s13 = inlined_call_operand.vmem [shape: f32[2,512,256], index: 13, kind: output, shape index: {}]  }
   0x1   :  { %18 = sst [smem:[#allocation2]] %s11706_s12 }
   0x2 LB: > { %s6702_s28 = sadd.s32 4294967295, %s8044_s27   ;;  %p6706_p0 = scmp.ge.s32.totalorder %s8044_s27, 1  ;;  %s8044_s27 = sphi %s8120_s27, %s24_s27  }
   0x3   : > { %p418_p1 = scmp.lt.s32.totalorder %s8044_s27, 3 }
   0x5   : > { %p419_p2 = pnand %p6706_p0, %p418_p1 }
   0x7   : > { %422 = sbr.rel (%p419_p2) target bundleno = 1602 (0x642), region = 72 }
   0xc   : > { %v7230_v0 = vld [vmem:[%s11698_s4 + $0x74] ss:$8 sps:$4 sm:$0xff]   ;;  %v7234_v2 = vld [vmem:[%s11698_s4 + $0x70] ss:$8 sps:$4 sm:$0xff]   ;;  %v7236_v4 = vld [vmem:[%s11698_s4 + $0x64] ss:$8 sps:$4 sm:$0xff]  }
   0xd   : > { %v7232_v1 = vld [vmem:[%s11698_s4 + $0x174] ss:$8 sps:$4 sm:$0xff]   ;;  %1491 = vmatprep.subr.bf16.mxu0 %v7230_v0  ;;  %v7235_v3 = vld [vmem:[%s11698_s4 + $0x170] ss:$8 sps:$4 sm:$0xff]   ;;  %v7238_v5 = vld [vmem:[%s11698_s4 + $0x164] ss:$8 sps:$4 sm:$0xff]  }
   0xe   : > { %1684 = vmatprep.subr.bf16.mxu1 %v7232_v1  ;;  %1492 = vmatpush1.bf16.msra.mxu0 %v7234_v2  ;;  %v7240_v6 = vld [vmem:[%s11698_s4 + $0x60] ss:$8 sps:$4 sm:$0xff]   ;;  %v7242_v8 = vld [vmem:[%s11698_s4 + $0x54] ss:$8 sps:$4 sm:$0xff]   ;;  %v7246_v10 = vld [vmem:[%s11698_s4 + $0x50] ss:$8 sps:$4 sm:$0xff]  }
   0xf   : > { %1685 = vmatpush1.bf16.msra.mxu1 %v7235_v3  ;;  %1493 = vmatprep.subr.bf16.mxu0 %v7236_v4  ;;  %v7241_v7 = vld [vmem:[%s11698_s4 + $0x160] ss:$8 sps:$4 sm:$0xff]   ;;  %v7244_v9 = vld [vmem:[%s11698_s4 + $0x154] ss:$8 sps:$4 sm:$0xff]   ;;  %v7247_v11 = vld [vmem:[%s11698_s4 + $0x150] ss:$8 sps:$4 sm:$0xff]  }
  0x10   : > { %1686 = vmatprep.subr.bf16.mxu1 %v7238_v5  ;;  %v7248_v12 = vld [vmem:[%s11698_s4 + $0x44] ss:$8 sps:$4 sm:$0xff]   ;;  %v7252_v14 = vld [vmem:[%s11698_s4 + $0x40] ss:$8 sps:$4 sm:$0xff]   ;;  %v7254_v16 = vld [vmem:[%s11698_s4 + $0x34] ss:$8 sps:$4 sm:$0xff]  }
  0x11   : > { %v7250_v13 = vld [vmem:[%s11698_s4 + $0x144] ss:$8 sps:$4 sm:$0xff]   ;;  %v7253_v15 = vld [vmem:[%s11698_s4 + $0x140] ss:$8 sps:$4 sm:$0xff]   ;;  %v7256_v17 = vld [vmem:[%s11698_s4 + $0x134] ss:$8 sps:$4 sm:$0xff]  }
  0x12   : > { %1494 = vmatpush1.bf16.msra.mxu0 %v7240_v6  ;;  %v7258_v18 = vld [vmem:[%s11698_s4 + $0x30] ss:$8 sps:$4 sm:$0xff]   ;;  %v7260_v20 = vld [vmem:[%s11698_s4 + $0x24] ss:$8 sps:$4 sm:$0xff]   ;;  %v7264_v22 = vld [vmem:[%s11698_s4 + $0x20] ss:$8 sps:$4 sm:$0xff]  }
  0x13   : > { %1687 = vmatpush1.bf16.msra.mxu1 %v7241_v7  ;;  %1495 = vmatprep.subr.bf16.mxu0 %v7242_v8  ;;  %v7259_v19 = vld [vmem:[%s11698_s4 + $0x130] ss:$8 sps:$4 sm:$0xff]   ;;  %v7262_v21 = vld [vmem:[%s11698_s4 + $0x124] ss:$8 sps:$4 sm:$0xff]   ;;  %v7265_v23 = vld [vmem:[%s11698_s4 + $0x120] ss:$8 sps:$4 sm:$0xff]  }
  0x14   : > { %1688 = vmatprep.subr.bf16.mxu1 %v7244_v9  ;;  %v7266_v24 = vld [vmem:[%s11698_s4 + $0x14] ss:$8 sps:$4 sm:$0xff]   ;;  %v7270_v26 = vld [vmem:[%s11698_s4 + $0x10] ss:$8 sps:$4 sm:$0xff]   ;;  %v7272_v28 = vld [vmem:[%s11698_s4 + $0x4] ss:$8 sps:$4 sm:$0xff]  }
  0x15   : > { %v7268_v25 = vld [vmem:[%s11698_s4 + $0x114] ss:$8 sps:$4 sm:$0xff]   ;;  %v7271_v27 = vld [vmem:[%s11698_s4 + $0x110] ss:$8 sps:$4 sm:$0xff]   ;;  %v7274_v29 = vld [vmem:[%s11698_s4 + $0x104] ss:$8 sps:$4 sm:$0xff]  }
  0x16   : > { %1496 = vmatpush1.bf16.msra.mxu0 %v7246_v10  ;;  %v7276_v30 = vld [vmem:[%s11698_s4] ss:$8 sps:$4 sm:$0xff]   ;;  %v7278_v32 = vld [vmem:[%s11698_s4 + $0xf4] ss:$8 sps:$4 sm:$0xff]   ;;  %p477_p3 = scmp.lt.s32.totalorder %s6702_s28, 1  ;;  %s6225_s19 = sld [smem:[#allocation2]] }
  0x17   : > { %1689 = vmatpush1.bf16.msra.mxu1 %v7247_v11  ;;  %1497 = vmatprep.subr.bf16.mxu0 %v7248_v12  ;;  %v7277_v31 = vld [vmem:[%s11698_s4 + $0x100] ss:$8 sps:$4 sm:$0xff]   ;;  %v7280_v33 = vld [vmem:[%s11698_s4 + $0x1f4] ss:$8 sps:$4 sm:$0xff]   ;;  %v7282_v34 = vld [vmem:[%s11698_s4 + $0xf0] ss:$8 sps:$4 sm:$0xff]  }
  0x18   : > { %1690 = vmatprep.subr.bf16.mxu1 %v7250_v13  ;;  %v7283_v35 = vld [vmem:[%s11698_s4 + $0x1f0] ss:$8 sps:$4 sm:$0xff]   ;;  %v7284_v36 = vld [vmem:[%s11698_s4 + $0xe4] ss:$8 sps:$4 sm:$0xff]   ;;  %s12323_s28 = smov (!%p477_p3, %s6702_s28), 1 }
  0x19   : > { %v7286_v37 = vld [vmem:[%s11698_s4 + $0x1e4] ss:$8 sps:$4 sm:$0xff]   ;;  %v7288_v38 = vld [vmem:[%s11698_s4 + $0xe0] ss:$8 sps:$4 sm:$0xff]   ;;  %v7290_v40 = vld [vmem:[%s11698_s4 + $0xd4] ss:$8 sps:$4 sm:$0xff]  }
  0x1a   : > { %1498 = vmatpush1.bf16.msra.mxu0 %v7252_v14  ;;  %v7289_v39 = vld [vmem:[%s11698_s4 + $0x1e0] ss:$8 sps:$4 sm:$0xff]   ;;  %v7292_v41 = vld [vmem:[%s11698_s4 + $0x1d4] ss:$8 sps:$4 sm:$0xff]   ;;  %s7134_s15 = sshll.u32 %s12323_s28, 9  ;;  %s7135_s20 = sshll.u32 %s12323_s28, 10 }
  0x1b   : > { %1691 = vmatpush1.bf16.msra.mxu1 %v7253_v15  ;;  %1499 = vmatprep.subr.bf16.mxu0 %v7254_v16  ;;  %v7294_v42 = vld [vmem:[%s11698_s4 + $0xd0] ss:$8 sps:$4 sm:$0xff]   ;;  %v7296_v44 = vld [vmem:[%s11698_s4 + $0xc4] ss:$8 sps:$4 sm:$0xff]   ;;  %s8273_s24 = scalar_lea.vmem %s11694_s0, %s7134_s15  ;;  %v7300_v46 = vld [vmem:[%s11698_s4 + $0xc0] ss:$8 sps:$4 sm:$0xff]   ;;  %s11252_s23 = scalar_lea.vmem %s11695_s1, %s7135_s20 }
  0x1c   : > { %1692 = vmatprep.subr.bf16.mxu1 %v7256_v17  ;;  %v7295_v43 = vld [vmem:[%s11698_s4 + $0x1d0] ss:$8 sps:$4 sm:$0xff]   ;;  %v7298_v45 = vld [vmem:[%s11698_s4 + $0x1c4] ss:$8 sps:$4 sm:$0xff]   ;;  %v7301_v47 = vld [vmem:[%s11698_s4 + $0x1c0] ss:$8 sps:$4 sm:$0xff]   ;;  %s11263_s26 = scalar_lea.vmem %s11707_s13, %s7135_s20 }
  0x1d   : > { %v7302_v48 = vld [vmem:[%s11698_s4 + $0xb4] ss:$8 sps:$4 sm:$0xff]   ;;  %v7306_v52 = vld [vmem:[%s11698_s4 + $0xb0] ss:$8 sps:$4 sm:$0xff]   ;;  %v7308_v54 = vld [vmem:[%s11698_s4 + $0xa4] ss:$8 sps:$4 sm:$0xff]  }
  0x1e   : > { %1500 = vmatpush1.bf16.msra.mxu0 %v7258_v18  ;;  %v7328_v49 = vld [vmem:[%s8273_s24 + $0x4] ss:$16 sps:$4 sm:$0xff]   ;;  %v7331_v51 = vld [vmem:[%s8273_s24 + $0xc] ss:$16 sps:$4 sm:$0xff]   ;;  %v7307_v53 = vld [vmem:[%s11698_s4 + $0x1b0] ss:$8 sps:$4 sm:$0xff]  }
  0x1f   : > { %1693 = vmatpush1.bf16.msra.mxu1 %v7259_v19  ;;  %1501 = vmatprep.subr.bf16.mxu0 %v7260_v20  ;;  %v7304_v50 = vld [vmem:[%s11698_s4 + $0x1b4] ss:$8 sps:$4 sm:$0xff]   ;;  %v7310_v55 = vld [vmem:[%s11698_s4 + $0x1a4] ss:$8 sps:$4 sm:$0xff]   ;;  %v7312_v56 = vld [vmem:[%s11698_s4 + $0xa0] ss:$8 sps:$4 sm:$0xff]  }
  0x20   : > { %1694 = vmatprep.subr.bf16.mxu1 %v7262_v21  ;;  %1523 = vmatprep.mubr.bf16.mxu0 %v7328_v49  ;;  %v7313_v57 = vld [vmem:[%s11698_s4 + $0x1a0] ss:$8 sps:$4 sm:$0xff]   ;;  %v7314_v58 = vld [vmem:[%s11698_s4 + $0x94] ss:$8 sps:$4 sm:$0xff]   ;;  %v7318_v60 = vld [vmem:[%s11698_s4 + $0x90] ss:$8 sps:$4 sm:$0xff]  }
  0x21   : > { %1716 = vmatprep.mubr.bf16.mxu1 %v7331_v51  ;;  %v7316_v59 = vld [vmem:[%s11698_s4 + $0x194] ss:$8 sps:$4 sm:$0xff]   ;;  %v7319_v61 = vld [vmem:[%s11698_s4 + $0x190] ss:$8 sps:$4 sm:$0xff]   ;;  %v7320_v62 = vld [vmem:[%s11698_s4 + $0x84] ss:$8 sps:$4 sm:$0xff]  }
  0x22   : > { %1502 = vmatpush1.bf16.msra.mxu0 %v7264_v22  ;;  %v7322_v63 = vld [vmem:[%s11698_s4 + $0x184] ss:$8 sps:$4 sm:$0xff]   ;;  %v7324_v0 = vld [vmem:[%s11698_s4 + $0x80] ss:$8 sps:$4 sm:$0xff]   ;;  %s7218_s15 = smul.u32 384, %s12323_s28 }
  0x23   : > { %1695 = vmatpush1.bf16.msra.mxu1 %v7265_v23  ;;  %1503 = vmatprep.subr.bf16.mxu0 %v7266_v24  ;;  %v7325_v1 = vld [vmem:[%s11698_s4 + $0x180] ss:$8 sps:$4 sm:$0xff]   ;;  %v7332_v4 = vld [vmem:[%s8273_s24 + $0x24] ss:$16 sps:$4 sm:$0xff]   ;;  %v7334_v5 = vld [vmem:[%s8273_s24 + $0x2c] ss:$16 sps:$4 sm:$0xff]  }
  0x24   : > { %1696 = vmatprep.subr.bf16.mxu1 %v7268_v25  ;;  %v7326_v2 = vld [vmem:[%s8273_s24] ss:$16 sps:$4 sm:$0xff]   ;;  %v7329_v3 = vld [vmem:[%s8273_s24 + $0x8] ss:$16 sps:$4 sm:$0xff]   ;;  %v7338_v8 = vld [vmem:[%s8273_s24 + $0x44] ss:$16 sps:$4 sm:$0xff]   ;;  %s8588_s22 = scalar_lea.vmem %s11696_s2, %s7218_s15 }
  0x25   : > { %v7336_v6 = vld [vmem:[%s8273_s24 + $0x20] ss:$16 sps:$4 sm:$0xff]   ;;  %v7337_v7 = vld [vmem:[%s8273_s24 + $0x28] ss:$16 sps:$4 sm:$0xff]   ;;  %v7340_v9 = vld [vmem:[%s8273_s24 + $0x4c] ss:$16 sps:$4 sm:$0xff]  }
  0x26   : > { %1504 = vmatpush1.bf16.msra.mxu0 %v7270_v26  ;;  %v7342_v10 = vld [vmem:[%s8273_s24 + $0x40] ss:$16 sps:$4 sm:$0xff]   ;;  %v7343_v11 = vld [vmem:[%s8273_s24 + $0x48] ss:$16 sps:$4 sm:$0xff]   ;;  %v7344_v12 = vld [vmem:[%s8273_s24 + $0x64] ss:$16 sps:$4 sm:$0xff]  }
  0x27   : > { %1697 = vmatpush1.bf16.msra.mxu1 %v7271_v27  ;;  %1505 = vmatprep.subr.bf16.mxu0 %v7272_v28  ;;  %v7346_v13 = vld [vmem:[%s8273_s24 + $0x6c] ss:$16 sps:$4 sm:$0xff]   ;;  %v7348_v14 = vld [vmem:[%s8273_s24 + $0x60] ss:$16 sps:$4 sm:$0xff]   ;;  %v7349_v15 = vld [vmem:[%s8273_s24 + $0x68] ss:$16 sps:$4 sm:$0xff]  }
  0x28   : > { %1698 = vmatprep.subr.bf16.mxu1 %v7274_v29  ;;  %v7350_v16 = vld [vmem:[%s8273_s24 + $0x84] ss:$16 sps:$4 sm:$0xff]   ;;  %v7352_v17 = vld [vmem:[%s8273_s24 + $0x8c] ss:$16 sps:$4 sm:$0xff]   ;;  %v7354_v18 = vld [vmem:[%s8273_s24 + $0x80] ss:$16 sps:$4 sm:$0xff]  }
  0x29   : > { %v7355_v19 = vld [vmem:[%s8273_s24 + $0x88] ss:$16 sps:$4 sm:$0xff]   ;;  %v7356_v20 = vld [vmem:[%s8273_s24 + $0xa4] ss:$16 sps:$4 sm:$0xff]   ;;  %v7358_v21 = vld [vmem:[%s8273_s24 + $0xac] ss:$16 sps:$4 sm:$0xff]  }
  0x2a   : > { %1506 = vmatpush1.bf16.msra.mxu0 %v7276_v30  ;;  %v7360_v22 = vld [vmem:[%s8273_s24 + $0xa0] ss:$16 sps:$4 sm:$0xff]   ;;  %v7361_v23 = vld [vmem:[%s8273_s24 + $0xa8] ss:$16 sps:$4 sm:$0xff]   ;;  %v7362_v24 = vld [vmem:[%s8273_s24 + $0xc4] ss:$16 sps:$4 sm:$0xff]  }
  0x2b   : > { %1699 = vmatpush1.bf16.msra.mxu1 %v7277_v31  ;;  %1507 = vmatprep.subr.bf16.mxu0 %v7278_v32  ;;  %v7364_v25 = vld [vmem:[%s8273_s24 + $0xcc] ss:$16 sps:$4 sm:$0xff]   ;;  %v7366_v26 = vld [vmem:[%s8273_s24 + $0xc0] ss:$16 sps:$4 sm:$0xff]   ;;  %v7367_v27 = vld [vmem:[%s8273_s24 + $0xc8] ss:$16 sps:$4 sm:$0xff]  }
  0x2c   : > { %1700 = vmatprep.subr.bf16.mxu1 %v7280_v33  ;;  %v7368_v28 = vld [vmem:[%s8273_s24 + $0xe4] ss:$16 sps:$4 sm:$0xff]   ;;  %v7370_v29 = vld [vmem:[%s8273_s24 + $0xec] ss:$16 sps:$4 sm:$0xff]   ;;  %v7372_v30 = vld [vmem:[%s8273_s24 + $0xe0] ss:$16 sps:$4 sm:$0xff]  }
  0x2d   : > { %v7373_v31 = vld [vmem:[%s8273_s24 + $0xe8] ss:$16 sps:$4 sm:$0xff]   ;;  %v7374_v32 = vld [vmem:[%s8273_s24 + $0x104] ss:$16 sps:$4 sm:$0xff]   ;;  %v7376_v33 = vld [vmem:[%s8273_s24 + $0x10c] ss:$16 sps:$4 sm:$0xff]  }
  0x2e   : > { %1508 = vmatpush2.bf16.msra.mxu0 %v7282_v34  ;;  %v7378_v34 = vld [vmem:[%s8273_s24 + $0x100] ss:$16 sps:$4 sm:$0xff]   ;;  %v7400_v49 = vld [vmem:[%s8273_s24 + $0x18c] ss:$16 sps:$4 sm:$0xff]   ;;  %v7403_v51 = vld [vmem:[%s8273_s24 + $0x188] ss:$16 sps:$4 sm:$0xff]  }
  0x2f   : > { %1701 = vmatpush2.bf16.msra.mxu1 %v7283_v35  ;;  %1509 = vmatprep.subr.bf16.mxu0 %v7284_v36  ;;  %v7379_v35 = vld [vmem:[%s8273_s24 + $0x108] ss:$16 sps:$4 sm:$0xff]   ;;  %v7380_v36 = vld [vmem:[%s8273_s24 + $0x124] ss:$16 sps:$4 sm:$0xff]  }
  0x30   : > { %1702 = vmatprep.subr.bf16.mxu1 %v7286_v37  ;;  %v7382_v37 = vld [vmem:[%s8273_s24 + $0x12c] ss:$16 sps:$4 sm:$0xff]  }
  0x32   : > { %1510 = vmatpush2.bf16.msra.mxu0 %v7288_v38  ;;  %v7384_v38 = vld [vmem:[%s8273_s24 + $0x120] ss:$16 sps:$4 sm:$0xff]  }
  0x33   : > { %1703 = vmatpush2.bf16.msra.mxu1 %v7289_v39  ;;  %1511 = vmatprep.subr.bf16.mxu0 %v7290_v40  ;;  %v7385_v39 = vld [vmem:[%s8273_s24 + $0x128] ss:$16 sps:$4 sm:$0xff]   ;;  %v7386_v40 = vld [vmem:[%s8273_s24 + $0x144] ss:$16 sps:$4 sm:$0xff]  }
  0x34   : > { %1704 = vmatprep.subr.bf16.mxu1 %v7292_v41  ;;  %v7388_v41 = vld [vmem:[%s8273_s24 + $0x14c] ss:$16 sps:$4 sm:$0xff]  }
  0x36   : > { %1512 = vmatpush2.bf16.msra.mxu0 %v7294_v42  ;;  %v7390_v42 = vld [vmem:[%s8273_s24 + $0x140] ss:$16 sps:$4 sm:$0xff]  }
  0x37   : > { %1705 = vmatpush2.bf16.msra.mxu1 %v7295_v43  ;;  %1513 = vmatprep.subr.bf16.mxu0 %v7296_v44  ;;  %v7391_v43 = vld [vmem:[%s8273_s24 + $0x148] ss:$16 sps:$4 sm:$0xff]   ;;  %v7392_v44 = vld [vmem:[%s8273_s24 + $0x164] ss:$16 sps:$4 sm:$0xff]  }
  0x38   : > { %1706 = vmatprep.subr.bf16.mxu1 %v7298_v45  ;;  %v7394_v45 = vld [vmem:[%s8273_s24 + $0x16c] ss:$16 sps:$4 sm:$0xff]  }
  0x3a   : > { %1514 = vmatpush2.bf16.msra.mxu0 %v7300_v46  ;;  %v7396_v46 = vld [vmem:[%s8273_s24 + $0x160] ss:$16 sps:$4 sm:$0xff]  }
  0x3b   : > { %1707 = vmatpush2.bf16.msra.mxu1 %v7301_v47  ;;  %1515 = vmatprep.subr.bf16.mxu0 %v7302_v48  ;;  %v7397_v47 = vld [vmem:[%s8273_s24 + $0x168] ss:$16 sps:$4 sm:$0xff]   ;;  %v7398_v48 = vld [vmem:[%s8273_s24 + $0x184] ss:$16 sps:$4 sm:$0xff]  }
  0x3c   : > { %1708 = vmatprep.subr.bf16.mxu1 %v7304_v50  ;;  %v7402_v50 = vld [vmem:[%s8273_s24 + $0x180] ss:$16 sps:$4 sm:$0xff]  }
  0x3e   : > { %1516 = vmatpush2.bf16.msra.mxu0 %v7306_v52  ;;  %v7404_v52 = vld [vmem:[%s8273_s24 + $0x1a4] ss:$16 sps:$4 sm:$0xff]  }
  0x3f   : > { %1709 = vmatpush2.bf16.msra.mxu1 %v7307_v53  ;;  %1517 = vmatprep.subr.bf16.mxu0 %v7308_v54  ;;  %v7406_v53 = vld [vmem:[%s8273_s24 + $0x1ac] ss:$16 sps:$4 sm:$0xff]   ;;  %v7408_v54 = vld [vmem:[%s8273_s24 + $0x1a0] ss:$16 sps:$4 sm:$0xff]  }
  0x40   : > { %1710 = vmatprep.subr.bf16.mxu1 %v7310_v55  ;;  %v7409_v55 = vld [vmem:[%s8273_s24 + $0x1a8] ss:$16 sps:$4 sm:$0xff]  }
  0x42   : > { %1518 = vmatpush2.bf16.msra.mxu0 %v7312_v56  ;;  %v7410_v56 = vld [vmem:[%s8273_s24 + $0x1c4] ss:$16 sps:$4 sm:$0xff]  }
  0x43   : > { %1711 = vmatpush2.bf16.msra.mxu1 %v7313_v57  ;;  %1519 = vmatprep.subr.bf16.mxu0 %v7314_v58  ;;  %v7412_v57 = vld [vmem:[%s8273_s24 + $0x1cc] ss:$16 sps:$4 sm:$0xff]   ;;  %v7414_v58 = vld [vmem:[%s8273_s24 + $0x1c0] ss:$16 sps:$4 sm:$0xff]  }
  0x44   : > { %1712 = vmatprep.subr.bf16.mxu1 %v7316_v59  ;;  %v7415_v59 = vld [vmem:[%s8273_s24 + $0x1c8] ss:$16 sps:$4 sm:$0xff]  }
  0x46   : > { %1520 = vmatpush2.bf16.msra.mxu0 %v7318_v60  ;;  %v7416_v60 = vld [vmem:[%s8273_s24 + $0x1e4] ss:$16 sps:$4 sm:$0xff]  }
  0x47   : > { %1713 = vmatpush2.bf16.msra.mxu1 %v7319_v61  ;;  %1521 = vmatprep.subr.bf16.mxu0 %v7320_v62  ;;  %v7418_v61 = vld [vmem:[%s8273_s24 + $0x1ec] ss:$16 sps:$4 sm:$0xff]   ;;  %v7420_v62 = vld [vmem:[%s8273_s24 + $0x1e0] ss:$16 sps:$4 sm:$0xff]  }
  0x48   : > { %1714 = vmatprep.subr.bf16.mxu1 %v7322_v63  ;;  %v7421_v63 = vld [vmem:[%s8273_s24 + $0x1e8] ss:$16 sps:$4 sm:$0xff]  }
  0x4a   : > { %1522 = vmatpush2.bf16.msra.mxu0 %v7324_v0  ;;  %v11708_v0 = vlaneseq }
  0x4b   : > { %1715 = vmatpush2.bf16.msra.mxu1 %v7325_v1 }
  0x4c   : > { %v842_v1 = vshrl.u32 %v11708_v0, 7  ;;  %v7520_v0 = vld [vmem:[%s11700_s6 + $0x1d4] ss:$8 sps:$4 sm:$0xff]  }
  0x4d   : > { %1524 = vmatmul.mubr.bf16.vlgmr.msra.gmra.mxu0 %v7326_v2 }
  0x4e   : > { %1717 = vmatmul.mubr.bf16.vlgmr.msra.gmra.mxu1 %v7329_v3  ;;  %1533 = vmatprep.mubr.bf16.mxu0 %v7332_v4  ;;  %v843_v2 = vsub.s32 0, %v842_v1  ;;  %v847_v3 = vsub.s32 1, %v842_v1  ;;  %v7424_v4 = vld [vmem:[%s11700_s6 + $0x74] ss:$8 sps:$4 sm:$0xff]  }
  0x4f   : > { %1726 = vmatprep.mubr.bf16.mxu1 %v7334_v5  ;;  %v839_v5 = vld [vmem:[%s11699_s5] sm:$0x3]  ;;  %3467 = vmatprep.subr.bf16.mxu1 %v7424_v4 }
  0x55   : > { %1534 = vmatmul.mubr.bf16.gmra.mxu0 %v7336_v6  ;;  %v7422_v6 = vld [vmem:[%s11700_s6 + $0x70] ss:$8 sps:$4 sm:$0xff]  }
  0x56   : > { %1727 = vmatmul.mubr.bf16.gmra.mxu1 %v7337_v7  ;;  %1543 = vmatprep.mubr.bf16.mxu0 %v7338_v8  ;;  %v8406_v7 = vrot.slane %v839_v5, %v843_v2  ;;  %v8408_v8 = vrot.slane %v839_v5, %v847_v3  ;;  %v7440_v2 = vld [vmem:[%s11700_s6 + $0x10] ss:$8 sps:$4 sm:$0xff]  }
  0x57   : > { %1736 = vmatprep.mubr.bf16.mxu1 %v7340_v9  ;;  %3468 = vmatpush1.bf16.msra.mxu1 %v7422_v6  ;;  %v7427_v9 = vld [vmem:[%s11700_s6 + $0x64] ss:$8 sps:$4 sm:$0xff]  }
  0x58   : > { %3469 = vmatprep.subr.bf16.mxu1 %v7427_v9 }
  0x5d   : > { %1544 = vmatmul.mubr.bf16.gmra.mxu0 %v7342_v10 }
  0x5e   : > { %1737 = vmatmul.mubr.bf16.gmra.mxu1 %v7343_v11  ;;  %1553 = vmatprep.mubr.bf16.mxu0 %v7344_v12  ;;  %v7425_v12 = vld [vmem:[%s11700_s6 + $0x60] ss:$8 sps:$4 sm:$0xff]  }
  0x5f   : > { %1746 = vmatprep.mubr.bf16.mxu1 %v7346_v13  ;;  %3470 = vmatpush1.bf16.msra.mxu1 %v7425_v12 }
  0x65   : > { %1554 = vmatmul.mubr.bf16.gmra.mxu0 %v7348_v14 }
  0x66   : > { %1747 = vmatmul.mubr.bf16.gmra.mxu1 %v7349_v15  ;;  %1563 = vmatprep.mubr.bf16.mxu0 %v7350_v16 }
  0x67   : > { %1756 = vmatprep.mubr.bf16.mxu1 %v7352_v17  ;;  %v7430_v17 = vld [vmem:[%s11700_s6 + $0x54] ss:$8 sps:$4 sm:$0xff]  }
  0x68   : > { %3471 = vmatprep.subr.bf16.mxu1 %v7430_v17 }
  0x6d   : > { %1564 = vmatmul.mubr.bf16.gmra.mxu0 %v7354_v18 }
  0x6e   : > { %1757 = vmatmul.mubr.bf16.gmra.mxu1 %v7355_v19  ;;  %1573 = vmatprep.mubr.bf16.mxu0 %v7356_v20  ;;  %v7428_v20 = vld [vmem:[%s11700_s6 + $0x50] ss:$8 sps:$4 sm:$0xff]  }
  0x6f   : > { %1766 = vmatprep.mubr.bf16.mxu1 %v7358_v21  ;;  %3472 = vmatpush1.bf16.msra.mxu1 %v7428_v20  ;;  %v7535_v20 = vld [vmem:[%s11700_s6 + $0x1b4] ss:$8 sps:$4 sm:$0xff]  }
  0x75   : > { %1574 = vmatmul.mubr.bf16.gmra.mxu0 %v7360_v22 }
  0x76   : > { %1767 = vmatmul.mubr.bf16.gmra.mxu1 %v7361_v23  ;;  %1583 = vmatprep.mubr.bf16.mxu0 %v7362_v24 }
  0x77   : > { %1776 = vmatprep.mubr.bf16.mxu1 %v7364_v25 }
  0x7d   : > { %1584 = vmatmul.mubr.bf16.gmra.mxu0 %v7366_v26 }
  0x7e   : > { %1777 = vmatmul.mubr.bf16.gmra.mxu1 %v7367_v27  ;;  %1593 = vmatprep.mubr.bf16.mxu0 %v7368_v28  ;;  %v7433_v28 = vld [vmem:[%s11700_s6 + $0x44] ss:$8 sps:$4 sm:$0xff]  }
  0x7f   : > { %1786 = vmatprep.mubr.bf16.mxu1 %v7370_v29  ;;  %3473 = vmatprep.subr.bf16.mxu1 %v7433_v28 }
  0x85   : > { %1594 = vmatmul.mubr.bf16.gmra.mxu0 %v7372_v30 }
  0x86   : > { %1787 = vmatmul.mubr.bf16.gmra.mxu1 %v7373_v31  ;;  %1603 = vmatprep.mubr.bf16.mxu0 %v7374_v32  ;;  %v7431_v31 = vld [vmem:[%s11700_s6 + $0x40] ss:$8 sps:$4 sm:$0xff]  }
  0x87   : > { %1796 = vmatprep.mubr.bf16.mxu1 %v7376_v33  ;;  %3474 = vmatpush1.bf16.msra.mxu1 %v7431_v31 }
  0x8d   : > { %1604 = vmatmul.mubr.bf16.gmra.mxu0 %v7378_v34 }
  0x8e   : > { %1797 = vmatmul.mubr.bf16.gmra.mxu1 %v7379_v35  ;;  %1613 = vmatprep.mubr.bf16.mxu0 %v7380_v36 }
  0x8f   : > { %1806 = vmatprep.mubr.bf16.mxu1 %v7382_v37 }
  0x95   : > { %1614 = vmatmul.mubr.bf16.gmra.mxu0 %v7384_v38 }
  0x96   : > { %1807 = vmatmul.mubr.bf16.gmra.mxu1 %v7385_v39  ;;  %1623 = vmatprep.mubr.bf16.mxu0 %v7386_v40  ;;  %v7436_v40 = vld [vmem:[%s11700_s6 + $0x34] ss:$8 sps:$4 sm:$0xff]  }
  0x97   : > { %1816 = vmatprep.mubr.bf16.mxu1 %v7388_v41  ;;  %3475 = vmatprep.subr.bf16.mxu1 %v7436_v40  ;;  %v7449_v40 = vld [vmem:[%s11700_s6 + $0xe0] ss:$8 sps:$4 sm:$0xff]  }
  0x9d   : > { %1624 = vmatmul.mubr.bf16.gmra.mxu0 %v7390_v42 }
  0x9e   : > { %1817 = vmatmul.mubr.bf16.gmra.mxu1 %v7391_v43  ;;  %1633 = vmatprep.mubr.bf16.mxu0 %v7392_v44  ;;  %v7434_v43 = vld [vmem:[%s11700_s6 + $0x30] ss:$8 sps:$4 sm:$0xff]  }
  0x9f   : > { %1826 = vmatprep.mubr.bf16.mxu1 %v7394_v45  ;;  %3476 = vmatpush1.bf16.msra.mxu1 %v7434_v43 }
  0xa5   : > { %1634 = vmatmul.mubr.bf16.gmra.mxu0 %v7396_v46 }
  0xa6   : > { %1827 = vmatmul.mubr.bf16.gmra.mxu1 %v7397_v47  ;;  %1643 = vmatprep.mubr.bf16.mxu0 %v7398_v48 }
  0xa7   : > { %1836 = vmatprep.mubr.bf16.mxu1 %v7400_v49 }
  0xad   : > { %1644 = vmatmul.mubr.bf16.gmra.mxu0 %v7402_v50  ;;  %v7439_v50 = vld [vmem:[%s11700_s6 + $0x24] ss:$8 sps:$4 sm:$0xff]  }
  0xae   : > { %1837 = vmatmul.mubr.bf16.gmra.mxu1 %v7403_v51  ;;  %1653 = vmatprep.mubr.bf16.mxu0 %v7404_v52 }
  0xaf   : > { %1846 = vmatprep.mubr.bf16.mxu1 %v7406_v53  ;;  %v7437_v53 = vld [vmem:[%s11700_s6 + $0x20] ss:$8 sps:$4 sm:$0xff]   ;;  %3477 = vmatprep.subr.bf16.mxu1 %v7439_v50  ;;  %v7454_v50 = vld [vmem:[%s11700_s6 + $0xd4] ss:$8 sps:$4 sm:$0xff]  }
  0xb0   : > { %3478 = vmatpush1.bf16.msra.mxu1 %v7437_v53  ;;  %v7452_v53 = vld [vmem:[%s11700_s6 + $0xd0] ss:$8 sps:$4 sm:$0xff]  }
  0xb5   : > { %1654 = vmatmul.mubr.bf16.gmra.mxu0 %v7408_v54 }
  0xb6   : > { %1847 = vmatmul.mubr.bf16.gmra.mxu1 %v7409_v55  ;;  %1663 = vmatprep.mubr.bf16.mxu0 %v7410_v56 }
  0xb7   : > { %1856 = vmatprep.mubr.bf16.mxu1 %v7412_v57 }
  0xbd   : > { %1664 = vmatmul.mubr.bf16.gmra.mxu0 %v7414_v58 }
  0xbe   : > { %1857 = vmatmul.mubr.bf16.gmra.mxu1 %v7415_v59  ;;  %1673 = vmatprep.mubr.bf16.mxu0 %v7416_v60 }
  0xbf   : > { %1866 = vmatprep.mubr.bf16.mxu1 %v7418_v61 }
  0xc5   : > { %1674 = vmatmul.mubr.bf16.gmra.mxu0 %v7420_v62  ;;  %v7442_v62 = vld [vmem:[%s11700_s6 + $0x14] ss:$8 sps:$4 sm:$0xff]  }
  0xc6   : > { %1867 = vmatmul.mubr.bf16.gmra.mxu1 %v7421_v63  ;;  %3479 = vmatprep.subr.bf16.mxu1 %v7442_v62 }
  0xc7   : > { %3480 = vmatpush1.bf16.msra.mxu1 %v7440_v2 }
 0x10d   : > { %v1525_v10 = vpop.f32.mrf.mxu0 }
 0x10e   : > { %v1718_v11 = vpop.f32.mrf.mxu1  ;;  %v1526_v15 = vadd.f32 %v1525_v10, %v8406_v7 }
 0x10f   : > { %v1527_v13 = vpop.f32.mrf.mxu0 }
 0x110   : > { %v1720_v14 = vpop.f32.mrf.mxu1  ;;  %v1528_v16 = vadd.f32 %v1527_v13, %v8408_v8  ;;  %v1719_v25 = vadd.f32 %v1718_v11, %v1526_v15  ;;  %v7445_v11 = vld [vmem:[%s11700_s6 + $0x4] ss:$8 sps:$4 sm:$0xff]  }
 0x111   : > { %v1529_v18 = vpop.f32.mrf.mxu0  ;;  %3481 = vmatprep.subr.bf16.mxu1 %v7445_v11 }
 0x112   : > { %v1722_v19 = vpop.f32.mrf.mxu1  ;;  %v8424_v21 = vadd.f32 %v1720_v14, %v1528_v16  ;;  %v1530_v22 = vadd.f32 %v1529_v18, %v8406_v7  ;;  %v7443_v14 = vld [vmem:[%s11700_s6] ss:$8 sps:$4 sm:$0xff]  }
 0x113   : > { %v1531_v23 = vpop.f32.mrf.mxu0  ;;  %3482 = vmatpush1.bf16.msra.mxu1 %v7443_v14 }
 0x114   : > { %v1724_v24 = vpop.f32.mrf.mxu1  ;;  %v1723_v26 = vadd.f32 %v1722_v19, %v1530_v22  ;;  %v1532_v27 = vadd.f32 %v1531_v23, %v8408_v8 }
 0x115   : > { %v1535_v29 = vpop.f32.mrf.mxu0 }
 0x116   : > { %v1728_v30 = vpop.f32.mrf.mxu1  ;;  %v8434_v32 = vpack.c.bf16 %v1723_v26, %v1719_v25  ;;  %v8436_v33 = vadd.f32 %v1724_v24, %v1532_v27  ;;  %v1536_v34 = vadd.f32 %v1535_v29, %v8406_v7  ;;  %v7448_v24 = vld [vmem:[%s11700_s6 + $0xf4] ss:$8 sps:$4 sm:$0xff]   ;;  %v7446_v27 = vld [vmem:[%s11700_s6 + $0xf0] ss:$8 sps:$4 sm:$0xff]  }
 0x117   : > { %v1537_v35 = vpop.f32.mrf.mxu0  ;;  %3483 = vmatprep.subr.bf16.mxu1 %v7448_v24 }
 0x118   : > { %v1730_v36 = vpop.f32.mrf.mxu1  ;;  %v1729_v38 = vadd.f32 %v1728_v30, %v1536_v34  ;;  %v1538_v39 = vadd.f32 %v1537_v35, %v8408_v8  ;;  %7154 = vmatprep.mubr.bf16.mxu0 %v8434_v32  ;;  %3484 = vmatpush2.bf16.msra.mxu1 %v7446_v27 }
 0x119   : > { %v1539_v41 = vpop.f32.mrf.mxu0 }
 0x11a   : > { %v1732_v42 = vpop.f32.mrf.mxu1  ;;  %v8449_v44 = vadd.f32 %v1730_v36, %v1538_v39  ;;  %v1540_v45 = vadd.f32 %v1539_v41, %v8406_v7  ;;  %v7451_v36 = vld [vmem:[%s11700_s6 + $0xe4] ss:$8 sps:$4 sm:$0xff]  }
 0x11b   : > { %v1541_v46 = vpop.f32.mrf.mxu0  ;;  %3485 = vmatprep.subr.bf16.mxu1 %v7451_v36 }
 0x11c   : > { %v1734_v47 = vpop.f32.mrf.mxu1  ;;  %v1733_v48 = vadd.f32 %v1732_v42, %v1540_v45  ;;  %v1542_v49 = vadd.f32 %v1541_v46, %v8408_v8  ;;  %3486 = vmatpush2.bf16.msra.mxu1 %v7449_v40 }
 0x11d   : > { %v1545_v51 = vpop.f32.mrf.mxu0  ;;  %3487 = vmatprep.subr.bf16.mxu1 %v7454_v50 }
 0x11e   : > { %v1738_v52 = vpop.f32.mrf.mxu1  ;;  %v8459_v54 = vpack.c.bf16 %v1733_v48, %v1729_v38  ;;  %v8461_v55 = vadd.f32 %v1734_v47, %v1542_v49  ;;  %v1546_v56 = vadd.f32 %v1545_v51, %v8406_v7 }
 0x11f   : > { %v1547_v57 = vpop.f32.mrf.mxu0 }
 0x120   : > { %v1740_v58 = vpop.f32.mrf.mxu1  ;;  %v1739_v60 = vadd.f32 %v1738_v52, %v1546_v56  ;;  %v1548_v61 = vadd.f32 %v1547_v57, %v8408_v8  ;;  %3488 = vmatpush2.bf16.msra.mxu1 %v7452_v53 }
 0x121   : > { %v1549_v63 = vpop.f32.mrf.mxu0 }
 0x122   : > { %v1742_v1 = vpop.f32.mrf.mxu1  ;;  %v8473_v3 = vadd.f32 %v1740_v58, %v1548_v61  ;;  %v1550_v4 = vadd.f32 %v1549_v63, %v8406_v7  ;;  %v7457_v63 = vld [vmem:[%s11700_s6 + $0xc4] ss:$8 sps:$4 sm:$0xff]  }
 0x123   : > { %v1551_v5 = vpop.f32.mrf.mxu0  ;;  %3489 = vmatprep.subr.bf16.mxu1 %v7457_v63  ;;  %v7469_v63 = vld [vmem:[%s11700_s6 + $0x84] ss:$8 sps:$4 sm:$0xff]  }
 0x124   : > { %v1744_v6 = vpop.f32.mrf.mxu1  ;;  %v1743_v9 = vadd.f32 %v1742_v1, %v1550_v4  ;;  %v1552_v10 = vadd.f32 %v1551_v5, %v8408_v8  ;;  %v7455_v4 = vld [vmem:[%s11700_s6 + $0xc0] ss:$8 sps:$4 sm:$0xff]  }
 0x125   : > { %v1555_v12 = vpop.f32.mrf.mxu0  ;;  %3490 = vmatpush2.bf16.msra.mxu1 %v7455_v4  ;;  %v7467_v4 = vld [vmem:[%s11700_s6 + $0x80] ss:$8 sps:$4 sm:$0xff]  }
 0x126   : > { %v1748_v13 = vpop.f32.mrf.mxu1  ;;  %v8483_v15 = vpack.c.bf16 %v1743_v9, %v1739_v60  ;;  %v8485_v16 = vadd.f32 %v1744_v6, %v1552_v10  ;;  %v1556_v17 = vadd.f32 %v1555_v12, %v8406_v7 }
 0x127   : > { %v1557_v18 = vpop.f32.mrf.mxu0 }
 0x128   : > { %v1750_v19 = vpop.f32.mrf.mxu1  ;;  %v1749_v22 = vadd.f32 %v1748_v13, %v1556_v17  ;;  %v1558_v23 = vadd.f32 %v1557_v18, %v8408_v8  ;;  %v7460_v17 = vld [vmem:[%s11700_s6 + $0xb4] ss:$8 sps:$4 sm:$0xff]  }
 0x129   : > { %v1559_v25 = vpop.f32.mrf.mxu0  ;;  %3491 = vmatprep.subr.bf16.mxu1 %v7460_v17  ;;  %v7472_v17 = vld [vmem:[%s8588_s22 + $0x4] ss:$24 sps:$4 sm:$0xff]  }
 0x12a   : > { %v1752_v26 = vpop.f32.mrf.mxu1  ;;  %v8497_v28 = vadd.f32 %v1750_v19, %v1558_v23  ;;  %v1560_v29 = vadd.f32 %v1559_v25, %v8406_v7  ;;  %3499 = vmatprep.mubr.bf16.mxu1 %v7472_v17 }
 0x12b   : > { %v1561_v30 = vpop.f32.mrf.mxu0 }
 0x12c   : > { %v1754_v31 = vpop.f32.mrf.mxu1  ;;  %v1753_v34 = vadd.f32 %v1752_v26, %v1560_v29  ;;  %v1562_v35 = vadd.f32 %v1561_v30, %v8408_v8  ;;  %v7463_v30 = vld [vmem:[%s11700_s6 + $0xa4] ss:$8 sps:$4 sm:$0xff]  }
 0x12d   : > { %v1565_v38 = vpop.f32.mrf.mxu0 }
 0x12e   : > { %v1758_v39 = vpop.f32.mrf.mxu1  ;;  %v8507_v41 = vpack.c.bf16 %v1753_v34, %v1749_v22  ;;  %v8509_v42 = vadd.f32 %v1754_v31, %v1562_v35  ;;  %v1566_v43 = vadd.f32 %v1565_v38, %v8406_v7  ;;  %v7458_v22 = vld [vmem:[%s11700_s6 + $0xb0] ss:$8 sps:$4 sm:$0xff]   ;;  %v7461_v35 = vld [vmem:[%s11700_s6 + $0xa0] ss:$8 sps:$4 sm:$0xff]  }
 0x12f   : > { %v1567_v45 = vpop.f32.mrf.mxu0  ;;  %3492 = vmatpush2.bf16.msra.mxu1 %v7458_v22 }
 0x130   : > { %v1760_v46 = vpop.f32.mrf.mxu1  ;;  %v1759_v48 = vadd.f32 %v1758_v39, %v1566_v43  ;;  %v1568_v49 = vadd.f32 %v1567_v45, %v8408_v8  ;;  %3493 = vmatprep.subr.bf16.mxu1 %v7463_v30 }
 0x131   : > { %v1569_v51 = vpop.f32.mrf.mxu0 }
 0x132   : > { %v1762_v52 = vpop.f32.mrf.mxu1  ;;  %v8521_v56 = vadd.f32 %v1760_v46, %v1568_v49  ;;  %v1570_v57 = vadd.f32 %v1569_v51, %v8406_v7  ;;  %v7466_v49 = vld [vmem:[%s11700_s6 + $0x94] ss:$8 sps:$4 sm:$0xff]  }
 0x133   : > { %v1571_v58 = vpop.f32.mrf.mxu0  ;;  %3494 = vmatpush2.bf16.msra.mxu1 %v7461_v35 }
 0x134   : > { %v1764_v60 = vpop.f32.mrf.mxu1  ;;  %v1763_v61 = vadd.f32 %v1762_v52, %v1570_v57  ;;  %v1572_v62 = vadd.f32 %v1571_v58, %v8408_v8  ;;  %v7464_v52 = vld [vmem:[%s11700_s6 + $0x90] ss:$8 sps:$4 sm:$0xff]   ;;  %3495 = vmatprep.subr.bf16.mxu1 %v7466_v49  ;;  %v7476_v49 = vld [vmem:[%s11700_s6 + $0x160] ss:$8 sps:$4 sm:$0xff]  }
 0x135   : > { %v1575_v1 = vpop.f32.mrf.mxu0 }
 0x136   : > { %v1768_v2 = vpop.f32.mrf.mxu1  ;;  %v8531_v5 = vpack.c.bf16 %v1763_v61, %v1759_v48  ;;  %v8533_v6 = vadd.f32 %v1764_v60, %v1572_v62  ;;  %v1576_v9 = vadd.f32 %v1575_v1, %v8406_v7 }
 0x137   : > { %v1577_v10 = vpop.f32.mrf.mxu0  ;;  %3496 = vmatpush2.bf16.msra.mxu1 %v7464_v52 }
 0x138   : > { %11837 = vst [vmem:[#allocation3_spill] sm:$0xff] %v8531_v5  ;;  %v1770_v11 = vpop.f32.mrf.mxu1  ;;  %v1769_v13 = vadd.f32 %v1768_v2, %v1576_v9  ;;  %v1578_v14 = vadd.f32 %v1577_v10, %v8408_v8  ;;  %3497 = vmatprep.subr.bf16.mxu1 %v7469_v63  ;;  %v7571_v5 = vld [vmem:[%s8588_s22 + $0x38] ss:$24 sps:$4 sm:$0xff]  }
 0x139   : > { %v1579_v18 = vpop.f32.mrf.mxu0 }
 0x13a   : > { %v1772_v19 = vpop.f32.mrf.mxu1  ;;  %v8545_v23 = vadd.f32 %v1770_v11, %v1578_v14  ;;  %v1580_v24 = vadd.f32 %v1579_v18, %v8406_v7  ;;  %v7550_v18 = vld [vmem:[%s11700_s6 + $0x194] ss:$8 sps:$4 sm:$0xff]  }
 0x13b   : > { %v1581_v25 = vpop.f32.mrf.mxu0  ;;  %3498 = vmatpush2.bf16.msra.mxu1 %v7467_v4 }
 0x13c   : > { %v1774_v26 = vpop.f32.mrf.mxu1  ;;  %v1773_v27 = vadd.f32 %v1772_v19, %v1580_v24  ;;  %v1582_v29 = vadd.f32 %v1581_v25, %v8408_v8  ;;  %v7470_v24 = vld [vmem:[%s8588_s22] ss:$24 sps:$4 sm:$0xff]   ;;  %v7475_v25 = vld [vmem:[%s11700_s6 + $0x174] ss:$8 sps:$4 sm:$0xff]  }
 0x13d   : > { %v1585_v31 = vpop.f32.mrf.mxu0  ;;  %3580 = vmatprep.subr.bf16.mxu1 %v7475_v25 }
 0x13e   : > { %v1778_v34 = vpop.f32.mrf.mxu1  ;;  %v8555_v36 = vpack.c.bf16 %v1773_v27, %v1769_v13  ;;  %v8557_v38 = vadd.f32 %v1774_v26, %v1582_v29  ;;  %v1586_v39 = vadd.f32 %v1585_v31, %v8406_v7  ;;  %v7473_v29 = vld [vmem:[%s11700_s6 + $0x170] ss:$8 sps:$4 sm:$0xff]   ;;  %3500 = vmatmul.mubr.bf16.vlgmr.msra.gmra.mxu1 %v7470_v24 }
 0x13f   : > { %v1587_v40 = vpop.f32.mrf.mxu0  ;;  %3581 = vmatpush1.bf16.msra.mxu1 %v7473_v29 }
 0x140   : > { %11838 = vst [vmem:[#allocation4_spill] sm:$0xff] %v8555_v36  ;;  %v1780_v43 = vpop.f32.mrf.mxu1  ;;  %v1779_v46 = vadd.f32 %v1778_v34, %v1586_v39  ;;  %v1588_v48 = vadd.f32 %v1587_v40, %v8408_v8 }
 0x141   : > { %v1589_v50 = vpop.f32.mrf.mxu0 }
 0x142   : > { %v1782_v51 = vpop.f32.mrf.mxu1  ;;  %v8569_v53 = vadd.f32 %v1780_v43, %v1588_v48  ;;  %v1590_v57 = vadd.f32 %v1589_v50, %v8406_v7  ;;  %v7478_v43 = vld [vmem:[%s11700_s6 + $0x164] ss:$8 sps:$4 sm:$0xff]  }
 0x143   : > { %v1591_v58 = vpop.f32.mrf.mxu0  ;;  %3582 = vmatprep.subr.bf16.mxu1 %v7478_v43 }
 0x144   : > { %v1784_v60 = vpop.f32.mrf.mxu1  ;;  %v1783_v61 = vadd.f32 %v1782_v51, %v1590_v57  ;;  %v1592_v62 = vadd.f32 %v1591_v58, %v8408_v8  ;;  %3583 = vmatpush1.bf16.msra.mxu1 %v7476_v49 }
 0x145   : > { %v1595_v1 = vpop.f32.mrf.mxu0 }
 0x146   : > { %v1788_v2 = vpop.f32.mrf.mxu1  ;;  %v8580_v9 = vpack.c.bf16 %v1783_v61, %v1779_v46  ;;  %v8582_v10 = vadd.f32 %v1784_v60, %v1592_v62  ;;  %v1596_v11 = vadd.f32 %v1595_v1, %v8406_v7  ;;  %v7479_v60 = vld [vmem:[%s8588_s22 + $0x34] ss:$24 sps:$4 sm:$0xff]   ;;  %v7481_v1 = vld [vmem:[%s8588_s22 + $0x30] ss:$24 sps:$4 sm:$0xff]  }
 0x147   : > { %v1597_v13 = vpop.f32.mrf.mxu0  ;;  %3509 = vmatprep.mubr.bf16.mxu1 %v7479_v60 }
 0x148   : > { %11839 = vst [vmem:[#allocation5_spill] sm:$0xff] %v8580_v9  ;;  %v1790_v14 = vpop.f32.mrf.mxu1  ;;  %v1789_v19 = vadd.f32 %v1788_v2, %v1596_v11  ;;  %v1598_v22 = vadd.f32 %v1597_v13, %v8408_v8  ;;  %v7484_v2 = vld [vmem:[%s11700_s6 + $0x154] ss:$8 sps:$4 sm:$0xff]   ;;  %v7482_v13 = vld [vmem:[%s11700_s6 + $0x150] ss:$8 sps:$4 sm:$0xff]   ;;  %3510 = vmatmul.mubr.bf16.gmra.mxu1 %v7481_v1 }
 0x149   : > { %v1599_v26 = vpop.f32.mrf.mxu0  ;;  %3584 = vmatprep.subr.bf16.mxu1 %v7484_v2 }
 0x14a   : > { %v1792_v27 = vpop.f32.mrf.mxu1  ;;  %v8601_v30 = vadd.f32 %v1790_v14, %v1598_v22  ;;  %v1600_v31 = vadd.f32 %v1599_v26, %v8406_v7  ;;  %3585 = vmatpush1.bf16.msra.mxu1 %v7482_v13  ;;  %v7487_v26 = vld [vmem:[%s11700_s6 + $0x144] ss:$8 sps:$4 sm:$0xff]  }
 0x14b   : > { %v1601_v34 = vpop.f32.mrf.mxu0  ;;  %3586 = vmatprep.subr.bf16.mxu1 %v7487_v26 }
 0x14c   : > { %v1794_v35 = vpop.f32.mrf.mxu1  ;;  %v1793_v39 = vadd.f32 %v1792_v27, %v1600_v31  ;;  %v1602_v40 = vadd.f32 %v1601_v34, %v8408_v8  ;;  %v7485_v31 = vld [vmem:[%s11700_s6 + $0x140] ss:$8 sps:$4 sm:$0xff]  }
 0x14d   : > { %v1605_v46 = vpop.f32.mrf.mxu0 }
 0x14e   : > { %v1798_v48 = vpop.f32.mrf.mxu1  ;;  %v8611_v50 = vpack.c.bf16 %v1793_v39, %v1789_v19  ;;  %v8613_v51 = vadd.f32 %v1794_v35, %v1602_v40  ;;  %v1606_v52 = vadd.f32 %v1605_v46, %v8406_v7  ;;  %3587 = vmatpush1.bf16.msra.mxu1 %v7485_v31  ;;  %v7488_v46 = vld [vmem:[%s8588_s22 + $0x64] ss:$24 sps:$4 sm:$0xff]  }
 0x14f   : > { %v1607_v57 = vpop.f32.mrf.mxu0  ;;  %3519 = vmatprep.mubr.bf16.mxu1 %v7488_v46 }
 0x150   : > { %11840 = vst [vmem:[#allocation6_spill] sm:$0xff] %v8611_v50  ;;  %v1800_v58 = vpop.f32.mrf.mxu1  ;;  %v1799_v62 = vadd.f32 %v1798_v48, %v1606_v52  ;;  %v1608_v63 = vadd.f32 %v1607_v57, %v8408_v8  ;;  %v7490_v57 = vld [vmem:[%s8588_s22 + $0x60] ss:$24 sps:$4 sm:$0xff]  }
 0x151   : > { %v1609_v4 = vpop.f32.mrf.mxu0  ;;  %3520 = vmatmul.mubr.bf16.gmra.mxu1 %v7490_v57  ;;  %v7499_v57 = vld [vmem:[%s8588_s22 + $0x90] ss:$24 sps:$4 sm:$0xff]  }
 0x152   : > { %v1802_v11 = vpop.f32.mrf.mxu1  ;;  %v8627_v14 = vadd.f32 %v1800_v58, %v1608_v63  ;;  %v1610_v17 = vadd.f32 %v1609_v4, %v8406_v7  ;;  %v7493_v58 = vld [vmem:[%s11700_s6 + $0x134] ss:$8 sps:$4 sm:$0xff]   ;;  %v7491_v63 = vld [vmem:[%s11700_s6 + $0x130] ss:$8 sps:$4 sm:$0xff]  }
 0x153   : > { %v1611_v19 = vpop.f32.mrf.mxu0  ;;  %3588 = vmatprep.subr.bf16.mxu1 %v7493_v58 }
 0x154   : > { %v1804_v22 = vpop.f32.mrf.mxu1  ;;  %v1803_v24 = vadd.f32 %v1802_v11, %v1610_v17  ;;  %v1612_v25 = vadd.f32 %v1611_v19, %v8408_v8  ;;  %3589 = vmatpush1.bf16.msra.mxu1 %v7491_v63  ;;  %v7496_v19 = vld [vmem:[%s11700_s6 + $0x124] ss:$8 sps:$4 sm:$0xff]  }
 0x155   : > { %v1615_v27 = vpop.f32.mrf.mxu0  ;;  %3590 = vmatprep.subr.bf16.mxu1 %v7496_v19  ;;  %v7505_v19 = vld [vmem:[%s11700_s6 + $0x104] ss:$8 sps:$4 sm:$0xff]  }
 0x156   : > { %v1808_v29 = vpop.f32.mrf.mxu1  ;;  %v8637_v34 = vpack.c.bf16 %v1803_v24, %v1799_v62  ;;  %v8639_v35 = vadd.f32 %v1804_v22, %v1612_v25  ;;  %v1616_v39 = vadd.f32 %v1615_v27, %v8406_v7  ;;  %v7494_v25 = vld [vmem:[%s11700_s6 + $0x120] ss:$8 sps:$4 sm:$0xff]  }
 0x157   : > { %v1617_v40 = vpop.f32.mrf.mxu0 }
 0x158   : > { %11841 = vst [vmem:[#allocation7_spill] sm:$0xff] %v8637_v34  ;;  %v1810_v43 = vpop.f32.mrf.mxu1  ;;  %v1809_v49 = vadd.f32 %v1808_v29, %v1616_v39  ;;  %v1618_v52 = vadd.f32 %v1617_v40, %v8408_v8  ;;  %3591 = vmatpush1.bf16.msra.mxu1 %v7494_v25  ;;  %v7497_v40 = vld [vmem:[%s8588_s22 + $0x94] ss:$24 sps:$4 sm:$0xff]   ;;  %v7503_v25 = vld [vmem:[%s11700_s6 + $0x100] ss:$8 sps:$4 sm:$0xff]  }
 0x159   : > { %v1619_v60 = vpop.f32.mrf.mxu0  ;;  %3529 = vmatprep.mubr.bf16.mxu1 %v7497_v40 }
 0x15a   : > { %v1812_v62 = vpop.f32.mrf.mxu1  ;;  %v8653_v1 = vadd.f32 %v1810_v43, %v1618_v52  ;;  %v1620_v2 = vadd.f32 %v1619_v60, %v8406_v7  ;;  %3530 = vmatmul.mubr.bf16.gmra.mxu1 %v7499_v57  ;;  %v7506_v57 = vld [vmem:[%s8588_s22 + $0xc4] ss:$24 sps:$4 sm:$0xff]  }
 0x15b   : > { %v1621_v4 = vpop.f32.mrf.mxu0  ;;  %3539 = vmatprep.mubr.bf16.mxu1 %v7506_v57 }
 0x15c   : > { %v1814_v11 = vpop.f32.mrf.mxu1  ;;  %v1813_v13 = vadd.f32 %v1812_v62, %v1620_v2  ;;  %v1622_v17 = vadd.f32 %v1621_v4, %v8408_v8  ;;  %v7500_v62 = vld [vmem:[%s11700_s6 + $0x110] ss:$8 sps:$4 sm:$0xff]  }
 0x15d   : > { %v1625_v22 = vpop.f32.mrf.mxu0 }
 0x15e   : > { %v1818_v24 = vpop.f32.mrf.mxu1  ;;  %v8663_v26 = vpack.c.bf16 %v1813_v13, %v1809_v49  ;;  %v8665_v27 = vadd.f32 %v1814_v11, %v1622_v17  ;;  %v1626_v29 = vadd.f32 %v1625_v22, %v8406_v7  ;;  %v7502_v49 = vld [vmem:[%s11700_s6 + $0x114] ss:$8 sps:$4 sm:$0xff]  }
 0x15f   : > { %v1627_v31 = vpop.f32.mrf.mxu0  ;;  %3592 = vmatprep.subr.bf16.mxu1 %v7502_v49 }
 0x160   : > { %11842 = vst [vmem:[#allocation8_spill] sm:$0xff] %v8663_v26  ;;  %v1820_v39 = vpop.f32.mrf.mxu1  ;;  %v1819_v46 = vadd.f32 %v1818_v24, %v1626_v29  ;;  %v1628_v52 = vadd.f32 %v1627_v31, %v8408_v8  ;;  %3593 = vmatpush1.bf16.msra.mxu1 %v7500_v62 }
 0x161   : > { %v1629_v58 = vpop.f32.mrf.mxu0  ;;  %3594 = vmatprep.subr.bf16.mxu1 %v7505_v19 }
 0x162   : > { %v1822_v60 = vpop.f32.mrf.mxu1  ;;  %v8679_v63 = vadd.f32 %v1820_v39, %v1628_v52  ;;  %v1630_v2 = vadd.f32 %v1629_v58, %v8406_v7 }
 0x163   : > { %v1631_v4 = vpop.f32.mrf.mxu0 }
 0x164   : > { %v1824_v11 = vpop.f32.mrf.mxu1  ;;  %v1823_v13 = vadd.f32 %v1822_v60, %v1630_v2  ;;  %v1632_v17 = vadd.f32 %v1631_v4, %v8408_v8  ;;  %3595 = vmatpush1.bf16.msra.mxu1 %v7503_v25  ;;  %v7508_v60 = vld [vmem:[%s8588_s22 + $0xc0] ss:$24 sps:$4 sm:$0xff]  }
 0x165   : > { %v1635_v22 = vpop.f32.mrf.mxu0  ;;  %v7509_v4 = vld [vmem:[%s11700_s6 + $0x1f0] ss:$8 sps:$4 sm:$0xff]   ;;  %3540 = vmatmul.mubr.bf16.gmra.mxu1 %v7508_v60 }
 0x166   : > { %v1828_v24 = vpop.f32.mrf.mxu1  ;;  %v8689_v29 = vpack.c.bf16 %v1823_v13, %v1819_v46  ;;  %v8691_v31 = vadd.f32 %v1824_v11, %v1632_v17  ;;  %v1636_v39 = vadd.f32 %v1635_v22, %v8406_v7  ;;  %v7511_v46 = vld [vmem:[%s11700_s6 + $0x1f4] ss:$8 sps:$4 sm:$0xff]   ;;  %v7514_v22 = vld [vmem:[%s11700_s6 + $0x1e4] ss:$8 sps:$4 sm:$0xff]  }
 0x167   : > { %v8694_v40 = vpop.f32.mrf.mxu0  ;;  %3596 = vmatprep.subr.bf16.mxu1 %v7511_v46 }
 0x168   : > { %11843 = vst [vmem:[#allocation9_spill] sm:$0xff] %v8689_v29  ;;  %v8696_v52 = vpop.f32.mrf.mxu1  ;;  %v1829_v58 = vadd.f32 %v1828_v24, %v1636_v39  ;;  %3597 = vmatpush2.bf16.msra.mxu1 %v7509_v4  ;;  %v7512_v39 = vld [vmem:[%s11700_s6 + $0x1e0] ss:$8 sps:$4 sm:$0xff]  }
 0x169   : > { %v1639_v62 = vpop.f32.mrf.mxu0  ;;  %3598 = vmatprep.subr.bf16.mxu1 %v7514_v22 }
 0x16a   : > { %v1832_v2 = vpop.f32.mrf.mxu1  ;;  %v1640_v11 = vadd.f32 %v1639_v62, %v8406_v7 }
 0x16b   : > { %v8709_v13 = vpop.f32.mrf.mxu0 }
 0x16c   : > { %v8711_v17 = vpop.f32.mrf.mxu1  ;;  %v1833_v19 = vadd.f32 %v1832_v2, %v1640_v11  ;;  %3599 = vmatpush2.bf16.msra.mxu1 %v7512_v39  ;;  %v7515_v2 = vld [vmem:[%s8588_s22 + $0xf4] ss:$24 sps:$4 sm:$0xff]   ;;  %v7517_v11 = vld [vmem:[%s8588_s22 + $0xf0] ss:$24 sps:$4 sm:$0xff]  }
 0x16d   : > { %v1645_v24 = vpop.f32.mrf.mxu0  ;;  %3549 = vmatprep.mubr.bf16.mxu1 %v7515_v2  ;;  %3600 = vmatprep.subr.bf16.mxu1 %v7520_v0  ;;  %v7526_v39 = vld [vmem:[%s11700_s6 + $0x1c4] ss:$8 sps:$4 sm:$0xff]  }
 0x16e   : > { %v1838_v25 = vpop.f32.mrf.mxu1  ;;  %v8719_v57 = vpack.c.bf16 %v1833_v19, %v1829_v58  ;;  %v1646_v60 = vadd.f32 %v1645_v24, %v8406_v7  ;;  %v7518_v58 = vld [vmem:[%s11700_s6 + $0x1d0] ss:$8 sps:$4 sm:$0xff]   ;;  %3550 = vmatmul.mubr.bf16.gmra.mxu1 %v7517_v11 }
 0x16f   : > { %v8722_v46 = vpop.f32.mrf.mxu0 }
 0x170   : > { %11844 = vst [vmem:[#allocation10_spill] sm:$0xff] %v8719_v57  ;;  %v8724_v62 = vpop.f32.mrf.mxu1  ;;  %v1839_v4 = vadd.f32 %v1838_v25, %v1646_v60  ;;  %3601 = vmatpush2.bf16.msra.mxu1 %v7518_v58 }
 0x171   : > { %v1649_v37 = vpop.f32.mrf.mxu0  ;;  %3602 = vmatprep.subr.bf16.mxu1 %v7526_v39 }
 0x172   : > { %v1842_v48 = vpop.f32.mrf.mxu1  ;;  %v1650_v19 = vadd.f32 %v1649_v37, %v8406_v7  ;;  %v7524_v37 = vld [vmem:[%s11700_s6 + $0x1c0] ss:$8 sps:$4 sm:$0xff]  }
 0x173   : > { %v8735_v22 = vpop.f32.mrf.mxu0 }
 0x174   : > { %v8737_v24 = vpop.f32.mrf.mxu1  ;;  %v1843_v25 = vadd.f32 %v1842_v48, %v1650_v19  ;;  %3603 = vmatpush2.bf16.msra.mxu1 %v7524_v37  ;;  %v7530_v48 = vld [vmem:[%s8588_s22 + $0x124] ss:$24 sps:$4 sm:$0xff]   ;;  %v7532_v19 = vld [vmem:[%s8588_s22 + $0x120] ss:$24 sps:$4 sm:$0xff]  }
 0x175   : > { %v1655_v60 = vpop.f32.mrf.mxu0  ;;  %3559 = vmatprep.mubr.bf16.mxu1 %v7530_v48  ;;  %3604 = vmatprep.subr.bf16.mxu1 %v7535_v20  ;;  %v7541_v37 = vld [vmem:[%s11700_s6 + $0x1a4] ss:$8 sps:$4 sm:$0xff]  }
 0x176   : > { %v1848_v2 = vpop.f32.mrf.mxu1  ;;  %v8745_v11 = vpack.c.bf16 %v1843_v25, %v1839_v4  ;;  %v1656_v0 = vadd.f32 %v1655_v60, %v8406_v7  ;;  %v7533_v4 = vld [vmem:[%s11700_s6 + $0x1b0] ss:$8 sps:$4 sm:$0xff]   ;;  %3560 = vmatmul.mubr.bf16.gmra.mxu1 %v7532_v19 }
 0x177   : > { %v8748_v59 = vpop.f32.mrf.mxu0 }
 0x178   : > { %11845 = vst [vmem:[#allocation11_spill] sm:$0xff] %v8745_v11  ;;  %v8750_v43 = vpop.f32.mrf.mxu1  ;;  %v1849_v58 = vadd.f32 %v1848_v2, %v1656_v0  ;;  %3605 = vmatpush2.bf16.msra.mxu1 %v7533_v4  ;;  %v7545_v4 = vld [vmem:[%s8588_s22 + $0x154] ss:$24 sps:$4 sm:$0xff]  }
 0x179   : > { %v1659_v49 = vpop.f32.mrf.mxu0  ;;  %3606 = vmatprep.subr.bf16.mxu1 %v7541_v37  ;;  %3569 = vmatprep.mubr.bf16.mxu1 %v7545_v4 }
 0x17a   : > { %v1852_v47 = vpop.f32.mrf.mxu1  ;;  %v1660_v25 = vadd.f32 %v1659_v49, %v8406_v7  ;;  %v7539_v49 = vld [vmem:[%s11700_s6 + $0x1a0] ss:$8 sps:$4 sm:$0xff]  }
 0x17b   : > { %v8761_v39 = vpop.f32.mrf.mxu0 }
 0x17c   : > { %v8763_v60 = vpop.f32.mrf.mxu1  ;;  %v1853_v2 = vadd.f32 %v1852_v47, %v1660_v25  ;;  %3607 = vmatpush2.bf16.msra.mxu1 %v7539_v49  ;;  %v7547_v25 = vld [vmem:[%s8588_s22 + $0x150] ss:$24 sps:$4 sm:$0xff]   ;;  %v7556_v49 = vld [vmem:[%s11700_s6 + $0x184] ss:$8 sps:$4 sm:$0xff]  }
 0x17d   : > { %v1665_v0 = vpop.f32.mrf.mxu0  ;;  %3608 = vmatprep.subr.bf16.mxu1 %v7550_v18 }
 0x17e   : > { %v1858_v48 = vpop.f32.mrf.mxu1  ;;  %v8771_v19 = vpack.c.bf16 %v1853_v2, %v1849_v58  ;;  %v1666_v20 = vadd.f32 %v1665_v0, %v8406_v7  ;;  %v7548_v58 = vld [vmem:[%s11700_s6 + $0x190] ss:$8 sps:$4 sm:$0xff]   ;;  %3570 = vmatmul.mubr.bf16.gmra.mxu1 %v7547_v25 }
 0x17f   : > { %v1667_v12 = vpop.f32.mrf.mxu0 }
 0x180   : > { %11846 = vst [vmem:[#allocation12_spill] sm:$0xff] %v8771_v19  ;;  %v1860_v45 = vpop.f32.mrf.mxu1  ;;  %v1859_v47 = vadd.f32 %v1858_v48, %v1666_v20  ;;  %3609 = vmatpush2.bf16.msra.mxu1 %v7548_v58  ;;  %v7554_v19 = vld [vmem:[%s11700_s6 + $0x180] ss:$8 sps:$4 sm:$0xff]   ;;  %v7562_v58 = vld [vmem:[%s8588_s22 + $0xc] ss:$24 sps:$4 sm:$0xff]  }
 0x181   : > { %v1669_v61 = vpop.f32.mrf.mxu0  ;;  %3610 = vmatprep.subr.bf16.mxu1 %v7556_v49  ;;  %3612 = vmatprep.mubr.bf16.mxu1 %v7562_v58  ;;  %v1668_v49 = vadd.f32 %v1667_v12, %v8408_v8 }
 0x182   : > { %v1862_v11 = vpop.f32.mrf.mxu1  ;;  %v1670_v2 = vadd.f32 %v1669_v61, %v8406_v7 }
 0x183   : > { %v1671_v37 = vpop.f32.mrf.mxu0  ;;  %v1861_v36 = vadd.f32 %v1860_v45, %v1668_v49  ;;  %v4827_v49 = vld [vmem:[%s11703_s9 + $0x58] sm:$0xff] }
 0x184   : > { %v1864_v0 = vpop.f32.mrf.mxu1  ;;  %v1863_v48 = vadd.f32 %v1862_v11, %v1670_v2  ;;  %3611 = vmatpush2.bf16.msra.mxu1 %v7554_v19  ;;  %v7560_v2 = vld [vmem:[%s8588_s22 + $0x8] ss:$24 sps:$4 sm:$0xff]   ;;  %v1672_v34 = vadd.f32 %v1671_v37, %v8408_v8  ;;  %v7569_v37 = vld [vmem:[%s8588_s22 + $0x3c] ss:$24 sps:$4 sm:$0xff]  }
 0x185   : > { %v1675_v20 = vpop.f32.mrf.mxu0 }
 0x186   : > { %v1868_v4 = vpop.f32.mrf.mxu1  ;;  %v8789_v57 = vpack.c.bf16 %v1863_v48, %v1859_v47  ;;  %v1676_v61 = vadd.f32 %v1675_v20, %v8406_v7 }
 0x187   : > { %v1677_v18 = vpop.f32.mrf.mxu0  ;;  %3613 = vmatmul.mubr.bf16.vlgmr.msra.gmra.mxu1 %v7560_v2  ;;  %v7619_v2 = vld [vmem:[%s8588_s22 + $0x15c] ss:$24 sps:$4 sm:$0xff]  }
 0x188   : > { %11847 = vst [vmem:[#allocation13_spill] sm:$0xff] %v8789_v57  ;;  %v1870_v25 = vpop.f32.mrf.mxu1  ;;  %v1869_v11 = vadd.f32 %v1868_v4, %v1676_v61  ;;  %v1678_v50 = vadd.f32 %v1677_v18, %v8408_v8  ;;  %v1865_v61 = vadd.f32 %v1864_v0, %v1672_v34  ;;  %3622 = vmatprep.mubr.bf16.mxu1 %v7569_v37  ;;  %v11859_v37 = vld [vmem:[#allocation3_spill] sm:$0xff] }
 0x189   : > { %v1679_v29 = vpop.f32.mrf.mxu0  ;;  %v11848_v34 = vpack.c.bf16 %v8613_v51, %v8601_v30  ;;  %v11849_v30 = vpack.c.bf16 %v8582_v10, %v8569_v53  ;;  %v11850_v10 = vpack.c.bf16 %v8557_v38, %v8545_v23  ;;  %v11851_v23 = vpack.c.bf16 %v8533_v6, %v8521_v56  ;;  %v7605_v38 = vld [vmem:[%s8588_s22 + $0xf8] ss:$24 sps:$4 sm:$0xff]  }
 0x18a   : > { %v1872_v26 = vpop.f32.mrf.mxu1  ;;  %v1680_v47 = vadd.f32 %v1679_v29, %v8406_v7  ;;  %v1871_v57 = vadd.f32 %v1870_v25, %v1678_v50  ;;  %v1662_v7 = vadd.f32 %v8761_v39, %v8408_v8  ;;  %v1907_v12 = vpack.c.bf16 %v1865_v61, %v1861_v36  ;;  %v7596_v25 = vld [vmem:[%s8588_s22 + $0xc8] ss:$24 sps:$4 sm:$0xff]   ;;  %v7568_v61 = vld [vmem:[%s11700_s6 + $0x204] ss:$8 sps:$4 sm:$0xff]  }
 0x18b   : > { %v1681_v48 = vpop.f32.mrf.mxu0  ;;  %v1658_v50 = vadd.f32 %v8748_v59, %v8408_v8  ;;  %v1648_v59 = vadd.f32 %v8722_v46, %v8408_v8  ;;  %v1638_v46 = vadd.f32 %v8694_v40, %v8408_v8  ;;  %v11852_v40 = vpack.c.bf16 %v8509_v42, %v8497_v28 }
 0x18c   : > { %v1873_v20 = vadd.f32 %v1872_v26, %v1680_v47  ;;  %v1682_v19 = vadd.f32 %v1681_v48, %v8408_v8  ;;  %v1874_v4 = vpop.f32.mrf.mxu1  ;;  %v1855_v45 = vadd.f32 %v8763_v60, %v1662_v7  ;;  %v7578_v26 = vld [vmem:[%s8588_s22 + $0x6c] ss:$24 sps:$4 sm:$0xff]   ;;  %v7589_v60 = vld [vmem:[%s8588_s22 + $0x98] ss:$24 sps:$4 sm:$0xff]   ;;  %v11854_v56 = vpack.c.bf16 %v8485_v16, %v8473_v3  ;;  %v7523_v3 = vld [vmem:[%s11700_s6 + $0x274] ss:$8 sps:$4 sm:$0xff]  }
 0x18d   : > { %v1851_v29 = vadd.f32 %v8750_v43, %v1658_v50  ;;  %v7587_v43 = vld [vmem:[%s8588_s22 + $0x9c] ss:$24 sps:$4 sm:$0xff]   ;;  %v1841_v39 = vadd.f32 %v8724_v62, %v1648_v59  ;;  %v1831_v0 = vadd.f32 %v8696_v52, %v1638_v46  ;;  %v11853_v52 = vpack.c.bf16 %v8691_v31, %v8679_v63  ;;  %v7617_v47 = vld [vmem:[%s8588_s22 + $0x158] ss:$24 sps:$4 sm:$0xff]   ;;  %v7559_v48 = vld [vmem:[%s11700_s6 + $0x224] ss:$8 sps:$4 sm:$0xff]  }
 0x18e   : > { %v8799_v9 = vpack.c.bf16 %v1873_v20, %v1869_v11  ;;  %v1875_v58 = vadd.f32 %v1874_v4, %v1682_v19  ;;  %v7611_v11 = vld [vmem:[%s8588_s22 + $0x128] ss:$24 sps:$4 sm:$0xff]   ;;  %v11855_v6 = vpack.c.bf16 %v8665_v27, %v8653_v1  ;;  %v11856_v28 = vpack.c.bf16 %v8461_v55, %v8449_v44  ;;  %v7521_v1 = vld [vmem:[%s11700_s6 + $0x270] ss:$8 sps:$4 sm:$0xff]   ;;  %v7529_v44 = vld [vmem:[%s11700_s6 + $0x264] ss:$8 sps:$4 sm:$0xff]  }
 0x18f   : > { %3623 = vmatmul.mubr.bf16.gmra.mxu1 %v7571_v5  ;;  %v1652_v5 = vadd.f32 %v8735_v22, %v8408_v8  ;;  %v1906_v36 = vpack.c.bf16 %v1855_v45, %v1851_v29  ;;  %v1642_v22 = vadd.f32 %v8709_v13, %v8408_v8  ;;  %v7607_v8 = vld [vmem:[%s8588_s22 + $0xfc] ss:$24 sps:$4 sm:$0xff]   ;;  %v11857_v42 = vpack.c.bf16 %v8639_v35, %v8627_v14  ;;  %v7527_v55 = vld [vmem:[%s11700_s6 + $0x260] ss:$8 sps:$4 sm:$0xff]   ;;  %v7551_v31 = vld [vmem:[%s11700_s6 + $0x230] ss:$8 sps:$4 sm:$0xff]  }
 0x190   : > { %v1908_v18 = vpack.c.bf16 %v1875_v58, %v1871_v57  ;;  %v7580_v57 = vld [vmem:[%s8588_s22 + $0x68] ss:$24 sps:$4 sm:$0xff]   ;;  %3632 = vmatprep.mubr.bf16.mxu1 %v7578_v26  ;;  %v11858_v16 = vpack.c.bf16 %v8436_v33, %v8424_v21  ;;  %v7538_v21 = vld [vmem:[%s11700_s6 + $0x254] ss:$8 sps:$4 sm:$0xff]   ;;  %v7536_v33 = vld [vmem:[%s11700_s6 + $0x250] ss:$8 sps:$4 sm:$0xff]  }
 0x191   : > { %v1845_v51 = vadd.f32 %v8737_v24, %v1652_v5  ;;  %v1835_v62 = vadd.f32 %v8711_v17, %v1642_v22  ;;  %v7598_v24 = vld [vmem:[%s8588_s22 + $0xcc] ss:$24 sps:$4 sm:$0xff]   ;;  %v4830_v14 = vld [vmem:[%s11703_s9 + $0x70] sm:$0xff]  ;;  %v7542_v35 = vld [vmem:[%s11700_s6 + $0x240] ss:$8 sps:$4 sm:$0xff]   ;;  %v11720_v63 = vmov 0  }
 0x192   : > { %7138 = vmatprep.subr.bf16.mxu0 %v1908_v18  ;;  %v7613_v17 = vld [vmem:[%s8588_s22 + $0x12c] ss:$24 sps:$4 sm:$0xff]   ;;  %v7553_v27 = vld [vmem:[%s11700_s6 + $0x234] ss:$8 sps:$4 sm:$0xff]   ;;  %7228 = vset.pattern.permute.xlu0 %v11720_v63  ;;  %v7557_v20 = vld [vmem:[%s11700_s6 + $0x220] ss:$8 sps:$4 sm:$0xff]  }
 0x193   : > { %7139 = vmatpush3.bf16.xpose.msra.mxu0 %v11848_v34  ;;  %v1905_v53 = vpack.c.bf16 %v1845_v51, %v1841_v39  ;;  %v1904_v13 = vpack.c.bf16 %v1835_v62, %v1831_v0  ;;  %4920 = vperm.xlu0 %7228, %v4830_v14   ;;  %v7565_v19 = vld [vmem:[%s11700_s6 + $0x214] ss:$8 sps:$4 sm:$0xff]   ;;  %v7563_v4 = vld [vmem:[%s11700_s6 + $0x210] ss:$8 sps:$4 sm:$0xff]   ;;  %v7566_v18 = vld [vmem:[%s11700_s6 + $0x200] ss:$8 sps:$4 sm:$0xff]  }
 0x194   : > { %7140 = vmatprep.subr.bf16.mxu0 %v1907_v12  ;;  %7229 = vset.pattern.permute.xlu1 %v11720_v63  ;;  %v4823_v58 = vld [vmem:[%s11703_s9 + $0x38] sm:$0xff]  ;;  %v7577_v34 = vld [vmem:[%s11700_s6 + $0x2e4] ss:$8 sps:$4 sm:$0xff]   ;;  %v7575_v26 = vld [vmem:[%s11700_s6 + $0x2e0] ss:$8 sps:$4 sm:$0xff]  }
 0x195   : > { %v7574_v7 = vld [vmem:[%s11700_s6 + $0x2f4] ss:$8 sps:$4 sm:$0xff]   ;;  %v7572_v12 = vld [vmem:[%s11700_s6 + $0x2f0] ss:$8 sps:$4 sm:$0xff]   ;;  %v11860_v45 = vld [vmem:[#allocation4_spill] sm:$0xff] }
 0x196   : > { %v4819_v50 = vld [vmem:[%s11703_s9 + $0x18] sm:$0xff]  ;;  %v7584_v59 = vld [vmem:[%s11700_s6 + $0x2c0] ss:$8 sps:$4 sm:$0xff]   ;;  %v7595_v39 = vld [vmem:[%s11700_s6 + $0x2a4] ss:$8 sps:$4 sm:$0xff]  }
 0x197   : > { %3633 = vmatmul.mubr.bf16.gmra.mxu1 %v7580_v57  ;;  %v7583_v29 = vld [vmem:[%s11700_s6 + $0x2d4] ss:$8 sps:$4 sm:$0xff]   ;;  %v7581_v5 = vld [vmem:[%s11700_s6 + $0x2d0] ss:$8 sps:$4 sm:$0xff]   ;;  %v7593_v22 = vld [vmem:[%s11700_s6 + $0x2a0] ss:$8 sps:$4 sm:$0xff]  }
 0x198   : > { %3642 = vmatprep.mubr.bf16.mxu1 %v7587_v43  ;;  %v4846_v57 = vld [vmem:[%s11703_s9 + $0xf0] sm:$0xff]  ;;  %v7604_v46 = vld [vmem:[%s11700_s6 + $0x284] ss:$8 sps:$4 sm:$0xff]  }
 0x199   : > { %v7592_v51 = vld [vmem:[%s11700_s6 + $0x2b4] ss:$8 sps:$4 sm:$0xff]   ;;  %v7590_v43 = vld [vmem:[%s11700_s6 + $0x2b0] ss:$8 sps:$4 sm:$0xff]   ;;  %v11863_v62 = vld [vmem:[#allocation7_spill] sm:$0xff] }
 0x19a   : > { %v11864_v0 = vld [vmem:[#allocation8_spill] sm:$0xff] }
 0x19b   : > { %7141 = vmatpush3.bf16.xpose.msra.mxu0 %v11849_v30  ;;  %v11861_v30 = vld [vmem:[#allocation5_spill] sm:$0xff] }
 0x19c   : > { %7142 = vmatprep.subr.bf16.mxu0 %v1906_v36  ;;  %v7586_v36 = vld [vmem:[%s11700_s6 + $0x2c4] ss:$8 sps:$4 sm:$0xff]  }
 0x19f   : > { %3643 = vmatmul.mubr.bf16.gmra.mxu1 %v7589_v60  ;;  %v11862_v60 = vld [vmem:[#allocation6_spill] sm:$0xff] }
 0x1a0   : > { %3652 = vmatprep.mubr.bf16.mxu1 %v7598_v24  ;;  %v7602_v24 = vld [vmem:[%s11700_s6 + $0x280] ss:$8 sps:$4 sm:$0xff]  }
 0x1a3   : > { %7143 = vmatpush3.bf16.xpose.msra.mxu0 %v11850_v10  ;;  %v7599_v10 = vld [vmem:[%s11700_s6 + $0x290] ss:$8 sps:$4 sm:$0xff]  }
 0x1a4   : > { %7144 = vmatprep.subr.bf16.mxu0 %v1905_v53  ;;  %v7601_v53 = vld [vmem:[%s11700_s6 + $0x294] ss:$8 sps:$4 sm:$0xff]  }
 0x1a7   : > { %3653 = vmatmul.mubr.bf16.gmra.mxu1 %v7596_v25  ;;  %v11865_v25 = vld [vmem:[#allocation9_spill] sm:$0xff] }
 0x1a8   : > { %3662 = vmatprep.mubr.bf16.mxu1 %v7607_v8  ;;  %v11868_v8 = vld [vmem:[#allocation12_spill] sm:$0xff] }
 0x1ab   : > { %7145 = vmatpush3.bf16.xpose.msra.mxu0 %v11851_v23  ;;  %v11867_v23 = vld [vmem:[#allocation11_spill] sm:$0xff] }
 0x1ac   : > { %7146 = vmatprep.subr.bf16.mxu0 %v1904_v13  ;;  %v11866_v13 = vld [vmem:[#allocation10_spill] sm:$0xff] }
 0x1af   : > { %3663 = vmatmul.mubr.bf16.gmra.mxu1 %v7605_v38  ;;  %v11869_v38 = vld [vmem:[#allocation13_spill] sm:$0xff] }
 0x1b0   : > { %3672 = vmatprep.mubr.bf16.mxu1 %v7613_v17  ;;  %v7616_v17 = vld [vmem:[%s8588_s22 + $0x44] ss:$24 sps:$4 sm:$0xff]  }
 0x1b3   : > { %7147 = vmatpush3.bf16.xpose.msra.mxu0 %v11852_v40  ;;  %v7610_v40 = vld [vmem:[%s8588_s22 + $0x14] ss:$24 sps:$4 sm:$0xff]  }
 0x1b4   : > { %7148 = vmatprep.subr.bf16.mxu0 %v11853_v52  ;;  %v7608_v52 = vld [vmem:[%s8588_s22 + $0x10] ss:$24 sps:$4 sm:$0xff]  }
 0x1b7   : > { %3673 = vmatmul.mubr.bf16.gmra.mxu1 %v7611_v11 }
 0x1b8   : > { %3682 = vmatprep.mubr.bf16.mxu1 %v7619_v2  ;;  %v7622_v2 = vld [vmem:[%s8588_s22 + $0x74] ss:$24 sps:$4 sm:$0xff]  }
 0x1bb   : > { %7149 = vmatpush3.bf16.xpose.msra.mxu0 %v11854_v56 }
 0x1bc   : > { %7150 = vmatprep.subr.bf16.mxu0 %v11855_v6  ;;  %v7614_v6 = vld [vmem:[%s8588_s22 + $0x40] ss:$24 sps:$4 sm:$0xff]  }
 0x1bf   : > { %3683 = vmatmul.mubr.bf16.gmra.mxu1 %v7617_v47 }
 0x1c0   : > { %3982 = vmatprep.mubr.bf16.mxu1 %v11720_v63 }
 0x1c3   : > { %7151 = vmatpush3.bf16.xpose.msra.mxu0 %v11856_v28  ;;  %v7620_v28 = vld [vmem:[%s8588_s22 + $0x70] ss:$24 sps:$4 sm:$0xff]  }
 0x1c4   : > { %7152 = vmatprep.subr.bf16.mxu0 %v11857_v42  ;;  %v7625_v42 = vld [vmem:[%s8588_s22 + $0xa4] ss:$24 sps:$4 sm:$0xff]  }
 0x1cb   : > { %7153 = vmatpush3.bf16.xpose.msra.mxu0 %v11858_v16 }
 0x1cc   : > { %3693 = vmatprep.subr.bf16.mxu0 %v7523_v3 }
 0x1d2   : > { %7155 = vmatmul.mubr.bf16.vlgmr.msra.gmra.mxu0 %v8434_v32  ;;  %v7544_v32 = vld [vmem:[%s11700_s6 + $0x244] ss:$8 sps:$4 sm:$0xff]  }
 0x1d3   : > { %7156 = vmatprep.mubr.bf16.mxu0 %v8459_v54  ;;  %3694 = vmatpush1.bf16.msra.mxu0 %v7521_v1  ;;  %v7623_v1 = vld [vmem:[%s8588_s22 + $0xa0] ss:$24 sps:$4 sm:$0xff]  }
 0x1d4   : > { %3695 = vmatprep.subr.bf16.mxu0 %v7529_v44  ;;  %v7628_v44 = vld [vmem:[%s8588_s22 + $0xd4] ss:$24 sps:$4 sm:$0xff]  }
 0x1d7   : > { %3696 = vmatpush1.bf16.msra.mxu0 %v7527_v55 }
 0x1d8   : > { %3697 = vmatprep.subr.bf16.mxu0 %v7538_v21 }
 0x1da   : > { %7157 = vmatmul.mubr.bf16.gmra.mxu0 %v8459_v54  ;;  %v4826_v54 = vld [vmem:[%s11703_s9 + $0x50] sm:$0xff] }
 0x1db   : > { %7158 = vmatprep.mubr.bf16.mxu0 %v8483_v15  ;;  %3698 = vmatpush1.bf16.msra.mxu0 %v7536_v33  ;;  %v7626_v33 = vld [vmem:[%s8588_s22 + $0xd0] ss:$24 sps:$4 sm:$0xff]  }
 0x1dc   : > { %3699 = vmatprep.subr.bf16.mxu0 %v7544_v32  ;;  %4900 = vperm.xlu0 %7228, %v4826_v54   ;;  %v7631_v32 = vld [vmem:[%s8588_s22 + $0x104] ss:$24 sps:$4 sm:$0xff]   ;;  %v7634_v54 = vld [vmem:[%s8588_s22 + $0x134] ss:$24 sps:$4 sm:$0xff]  }
 0x1df   : > { %3700 = vmatpush1.bf16.msra.mxu0 %v7542_v35 }
 0x1e0   : > { %3701 = vmatprep.subr.bf16.mxu0 %v7553_v27  ;;  %4905 = vperm.xlu0 %7228, %v4827_v49   ;;  %v7629_v27 = vld [vmem:[%s8588_s22 + $0x100] ss:$24 sps:$4 sm:$0xff]   ;;  %v7632_v49 = vld [vmem:[%s8588_s22 + $0x130] ss:$24 sps:$4 sm:$0xff]  }
 0x1e2   : > { %7159 = vmatmul.mubr.bf16.gmra.mxu0 %v8483_v15  ;;  %v4822_v15 = vld [vmem:[%s11703_s9 + $0x30] sm:$0xff] }
 0x1e3   : > { %7160 = vmatprep.mubr.bf16.mxu0 %v8507_v41  ;;  %3702 = vmatpush1.bf16.msra.mxu0 %v7551_v31 }
 0x1e4   : > { %3703 = vmatprep.subr.bf16.mxu0 %v7559_v48  ;;  %4880 = vperm.xlu0 %7228, %v4822_v15  }
 0x1e7   : > { %3704 = vmatpush1.bf16.msra.mxu0 %v7557_v20  ;;  %v7637_v20 = vld [vmem:[%s8588_s22 + $0x164] ss:$24 sps:$4 sm:$0xff]  }
 0x1e8   : > { %3705 = vmatprep.subr.bf16.mxu0 %v7565_v19  ;;  %4885 = vperm.xlu0 %7228, %v4823_v58   ;;  %v11877_v58 = vlaneseq }
 0x1ea   : > { %7161 = vmatmul.mubr.bf16.gmra.mxu0 %v8507_v41  ;;  %v4818_v41 = vld [vmem:[%s11703_s9 + $0x10] sm:$0xff] }
 0x1eb   : > { %7162 = vmatprep.mubr.bf16.mxu0 %v11859_v37  ;;  %3706 = vmatpush1.bf16.msra.mxu0 %v7563_v4  ;;  %v7635_v4 = vld [vmem:[%s8588_s22 + $0x160] ss:$24 sps:$4 sm:$0xff]   ;;  %s7136_s22 = sshll.u32 %s12323_s28, 8 }
 0x1ec   : > { %3707 = vmatprep.subr.bf16.mxu0 %v7568_v61  ;;  %4860 = vperm.xlu0 %7228, %v4818_v41   ;;  %s9150_s18 = scalar_lea.vmem %s11697_s3, %s7136_s22 }
 0x1ef   : > { %3708 = vmatpush1.bf16.msra.mxu0 %v7566_v18 }
 0x1f0   : > { %3709 = vmatprep.subr.bf16.mxu0 %v7574_v7  ;;  %4865 = vperm.xlu0 %7228, %v4819_v50  }
 0x1f2   : > { %7163 = vmatmul.mubr.bf16.gmra.mxu0 %v11859_v37  ;;  %v2103_v37 = vand.u32 127, %v11877_v58 }
 0x1f3   : > { %7164 = vmatprep.mubr.bf16.mxu0 %v11860_v45  ;;  %3710 = vmatpush2.bf16.msra.mxu0 %v7572_v12 }
 0x1f4   : > { %3711 = vmatprep.subr.bf16.mxu0 %v7577_v34  ;;  %5000 = vperm.xlu0 %7228, %v4846_v57   ;;  %v9069_v7 = vadd.s32 128, %v2103_v37 }
 0x1f6   : > { %vm2106_vm0 = vcmp.lt.s32.totalorder %v9069_v7, 169 }
 0x1f7   : > { %3712 = vmatpush2.bf16.msra.mxu0 %v7575_v26 }
 0x1f8   : > { %3713 = vmatprep.subr.bf16.mxu0 %v7583_v29 }
 0x1fa   : > { %7165 = vmatmul.mubr.bf16.gmra.mxu0 %v11860_v45 }
 0x1fb   : > { %7166 = vmatprep.mubr.bf16.mxu0 %v11861_v30  ;;  %3714 = vmatpush2.bf16.msra.mxu0 %v7581_v5 }
 0x1fc   : > { %3715 = vmatprep.subr.bf16.mxu0 %v7586_v36 }
 0x1fe   : > { %v9023_v11 = vpop.f32.mrf.mxu1 }
 0x1ff   : > { %3716 = vmatpush2.bf16.msra.mxu0 %v7584_v59 }
 0x200   : > { %3717 = vmatprep.subr.bf16.mxu0 %v7592_v51  ;;  %v9025_v56 = vpop.f32.mrf.mxu1 }
 0x202   : > { %7167 = vmatmul.mubr.bf16.gmra.mxu0 %v11861_v30  ;;  %v9029_v47 = vpop.f32.mrf.mxu1 }
 0x203   : > { %7168 = vmatprep.mubr.bf16.mxu0 %v11862_v60  ;;  %3718 = vmatpush2.bf16.msra.mxu0 %v7590_v43 }
 0x204   : > { %3719 = vmatprep.subr.bf16.mxu0 %v7595_v39 }
 0x207   : > { %3720 = vmatpush2.bf16.msra.mxu0 %v7593_v22 }
 0x208   : > { %3721 = vmatprep.subr.bf16.mxu0 %v7601_v53 }
 0x20a   : > { %7169 = vmatmul.mubr.bf16.gmra.mxu0 %v11862_v60 }
 0x20b   : > { %7170 = vmatprep.mubr.bf16.mxu0 %v11863_v62  ;;  %3722 = vmatpush2.bf16.msra.mxu0 %v7599_v10 }
 0x20c   : > { %3723 = vmatprep.subr.bf16.mxu0 %v7604_v46 }
 0x20f   : > { %3724 = vmatpush2.bf16.msra.mxu0 %v7602_v24 }
 0x212   : > { %7171 = vmatmul.mubr.bf16.gmra.mxu0 %v11863_v62 }
 0x213   : > { %7172 = vmatprep.mubr.bf16.mxu0 %v11864_v0 }
 0x21a   : > { %7173 = vmatmul.mubr.bf16.gmra.mxu0 %v11864_v0 }
 0x21b   : > { %7174 = vmatprep.mubr.bf16.mxu0 %v11865_v25 }
 0x222   : > { %7175 = vmatmul.mubr.bf16.gmra.mxu0 %v11865_v25 }
 0x223   : > { %7176 = vmatprep.mubr.bf16.mxu0 %v11866_v13 }
 0x22a   : > { %7177 = vmatmul.mubr.bf16.gmra.mxu0 %v11866_v13 }
 0x22b   : > { %7178 = vmatprep.mubr.bf16.mxu0 %v11867_v23 }
 0x232   : > { %7179 = vmatmul.mubr.bf16.gmra.mxu0 %v11867_v23 }
 0x233   : > { %7180 = vmatprep.mubr.bf16.mxu0 %v11868_v8 }
 0x23a   : > { %7181 = vmatmul.mubr.bf16.gmra.mxu0 %v11868_v8 }
 0x23b   : > { %7182 = vmatprep.mubr.bf16.mxu0 %v11869_v38 }
 0x242   : > { %7183 = vmatmul.mubr.bf16.gmra.mxu0 %v11869_v38 }
 0x243   : > { %7184 = vmatprep.mubr.bf16.mxu0 %v8799_v9 }
 0x24a   : > { %7185 = vmatmul.mubr.bf16.gmra.mxu0 %v8799_v9  ;;  %v9031_v9 = vpop.f32.mrf.mxu1 }
 0x24b   : > { %3725 = vmatprep.mubr.bf16.mxu0 %v7610_v40  ;;  %11870 = vst [vmem:[#allocation3_spill] sm:$0xff] %v9031_v9 }
 0x24c   : > { %v9035_v3 = vpop.f32.mrf.mxu1 }
 0x24e   : > { %v9037_v16 = vpop.f32.mrf.mxu1 }
 0x250   : > { %v9041_v55 = vpop.f32.mrf.mxu1 }
 0x252   : > { %3726 = vmatmul.mubr.bf16.vlgmr.msra.gmra.mxu0 %v7608_v52  ;;  %v9043_v21 = vpop.f32.mrf.mxu1 }
 0x253   : > { %3735 = vmatprep.mubr.bf16.mxu0 %v7616_v17  ;;  %11871 = vst [vmem:[#allocation4_spill] sm:$0xff] %v9043_v21 }
 0x254   : > { %v9047_v14 = vpop.f32.mrf.mxu1 }
 0x256   : > { %v9049_v35 = vpop.f32.mrf.mxu1 }
 0x257   : > { %11872 = vst [vmem:[#allocation5_spill] sm:$0xff] %v9049_v35 }
 0x258   : > { %v9053_v31 = vpop.f32.mrf.mxu1 }
 0x259   : > { %11873 = vst [vmem:[#allocation6_spill] sm:$0xff] %v9053_v31 }
 0x25a   : > { %3736 = vmatmul.mubr.bf16.gmra.mxu0 %v7614_v6  ;;  %v9055_v48 = vpop.f32.mrf.mxu1 }
 0x25b   : > { %3745 = vmatprep.mubr.bf16.mxu0 %v7622_v2  ;;  %11874 = vst [vmem:[#allocation7_spill] sm:$0xff] %v9055_v48 }
 0x25c   : > { %v9059_v19 = vpop.f32.mrf.mxu1 }
 0x25d   : > { %11875 = vst [vmem:[#allocation8_spill] sm:$0xff] %v9059_v19 }
 0x25e   : > { %v9061_v15 = vpop.f32.mrf.mxu1 }
 0x260   : > { %v9064_v61 = vpop.f32.mrf.mxu1 }
 0x261   : > { %11876 = vst [vmem:[#allocation9_spill] sm:$0xff] %v9064_v61 }
 0x262   : > { %3746 = vmatmul.mubr.bf16.gmra.mxu0 %v7620_v28  ;;  %v9067_v18 = vpop.f32.mrf.mxu1 }
 0x263   : > { %3755 = vmatprep.mubr.bf16.mxu0 %v7625_v42  ;;  %11878 = vst [vmem:[#allocation10_spill] sm:$0xff] %v9067_v18 }
 0x264   : > { %v9071_v41 = vpop.f32.mrf.mxu1 }
 0x265   : > { %11879 = vst [vmem:[#allocation11_spill] sm:$0xff] %v9071_v41 }
 0x266   : > { %v9076_v50 = vpop.f32.mrf.mxu1 }
 0x268   : > { %v9086_v5 = vpop.f32.mrf.mxu1 }
 0x269   : > { %11880 = vst [vmem:[#allocation12_spill] sm:$0xff] %v9086_v5 }
 0x26a   : > { %3756 = vmatmul.mubr.bf16.gmra.mxu0 %v7623_v1  ;;  %v9096_v43 = vpop.f32.mrf.mxu1 }
 0x26b   : > { %3765 = vmatprep.mubr.bf16.mxu0 %v7628_v44  ;;  %11881 = vst [vmem:[#allocation13_spill] sm:$0xff] %v9096_v43 }
 0x26c   : > { %v9106_v10 = vpop.f32.mrf.mxu1 }
 0x26d   : > { %11882 = vst [vmem:[#allocation14_spill] sm:$0xff] %v9106_v10 }
 0x26e   : > { %v9116_v25 = vpop.f32.mrf.mxu1 }
 0x270   : > { %v9126_v40 = vpop.f32.mrf.mxu1 }
 0x271   : > { %11883 = vst [vmem:[#allocation15_spill] sm:$0xff] %v9126_v40 }
 0x272   : > { %3766 = vmatmul.mubr.bf16.gmra.mxu0 %v7626_v33  ;;  %v9136_v28 = vpop.f32.mrf.mxu1 }
 0x273   : > { %3775 = vmatprep.mubr.bf16.mxu0 %v7631_v32 }
 0x274   : > { %v9152_v32 = vpop.f32.mrf.mxu1 }
 0x275   : > { %11884 = vst [vmem:[#allocation16_spill] sm:$0xff] %v9152_v32 }
 0x276   : > { %v9164_v37 = vpop.f32.mrf.mxu1 }
 0x27a   : > { %3776 = vmatmul.mubr.bf16.gmra.mxu0 %v7629_v27  ;;  %v7640_v27 = vld [vmem:[%s9150_s18 + $0x74] ss:$8 sps:$4 sm:$0xff]  }
 0x27b   : > { %3785 = vmatprep.mubr.bf16.mxu0 %v7634_v54  ;;  %4495 = vmatprep.subr.bf16.mxu0 %v7640_v27 }
 0x282   : > { %3786 = vmatmul.mubr.bf16.gmra.mxu0 %v7632_v49  ;;  %v7638_v49 = vld [vmem:[%s9150_s18 + $0x70] ss:$8 sps:$4 sm:$0xff]  }
 0x283   : > { %3795 = vmatprep.mubr.bf16.mxu0 %v7637_v20  ;;  %4496 = vmatpush1.bf16.msra.mxu0 %v7638_v49  ;;  %v7647_v49 = vld [vmem:[%s9150_s18 + $0x40] ss:$8 sps:$4 sm:$0xff]  }
 0x28a   : > { %3796 = vmatmul.mubr.bf16.gmra.mxu0 %v7635_v4 }
 0x292   : > { %v9073_v12 = vpop.f32.mrf.mxu0 }
 0x294   : > { %v1945_v34 = vpop.f32.mrf.mxu0 }
 0x295   : > { %v9080_v45 = vsel %vm2106_vm0, %v1945_v34, -1e+30  ;;  %v7643_v34 = vld [vmem:[%s9150_s18 + $0x64] ss:$8 sps:$4 sm:$0xff]  }
 0x296   : > { %v9082_v26 = vpop.f32.mrf.mxu0  ;;  %v2171_v29 = vmax.f32 %v9073_v12, %v9080_v45  ;;  %4497 = vmatprep.subr.bf16.mxu0 %v7643_v34 }
 0x298   : > { %2172 = vmax.xlane.f32.xlu0 %v2171_v29  ;;  %v1949_v57 = vpop.f32.mrf.mxu0 }
 0x299   : > { %v9090_v36 = vsel %vm2106_vm0, %v1949_v57, -1e+30  ;;  %v7641_v57 = vld [vmem:[%s9150_s18 + $0x60] ss:$8 sps:$4 sm:$0xff]  }
 0x29a   : > { %v9092_v30 = vpop.f32.mrf.mxu0  ;;  %v2174_v59 = vmax.f32 %v9082_v26, %v9090_v36  ;;  %4498 = vmatpush1.bf16.msra.mxu0 %v7641_v57 }
 0x29c   : > { %2175 = vmax.xlane.f32.xlu1 %v2174_v59  ;;  %v1955_v51 = vpop.f32.mrf.mxu0 }
 0x29d   : > { %v9100_v39 = vsel %vm2106_vm0, %v1955_v51, -1e+30 }
 0x29e   : > { %v9102_v60 = vpop.f32.mrf.mxu0  ;;  %v2177_v22 = vmax.f32 %v9092_v30, %v9100_v39 }
 0x2a0   : > { %2178 = vmax.xlane.f32.xlu0 %v2177_v22  ;;  %v1959_v53 = vpop.f32.mrf.mxu0 }
 0x2a1   : > { %v9110_v46 = vsel %vm2106_vm0, %v1959_v53, -1e+30  ;;  %v9176_v53 = vpop.f32.mrf.mxu1 }
 0x2a2   : > { %v9112_v62 = vpop.f32.mrf.mxu0  ;;  %v2180_v24 = vmax.f32 %v9102_v60, %v9110_v46 }
 0x2a4   : > { %2181 = vmax.xlane.f32.xlu1 %v2180_v24  ;;  %v1965_v0 = vpop.f32.mrf.mxu0  ;;  %v7646_v24 = vld [vmem:[%s9150_s18 + $0x54] ss:$8 sps:$4 sm:$0xff]  }
 0x2a5   : > { %v9120_v13 = vsel %vm2106_vm0, %v1965_v0, -1e+30  ;;  %4499 = vmatprep.subr.bf16.mxu0 %v7646_v24  ;;  %v7650_v24 = vld [vmem:[%s9150_s18 + $0x30] ss:$8 sps:$4 sm:$0xff]  }
 0x2a6   : > { %v9122_v23 = vpop.f32.mrf.mxu0  ;;  %v2183_v8 = vmax.f32 %v9112_v62, %v9120_v13 }
 0x2a8   : > { %2184 = vmax.xlane.f32.xlu0 %v2183_v8  ;;  %v1969_v38 = vpop.f32.mrf.mxu0  ;;  %v7644_v8 = vld [vmem:[%s9150_s18 + $0x50] ss:$8 sps:$4 sm:$0xff]  }
 0x2a9   : > { %v9130_v52 = vsel %vm2106_vm0, %v1969_v38, -1e+30  ;;  %4500 = vmatpush1.bf16.msra.mxu0 %v7644_v8 }
 0x2aa   : > { %v9132_v17 = vpop.f32.mrf.mxu0  ;;  %v2186_v6 = vmax.f32 %v9122_v23, %v9130_v52 }
 0x2ac   : > { %2187 = vmax.xlane.f32.xlu1 %v2186_v6  ;;  %v1975_v2 = vpop.f32.mrf.mxu0 }
 0x2ad   : > { %v9140_v42 = vsel %vm2106_vm0, %v1975_v2, -1e+30 }
 0x2ae   : > { %v9142_v1 = vpop.f32.mrf.mxu0  ;;  %v2189_v44 = vmax.f32 %v9132_v17, %v9140_v42 }
 0x2b0   : > { %2190 = vmax.xlane.f32.xlu0 %v2189_v44  ;;  %v1979_v33 = vpop.f32.mrf.mxu0  ;;  %v9188_v44 = vpop.f32.mrf.mxu1 }
 0x2b1   : > { %v9157_v54 = vsel %vm2106_vm0, %v1979_v33, -1e+30  ;;  %v7649_v33 = vld [vmem:[%s9150_s18 + $0x44] ss:$8 sps:$4 sm:$0xff]  }
 0x2b2   : > { %v9160_v20 = vpop.f32.mrf.mxu0  ;;  %v2192_v4 = vmax.f32 %v9142_v1, %v9157_v54  ;;  %4501 = vmatprep.subr.bf16.mxu0 %v7649_v33  ;;  %v9200_v57 = vpop.f32.mrf.mxu1 }
 0x2b3   : > { %4502 = vmatpush1.bf16.msra.mxu0 %v7647_v49  ;;  %v7655_v49 = vld [vmem:[%s9150_s18 + $0x24] ss:$8 sps:$4 sm:$0xff]  }
 0x2b4   : > { %2193 = vmax.xlane.f32.xlu1 %v2192_v4  ;;  %v1985_v58 = vpop.f32.mrf.mxu0  ;;  %v9212_v33 = vpop.f32.mrf.mxu1 }
 0x2b5   : > { %v9169_v29 = vsel %vm2106_vm0, %v1985_v58, -1e+30 }
 0x2b6   : > { %v9172_v59 = vpop.f32.mrf.mxu0  ;;  %v2195_v51 = vmax.f32 %v9160_v20, %v9169_v29 }
 0x2b8   : > { %2196 = vmax.xlane.f32.xlu0 %v2195_v51  ;;  %v1989_v22 = vpop.f32.mrf.mxu0  ;;  %v7652_v51 = vld [vmem:[%s9150_s18 + $0x34] ss:$8 sps:$4 sm:$0xff]  }
 0x2b9   : > { %v9181_v0 = vsel %vm2106_vm0, %v1989_v22, -1e+30  ;;  %4503 = vmatprep.subr.bf16.mxu0 %v7652_v51 }
 0x2ba   : > { %v9184_v38 = vpop.f32.mrf.mxu0  ;;  %v2198_v6 = vmax.f32 %v9172_v59, %v9181_v0  ;;  %4504 = vmatpush1.bf16.msra.mxu0 %v7650_v24  ;;  %v9224_v24 = vpop.f32.mrf.mxu1 }
 0x2bb   : > { %4505 = vmatprep.subr.bf16.mxu0 %v7655_v49 }
 0x2bc   : > { %2199 = vmax.xlane.f32.xlu1 %v2198_v6  ;;  %v1995_v2 = vpop.f32.mrf.mxu0  ;;  %v9236_v49 = vpop.f32.mrf.mxu1 }
 0x2bd   : > { %v9193_v27 = vsel %vm2106_vm0, %v1995_v2, -1e+30 }
 0x2be   : > { %v9196_v4 = vpop.f32.mrf.mxu0  ;;  %v2201_v58 = vmax.f32 %v9184_v38, %v9193_v27 }
 0x2c0   : > { %2202 = vmax.xlane.f32.xlu0 %v2201_v58  ;;  %v1999_v34 = vpop.f32.mrf.mxu0 }
 0x2c1   : > { %v9205_v22 = vsel %vm2106_vm0, %v1999_v34, -1e+30  ;;  %v7653_v34 = vld [vmem:[%s9150_s18 + $0x20] ss:$8 sps:$4 sm:$0xff]  }
 0x2c2   : > { %v9208_v8 = vpop.f32.mrf.mxu0  ;;  %v2204_v6 = vmax.f32 %v9196_v4, %v9205_v22  ;;  %4506 = vmatpush1.bf16.msra.mxu0 %v7653_v34  ;;  %v7661_v34 = vld [vmem:[%s9150_s18 + $0x4] ss:$8 sps:$4 sm:$0xff]  }
 0x2c4   : > { %2205 = vmax.xlane.f32.xlu1 %v2204_v6  ;;  %v2005_v2 = vpop.f32.mrf.mxu0  ;;  %v7658_v6 = vld [vmem:[%s9150_s18 + $0x14] ss:$8 sps:$4 sm:$0xff]  }
 0x2c5   : > { %v9217_v58 = vsel %vm2106_vm0, %v2005_v2, -1e+30  ;;  %v7656_v2 = vld [vmem:[%s9150_s18 + $0x10] ss:$8 sps:$4 sm:$0xff]   ;;  %4507 = vmatprep.subr.bf16.mxu0 %v7658_v6  ;;  %v9248_v6 = vpop.f32.mrf.mxu1 }
 0x2c6   : > { %11885 = vst [vmem:[#allocation17_spill] sm:$0xff] %v9217_v58  ;;  %v9220_v63 = vpop.f32.mrf.mxu0  ;;  %v2207_v9 = vmax.f32 %v9208_v8, %v9217_v58  ;;  %4508 = vmatpush1.bf16.msra.mxu0 %v7656_v2  ;;  %v7664_v2 = vld [vmem:[%s9150_s18 + $0xf4] ss:$8 sps:$4 sm:$0xff]  }
 0x2c7   : > { %11886 = vst [vmem:[#allocation18_spill] sm:$0xff] %v9220_v63  ;;  %4509 = vmatprep.subr.bf16.mxu0 %v7661_v34  ;;  %v9260_v34 = vpop.f32.mrf.mxu1 }
 0x2c8   : > { %2208 = vmax.xlane.f32.xlu1 %v2207_v9  ;;  %v2009_v51 = vpop.f32.mrf.mxu0 }
 0x2c9   : > { %v9229_v21 = vsel %vm2106_vm0, %v2009_v51, -1e+30  ;;  %v7659_v51 = vld [vmem:[%s9150_s18] ss:$8 sps:$4 sm:$0xff]  }
 0x2ca   : > { %11887 = vst [vmem:[#allocation19_spill] sm:$0xff] %v9229_v21  ;;  %v9232_v31 = vpop.f32.mrf.mxu0  ;;  %v2210_v35 = vmax.f32 %v9220_v63, %v9229_v21  ;;  %4510 = vmatpush1.bf16.msra.mxu0 %v7659_v51  ;;  %v7667_v51 = vld [vmem:[%s9150_s18 + $0xe4] ss:$8 sps:$4 sm:$0xff]  }
 0x2cb   : > { %11888 = vst [vmem:[#allocation20_spill] sm:$0xff] %v9232_v31  ;;  %4511 = vmatprep.subr.bf16.mxu0 %v7664_v2  ;;  %v9272_v2 = vpop.f32.mrf.mxu1 }
 0x2cc   : > { %2211 = vmax.xlane.f32.xlu1 %v2210_v35  ;;  %v2015_v9 = vpop.f32.mrf.mxu0 }
 0x2cd   : > { %v9241_v19 = vsel %vm2106_vm0, %v2015_v9, -1e+30  ;;  %v7662_v9 = vld [vmem:[%s9150_s18 + $0xf0] ss:$8 sps:$4 sm:$0xff]  }
 0x2ce   : > { %11889 = vst [vmem:[#allocation21_spill] sm:$0xff] %v9241_v19  ;;  %v9244_v48 = vpop.f32.mrf.mxu0  ;;  %v2213_v61 = vmax.f32 %v9232_v31, %v9241_v19  ;;  %4512 = vmatpush2.bf16.msra.mxu0 %v7662_v9  ;;  %v7670_v9 = vld [vmem:[%s9150_s18 + $0xd4] ss:$8 sps:$4 sm:$0xff]  }
 0x2cf   : > { %11890 = vst [vmem:[#allocation22_spill] sm:$0xff] %v9244_v48  ;;  %4513 = vmatprep.subr.bf16.mxu0 %v7667_v51  ;;  %v9284_v51 = vpop.f32.mrf.mxu1 }
 0x2d0   : > { %2214 = vmax.xlane.f32.xlu0 %v2213_v61  ;;  %v2019_v35 = vpop.f32.mrf.mxu0  ;;  %11897 = vst [vmem:[#allocation29_spill] sm:$0xff] %v9284_v51 }
 0x2d1   : > { %v9253_v41 = vsel %vm2106_vm0, %v2019_v35, -1e+30  ;;  %v7665_v35 = vld [vmem:[%s9150_s18 + $0xe0] ss:$8 sps:$4 sm:$0xff]  }
 0x2d2   : > { %11891 = vst [vmem:[#allocation23_spill] sm:$0xff] %v9253_v41  ;;  %v9256_v18 = vpop.f32.mrf.mxu0  ;;  %v2216_v5 = vmax.f32 %v9244_v48, %v9253_v41  ;;  %4514 = vmatpush2.bf16.msra.mxu0 %v7665_v35  ;;  %v7673_v35 = vld [vmem:[%s9150_s18 + $0xc4] ss:$8 sps:$4 sm:$0xff]  }
 0x2d3   : > { %11892 = vst [vmem:[#allocation24_spill] sm:$0xff] %v9256_v18  ;;  %4515 = vmatprep.subr.bf16.mxu0 %v7670_v9  ;;  %v9296_v9 = vpop.f32.mrf.mxu1 }
 0x2d4   : > { %2217 = vmax.xlane.f32.xlu0 %v2216_v5  ;;  %v2025_v61 = vpop.f32.mrf.mxu0 }
 0x2d5   : > { %v9265_v19 = vsel %vm2106_vm0, %v2025_v61, -1e+30  ;;  %v7668_v61 = vld [vmem:[%s9150_s18 + $0xd0] ss:$8 sps:$4 sm:$0xff]  }
 0x2d6   : > { %11893 = vst [vmem:[#allocation25_spill] sm:$0xff] %v9265_v19  ;;  %v9268_v31 = vpop.f32.mrf.mxu0  ;;  %v2219_v10 = vmax.f32 %v9256_v18, %v9265_v19  ;;  %4516 = vmatpush2.bf16.msra.mxu0 %v7668_v61  ;;  %v7676_v61 = vld [vmem:[%s9150_s18 + $0xb4] ss:$8 sps:$4 sm:$0xff]  }
 0x2d7   : > { %11894 = vst [vmem:[#allocation26_spill] sm:$0xff] %v9268_v31  ;;  %4517 = vmatprep.subr.bf16.mxu0 %v7673_v35  ;;  %v9308_v35 = vpop.f32.mrf.mxu1 }
 0x2d8   : > { %2220 = vmax.xlane.f32.xlu0 %v2219_v10  ;;  %v2029_v5 = vpop.f32.mrf.mxu0 }
 0x2d9   : > { %v9277_v41 = vsel %vm2106_vm0, %v2029_v5, -1e+30  ;;  %v7671_v5 = vld [vmem:[%s9150_s18 + $0xc0] ss:$8 sps:$4 sm:$0xff]  }
 0x2da   : > { %11895 = vst [vmem:[#allocation27_spill] sm:$0xff] %v9277_v41  ;;  %v9280_v48 = vpop.f32.mrf.mxu0  ;;  %v2222_v43 = vmax.f32 %v9268_v31, %v9277_v41  ;;  %4518 = vmatpush2.bf16.msra.mxu0 %v7671_v5  ;;  %v7679_v5 = vld [vmem:[%s9150_s18 + $0xa4] ss:$8 sps:$4 sm:$0xff]  }
 0x2db   : > { %11896 = vst [vmem:[#allocation28_spill] sm:$0xff] %v9280_v48  ;;  %4519 = vmatprep.subr.bf16.mxu0 %v7676_v61  ;;  %v9320_v61 = vpop.f32.mrf.mxu1 }
 0x2dc   : > { %2223 = vmax.xlane.f32.xlu1 %v2222_v43  ;;  %v2035_v10 = vpop.f32.mrf.mxu0 }
 0x2dd   : > { %v9289_v19 = vsel %vm2106_vm0, %v2035_v10, -1e+30  ;;  %v7674_v10 = vld [vmem:[%s9150_s18 + $0xb0] ss:$8 sps:$4 sm:$0xff]  }
 0x2de   : > { %11898 = vst [vmem:[#allocation30_spill] sm:$0xff] %v9289_v19  ;;  %v9292_v18 = vpop.f32.mrf.mxu0  ;;  %v2225_v21 = vmax.f32 %v9280_v48, %v9289_v19  ;;  %4520 = vmatpush2.bf16.msra.mxu0 %v7674_v10  ;;  %v7682_v10 = vld [vmem:[%s9150_s18 + $0x94] ss:$8 sps:$4 sm:$0xff]  }
 0x2df   : > { %11899 = vst [vmem:[#allocation31_spill] sm:$0xff] %v9292_v18  ;;  %4521 = vmatprep.subr.bf16.mxu0 %v7679_v5 }
 0x2e0   : > { %2226 = vmax.xlane.f32.xlu0 %v2225_v21  ;;  %v2039_v43 = vpop.f32.mrf.mxu0 }
 0x2e1   : > { %v9301_v41 = vsel %vm2106_vm0, %v2039_v43, -1e+30  ;;  %v7677_v43 = vld [vmem:[%s9150_s18 + $0xa0] ss:$8 sps:$4 sm:$0xff]  }
 0x2e2   : > { %11900 = vst [vmem:[#allocation32_spill] sm:$0xff] %v9301_v41  ;;  %v9304_v31 = vpop.f32.mrf.mxu0  ;;  %v2228_v51 = vmax.f32 %v9292_v18, %v9301_v41  ;;  %4522 = vmatpush2.bf16.msra.mxu0 %v7677_v43  ;;  %v9332_v43 = vpop.f32.mrf.mxu1 }
 0x2e3   : > { %11901 = vst [vmem:[#allocation33_spill] sm:$0xff] %v9304_v31  ;;  %4523 = vmatprep.subr.bf16.mxu0 %v7682_v10  ;;  %11906 = vst [vmem:[#allocation38_spill] sm:$0xff] %v9332_v43 }
 0x2e4   : > { %2229 = vmax.xlane.f32.xlu1 %v2228_v51  ;;  %v2045_v21 = vpop.f32.mrf.mxu0 }
 0x2e5   : > { %v9313_v19 = vsel %vm2106_vm0, %v2045_v21, -1e+30  ;;  %v7680_v21 = vld [vmem:[%s9150_s18 + $0x90] ss:$8 sps:$4 sm:$0xff]  }
 0x2e6   : > { %11902 = vst [vmem:[#allocation34_spill] sm:$0xff] %v9313_v19  ;;  %v9316_v48 = vpop.f32.mrf.mxu0  ;;  %v2231_v63 = vmax.f32 %v9304_v31, %v9313_v19  ;;  %4524 = vmatpush2.bf16.msra.mxu0 %v7680_v21  ;;  %v7683_v31 = vld [vmem:[%s9150_s18 + $0x80] ss:$8 sps:$4 sm:$0xff]   ;;  %v9347_v21 = vpop.f32.mrf.mxu1 }
 0x2e7   : > { %11903 = vst [vmem:[#allocation35_spill] sm:$0xff] %v9316_v48 }
 0x2e8   : > { %2232 = vmax.xlane.f32.xlu0 %v2231_v63  ;;  %v2049_v51 = vpop.f32.mrf.mxu0  ;;  %v7685_v63 = vld [vmem:[%s9150_s18 + $0x84] ss:$8 sps:$4 sm:$0xff]  }
 0x2e9   : > { %v9325_v41 = vsel %vm2106_vm0, %v2049_v51, -1e+30  ;;  %4525 = vmatprep.subr.bf16.mxu0 %v7685_v63 }
 0x2ea   : > { %11904 = vst [vmem:[#allocation36_spill] sm:$0xff] %v9325_v41  ;;  %v9328_v18 = vpop.f32.mrf.mxu0  ;;  %v2234_v40 = vmax.f32 %v9316_v48, %v9325_v41  ;;  %4526 = vmatpush2.bf16.msra.mxu0 %v7683_v31  ;;  %v9356_v48 = vpop.permute.xlu0 %4920 }
 0x2eb   : > { %11905 = vst [vmem:[#allocation37_spill] sm:$0xff] %v9328_v18  ;;  %11910 = vst [vmem:[#allocation42_spill] sm:$0xff] %v9356_v48  ;;  %v7693_v48 = vld [vmem:[%s11702_s8 + $0x14] ss:$8 sps:$4 sm:$0xff]  }
 0x2ec   : > { %2235 = vmax.xlane.f32.xlu1 %v2234_v40  ;;  %v2055_v5 = vpop.f32.mrf.mxu0  ;;  %v7689_v40 = vld [vmem:[%s11702_s8 + $0x4] ss:$8 sps:$4 sm:$0xff]  }
 0x2ed   : > { %v9337_v19 = vsel %vm2106_vm0, %v2055_v5, -1e+30  ;;  %v7687_v5 = vld [vmem:[%s11702_s8] ss:$8 sps:$4 sm:$0xff]   ;;  %4527 = vmatprep.mubr.bf16.mxu0 %v7689_v40 }
 0x2ee   : > { %11907 = vst [vmem:[#allocation39_spill] sm:$0xff] %v9337_v19  ;;  %v9340_v51 = vpop.f32.mrf.mxu0  ;;  %v2237_v32 = vmax.f32 %v9328_v18, %v9337_v19  ;;  %4528 = vmatmul.mubr.bf16.vlgmr.msra.gmra.mxu0 %v7687_v5  ;;  %v9362_v19 = vpop.f32.mrf.mxu1 }
 0x2ef   : > { %11908 = vst [vmem:[#allocation40_spill] sm:$0xff] %v9340_v51  ;;  %11912 = vst [vmem:[#allocation44_spill] sm:$0xff] %v9362_v19  ;;  %v9372_v40 = vpop.permute.xlu0 %4900  ;;  %4537 = vmatprep.mubr.bf16.mxu0 %v7693_v48 }
 0x2f0   : > { %2238 = vmax.xlane.f32.xlu0 %v2237_v32  ;;  %v2059_v10 = vpop.f32.mrf.mxu0  ;;  %11915 = vst [vmem:[#allocation47_spill] sm:$0xff] %v9372_v40 }
 0x2f1   : > { %v9354_v41 = vsel %vm2106_vm0, %v2059_v10, -1e+30 }
 0x2f2   : > { %11909 = vst [vmem:[#allocation41_spill] sm:$0xff] %v9354_v41  ;;  %v9358_v31 = vpop.f32.mrf.mxu0  ;;  %v2240_v63 = vmax.f32 %v9340_v51, %v9354_v41 }
 0x2f3   : > { %11911 = vst [vmem:[#allocation43_spill] sm:$0xff] %v9358_v31 }
 0x2f4   : > { %2241 = vmax.xlane.f32.xlu1 %v2240_v63  ;;  %v2065_v32 = vpop.f32.mrf.mxu0  ;;  %v9377_v63 = vpop.f32.mrf.mxu1 }
 0x2f5   : > { %v9366_v18 = vsel %vm2106_vm0, %v2065_v32, -1e+30  ;;  %11916 = vst [vmem:[#allocation48_spill] sm:$0xff] %v9377_v63  ;;  %v7691_v32 = vld [vmem:[%s11702_s8 + $0x10] ss:$8 sps:$4 sm:$0xff]   ;;  %v9396_v63 = vpop.permute.xlu0 %4905 }
 0x2f6   : > { %11913 = vst [vmem:[#allocation45_spill] sm:$0xff] %v9366_v18  ;;  %v9368_v43 = vpop.f32.mrf.mxu0  ;;  %v2243_v10 = vmax.f32 %v9358_v31, %v9366_v18  ;;  %4538 = vmatmul.mubr.bf16.gmra.mxu0 %v7691_v32  ;;  %v9390_v31 = vpop.f32.mrf.mxu1  ;;  %11921 = vst [vmem:[#allocation53_spill] sm:$0xff] %v9396_v63 }
 0x2f7   : > { %11914 = vst [vmem:[#allocation46_spill] sm:$0xff] %v9368_v43  ;;  %11919 = vst [vmem:[#allocation51_spill] sm:$0xff] %v9390_v31 }
 0x2f8   : > { %2244 = vmax.xlane.f32.xlu0 %v2243_v10  ;;  %v2069_v5 = vpop.f32.mrf.mxu0  ;;  %v9405_v32 = vpop.f32.mrf.mxu1 }
 0x2f9   : > { %v9384_v41 = vsel %vm2106_vm0, %v2069_v5, -1e+30  ;;  %v7697_v5 = vld [vmem:[%s11702_s8 + $0x24] ss:$8 sps:$4 sm:$0xff]   ;;  %11923 = vst [vmem:[#allocation55_spill] sm:$0xff] %v9405_v32 }
 0x2fa   : > { %11917 = vst [vmem:[#allocation49_spill] sm:$0xff] %v9384_v41  ;;  %v9386_v18 = vpop.f32.mrf.mxu0  ;;  %v2246_v40 = vmax.f32 %v9368_v43, %v9384_v41  ;;  %4547 = vmatprep.mubr.bf16.mxu0 %v7697_v5 }
 0x2fb   : > { %11918 = vst [vmem:[#allocation50_spill] sm:$0xff] %v9386_v18 }
 0x2fc   : > { %2247 = vmax.xlane.f32.xlu1 %v2246_v40  ;;  %v2075_v10 = vpop.f32.mrf.mxu0 }
 0x2fd   : > { %v9394_v51 = vsel %vm2106_vm0, %v2075_v10, -1e+30  ;;  %v7695_v10 = vld [vmem:[%s11702_s8 + $0x20] ss:$8 sps:$4 sm:$0xff]  }
 0x2fe   : > { %11920 = vst [vmem:[#allocation52_spill] sm:$0xff] %v9394_v51  ;;  %v9398_v19 = vpop.f32.mrf.mxu0  ;;  %v2249_v48 = vmax.f32 %v9386_v18, %v9394_v51  ;;  %4548 = vmatmul.mubr.bf16.gmra.mxu0 %v7695_v10  ;;  %v9418_v18 = vpop.permute.xlu0 %4880 }
 0x2ff   : > { %11922 = vst [vmem:[#allocation54_spill] sm:$0xff] %v9398_v19  ;;  %11926 = vst [vmem:[#allocation58_spill] sm:$0xff] %v9418_v18 }
 0x300   : > { %2250 = vmax.xlane.f32.xlu0 %v2249_v48  ;;  %v2079_v40 = vpop.f32.mrf.mxu0  ;;  %v9420_v48 = vpop.f32.mrf.mxu1 }
 0x301   : > { %v9412_v63 = vsel %vm2106_vm0, %v2079_v40, -1e+30  ;;  %v7701_v40 = vld [vmem:[%s11702_s8 + $0x34] ss:$8 sps:$4 sm:$0xff]  }
 0x302   : > { %11924 = vst [vmem:[#allocation56_spill] sm:$0xff] %v9412_v63  ;;  %v9414_v41 = vpop.f32.mrf.mxu0  ;;  %v2252_v51 = vmax.f32 %v9398_v19, %v9412_v63  ;;  %v9433_v10 = vpop.f32.mrf.mxu1  ;;  %4557 = vmatprep.mubr.bf16.mxu0 %v7701_v40 }
 0x303   : > { %11925 = vst [vmem:[#allocation57_spill] sm:$0xff] %v9414_v41  ;;  %11929 = vst [vmem:[#allocation61_spill] sm:$0xff] %v9433_v10  ;;  %v9442_v63 = vpop.permute.xlu0 %4885 }
 0x304   : > { %2253 = vmax.xlane.f32.xlu1 %v2252_v51  ;;  %v2085_v43 = vpop.f32.mrf.mxu0  ;;  %v7699_v51 = vld [vmem:[%s11702_s8 + $0x30] ss:$8 sps:$4 sm:$0xff]   ;;  %11931 = vst [vmem:[#allocation63_spill] sm:$0xff] %v9442_v63  ;;  %v9448_v19 = vpop.f32.mrf.mxu1  ;;  %v7705_v63 = vld [vmem:[%s11702_s8 + $0x44] ss:$8 sps:$4 sm:$0xff]  }
 0x305   : > { %v9424_v32 = vsel %vm2106_vm0, %v2085_v43, -1e+30  ;;  %11933 = vst [vmem:[#allocation65_spill] sm:$0xff] %v9448_v19 }
 0x306   : > { %11927 = vst [vmem:[#allocation59_spill] sm:$0xff] %v9424_v32  ;;  %v9426_v31 = vpop.f32.mrf.mxu0  ;;  %v2255_v5 = vmax.f32 %v9414_v41, %v9424_v32  ;;  %4558 = vmatmul.mubr.bf16.gmra.mxu0 %v7699_v51  ;;  %v9463_v51 = vpop.f32.mrf.mxu1 }
 0x307   : > { %11928 = vst [vmem:[#allocation60_spill] sm:$0xff] %v9426_v31  ;;  %v9458_v40 = vpop.permute.xlu0 %4860  ;;  %11937 = vst [vmem:[#allocation69_spill] sm:$0xff] %v9463_v51  ;;  %4567 = vmatprep.mubr.bf16.mxu0 %v7705_v63 }
 0x308   : > { %2256 = vmax.xlane.f32.xlu0 %v2255_v5  ;;  %v2089_v18 = vpop.f32.mrf.mxu0  ;;  %11936 = vst [vmem:[#allocation68_spill] sm:$0xff] %v9458_v40  ;;  %v9480_v51 = vpop.f32.mrf.mxu1 }
 0x309   : > { %v9440_v43 = vsel %vm2106_vm0, %v2089_v18, -1e+30 }
 0x30a   : > { %11930 = vst [vmem:[#allocation62_spill] sm:$0xff] %v9440_v43  ;;  %v9444_v32 = vpop.f32.mrf.mxu0  ;;  %v2258_v41 = vmax.f32 %v9426_v31, %v9440_v43  ;;  %v3615_v43 = vadd.f32 %v9248_v6, %v9023_v11  ;;  %v3619_v11 = vadd.f32 %v9272_v2, %v9029_v47  ;;  %v3625_v47 = vadd.f32 %v9296_v9, %v9035_v3 }
 0x30b   : > { %11932 = vst [vmem:[#allocation64_spill] sm:$0xff] %v9444_v32  ;;  %v9486_v6 = vpop.permute.xlu0 %4865 }
 0x30c   : > { %2259 = vmax.xlane.f32.xlu1 %v2258_v41  ;;  %v2095_v5 = vpop.f32.mrf.mxu0  ;;  %11941 = vst [vmem:[#allocation73_spill] sm:$0xff] %v9486_v6  ;;  %v3629_v6 = vadd.f32 %v9320_v61, %v9041_v55  ;;  %v3635_v55 = vadd.f32 %v9347_v21, %v9047_v14 }
 0x30d   : > { %v9452_v10 = vsel %vm2106_vm0, %v2095_v5, -1e+30  ;;  %v7703_v5 = vld [vmem:[%s11702_s8 + $0x40] ss:$8 sps:$4 sm:$0xff]  }
 0x30e   : > { %11934 = vst [vmem:[#allocation66_spill] sm:$0xff] %v9452_v10  ;;  %v9454_v58 = vpop.f32.mrf.mxu0  ;;  %v2261_v18 = vmax.f32 %v9444_v32, %v9452_v10  ;;  %4568 = vmatmul.mubr.bf16.gmra.mxu0 %v7703_v5 }
 0x30f   : > { %11935 = vst [vmem:[#allocation67_spill] sm:$0xff] %v9454_v58 }
 0x310   : > { %2262 = vmax.xlane.f32.xlu0 %v2261_v18  ;;  %v2099_v41 = vpop.f32.mrf.mxu0  ;;  %v3617_v18 = vadd.f32 %v9260_v34, %v9025_v56  ;;  %v7709_v56 = vld [vmem:[%s11702_s8 + $0x54] ss:$8 sps:$4 sm:$0xff]   ;;  %v9493_v34 = vpop.f32.mrf.mxu1 }
 0x311   : > { %v9472_v10 = vsel %vm2106_vm0, %v2099_v41, -1e+30  ;;  %4577 = vmatprep.mubr.bf16.mxu0 %v7709_v56  ;;  %v7713_v56 = vld [vmem:[%s11702_s8 + $0x64] ss:$8 sps:$4 sm:$0xff]  }
 0x312   : > { %11938 = vst [vmem:[#allocation70_spill] sm:$0xff] %v9472_v10  ;;  %v3727_v40 = vpop.f32.mrf.mxu0  ;;  %v2264_v32 = vmax.f32 %v9454_v58, %v9472_v10 }
 0x313   : > { %v9478_v31 = vadd.f32 %v3727_v40, %v3615_v43  ;;  %v3627_v40 = vadd.f32 %v9308_v35, %v9037_v16 }
 0x314   : > { %v3729_v19 = vpop.f32.mrf.mxu0  ;;  %2265 = vmax.xlane.f32.xlu1 %v2264_v32  ;;  %v7707_v32 = vld [vmem:[%s11702_s8 + $0x50] ss:$8 sps:$4 sm:$0xff]  }
 0x315   : > { %11939 = vst [vmem:[#allocation71_spill] sm:$0xff] %v9478_v31  ;;  %v9484_v7 = vadd.f32 %v3729_v19, %v3617_v18  ;;  %v9508_v18 = vpop.permute.xlu0 %5000 }
 0x316   : > { %v3731_v63 = vpop.f32.mrf.mxu0  ;;  %4578 = vmatmul.mubr.bf16.gmra.mxu0 %v7707_v32  ;;  %11945 = vst [vmem:[#allocation77_spill] sm:$0xff] %v9508_v18  ;;  %v7711_v32 = vld [vmem:[%s11702_s8 + $0x60] ss:$8 sps:$4 sm:$0xff]  }
 0x317   : > { %11940 = vst [vmem:[#allocation72_spill] sm:$0xff] %v9484_v7  ;;  %v9488_v41 = vadd.f32 %v3731_v63, %v3619_v11  ;;  %v9510_v11 = vpop.f32.mrf.mxu1  ;;  %4587 = vmatprep.mubr.bf16.mxu0 %v7713_v56 }
 0x318   : > { %v9495_v43 = vpop.f32.mrf.mxu0 }
 0x319   : > { %11942 = vst [vmem:[#allocation74_spill] sm:$0xff] %v9488_v41  ;;  %11943 = vst [vmem:[#allocation75_spill] sm:$0xff] %v9495_v43  ;;  %v9521_v16 = vpop.f32.mrf.mxu1 }
 0x31a   : > { %v3737_v2 = vpop.f32.mrf.mxu0 }
 0x31b   : > { %v9506_v5 = vadd.f32 %v3737_v2, %v3625_v47 }
 0x31c   : > { %v3739_v63 = vpop.f32.mrf.mxu0 }
 0x31d   : > { %11944 = vst [vmem:[#allocation76_spill] sm:$0xff] %v9506_v5  ;;  %v9514_v3 = vadd.f32 %v3739_v63, %v3627_v40 }
 0x31e   : > { %v3741_v9 = vpop.f32.mrf.mxu0  ;;  %4588 = vmatmul.mubr.bf16.gmra.mxu0 %v7711_v32 }
 0x31f   : > { %11946 = vst [vmem:[#allocation78_spill] sm:$0xff] %v9514_v3  ;;  %v9516_v19 = vadd.f32 %v3741_v9, %v3629_v6  ;;  %v9536_v9 = vpop.f32.mrf.mxu1 }
 0x320   : > { %v9523_v35 = vpop.f32.mrf.mxu0 }
 0x321   : > { %11947 = vst [vmem:[#allocation79_spill] sm:$0xff] %v9516_v19  ;;  %11948 = vst [vmem:[#allocation80_spill] sm:$0xff] %v9523_v35  ;;  %v2173_v6 = vpop.xlane.xlu0 %2172 }
 0x322   : > { %v2267_v47 = vsub.f32 %v9073_v12, %v2173_v6  ;;  %v2268_v2 = vsub.f32 %v9080_v45, %v2173_v6  ;;  %v3747_v40 = vpop.f32.mrf.mxu0  ;;  %v7717_v12 = vld [vmem:[%s11702_s8 + $0x74] ss:$8 sps:$4 sm:$0xff]   ;;  %v9547_v45 = vpop.f32.mrf.mxu1 }
 0x323   : > { %v9534_v63 = vadd.f32 %v3747_v40, %v3635_v55  ;;  %4597 = vmatprep.mubr.bf16.mxu0 %v7717_v12 }
 0x324   : > { %v2331_v18 = vmul.f32 1.442695, %v2267_v47  ;;  %v2333_v10 = vmul.f32 1.442695, %v2268_v2  ;;  %v9538_v58 = vpop.f32.mrf.mxu0  ;;  %v9558_v2 = vpop.f32.mrf.mxu1 }
 0x325   : > { %11949 = vst [vmem:[#allocation81_spill] sm:$0xff] %v9534_v63  ;;  %v2176_v14 = vpop.xlane.xlu1 %2175 }
 0x326   : > { %7846 = vpow2.f32 %v2331_v18  ;;  %v2269_v21 = vsub.f32 %v9082_v26, %v2176_v14  ;;  %v2270_v56 = vsub.f32 %v9090_v36, %v2176_v14  ;;  %v9542_v61 = vpop.f32.mrf.mxu0  ;;  %v7715_v18 = vld [vmem:[%s11702_s8 + $0x70] ss:$8 sps:$4 sm:$0xff]  }
 0x327   : > { %11950 = vst [vmem:[#allocation82_spill] sm:$0xff] %v9542_v61  ;;  %7848 = vpow2.f32 %v2333_v10  ;;  %4598 = vmatmul.mubr.bf16.gmra.mxu0 %v7715_v18 }
 0x328   : > { %v2335_v32 = vmul.f32 1.442695, %v2269_v21  ;;  %v2337_v55 = vmul.f32 1.442695, %v2270_v56  ;;  %v9549_v6 = vpop.f32.mrf.mxu0 }
 0x329   : > { %v2179_v26 = vpop.xlane.xlu0 %2178 }
 0x32a   : > { %7850 = vpow2.f32 %v2335_v32  ;;  %v2271_v36 = vsub.f32 %v9092_v30, %v2179_v26  ;;  %v2272_v10 = vsub.f32 %v9100_v39, %v2179_v26  ;;  %v9556_v47 = vpop.f32.mrf.mxu0  ;;  %v7721_v30 = vld [vmem:[%s11702_s8 + $0x84] ss:$8 sps:$4 sm:$0xff]   ;;  %v9569_v39 = vpop.f32.mrf.mxu1 }
 0x32b   : > { %7852 = vpow2.f32 %v2337_v55  ;;  %4607 = vmatprep.mubr.bf16.mxu0 %v7721_v30 }
 0x32c   : > { %v2339_v40 = vmul.f32 1.442695, %v2271_v36  ;;  %v2341_v14 = vmul.f32 1.442695, %v2272_v10  ;;  %v9560_v21 = vpop.f32.mrf.mxu0  ;;  %v7719_v36 = vld [vmem:[%s11702_s8 + $0x80] ss:$8 sps:$4 sm:$0xff]  }
 0x32d   : > { %v2182_v56 = vpop.xlane.xlu1 %2181 }
 0x32e   : > { %7854 = vpow2.f32 %v2339_v40  ;;  %v2273_v31 = vsub.f32 %v9102_v60, %v2182_v56  ;;  %v2274_v12 = vsub.f32 %v9110_v46, %v2182_v56  ;;  %v9564_v32 = vpop.f32.mrf.mxu0  ;;  %v9584_v56 = vpop.f32.mrf.mxu1 }
 0x32f   : > { %7856 = vpow2.f32 %v2341_v14  ;;  %4608 = vmatmul.mubr.bf16.gmra.mxu0 %v7719_v36 }
 0x330   : > { %v2343_v55 = vmul.f32 1.442695, %v2273_v31  ;;  %v2345_v18 = vmul.f32 1.442695, %v2274_v12  ;;  %v9571_v26 = vpop.f32.mrf.mxu0 }
 0x331   : > { %v2185_v60 = vpop.xlane.xlu0 %2184 }
 0x332   : > { %7858 = vpow2.f32 %v2343_v55  ;;  %v2275_v46 = vsub.f32 %v9112_v62, %v2185_v60  ;;  %v2276_v10 = vsub.f32 %v9120_v13, %v2185_v60  ;;  %v9578_v40 = vpop.f32.mrf.mxu0  ;;  %v7725_v60 = vld [vmem:[%s11702_s8 + $0x94] ss:$8 sps:$4 sm:$0xff]  }
 0x333   : > { %v9580_v14 = vpop.eup %7846  ;;  %7860 = vpow2.f32 %v2345_v18  ;;  %4617 = vmatprep.mubr.bf16.mxu0 %v7725_v60 }
 0x334   : > { %11951 = vst [vmem:[#allocation83_spill] sm:$0xff] %v9580_v14  ;;  %v9582_v31 = vpop.eup %7848  ;;  %v2347_v12 = vmul.f32 1.442695, %v2275_v46  ;;  %v2349_v41 = vmul.f32 1.442695, %v2276_v10  ;;  %v9586_v5 = vpop.f32.mrf.mxu0 }
 0x335   : > { %11952 = vst [vmem:[#allocation84_spill] sm:$0xff] %v9582_v31  ;;  %v2188_v30 = vpop.xlane.xlu1 %2187  ;;  %v2459_v62 = vadd.f32 %v9582_v31, %v9580_v14  ;;  %v9601_v10 = vpop.f32.mrf.mxu1 }
 0x336   : > { %7862 = vpow2.f32 %v2347_v12  ;;  %v2277_v13 = vsub.f32 %v9122_v23, %v2188_v30  ;;  %v2278_v55 = vsub.f32 %v9130_v52, %v2188_v30  ;;  %v9592_v36 = vpop.f32.mrf.mxu0  ;;  %v7723_v23 = vld [vmem:[%s11702_s8 + $0x90] ss:$8 sps:$4 sm:$0xff]  }
 0x337   : > { %v9594_v18 = vpop.eup %7850  ;;  %7864 = vpow2.f32 %v2349_v41  ;;  %2460 = vadd.xlane.f32.xlu1 %v2459_v62  ;;  %4618 = vmatmul.mubr.bf16.gmra.mxu0 %v7723_v23  ;;  %v9618_v7 = vpop.f32.mrf.mxu1 }
 0x338   : > { %11953 = vst [vmem:[#allocation85_spill] sm:$0xff] %v9594_v18  ;;  %v9599_v46 = vpop.eup %7852  ;;  %v2351_v31 = vmul.f32 1.442695, %v2277_v13  ;;  %v2353_v12 = vmul.f32 1.442695, %v2278_v55  ;;  %v9603_v14 = vpop.f32.mrf.mxu0 }
 0x339   : > { %11954 = vst [vmem:[#allocation86_spill] sm:$0xff] %v9599_v46  ;;  %v2191_v52 = vpop.xlane.xlu0 %2190  ;;  %v2462_v41 = vadd.f32 %v9599_v46, %v9594_v18 }
 0x33a   : > { %7866 = vpow2.f32 %v2351_v31  ;;  %v2279_v30 = vsub.f32 %v9132_v17, %v2191_v52  ;;  %v2280_v62 = vsub.f32 %v9140_v42, %v2191_v52  ;;  %v9612_v19 = vpop.f32.mrf.mxu0  ;;  %v7729_v52 = vld [vmem:[%s11702_s8 + $0xa4] ss:$8 sps:$4 sm:$0xff]  }
 0x33b   : > { %v9614_v13 = vpop.eup %7854  ;;  %7868 = vpow2.f32 %v2353_v12  ;;  %2463 = vadd.xlane.f32.xlu0 %v2462_v41  ;;  %4627 = vmatprep.mubr.bf16.mxu0 %v7729_v52 }
 0x33c   : > { %11955 = vst [vmem:[#allocation87_spill] sm:$0xff] %v9614_v13  ;;  %v9616_v55 = vpop.eup %7856  ;;  %v2355_v3 = vmul.f32 1.442695, %v2279_v30  ;;  %v2357_v43 = vmul.f32 1.442695, %v2280_v62  ;;  %v9620_v46 = vpop.f32.mrf.mxu0 }
 0x33d   : > { %11956 = vst [vmem:[#allocation88_spill] sm:$0xff] %v9616_v55  ;;  %v2194_v31 = vpop.xlane.xlu1 %2193  ;;  %v2465_v17 = vadd.f32 %v9616_v55, %v9614_v13  ;;  %v9635_v30 = vpop.f32.mrf.mxu1 }
 0x33e   : > { %7870 = vpow2.f32 %v2355_v3  ;;  %v2281_v42 = vsub.f32 %v9142_v1, %v2194_v31  ;;  %v2282_v60 = vsub.f32 %v9157_v54, %v2194_v31  ;;  %v9626_v23 = vpop.f32.mrf.mxu0  ;;  %v7727_v1 = vld [vmem:[%s11702_s8 + $0xa0] ss:$8 sps:$4 sm:$0xff]  }
 0x33f   : > { %v9628_v12 = vpop.eup %7858  ;;  %7872 = vpow2.f32 %v2357_v43  ;;  %2466 = vadd.xlane.f32.xlu0 %v2465_v17  ;;  %4628 = vmatmul.mubr.bf16.gmra.mxu0 %v7727_v1  ;;  %v3686_v13 = vpop.f32.mrf.mxu1 }
 0x340   : > { %v9633_v41 = vpop.eup %7860  ;;  %v2359_v62 = vmul.f32 1.442695, %v2281_v42  ;;  %v2361_v3 = vmul.f32 1.442695, %v2282_v60  ;;  %v9637_v55 = vpop.f32.mrf.mxu0 }
 0x341   : > { %11957 = vst [vmem:[#allocation89_spill] sm:$0xff] %v9633_v41  ;;  %v2197_v54 = vpop.xlane.xlu0 %2196  ;;  %v2468_v43 = vadd.f32 %v9633_v41, %v9628_v12 }
 0x342   : > { %7874 = vpow2.f32 %v2359_v62  ;;  %v2283_v31 = vsub.f32 %v9160_v20, %v2197_v54  ;;  %v2284_v17 = vsub.f32 %v9169_v29, %v2197_v54  ;;  %v9646_v18 = vpop.f32.mrf.mxu0  ;;  %v7733_v54 = vld [vmem:[%s11702_s8 + $0xb4] ss:$8 sps:$4 sm:$0xff]  }
 0x343   : > { %v9648_v42 = vpop.eup %7862  ;;  %7876 = vpow2.f32 %v2361_v3  ;;  %2469 = vadd.xlane.f32.xlu1 %v2468_v43  ;;  %4637 = vmatprep.mubr.bf16.mxu0 %v7733_v54  ;;  %v9684_v54 = vadd.f32 %v9480_v51, %v9076_v50 }
 0x344   : > { %11958 = vst [vmem:[#allocation90_spill] sm:$0xff] %v9648_v42  ;;  %v9650_v60 = vpop.eup %7864  ;;  %v2363_v63 = vmul.f32 1.442695, %v2283_v31  ;;  %v2365_v35 = vmul.f32 1.442695, %v2284_v17  ;;  %v9652_v61 = vpop.f32.mrf.mxu0 }
 0x345   : > { %11959 = vst [vmem:[#allocation91_spill] sm:$0xff] %v9650_v60  ;;  %v2200_v52 = vpop.xlane.xlu1 %2199  ;;  %v2471_v20 = vadd.f32 %v9650_v60, %v9648_v42  ;;  %v3688_v31 = vpop.f32.mrf.mxu1 }
 0x346   : > { %7878 = vpow2.f32 %v2363_v63  ;;  %v2285_v29 = vsub.f32 %v9172_v59, %v2200_v52  ;;  %v2286_v62 = vsub.f32 %v9181_v0, %v2200_v52  ;;  %v9658_v1 = vpop.f32.mrf.mxu0  ;;  %v7731_v59 = vld [vmem:[%s11702_s8 + $0xb0] ss:$8 sps:$4 sm:$0xff]  }
 0x347   : > { %v9660_v3 = vpop.eup %7866  ;;  %7880 = vpow2.f32 %v2365_v35  ;;  %2472 = vadd.xlane.f32.xlu0 %v2471_v20  ;;  %4638 = vmatmul.mubr.bf16.gmra.mxu0 %v7731_v59 }
 0x348   : > { %v9665_v43 = vpop.eup %7868  ;;  %v2367_v17 = vmul.f32 1.442695, %v2285_v29  ;;  %v2369_v60 = vmul.f32 1.442695, %v2286_v62  ;;  %v3793_v63 = vpop.f32.mrf.mxu0  ;;  %v9678_v29 = vadd.f32 %v9420_v48, %v9061_v15  ;;  %v3671_v15 = vadd.f32 %v9558_v2, %v9136_v28 }
 0x349   : > { %v2203_v0 = vpop.xlane.xlu0 %2202  ;;  %v2474_v52 = vadd.f32 %v9665_v43, %v9660_v3  ;;  %v3677_v48 = vadd.f32 %v9584_v56, %v9164_v37  ;;  %v3681_v28 = vadd.f32 %v9618_v7, %v9188_v44  ;;  %v3687_v37 = vadd.f32 %v3686_v13, %v9212_v33  ;;  %v7735_v44 = vld [vmem:[%s11702_s8 + $0xc0] ss:$8 sps:$4 sm:$0xff]  }
 0x34a   : > { %7882 = vpow2.f32 %v2367_v17  ;;  %v2287_v35 = vsub.f32 %v9184_v38, %v2203_v0  ;;  %v2288_v20 = vsub.f32 %v9193_v27, %v2203_v0  ;;  %v3797_v42 = vpop.f32.mrf.mxu0  ;;  %v9688_v38 = vadd.f32 %v9536_v9, %v9116_v25  ;;  %v3690_v27 = vpop.f32.mrf.mxu1 }
 0x34b   : > { %v9674_v41 = vpop.eup %7870  ;;  %7884 = vpow2.f32 %v2369_v60  ;;  %2475 = vadd.xlane.f32.xlu1 %v2474_v52  ;;  %v3679_v60 = vadd.f32 %v9601_v10, %v9176_v53  ;;  %v3689_v25 = vadd.f32 %v3688_v31, %v9224_v24  ;;  %v3691_v53 = vadd.f32 %v3690_v27, %v9236_v49  ;;  %v7737_v24 = vld [vmem:[%s11702_s8 + $0xc4] ss:$8 sps:$4 sm:$0xff]  }
 0x34c   : > { %v9680_v62 = vpop.eup %7872  ;;  %v2371_v17 = vmul.f32 1.442695, %v2287_v35  ;;  %v2373_v59 = vmul.f32 1.442695, %v2288_v20  ;;  %v3799_v0 = vpop.f32.mrf.mxu0  ;;  %v3794_v33 = vadd.f32 %v3793_v63, %v3681_v28  ;;  %4647 = vmatprep.mubr.bf16.mxu0 %v7737_v24  ;;  %v3790_v63 = vadd.f32 %v9652_v61, %v3677_v48  ;;  %v11962_v28 = vld [vmem:[#allocation15_spill] sm:$0xff]  ;;  %v11963_v48 = vld [vmem:[#allocation18_spill] sm:$0xff] }
 0x34d   : > { %v2206_v52 = vpop.xlane.xlu1 %2205  ;;  %v2477_v50 = vadd.f32 %v9680_v62, %v9674_v41  ;;  %v3800_v49 = vadd.f32 %v3799_v0, %v3687_v37  ;;  %v3669_v37 = vadd.f32 %v9547_v45, %v11962_v28 }
 0x34e   : > { %7886 = vpow2.f32 %v2371_v17  ;;  %v2289_v51 = vsub.f32 %v9196_v4, %v2206_v52  ;;  %v2290_v9 = vsub.f32 %v9205_v22, %v2206_v52  ;;  %v3801_v35 = vpop.f32.mrf.mxu0  ;;  %v3685_v4 = vadd.f32 %v9635_v30, %v9200_v57  ;;  %v11960_v30 = vld [vmem:[#allocation17_spill] sm:$0xff] }
 0x34f   : > { %v9701_v20 = vpop.eup %7874  ;;  %7888 = vpow2.f32 %v2373_v59  ;;  %2478 = vadd.xlane.f32.xlu0 %v2477_v50  ;;  %v3802_v10 = vadd.f32 %v3801_v35, %v3689_v25  ;;  %4648 = vmatmul.mubr.bf16.gmra.mxu0 %v7735_v44  ;;  %v11961_v50 = vld [vmem:[#allocation16_spill] sm:$0xff]  ;;  %v3819_v24 = vpack.c.bf16 %v3794_v33, %v3790_v63  ;;  %v3782_v33 = vadd.f32 %v9626_v23, %v3669_v37 }
 0x350   : > { %v9710_v2 = vpop.eup %7876  ;;  %v2375_v22 = vmul.f32 1.442695, %v2289_v51  ;;  %v2377_v56 = vmul.f32 1.442695, %v2290_v9  ;;  %v3803_v31 = vpop.f32.mrf.mxu0  ;;  %v3798_v17 = vadd.f32 %v3797_v42, %v3685_v4  ;;  %v3675_v25 = vadd.f32 %v9569_v39, %v11961_v50  ;;  %v11969_v50 = vld [vmem:[#allocation21_spill] sm:$0xff] }
 0x351   : > { %v3804_v7 = vadd.f32 %v3803_v31, %v3691_v53  ;;  %v2209_v13 = vpop.xlane.xlu1 %2208  ;;  %v2480_v27 = vadd.f32 %v9710_v2, %v9701_v20  ;;  %v3792_v42 = vadd.f32 %v9658_v1, %v3679_v60  ;;  %v3784_v53 = vadd.f32 %v9637_v55, %v3671_v15  ;;  %v11964_v1 = vld [vmem:[#allocation19_spill] sm:$0xff]  ;;  %v11966_v55 = vld [vmem:[#allocation14_spill] sm:$0xff] }
 0x352   : > { %7890 = vpow2.f32 %v2375_v22  ;;  %v2291_v57 = vsub.f32 %v9208_v8, %v2209_v13  ;;  %v2292_v59 = vsub.f32 %v11960_v30, %v2209_v13  ;;  %v3820_v9 = vpack.c.bf16 %v3802_v10, %v3798_v17  ;;  %v11965_v10 = vld [vmem:[#allocation13_spill] sm:$0xff]  ;;  %v11967_v13 = vld [vmem:[#allocation12_spill] sm:$0xff] }
 0x353   : > { %v9721_v52 = vpop.eup %7878  ;;  %7892 = vpow2.f32 %v2377_v56  ;;  %v3821_v0 = vpack.c.bf16 %v3804_v7, %v3800_v49  ;;  %2481 = vadd.xlane.f32.xlu1 %v2480_v27  ;;  %v3788_v39 = vadd.f32 %v9646_v18, %v3675_v25  ;;  %v3661_v45 = vadd.f32 %v9510_v11, %v11965_v10  ;;  %v7741_v18 = vld [vmem:[%s11702_s8 + $0xd4] ss:$8 sps:$4 sm:$0xff]   ;;  %v11968_v30 = vld [vmem:[#allocation20_spill] sm:$0xff] }
 0x354   : > { %v9726_v51 = vpop.eup %7880  ;;  %v2379_v35 = vmul.f32 1.442695, %v2291_v57  ;;  %v2381_v8 = vmul.f32 1.442695, %v2292_v59  ;;  %v3665_v15 = vadd.f32 %v9521_v16, %v11966_v55  ;;  %v3780_v31 = vadd.f32 %v9620_v46, %v9688_v38  ;;  %v7739_v16 = vld [vmem:[%s11702_s8 + $0xd0] ss:$8 sps:$4 sm:$0xff]   ;;  %4657 = vmatprep.mubr.bf16.mxu0 %v7741_v18 }
 0x355   : > { %v2212_v4 = vpop.xlane.xlu1 %2211  ;;  %3950 = vmatprep.subr.bf16.mxu1 %v3821_v0  ;;  %v2483_v61 = vadd.f32 %v9726_v51, %v9721_v52  ;;  %v3818_v49 = vpack.c.bf16 %v3792_v42, %v3788_v39  ;;  %v3659_v46 = vadd.f32 %v9493_v34, %v11967_v13  ;;  %v3774_v38 = vadd.f32 %v9603_v14, %v3661_v45  ;;  %v11970_v34 = vld [vmem:[#allocation10_spill] sm:$0xff]  ;;  %v11971_v0 = vld [vmem:[#allocation65_spill] sm:$0xff]  ;;  %v11972_v42 = vld [vmem:[#allocation11_spill] sm:$0xff] }
 0x356   : > { %7894 = vpow2.f32 %v2379_v35  ;;  %v2293_v22 = vsub.f32 %v11963_v48, %v2212_v4  ;;  %v2294_v60 = vsub.f32 %v11964_v1, %v2212_v4  ;;  %3951 = vmatpush1.bf16.msra.mxu1 %v3820_v9  ;;  %v3817_v27 = vpack.c.bf16 %v3784_v53, %v3780_v31  ;;  %v11973_v9 = vld [vmem:[#allocation69_spill] sm:$0xff]  ;;  %v11977_v45 = vld [vmem:[#allocation23_spill] sm:$0xff] }
 0x357   : > { %v9737_v56 = vpop.eup %7882  ;;  %7896 = vpow2.f32 %v2381_v8  ;;  %2484 = vadd.xlane.f32.xlu0 %v2483_v61  ;;  %3952 = vmatprep.subr.bf16.mxu1 %v3819_v24  ;;  %v3778_v23 = vadd.f32 %v9612_v19, %v3665_v15  ;;  %v3651_v14 = vadd.f32 %v11971_v0, %v11970_v34  ;;  %v3655_v35 = vadd.f32 %v11973_v9, %v11972_v42  ;;  %v11974_v4 = vld [vmem:[#allocation9_spill] sm:$0xff]  ;;  %v11978_v15 = vld [vmem:[#allocation7_spill] sm:$0xff]  ;;  %v11986_v0 = vld [vmem:[#allocation4_spill] sm:$0xff] }
 0x358   : > { %v9748_v44 = vpop.eup %7884  ;;  %v2383_v7 = vmul.f32 1.442695, %v2293_v22  ;;  %v2385_v11 = vmul.f32 1.442695, %v2294_v60  ;;  %4658 = vmatmul.mubr.bf16.gmra.mxu0 %v7739_v16  ;;  %v3770_v8 = vadd.f32 %v9586_v5, %v9684_v54  ;;  %v3772_v28 = vadd.f32 %v9592_v36, %v3659_v46  ;;  %v11975_v61 = vld [vmem:[#allocation61_spill] sm:$0xff]  ;;  %v11976_v60 = vld [vmem:[#allocation22_spill] sm:$0xff] }
 0x359   : > { %v2215_v17 = vpop.xlane.xlu0 %2214  ;;  %v2486_v57 = vadd.f32 %v9748_v44, %v9737_v56  ;;  %v3816_v37 = vpack.c.bf16 %v3782_v33, %v3778_v23  ;;  %v3649_v39 = vadd.f32 %v11975_v61, %v11974_v4  ;;  %v3764_v48 = vadd.f32 %v9571_v26, %v3651_v14  ;;  %v11979_v31 = vld [vmem:[#allocation51_spill] sm:$0xff]  ;;  %v11980_v33 = vld [vmem:[#allocation8_spill] sm:$0xff]  ;;  %v11987_v14 = vld [vmem:[#allocation38_spill] sm:$0xff] }
 0x35a   : > { %7898 = vpow2.f32 %v2383_v7  ;;  %v2295_v59 = vsub.f32 %v11968_v30, %v2215_v17  ;;  %v2296_v25 = vsub.f32 %v11969_v50, %v2215_v17  ;;  %3953 = vmatpush1.bf16.msra.mxu1 %v3818_v49  ;;  %v3815_v22 = vpack.c.bf16 %v3774_v38, %v3770_v8  ;;  %v11981_v26 = vld [vmem:[#allocation55_spill] sm:$0xff]  ;;  %v11982_v17 = vld [vmem:[#allocation5_spill] sm:$0xff]  ;;  %v11985_v50 = vld [vmem:[#allocation48_spill] sm:$0xff] }
 0x35b   : > { %v9762_v63 = vpop.eup %7886  ;;  %7900 = vpow2.f32 %v2385_v11  ;;  %2487 = vadd.xlane.f32.xlu1 %v2486_v57  ;;  %3954 = vmatprep.subr.bf16.mxu1 %v3817_v27  ;;  %v3768_v54 = vadd.f32 %v9578_v40, %v3655_v35  ;;  %v3641_v18 = vadd.f32 %v11979_v31, %v11978_v15  ;;  %v3645_v49 = vadd.f32 %v11981_v26, %v11980_v33  ;;  %v7745_v40 = vld [vmem:[%s11702_s8 + $0xe4] ss:$8 sps:$4 sm:$0xff]   ;;  %v7743_v27 = vld [vmem:[%s11702_s8 + $0xe0] ss:$8 sps:$4 sm:$0xff]   ;;  %v11988_v35 = vld [vmem:[#allocation82_spill] sm:$0xff] }
 0x35c   : > { %v9770_v19 = vpop.eup %7888  ;;  %v2387_v53 = vmul.f32 1.442695, %v2295_v59  ;;  %v2389_v24 = vmul.f32 1.442695, %v2296_v25  ;;  %v3760_v7 = vadd.f32 %v9560_v21, %v9678_v29  ;;  %v3762_v16 = vadd.f32 %v9564_v32, %v3649_v39  ;;  %v11983_v21 = vld [vmem:[#allocation44_spill] sm:$0xff]  ;;  %4667 = vmatprep.mubr.bf16.mxu0 %v7745_v40  ;;  %v11984_v59 = vld [vmem:[#allocation6_spill] sm:$0xff] }
 0x35d   : > { %v2218_v1 = vpop.xlane.xlu0 %2217  ;;  %v2489_v5 = vadd.f32 %v9770_v19, %v9762_v63  ;;  %v3814_v13 = vpack.c.bf16 %v3772_v28, %v3768_v54  ;;  %v3637_v29 = vadd.f32 %v11983_v21, %v11982_v17  ;;  %v3754_v57 = vadd.f32 %v9549_v6, %v3641_v18  ;;  %v11991_v39 = vld [vmem:[#allocation29_spill] sm:$0xff]  ;;  %v11995_v33 = vld [vmem:[#allocation28_spill] sm:$0xff] }
 0x35e   : > { %7902 = vpow2.f32 %v2387_v53  ;;  %v2297_v10 = vsub.f32 %v11976_v60, %v2218_v1  ;;  %v2298_v36 = vsub.f32 %v11977_v45, %v2218_v1  ;;  %3955 = vmatpush1.bf16.msra.mxu1 %v3816_v37  ;;  %v3813_v23 = vpack.c.bf16 %v3764_v48, %v3760_v7  ;;  %v11989_v37 = vld [vmem:[#allocation80_spill] sm:$0xff]  ;;  %v7747_v60 = vld [vmem:[%s11702_s8 + $0xf0] ss:$8 sps:$4 sm:$0xff]  }
 0x35f   : > { %v9781_v55 = vpop.eup %7890  ;;  %7904 = vpow2.f32 %v2389_v24  ;;  %2490 = vadd.xlane.f32.xlu0 %v2489_v5  ;;  %3956 = vmatprep.subr.bf16.mxu1 %v3815_v22  ;;  %v3639_v32 = vadd.f32 %v11985_v50, %v11984_v59  ;;  %v3758_v25 = vadd.f32 %v9556_v47, %v3645_v49  ;;  %v3631_v42 = vadd.f32 %v11987_v14, %v11986_v0  ;;  %v7749_v22 = vld [vmem:[%s11702_s8 + $0xf4] ss:$8 sps:$4 sm:$0xff]   ;;  %v12002_v14 = vld [vmem:[#allocation71_spill] sm:$0xff] }
 0x360   : > { %v9792_v11 = vpop.eup %7892  ;;  %v2391_v46 = vmul.f32 1.442695, %v2297_v10  ;;  %v2393_v38 = vmul.f32 1.442695, %v2298_v36  ;;  %4668 = vmatmul.mubr.bf16.gmra.mxu0 %v7743_v27  ;;  %v3750_v6 = vadd.f32 %v9538_v58, %v3637_v29  ;;  %v11990_v58 = vld [vmem:[#allocation3_spill] sm:$0xff]  ;;  %v11992_v5 = vld [vmem:[#allocation81_spill] sm:$0xff] }
 0x361   : > { %v2492_v30 = vadd.f32 %v9792_v11, %v9781_v55  ;;  %v3752_v8 = vadd.f32 %v11988_v35, %v3639_v32  ;;  %v3812_v28 = vpack.c.bf16 %v3762_v16, %v3758_v25  ;;  %v3744_v47 = vadd.f32 %v11989_v37, %v3631_v42  ;;  %v9815_v24 = vpop.xlane.xlu0 %2220  ;;  %v11993_v10 = vld [vmem:[#allocation75_spill] sm:$0xff]  ;;  %v11994_v36 = vld [vmem:[#allocation78_spill] sm:$0xff]  ;;  %4677 = vmatprep.mubr.bf16.mxu0 %v7749_v22  ;;  %v12005_v37 = vld [vmem:[#allocation36_spill] sm:$0xff] }
 0x362   : > { %7906 = vpow2.f32 %v2391_v46  ;;  %3957 = vmatpush1.bf16.msra.mxu1 %v3814_v13  ;;  %v3811_v53 = vpack.c.bf16 %v3754_v57, %v3750_v6  ;;  %v3621_v48 = vadd.f32 %v11991_v39, %v11990_v58  ;;  %v11996_v49 = vld [vmem:[#allocation30_spill] sm:$0xff]  ;;  %v11998_v29 = vld [vmem:[#allocation79_spill] sm:$0xff]  ;;  %v11999_v57 = vld [vmem:[#allocation76_spill] sm:$0xff] }
 0x363   : > { %v9806_v34 = vpop.eup %7894  ;;  %7908 = vpow2.f32 %v2393_v38  ;;  %2493 = vadd.xlane.f32.xlu1 %v2492_v30  ;;  %3958 = vmatprep.subr.bf16.mxu1 %v3813_v23  ;;  %v3810_v54 = vpack.c.bf16 %v3752_v8, %v11992_v5  ;;  %v3809_v15 = vpack.c.bf16 %v3744_v47, %v11994_v36  ;;  %v11997_v38 = vld [vmem:[#allocation72_spill] sm:$0xff]  ;;  %v12000_v23 = vpack.c.bf16 %v11998_v29, %v11999_v57  ;;  %v7686_v25 = vld [vmem:[%s11701_s7] sm:$0xff]   ;;  %v12001_v0 = vld [vmem:[#allocation74_spill] sm:$0xff] }
 0x364   : > { %v9811_v9 = vpop.eup %7896  ;;  %v3734_v45 = vadd.f32 %v11993_v10, %v3621_v48  ;;  %v12003_v42 = vpack.c.bf16 %v12001_v0, %v12002_v14  ;;  %v12004_v8 = vld [vmem:[#allocation35_spill] sm:$0xff]  ;;  %v7690_v48 = vld [vmem:[%s11701_s7 + $0x8] sm:$0xff]   ;;  %v12007_v22 = vld [vmem:[#allocation37_spill] sm:$0xff] }
 0x365   : > { %v2495_v4 = vadd.f32 %v9811_v9, %v9806_v34  ;;  %v9843_v17 = vpop.xlane.xlu1 %2223 }
 0x366   : > { %3959 = vmatpush1.bf16.msra.mxu1 %v3812_v28  ;;  %v3807_v27 = vpack.c.bf16 %v3734_v45, %v11997_v38  ;;  %v12011_v38 = vld [vmem:[#allocation49_spill] sm:$0xff] }
 0x367   : > { %v9819_v61 = vpop.eup %7898  ;;  %2496 = vadd.xlane.f32.xlu0 %v2495_v4  ;;  %3960 = vmatprep.subr.bf16.mxu1 %v3811_v53  ;;  %v12006_v53 = vmov 0  }
 0x368   : > { %v9826_v1 = vpop.eup %7900  ;;  %4678 = vmatmul.mubr.bf16.gmra.mxu0 %v7747_v60 }
 0x369   : > { %v2227_v31 = vpop.xlane.xlu0 %2226  ;;  %v2498_v18 = vadd.f32 %v9826_v1, %v9819_v61 }
 0x36a   : > { %v2303_v26 = vsub.f32 %v11995_v33, %v2227_v31  ;;  %v2304_v7 = vsub.f32 %v11996_v49, %v2227_v31  ;;  %3961 = vmatpush1.bf16.msra.mxu1 %v3810_v54  ;;  %v12008_v54 = vld [vmem:[#allocation39_spill] sm:$0xff]  ;;  %v7694_v33 = vld [vmem:[%s11701_s7 + $0x10] sm:$0xff]  }
 0x36b   : > { %v9838_v40 = vpop.eup %7902  ;;  %2499 = vadd.xlane.f32.xlu1 %v2498_v18  ;;  %3962 = vmatprep.subr.bf16.mxu1 %v3809_v15 }
 0x36c   : > { %v9840_v16 = vpop.eup %7904  ;;  %v2403_v13 = vmul.f32 1.442695, %v2303_v26  ;;  %v2405_v46 = vmul.f32 1.442695, %v2304_v7  ;;  %v4847_v26 = vld [vmem:[%s11703_s9 + $0xf8] sm:$0xff] }
 0x36d   : > { %v2501_v21 = vadd.f32 %v9840_v16, %v9838_v40  ;;  %v2230_v50 = vpop.xlane.xlu1 %2229 }
 0x36e   : > { %7910 = vpow2.f32 %v2403_v13  ;;  %3963 = vmatpush1.bf16.msra.mxu1 %v12000_v23  ;;  %v12010_v13 = vld [vmem:[#allocation46_spill] sm:$0xff] }
 0x36f   : > { %v9850_v30 = vpop.eup %7906  ;;  %7912 = vpow2.f32 %v2405_v46  ;;  %2502 = vadd.xlane.f32.xlu0 %v2501_v21  ;;  %3964 = vmatprep.subr.bf16.mxu1 %v3807_v27 }
 0x370   : > { %v9852_v59 = vpop.eup %7908 }
 0x371   : > { %v2504_v32 = vadd.f32 %v9852_v59, %v9850_v30  ;;  %v9862_v6 = vpop.xlane.xlu0 %2232 }
 0x372   : > { %3965 = vmatpush1.bf16.msra.mxu1 %v12003_v42  ;;  %v7698_v42 = vld [vmem:[%s11701_s7 + $0x18] sm:$0xff]  }
 0x373   : > { %2505 = vadd.xlane.f32.xlu1 %v2504_v32  ;;  %v12014_v32 = vld [vmem:[#allocation31_spill] sm:$0xff] }
 0x375   : > { %v2236_v35 = vpop.xlane.xlu1 %2235  ;;  %3983 = vmatmul.mubr.bf16.vlgmr.msra.gmra.mxu1 %v7686_v25  ;;  %v2305_v25 = vsub.f32 %v12014_v32, %v2230_v50 }
 0x376   : > { %v2309_v28 = vsub.f32 %v12004_v8, %v2236_v35  ;;  %v2310_v47 = vsub.f32 %v12005_v37, %v2236_v35  ;;  %3992 = vmatprep.mubr.bf16.mxu1 %v12006_v53  ;;  %v12015_v35 = vld [vmem:[#allocation32_spill] sm:$0xff] }
 0x377   : > { %v2306_v8 = vsub.f32 %v12015_v35, %v2230_v50  ;;  %v12026_v35 = vld [vmem:[#allocation45_spill] sm:$0xff] }
 0x378   : > { %v2415_v4 = vmul.f32 1.442695, %v2309_v28  ;;  %v2417_v58 = vmul.f32 1.442695, %v2310_v47  ;;  %v12016_v28 = vld [vmem:[#allocation50_spill] sm:$0xff]  ;;  %v12017_v47 = vld [vmem:[#allocation52_spill] sm:$0xff] }
 0x379   : > { %v2239_v39 = vpop.xlane.xlu0 %2238 }
 0x37a   : > { %7914 = vpow2.f32 %v2415_v4  ;;  %v2311_v5 = vsub.f32 %v12007_v22, %v2239_v39  ;;  %v2312_v60 = vsub.f32 %v12008_v54, %v2239_v39  ;;  %v12020_v54 = vld [vmem:[#allocation33_spill] sm:$0xff] }
 0x37b   : > { %v9872_v10 = vpop.eup %7910  ;;  %7916 = vpow2.f32 %v2417_v58 }
 0x37c   : > { %v9874_v45 = vpop.eup %7912  ;;  %v2419_v36 = vmul.f32 1.442695, %v2311_v5  ;;  %v2421_v15 = vmul.f32 1.442695, %v2312_v60  ;;  %v2407_v5 = vmul.f32 1.442695, %v2305_v25  ;;  %v2307_v60 = vsub.f32 %v12020_v54, %v9862_v6 }
 0x37d   : > { %12009 = vst [vmem:[#allocation17_spill] sm:$0xff] %v9874_v45  ;;  %3993 = vmatmul.mubr.bf16.gmra.mxu1 %v7690_v48  ;;  %v2513_v31 = vadd.f32 %v9874_v45, %v9872_v10  ;;  %v2242_v18 = vpop.xlane.xlu1 %2241 }
 0x37e   : > { %7918 = vpow2.f32 %v2419_v36  ;;  %4002 = vmatprep.mubr.bf16.mxu1 %v12006_v53  ;;  %v2409_v36 = vmul.f32 1.442695, %v2306_v8 }
 0x37f   : > { %7920 = vpow2.f32 %v2421_v15  ;;  %2514 = vadd.xlane.f32.xlu1 %v2513_v31  ;;  %v12021_v15 = vld [vmem:[#allocation34_spill] sm:$0xff] }
 0x380   : > { %v2308_v31 = vsub.f32 %v12021_v15, %v9862_v6 }
 0x381   : > { %v9885_v49 = vpop.xlane.xlu0 %2244 }
 0x382   : > { %v2413_v6 = vmul.f32 1.442695, %v2308_v31  ;;  %v2316_v8 = vsub.f32 %v12026_v35, %v9885_v49  ;;  %v12032_v31 = vld [vmem:[#allocation54_spill] sm:$0xff] }
 0x384   : > { %v2429_v15 = vmul.f32 1.442695, %v2316_v8  ;;  %v12038_v8 = vld [vmem:[#allocation57_spill] sm:$0xff] }
 0x385   : > { %5005 = vperm.xlu0 %7228, %v4847_v26   ;;  %v2248_v7 = vpop.xlane.xlu1 %2247  ;;  %4003 = vmatmul.mubr.bf16.gmra.mxu1 %v7694_v33  ;;  %v12022_v33 = vld [vmem:[#allocation26_spill] sm:$0xff] }
 0x386   : > { %v2317_v46 = vsub.f32 %v12010_v13, %v2248_v7  ;;  %v2318_v27 = vsub.f32 %v12011_v38, %v2248_v7  ;;  %4012 = vmatprep.mubr.bf16.mxu1 %v12006_v53  ;;  %v2301_v26 = vsub.f32 %v12022_v33, %v9843_v17  ;;  %v12023_v7 = vld [vmem:[#allocation40_spill] sm:$0xff]  ;;  %v12024_v38 = vld [vmem:[#allocation41_spill] sm:$0xff] }
 0x387   : > { %v9890_v21 = vpop.eup %7914  ;;  %v2313_v13 = vsub.f32 %v12023_v7, %v2242_v18 }
 0x388   : > { %12012 = vst [vmem:[#allocation16_spill] sm:$0xff] %v9890_v21  ;;  %v9892_v29 = vpop.eup %7916  ;;  %v2431_v57 = vmul.f32 1.442695, %v2317_v46  ;;  %v2433_v23 = vmul.f32 1.442695, %v2318_v27  ;;  %v2314_v27 = vsub.f32 %v12024_v38, %v2242_v18  ;;  %v12027_v18 = vld [vmem:[#allocation60_spill] sm:$0xff] }
 0x389   : > { %12013 = vst [vmem:[#allocation15_spill] sm:$0xff] %v9892_v29  ;;  %v2251_v0 = vpop.xlane.xlu0 %2250  ;;  %v2522_v14 = vadd.f32 %v9892_v29, %v9890_v21  ;;  %v2411_v46 = vmul.f32 1.442695, %v2307_v60  ;;  %v2399_v32 = vmul.f32 1.442695, %v2301_v26  ;;  %v12034_v38 = vld [vmem:[#allocation64_spill] sm:$0xff] }
 0x38a   : > { %7922 = vpow2.f32 %v2431_v57  ;;  %v2319_v37 = vsub.f32 %v12016_v28, %v2251_v0  ;;  %v2320_v4 = vsub.f32 %v12017_v47, %v2251_v0  ;;  %v2423_v25 = vmul.f32 1.442695, %v2313_v13  ;;  %v12025_v0 = vld [vmem:[#allocation43_spill] sm:$0xff]  ;;  %v7706_v13 = vld [vmem:[%s11701_s7 + $0x28] sm:$0xff]  }
 0x38b   : > { %v9903_v58 = vpop.eup %7918  ;;  %7924 = vpow2.f32 %v2433_v23  ;;  %2523 = vadd.xlane.f32.xlu1 %v2522_v14  ;;  %v7702_v23 = vld [vmem:[%s11701_s7 + $0x20] sm:$0xff]   ;;  %v2315_v14 = vsub.f32 %v12025_v0, %v9885_v49 }
 0x38c   : > { %12018 = vst [vmem:[#allocation18_spill] sm:$0xff] %v9903_v58  ;;  %v9905_v39 = vpop.eup %7920  ;;  %v2435_v48 = vmul.f32 1.442695, %v2319_v37  ;;  %v2437_v22 = vmul.f32 1.442695, %v2320_v4  ;;  %v12028_v4 = vld [vmem:[#allocation62_spill] sm:$0xff] }
 0x38d   : > { %12019 = vst [vmem:[#allocation19_spill] sm:$0xff] %v9905_v39  ;;  %4013 = vmatmul.mubr.bf16.gmra.mxu1 %v7698_v42  ;;  %v2525_v50 = vadd.f32 %v9905_v39, %v9903_v58  ;;  %v2254_v57 = vpop.xlane.xlu1 %2253  ;;  %v2425_v42 = vmul.f32 1.442695, %v2314_v27  ;;  %v2427_v49 = vmul.f32 1.442695, %v2315_v14  ;;  %v4832_v39 = vld [vmem:[%s11703_s9 + $0x80] sm:$0xff] }
 0x38e   : > { %7926 = vpow2.f32 %v2435_v48  ;;  %4022 = vmatprep.mubr.bf16.mxu1 %v12006_v53  ;;  %v2321_v33 = vsub.f32 %v12032_v31, %v2254_v57  ;;  %v5168_v29 = vld [vmem:[%s11705_s11] sm:$0xff] }
 0x38f   : > { %7928 = vpow2.f32 %v2437_v22  ;;  %2526 = vadd.xlane.f32.xlu1 %v2525_v50 }
 0x390   : > { %7930 = vpow2.f32 %v2407_v5  ;;  %v12030_v5 = vld [vmem:[#allocation27_spill] sm:$0xff]  ;;  %v2439_v35 = vmul.f32 1.442695, %v2321_v33  ;;  %v12044_v33 = vld [vmem:[#allocation70_spill] sm:$0xff] }
 0x391   : > { %7932 = vpow2.f32 %v2409_v36  ;;  %v2257_v28 = vpop.xlane.xlu0 %2256  ;;  %v2302_v54 = vsub.f32 %v12030_v5, %v9843_v17  ;;  %v12033_v17 = vld [vmem:[#allocation56_spill] sm:$0xff] }
 0x392   : > { %7934 = vpow2.f32 %v2411_v46  ;;  %v2322_v46 = vsub.f32 %v12033_v17, %v2254_v57 }
 0x393   : > { %7936 = vpow2.f32 %v2413_v6  ;;  %v2401_v0 = vmul.f32 1.442695, %v2302_v54 }
 0x394   : > { %7938 = vpow2.f32 %v2399_v32 }
 0x395   : > { %v2260_v37 = vpop.xlane.xlu1 %2259  ;;  %4023 = vmatmul.mubr.bf16.gmra.mxu1 %v7702_v23  ;;  %7940 = vpow2.f32 %v2423_v25  ;;  %v12035_v23 = vld [vmem:[#allocation66_spill] sm:$0xff] }
 0x396   : > { %v2325_v47 = vsub.f32 %v12027_v18, %v2260_v37  ;;  %v2326_v48 = vsub.f32 %v12028_v4, %v2260_v37  ;;  %4032 = vmatprep.mubr.bf16.mxu1 %v12006_v53  ;;  %7942 = vpow2.f32 %v2425_v42  ;;  %v2323_v37 = vsub.f32 %v12038_v8, %v2257_v28  ;;  %v12040_v4 = vld [vmem:[#allocation59_spill] sm:$0xff] }
 0x397   : > { %v9928_v22 = vpop.eup %7922 }
 0x398   : > { %12029 = vst [vmem:[#allocation13_spill] sm:$0xff] %v9928_v22  ;;  %v9932_v60 = vpop.eup %7924  ;;  %v2447_v50 = vmul.f32 1.442695, %v2325_v47  ;;  %v2449_v36 = vmul.f32 1.442695, %v2326_v48  ;;  %v2324_v48 = vsub.f32 %v12040_v4, %v2257_v28 }
 0x399   : > { %12031 = vst [vmem:[#allocation14_spill] sm:$0xff] %v9932_v60  ;;  %v2263_v26 = vpop.xlane.xlu0 %2262  ;;  %v2534_v7 = vadd.f32 %v9932_v60, %v9928_v22  ;;  %v2441_v47 = vmul.f32 1.442695, %v2322_v46  ;;  %v4834_v60 = vld [vmem:[%s11703_s9 + $0x90] sm:$0xff] }
 0x39a   : > { %7944 = vpow2.f32 %v2447_v50  ;;  %v2327_v27 = vsub.f32 %v12034_v38, %v2263_v26  ;;  %v2328_v6 = vsub.f32 %v12035_v23, %v2263_v26  ;;  %v12042_v50 = vld [vmem:[#allocation67_spill] sm:$0xff]  ;;  %v2445_v28 = vmul.f32 1.442695, %v2324_v48  ;;  %v12048_v38 = vld [vmem:[#allocation24_spill] sm:$0xff] }
 0x39b   : > { %v9943_v32 = vpop.eup %7926  ;;  %7946 = vpow2.f32 %v2449_v36  ;;  %2535 = vadd.xlane.f32.xlu1 %v2534_v7 }
 0x39c   : > { %12036 = vst [vmem:[#allocation12_spill] sm:$0xff] %v9943_v32  ;;  %v9945_v25 = vpop.eup %7928  ;;  %7948 = vpow2.f32 %v2427_v49  ;;  %v2451_v14 = vmul.f32 1.442695, %v2327_v27  ;;  %v2453_v42 = vmul.f32 1.442695, %v2328_v6  ;;  %v2299_v27 = vsub.f32 %v12048_v38, %v9815_v24 }
 0x39d   : > { %12037 = vst [vmem:[#allocation20_spill] sm:$0xff] %v9945_v25  ;;  %7950 = vpow2.f32 %v2429_v15  ;;  %4033 = vmatmul.mubr.bf16.gmra.mxu1 %v7706_v13  ;;  %v2537_v57 = vadd.f32 %v9945_v25, %v9943_v32  ;;  %v9950_v18 = vpop.eup %7930  ;;  %v2266_v5 = vpop.xlane.xlu1 %2265  ;;  %v2443_v49 = vmul.f32 1.442695, %v2323_v37  ;;  %v7710_v15 = vld [vmem:[%s11701_s7 + $0x30] sm:$0xff]  }
 0x39e   : > { %12039 = vst [vmem:[#allocation21_spill] sm:$0xff] %v9950_v18  ;;  %7952 = vpow2.f32 %v2451_v14  ;;  %4042 = vmatprep.mubr.bf16.mxu1 %v12006_v53  ;;  %v9954_v54 = vpop.eup %7932  ;;  %v2329_v36 = vsub.f32 %v12042_v50, %v2266_v5  ;;  %v2330_v26 = vsub.f32 %v12044_v33, %v2266_v5 }
 0x39f   : > { %12041 = vst [vmem:[#allocation10_spill] sm:$0xff] %v9954_v54  ;;  %7954 = vpow2.f32 %v2453_v42  ;;  %2538 = vadd.xlane.f32.xlu1 %v2537_v57  ;;  %v9960_v31 = vpop.eup %7934  ;;  %v2516_v7 = vadd.f32 %v9954_v54, %v9950_v18 }
 0x3a0   : > { %7956 = vpow2.f32 %v2401_v0  ;;  %12043 = vst [vmem:[#allocation65_spill] sm:$0xff] %v9960_v31  ;;  %v9965_v13 = vpop.eup %7936  ;;  %v2455_v23 = vmul.f32 1.442695, %v2329_v36  ;;  %v12050_v0 = vld [vmem:[#allocation25_spill] sm:$0xff]  ;;  %v2457_v42 = vmul.f32 1.442695, %v2330_v26 }
 0x3a1   : > { %7958 = vpow2.f32 %v2439_v35  ;;  %12045 = vst [vmem:[#allocation11_spill] sm:$0xff] %v9965_v13  ;;  %v9967_v17 = vpop.eup %7938  ;;  %v2300_v14 = vsub.f32 %v12050_v0, %v9815_v24  ;;  %v2519_v35 = vadd.f32 %v9965_v13, %v9960_v31  ;;  %v7714_v24 = vld [vmem:[%s11701_s7 + $0x38] sm:$0xff]  }
 0x3a2   : > { %7960 = vpow2.f32 %v2441_v47  ;;  %12046 = vst [vmem:[#allocation69_spill] sm:$0xff] %v9967_v17  ;;  %v9969_v46 = vpop.eup %7940  ;;  %v2395_v47 = vmul.f32 1.442695, %v2299_v27  ;;  %v7718_v27 = vld [vmem:[%s11701_s7 + $0x40] sm:$0xff]   ;;  %v5171_v13 = vld [vmem:[%s11705_s11 + $0x18] sm:$0xff] }
 0x3a3   : > { %12047 = vst [vmem:[#allocation9_spill] sm:$0xff] %v9969_v46  ;;  %7962 = vpow2.f32 %v2443_v49  ;;  %v9973_v6 = vpop.eup %7942  ;;  %v2397_v5 = vmul.f32 1.442695, %v2300_v14 }
 0x3a4   : > { %2517 = vadd.xlane.f32.xlu0 %v2516_v7  ;;  %12049 = vst [vmem:[#allocation61_spill] sm:$0xff] %v9973_v6  ;;  %7964 = vpow2.f32 %v2445_v28  ;;  %v2528_v49 = vadd.f32 %v9973_v6, %v9969_v46  ;;  %v4837_v6 = vld [vmem:[%s11703_s9 + $0xa8] sm:$0xff] }
 0x3a5   : > { %4043 = vmatmul.mubr.bf16.gmra.mxu1 %v7710_v15  ;;  %7966 = vpow2.f32 %v2455_v23  ;;  %v4821_v46 = vld [vmem:[%s11703_s9 + $0x28] sm:$0xff] }
 0x3a6   : > { %4052 = vmatprep.mubr.bf16.mxu1 %v12006_v53  ;;  %7968 = vpow2.f32 %v2457_v42 }
 0x3a7   : > { %v9980_v8 = vpop.eup %7944  ;;  %7970 = vpow2.f32 %v2395_v47 }
 0x3a8   : > { %12051 = vst [vmem:[#allocation22_spill] sm:$0xff] %v9980_v8  ;;  %v9982_v37 = vpop.eup %7946  ;;  %2520 = vadd.xlane.f32.xlu0 %v2519_v35  ;;  %7972 = vpow2.f32 %v2397_v5 }
 0x3a9   : > { %12052 = vst [vmem:[#allocation23_spill] sm:$0xff] %v9982_v37  ;;  %v9984_v57 = vpop.eup %7948  ;;  %v2546_v4 = vadd.f32 %v9982_v37, %v9980_v8  ;;  %v4833_v8 = vld [vmem:[%s11703_s9 + $0x88] sm:$0xff] }
 0x3aa   : > { %12053 = vst [vmem:[#allocation7_spill] sm:$0xff] %v9984_v57  ;;  %v9991_v48 = vpop.eup %7950 }
 0x3ab   : > { %12054 = vst [vmem:[#allocation51_spill] sm:$0xff] %v9991_v48  ;;  %v9995_v50 = vpop.eup %7952  ;;  %2547 = vadd.xlane.f32.xlu1 %v2546_v4  ;;  %v2531_v26 = vadd.f32 %v9991_v48, %v9984_v57 }
 0x3ac   : > { %12055 = vst [vmem:[#allocation8_spill] sm:$0xff] %v9995_v50  ;;  %v9997_v36 = vpop.eup %7954  ;;  %2529 = vadd.xlane.f32.xlu0 %v2528_v49 }
 0x3ad   : > { %12056 = vst [vmem:[#allocation55_spill] sm:$0xff] %v9997_v36  ;;  %v9999_v15 = vpop.eup %7956  ;;  %4053 = vmatmul.mubr.bf16.gmra.mxu1 %v7714_v24  ;;  %v2549_v28 = vadd.f32 %v9997_v36, %v9995_v50  ;;  %v7722_v24 = vld [vmem:[%s11701_s7 + $0x48] sm:$0xff]   ;;  %v4836_v36 = vld [vmem:[%s11703_s9 + $0xa0] sm:$0xff] }
 0x3ae   : > { %12057 = vst [vmem:[#allocation5_spill] sm:$0xff] %v9999_v15  ;;  %v10003_v33 = vpop.eup %7958  ;;  %4062 = vmatprep.mubr.bf16.mxu1 %v12006_v53  ;;  %v2510_v38 = vadd.f32 %v9999_v15, %v9967_v17  ;;  %v10028_v4 = vpop.f32.mrf.mxu0 }
 0x3af   : > { %12058 = vst [vmem:[#allocation44_spill] sm:$0xff] %v10003_v33  ;;  %v10008_v7 = vpop.eup %7960  ;;  %2550 = vadd.xlane.f32.xlu1 %v2549_v28 }
 0x3b0   : > { %12059 = vst [vmem:[#allocation6_spill] sm:$0xff] %v10008_v7  ;;  %2532 = vadd.xlane.f32.xlu0 %v2531_v26  ;;  %v10015_v23 = vpop.eup %7962  ;;  %v2540_v0 = vadd.f32 %v10008_v7, %v10003_v33  ;;  %v10039_v26 = vpop.f32.mrf.mxu0  ;;  %v7730_v33 = vld [vmem:[%s11701_s7 + $0x58] sm:$0xff]   ;;  %v4817_v7 = vld [vmem:[%s11703_s9 + $0x8] sm:$0xff] }
 0x3b1   : > { %12060 = vst [vmem:[#allocation48_spill] sm:$0xff] %v10015_v23  ;;  %v10019_v14 = vpop.eup %7964  ;;  %12066 = vst [vmem:[#allocation29_spill] sm:$0xff] %v10039_v26  ;;  %v5170_v26 = vld [vmem:[%s11705_s11 + $0x10] sm:$0xff] }
 0x3b2   : > { %12061 = vst [vmem:[#allocation4_spill] sm:$0xff] %v10019_v14  ;;  %v10021_v42 = vpop.eup %7966  ;;  %v2543_v35 = vadd.f32 %v10019_v14, %v10015_v23  ;;  %v7734_v23 = vld [vmem:[%s11701_s7 + $0x60] sm:$0xff]  }
 0x3b3   : > { %2511 = vadd.xlane.f32.xlu1 %v2510_v38  ;;  %12062 = vst [vmem:[#allocation38_spill] sm:$0xff] %v10021_v42  ;;  %v10026_v47 = vpop.eup %7968 }
 0x3b4   : > { %2541 = vadd.xlane.f32.xlu0 %v2540_v0  ;;  %12063 = vst [vmem:[#allocation82_spill] sm:$0xff] %v10026_v47  ;;  %v10033_v5 = vpop.eup %7970  ;;  %v2552_v49 = vadd.f32 %v10026_v47, %v10021_v42  ;;  %v4831_v0 = vld [vmem:[%s11703_s9 + $0x78] sm:$0xff]  ;;  %v4845_v42 = vld [vmem:[%s11703_s9 + $0xe8] sm:$0xff] }
 0x3b5   : > { %4063 = vmatmul.mubr.bf16.gmra.mxu1 %v7718_v27  ;;  %12064 = vst [vmem:[#allocation80_spill] sm:$0xff] %v10033_v5  ;;  %v10037_v28 = vpop.eup %7972  ;;  %v10044_v27 = vpop.f32.mrf.mxu0 }
 0x3b6   : > { %4072 = vmatprep.mubr.bf16.mxu1 %v12006_v53  ;;  %12065 = vst [vmem:[#allocation3_spill] sm:$0xff] %v10037_v28  ;;  %v2507_v38 = vadd.f32 %v10037_v28, %v10033_v5  ;;  %v5174_v5 = vld [vmem:[%s11705_s11 + $0x30] sm:$0xff] }
 0x3b7   : > { %v10052_v48 = vpop.f32.mrf.mxu0 }
 0x3b8   : > { %2544 = vadd.xlane.f32.xlu0 %v2543_v35  ;;  %v7726_v35 = vld [vmem:[%s11701_s7 + $0x50] sm:$0xff]   ;;  %12067 = vst [vmem:[#allocation81_spill] sm:$0xff] %v10052_v48 }
 0x3bc   : > { %2553 = vadd.xlane.f32.xlu0 %v2552_v49  ;;  %v10058_v49 = vpop.f32.mrf.mxu0 }
 0x3bd   : > { %4073 = vmatmul.mubr.bf16.gmra.mxu1 %v7722_v24  ;;  %v4828_v24 = vld [vmem:[%s11703_s9 + $0x60] sm:$0xff] }
 0x3be   : > { %4082 = vmatprep.mubr.bf16.mxu1 %v12006_v53  ;;  %v10066_v57 = vpop.f32.mrf.mxu0 }
 0x3bf   : > { %12068 = vst [vmem:[#allocation75_spill] sm:$0xff] %v10066_v57 }
 0x3c0   : > { %2508 = vadd.xlane.f32.xlu0 %v2507_v38  ;;  %v4829_v38 = vld [vmem:[%s11703_s9 + $0x68] sm:$0xff]  ;;  %v10177_v32 = vpop.xlane.xlu1 %2460 }
 0x3c4   : > { %4925 = vperm.xlu1 %7229, %v4831_v0   ;;  %v4824_v0 = vld [vmem:[%s11703_s9 + $0x40] sm:$0xff] }
 0x3c5   : > { %4083 = vmatmul.mubr.bf16.gmra.mxu1 %v7726_v35  ;;  %v10072_v35 = vpop.f32.mrf.mxu0 }
 0x3c6   : > { %4092 = vmatprep.mubr.bf16.mxu1 %v12006_v53 }
 0x3c8   : > { %4910 = vperm.xlu1 %7229, %v4828_v24   ;;  %v4825_v24 = vld [vmem:[%s11703_s9 + $0x48] sm:$0xff] }
 0x3cc   : > { %4915 = vperm.xlu1 %7229, %v4829_v38   ;;  %v10083_v38 = vpop.f32.mrf.mxu0 }
 0x3cd   : > { %4093 = vmatmul.mubr.bf16.gmra.mxu1 %v7730_v33  ;;  %v4843_v33 = vld [vmem:[%s11703_s9 + $0xd8] sm:$0xff]  ;;  %12069 = vst [vmem:[#allocation78_spill] sm:$0xff] %v10083_v38 }
 0x3ce   : > { %4102 = vmatprep.mubr.bf16.mxu1 %v12006_v53  ;;  %v10092_v47 = vpop.f32.mrf.mxu0 }
 0x3cf   : > { %12070 = vst [vmem:[#allocation28_spill] sm:$0xff] %v10092_v47  ;;  %v5172_v47 = vld [vmem:[%s11705_s11 + $0x20] sm:$0xff] }
 0x3d0   : > { %4890 = vperm.xlu1 %7229, %v4824_v0   ;;  %v4820_v0 = vld [vmem:[%s11703_s9 + $0x20] sm:$0xff] }
 0x3d4   : > { %4895 = vperm.xlu1 %7229, %v4825_v24   ;;  %v4835_v24 = vld [vmem:[%s11703_s9 + $0x98] sm:$0xff] }
 0x3d5   : > { %4103 = vmatmul.mubr.bf16.gmra.mxu1 %v7734_v23  ;;  %v7738_v23 = vld [vmem:[%s11701_s7 + $0x68] sm:$0xff]  }
 0x3d6   : > { %4985 = vperm.xlu0 %7228, %v4843_v33   ;;  %4112 = vmatprep.mubr.bf16.mxu1 %v12006_v53  ;;  %v10103_v33 = vpop.f32.mrf.mxu0 }
 0x3d7   : > { %12071 = vst [vmem:[#allocation30_spill] sm:$0xff] %v10103_v33 }
 0x3d8   : > { %4870 = vperm.xlu1 %7229, %v4820_v0   ;;  %v4816_v0 = vld [vmem:[%s11703_s9] sm:$0xff] }
 0x3da   : > { %4955 = vperm.xlu0 %7228, %v4837_v6   ;;  %v10112_v6 = vpop.f32.mrf.mxu0 }
 0x3db   : > { %12072 = vst [vmem:[#allocation72_spill] sm:$0xff] %v10112_v6 }
 0x3dc   : > { %4875 = vperm.xlu1 %7229, %v4821_v46   ;;  %v7742_v46 = vld [vmem:[%s11701_s7 + $0x70] sm:$0xff]  }
 0x3dd   : > { %4113 = vmatmul.mubr.bf16.gmra.mxu1 %v7738_v23  ;;  %v5169_v23 = vld [vmem:[%s11705_s11 + $0x8] sm:$0xff] }
 0x3de   : > { %4945 = vperm.xlu0 %7228, %v4835_v24   ;;  %4122 = vmatprep.mubr.bf16.mxu1 %v12006_v53  ;;  %v10123_v24 = vpop.f32.mrf.mxu0 }
 0x3df   : > { %12073 = vst [vmem:[#allocation79_spill] sm:$0xff] %v10123_v24  ;;  %v12103_v24 = vld [vmem:[#allocation87_spill] sm:$0xff] }
 0x3e0   : > { %4850 = vperm.xlu1 %7229, %v4816_v0   ;;  %v4844_v0 = vld [vmem:[%s11703_s9 + $0xe0] sm:$0xff] }
 0x3e2   : > { %4935 = vperm.xlu0 %7228, %v4833_v8   ;;  %v10132_v8 = vpop.f32.mrf.mxu0 }
 0x3e3   : > { %12074 = vst [vmem:[#allocation76_spill] sm:$0xff] %v10132_v8 }
 0x3e4   : > { %4855 = vperm.xlu1 %7229, %v4817_v7   ;;  %v7746_v7 = vld [vmem:[%s11701_s7 + $0x78] sm:$0xff]  }
 0x3e5   : > { %4123 = vmatmul.mubr.bf16.gmra.mxu1 %v7742_v46  ;;  %v10143_v46 = vpop.f32.mrf.mxu0 }
 0x3e6   : > { %5239 = vperm.xlu0 %7228, %v5169_v23   ;;  %4132 = vmatprep.mubr.bf16.mxu1 %v12006_v53  ;;  %v5173_v53 = vld [vmem:[%s11705_s11 + $0x28] sm:$0xff]  ;;  %12075 = vst [vmem:[#allocation74_spill] sm:$0xff] %v10143_v46  ;;  %v4842_v23 = vld [vmem:[%s11703_s9 + $0xd0] sm:$0xff] }
 0x3e7   : > { %v10151_v14 = vpop.f32.mrf.mxu0 }
 0x3e8   : > { %4990 = vperm.xlu1 %7229, %v4844_v0   ;;  %v5175_v0 = vld [vmem:[%s11705_s11 + $0x38] sm:$0xff]  ;;  %12076 = vst [vmem:[#allocation71_spill] sm:$0xff] %v10151_v14 }
 0x3ea   : > { %5249 = vperm.xlu0 %7228, %v5171_v13   ;;  %v4840_v13 = vld [vmem:[%s11703_s9 + $0xc0] sm:$0xff] }
 0x3ec   : > { %4995 = vperm.xlu1 %7229, %v4845_v42   ;;  %v5177_v42 = vld [vmem:[%s11705_s11 + $0x48] sm:$0xff] }
 0x3ed   : > { %4133 = vmatmul.mubr.bf16.gmra.mxu1 %v7746_v7  ;;  %v10159_v7 = vpop.f32.mrf.mxu0 }
 0x3ee   : > { %5259 = vperm.xlu0 %7228, %v5173_v53   ;;  %12077 = vst [vmem:[#allocation35_spill] sm:$0xff] %v10159_v7  ;;  %v4841_v53 = vld [vmem:[%s11703_s9 + $0xc8] sm:$0xff]  ;;  %v5178_v7 = vld [vmem:[%s11705_s11 + $0x50] sm:$0xff] }
 0x3ef   : > { %v10167_v50 = vpop.f32.mrf.mxu0 }
 0x3f0   : > { %4980 = vperm.xlu1 %7229, %v4842_v23   ;;  %v5179_v23 = vld [vmem:[%s11705_s11 + $0x58] sm:$0xff]  ;;  %12078 = vst [vmem:[#allocation36_spill] sm:$0xff] %v10167_v50 }
 0x3f1   : > { %v10175_v25 = vpop.f32.mrf.mxu0 }
 0x3f2   : > { %5269 = vperm.xlu0 %7228, %v5175_v0   ;;  %v4838_v0 = vld [vmem:[%s11703_s9 + $0xb0] sm:$0xff]  ;;  %12079 = vst [vmem:[#allocation37_spill] sm:$0xff] %v10175_v25 }
 0x3f3   : > { %v10185_v31 = vpop.f32.mrf.mxu0 }
 0x3f4   : > { %4970 = vperm.xlu1 %7229, %v4840_v13   ;;  %v5181_v13 = vld [vmem:[%s11705_s11 + $0x68] sm:$0xff]  ;;  %12080 = vst [vmem:[#allocation39_spill] sm:$0xff] %v10185_v31 }
 0x3f5   : > { %v10195_v37 = vpop.f32.mrf.mxu0 }
 0x3f6   : > { %5279 = vperm.xlu0 %7228, %v5177_v42   ;;  %v4839_v42 = vld [vmem:[%s11703_s9 + $0xb8] sm:$0xff]  ;;  %12081 = vst [vmem:[#allocation46_spill] sm:$0xff] %v10195_v37  ;;  %v5180_v37 = vld [vmem:[%s11705_s11 + $0x60] sm:$0xff] }
 0x3f7   : > { %v10205_v22 = vpop.f32.mrf.mxu0 }
 0x3f8   : > { %4975 = vperm.xlu1 %7229, %v4841_v53   ;;  %v5183_v53 = vld [vmem:[%s11705_s11 + $0x78] sm:$0xff]  ;;  %12082 = vst [vmem:[#allocation49_spill] sm:$0xff] %v10205_v22 }
 0x3f9   : > { %v10215_v58 = vpop.f32.mrf.mxu0 }
 0x3fa   : > { %5289 = vperm.xlu0 %7228, %v5179_v23   ;;  %v10187_v23 = vpop.xlane.xlu1 %2469  ;;  %12083 = vst [vmem:[#allocation31_spill] sm:$0xff] %v10215_v58 }
 0x3fb   : > { %v10225_v21 = vpop.f32.mrf.mxu0 }
 0x3fc   : > { %4960 = vperm.xlu1 %7229, %v4838_v0   ;;  %v5185_v0 = vld [vmem:[%s11705_s11 + $0x88] sm:$0xff]  ;;  %12084 = vst [vmem:[#allocation32_spill] sm:$0xff] %v10225_v21 }
 0x3fd   : > { %v10235_v48 = vpop.f32.mrf.mxu0 }
 0x3fe   : > { %5299 = vperm.xlu0 %7228, %v5181_v13   ;;  %v10197_v13 = vpop.xlane.xlu1 %2475  ;;  %12085 = vst [vmem:[#allocation50_spill] sm:$0xff] %v10235_v48 }
 0x3ff   : > { %v10245_v28 = vpop.f32.mrf.mxu0 }
 0x400   : > { %4965 = vperm.xlu1 %7229, %v4839_v42   ;;  %v5187_v42 = vld [vmem:[%s11705_s11 + $0x98] sm:$0xff]  ;;  %12086 = vst [vmem:[#allocation52_spill] sm:$0xff] %v10245_v28 }
 0x401   : > { %v10255_v31 = vpop.f32.mrf.mxu0 }
 0x402   : > { %5309 = vperm.xlu0 %7228, %v5183_v53   ;;  %v10207_v53 = vpop.xlane.xlu1 %2481  ;;  %12087 = vst [vmem:[#allocation33_spill] sm:$0xff] %v10255_v31 }
 0x403   : > { %v10267_v22 = vpop.f32.mrf.mxu0 }
 0x404   : > { %4950 = vperm.xlu1 %7229, %v4836_v36   ;;  %v5189_v36 = vld [vmem:[%s11705_s11 + $0xa8] sm:$0xff]  ;;  %12088 = vst [vmem:[#allocation34_spill] sm:$0xff] %v10267_v22 }
 0x406   : > { %5319 = vperm.xlu0 %7228, %v5185_v0   ;;  %v10217_v0 = vpop.xlane.xlu1 %2487 }
 0x408   : > { %4940 = vperm.xlu1 %7229, %v4834_v60   ;;  %v5191_v60 = vld [vmem:[%s11705_s11 + $0xb8] sm:$0xff] }
 0x40a   : > { %5329 = vperm.xlu0 %7228, %v5187_v42   ;;  %v10227_v42 = vpop.xlane.xlu1 %2493 }
 0x40c   : > { %4930 = vperm.xlu1 %7229, %v4832_v39   ;;  %v5193_v39 = vld [vmem:[%s11705_s11 + $0xc8] sm:$0xff] }
 0x40e   : > { %5339 = vperm.xlu0 %7228, %v5189_v36   ;;  %v10237_v36 = vpop.xlane.xlu1 %2499 }
 0x410   : > { %5234 = vperm.xlu1 %7229, %v5168_v29   ;;  %v5195_v29 = vld [vmem:[%s11705_s11 + $0xd8] sm:$0xff] }
 0x412   : > { %5349 = vperm.xlu0 %7228, %v5191_v60   ;;  %v10247_v60 = vpop.xlane.xlu1 %2505 }
 0x414   : > { %5244 = vperm.xlu1 %7229, %v5170_v26   ;;  %v5197_v26 = vld [vmem:[%s11705_s11 + $0xe8] sm:$0xff] }
 0x416   : > { %5359 = vperm.xlu0 %7228, %v5193_v39   ;;  %v10257_v39 = vpop.xlane.xlu0 %2463  ;;  %v10259_v50 = vpop.xlane.xlu1 %2514 }
 0x418   : > { %5254 = vperm.xlu1 %7229, %v5172_v47   ;;  %v5176_v47 = vld [vmem:[%s11705_s11 + $0x40] sm:$0xff] }
 0x41a   : > { %5369 = vperm.xlu0 %7228, %v5195_v29   ;;  %v5199_v29 = vld [vmem:[%s11705_s11 + $0xf8] sm:$0xff]  ;;  %v10269_v25 = vpop.xlane.xlu1 %2523  ;;  %v2467_v21 = vpop.xlane.xlu0 %2466 }
 0x41b   : > { %12089 = vst [vmem:[#allocation26_spill] sm:$0xff] %v10269_v25  ;;  %7974 = vrcp.f32 %v2467_v21  ;;  %v5186_v21 = vld [vmem:[%s11705_s11 + $0x90] sm:$0xff] }
 0x41c   : > { %5264 = vperm.xlu1 %7229, %v5174_v5   ;;  %v5201_v5 = vld [vmem:[%s11705_s11 + $0x108] sm:$0xff]  ;;  %7976 = vrcp.f32 %v10187_v23 }
 0x41d   : > { %7978 = vrcp.f32 %v10177_v32  ;;  %v5221_v32 = vld [vmem:[%s11705_s11 + $0x1a8] sm:$0xff] }
 0x41e   : > { %5379 = vperm.xlu0 %7228, %v5197_v26   ;;  %v10277_v26 = vpop.f32.mrf.mxu0  ;;  %v10282_v58 = vpop.xlane.xlu0 %2472  ;;  %7980 = vrcp.f32 %v10257_v39  ;;  %v5200_v39 = vld [vmem:[%s11705_s11 + $0x100] sm:$0xff] }
 0x41f   : > { %12090 = vst [vmem:[#allocation40_spill] sm:$0xff] %v10277_v26  ;;  %v5190_v26 = vld [vmem:[%s11705_s11 + $0xb0] sm:$0xff]  ;;  %7982 = vrcp.f32 %v10282_v58  ;;  %v5225_v58 = vld [vmem:[%s11705_s11 + $0x1c8] sm:$0xff] }
 0x420   : > { %5274 = vperm.xlu1 %7229, %v5176_v47   ;;  %v10284_v47 = vpop.xlane.xlu1 %2526  ;;  %v10289_v25 = vpop.f32.mrf.mxu0  ;;  %7984 = vrcp.f32 %v10197_v13 }
 0x421   : > { %12091 = vst [vmem:[#allocation41_spill] sm:$0xff] %v10284_v47  ;;  %12092 = vst [vmem:[#allocation43_spill] sm:$0xff] %v10289_v25 }
 0x422   : > { %5389 = vperm.xlu0 %7228, %v5199_v29   ;;  %v5203_v29 = vld [vmem:[%s11705_s11 + $0x118] sm:$0xff]  ;;  %v10294_v28 = vpop.xlane.xlu0 %2478  ;;  %v10301_v47 = vpop.f32.mrf.mxu0 }
 0x423   : > { %12094 = vst [vmem:[#allocation60_spill] sm:$0xff] %v10301_v47  ;;  %7986 = vrcp.f32 %v10294_v28 }
 0x424   : > { %5284 = vperm.xlu1 %7229, %v5178_v7   ;;  %v5182_v7 = vld [vmem:[%s11705_s11 + $0x70] sm:$0xff]  ;;  %v10296_v48 = vpop.xlane.xlu1 %2535  ;;  %7988 = vrcp.f32 %v10207_v53  ;;  %v5204_v53 = vld [vmem:[%s11705_s11 + $0x120] sm:$0xff] }
 0x425   : > { %12093 = vst [vmem:[#allocation45_spill] sm:$0xff] %v10296_v48  ;;  %v5207_v48 = vld [vmem:[%s11705_s11 + $0x138] sm:$0xff] }
 0x426   : > { %5399 = vperm.xlu0 %7228, %v5201_v5   ;;  %v5205_v5 = vld [vmem:[%s11705_s11 + $0x128] sm:$0xff]  ;;  %v10306_v22 = vpop.xlane.xlu0 %2484 }
 0x427   : > { %7990 = vrcp.f32 %v10306_v22 }
 0x428   : > { %5294 = vperm.xlu1 %7229, %v5180_v37   ;;  %v5184_v37 = vld [vmem:[%s11705_s11 + $0x80] sm:$0xff]  ;;  %v10314_v31 = vpop.xlane.xlu1 %2538  ;;  %7992 = vrcp.f32 %v10217_v0 }
 0x429   : > { %12096 = vst [vmem:[#allocation27_spill] sm:$0xff] %v10314_v31 }
 0x42a   : > { %5409 = vperm.xlu0 %7228, %v5203_v29   ;;  %v10311_v29 = vpop.f32.mrf.mxu0 }
 0x42b   : > { %12095 = vst [vmem:[#allocation62_spill] sm:$0xff] %v10311_v29 }
 0x42c   : > { %5304 = vperm.xlu1 %7229, %v5182_v7   ;;  %v10319_v7 = vpop.xlane.xlu0 %2490  ;;  %v10324_v25 = vpop.f32.mrf.mxu0 }
 0x42d   : > { %12097 = vst [vmem:[#allocation54_spill] sm:$0xff] %v10324_v25  ;;  %7994 = vrcp.f32 %v10319_v7 }
 0x42e   : > { %5419 = vperm.xlu0 %7228, %v5205_v5   ;;  %v5209_v5 = vld [vmem:[%s11705_s11 + $0x148] sm:$0xff]  ;;  %v10340_v47 = vpop.f32.mrf.mxu0  ;;  %7996 = vrcp.f32 %v10227_v42 }
 0x42f   : > { %12100 = vst [vmem:[#allocation66_spill] sm:$0xff] %v10340_v47  ;;  %v5213_v47 = vld [vmem:[%s11705_s11 + $0x168] sm:$0xff] }
 0x430   : > { %5314 = vperm.xlu1 %7229, %v5184_v37   ;;  %v5188_v37 = vld [vmem:[%s11705_s11 + $0xa0] sm:$0xff]  ;;  %v10333_v31 = vpop.xlane.xlu0 %2496 }
 0x431   : > { %7998 = vrcp.f32 %v10333_v31  ;;  %v7752_v31 = vld [vmem:[%s11704_s10 + $0x4] ss:$8 sps:$4 sm:$0xff]  }
 0x432   : > { %5429 = vperm.xlu0 %7228, %v5207_v48   ;;  %v5211_v48 = vld [vmem:[%s11705_s11 + $0x158] sm:$0xff]  ;;  %8000 = vrcp.f32 %v10237_v36  ;;  %v7755_v36 = vld [vmem:[%s11704_s10 + $0xc4] ss:$8 sps:$4 sm:$0xff]   ;;  %5904 = vmatprep.mubr.bf16.mxu0 %v7752_v31 }
 0x433   : > { %6024 = vmatprep.mubr.bf16.mxu1 %v7755_v36  ;;  %v5231_v36 = vld [vmem:[%s11705_s11 + $0x1f8] sm:$0xff] }
 0x434   : > { %5324 = vperm.xlu1 %7229, %v5186_v21   ;;  %v10326_v14 = vpop.xlane.xlu1 %2547 }
 0x435   : > { %12098 = vst [vmem:[#allocation56_spill] sm:$0xff] %v10326_v14  ;;  %v10328_v23 = vpop.f32.mrf.mxu1  ;;  %v10344_v14 = vpop.eup %7974 }
 0x436   : > { %5439 = vperm.xlu0 %7228, %v5209_v5   ;;  %v10351_v5 = vpop.xlane.xlu0 %2502  ;;  %v2591_v6 = vmul.f32 %v10344_v14, %v12103_v24  ;;  %v10364_v15 = vpop.eup %7976 }
 0x437   : > { %v10335_v29 = vpop.f32.mrf.mxu1  ;;  %v2593_v8 = vmul.f32 %v10364_v15, %v9628_v12  ;;  %8002 = vrcp.f32 %v10351_v5 }
 0x438   : > { %12099 = vst [vmem:[#allocation64_spill] sm:$0xff] %v10335_v29  ;;  %5334 = vperm.xlu1 %7229, %v5188_v37   ;;  %v10342_v21 = vpop.xlane.xlu1 %2550  ;;  %v10358_v37 = vpop.f32.mrf.mxu0  ;;  %8004 = vrcp.f32 %v10247_v60 }
 0x439   : > { %12101 = vst [vmem:[#allocation57_spill] sm:$0xff] %v10342_v21  ;;  %v10346_v25 = vpop.f32.mrf.mxu1  ;;  %12102 = vst [vmem:[#allocation59_spill] sm:$0xff] %v10358_v37  ;;  %8006 = vrcp.f32 %v10259_v50 }
 0x43a   : > { %5449 = vperm.xlu0 %7228, %v5211_v48   ;;  %v5192_v48 = vld [vmem:[%s11705_s11 + $0xc0] sm:$0xff]  ;;  %v10369_v33 = vpop.permute.xlu0 %5005  ;;  %v10376_v37 = vpop.f32.mrf.mxu0 }
 0x43b   : > { %v10353_v29 = vpop.f32.mrf.mxu1  ;;  %12104 = vst [vmem:[#allocation67_spill] sm:$0xff] %v10369_v33  ;;  %12105 = vst [vmem:[#allocation70_spill] sm:$0xff] %v10376_v37 }
 0x43c   : > { %5344 = vperm.xlu1 %7229, %v5190_v26   ;;  %v10360_v21 = vpop.xlane.xlu1 %2511  ;;  %v5215_v26 = vld [vmem:[%s11705_s11 + $0x178] sm:$0xff]  ;;  %v10393_v37 = vpop.f32.mrf.mxu0 }
 0x43d   : > { %v3994_v17 = vpop.f32.mrf.mxu1  ;;  %12107 = vst [vmem:[#allocation25_spill] sm:$0xff] %v10393_v37 }
 0x43e   : > { %v4692_v38 = vadd.f32 %v3994_v17, %v2591_v6  ;;  %5459 = vperm.xlu0 %7228, %v5213_v47   ;;  %v5194_v17 = vld [vmem:[%s11705_s11 + $0xd0] sm:$0xff]  ;;  %v10385_v6 = vpop.xlane.xlu0 %2517 }
 0x43f   : > { %v10371_v46 = vpop.f32.mrf.mxu1  ;;  %8008 = vrcp.f32 %v10385_v6 }
 0x440   : > { %5354 = vperm.xlu1 %7229, %v5192_v48   ;;  %v10378_v24 = vpop.permute.xlu1 %4925  ;;  %v4756_v47 = vadd.f32 %v4692_v38, %v10058_v49  ;;  %v5217_v48 = vld [vmem:[%s11705_s11 + $0x188] sm:$0xff] }
 0x441   : > { %12106 = vst [vmem:[#allocation24_spill] sm:$0xff] %v10378_v24  ;;  %v3998_v54 = vpop.f32.mrf.mxu1  ;;  %v12109_v49 = vld [vmem:[#allocation68_spill] sm:$0xff] }
 0x442   : > { %v4694_v33 = vadd.f32 %v3998_v54, %v2593_v8  ;;  %5469 = vperm.xlu0 %7228, %v5215_v26   ;;  %v5196_v54 = vld [vmem:[%s11705_s11 + $0xe0] sm:$0xff]  ;;  %v5012_v38 = vadd.f32 %v12109_v49, %v4756_v47  ;;  %v12110_v8 = vld [vmem:[#allocation73_spill] sm:$0xff] }
 0x443   : > { %v10388_v57 = vpop.f32.mrf.mxu1 }
 0x444   : > { %v4758_v12 = vadd.f32 %v4694_v33, %v10072_v35  ;;  %5364 = vperm.xlu1 %7229, %v5194_v17   ;;  %v10396_v24 = vpop.permute.xlu1 %4910  ;;  %v5219_v35 = vld [vmem:[%s11705_s11 + $0x198] sm:$0xff]  ;;  %v10410_v33 = vpop.f32.mrf.mxu0 }
 0x445   : > { %12108 = vst [vmem:[#allocation87_spill] sm:$0xff] %v10396_v24  ;;  %v10398_v18 = vpop.f32.mrf.mxu1  ;;  %12111 = vst [vmem:[#allocation92_spill] sm:$0xff] %v10410_v33  ;;  %v10413_v17 = vpop.xlane.xlu0 %2520  ;;  %v5206_v33 = vld [vmem:[%s11705_s11 + $0x130] sm:$0xff] }
 0x446   : > { %v5014_v26 = vadd.f32 %v12110_v8, %v4758_v12  ;;  %5479 = vperm.xlu0 %7228, %v5217_v48   ;;  %12112 = vst [vmem:[#allocation93_spill] sm:$0xff] %v10413_v17  ;;  %v5198_v48 = vld [vmem:[%s11705_s11 + $0xf0] sm:$0xff] }
 0x447   : > { %v10405_v45 = vpop.f32.mrf.mxu1 }
 0x448   : > { %v10415_v37 = vpack.c.bf16 %v5014_v26, %v5012_v38  ;;  %5374 = vperm.xlu1 %7229, %v5196_v54   ;;  %v10417_v24 = vpop.permute.xlu1 %4915  ;;  %v10430_v38 = vpop.f32.mrf.mxu0 }
 0x449   : > { %12114 = vst [vmem:[#allocation95_spill] sm:$0xff] %v10417_v24  ;;  %v10420_v47 = vpop.f32.mrf.mxu1  ;;  %12115 = vst [vmem:[#allocation96_spill] sm:$0xff] %v10430_v38  ;;  %v10439_v17 = vpop.xlane.xlu0 %2529  ;;  %v12146_v24 = vld [vmem:[#allocation90_spill] sm:$0xff] }
 0x44a   : > { %12113 = vst [vmem:[#allocation94_spill] sm:$0xff] %v10415_v37  ;;  %5489 = vperm.xlu0 %7228, %v5219_v35   ;;  %12117 = vst [vmem:[#allocation98_spill] sm:$0xff] %v10439_v17  ;;  %v5223_v37 = vld [vmem:[%s11705_s11 + $0x1b8] sm:$0xff]  ;;  %v10446_v49 = vpop.f32.mrf.mxu0 }
 0x44b   : > { %v10425_v12 = vpop.f32.mrf.mxu1  ;;  %12118 = vst [vmem:[#allocation99_spill] sm:$0xff] %v10446_v49  ;;  %v10471_v49 = vpop.eup %7978  ;;  %8010 = vrcp.f32 %v10360_v21 }
 0x44c   : > { %5384 = vperm.xlu1 %7229, %v5198_v48   ;;  %v10432_v54 = vpop.permute.xlu1 %4890 }
 0x44d   : > { %12116 = vst [vmem:[#allocation97_spill] sm:$0xff] %v10432_v54  ;;  %v10434_v26 = vpop.f32.mrf.mxu1  ;;  %v10467_v13 = vpop.xlane.xlu0 %2532 }
 0x44e   : > { %5499 = vperm.xlu0 %7228, %v5221_v32   ;;  %v5202_v32 = vld [vmem:[%s11705_s11 + $0x110] sm:$0xff]  ;;  %12121 = vst [vmem:[#allocation102_spill] sm:$0xff] %v10467_v13 }
 0x44f   : > { %v10441_v35 = vpop.f32.mrf.mxu1 }
 0x450   : > { %5394 = vperm.xlu1 %7229, %v5200_v39   ;;  %v10449_v48 = vpop.permute.xlu1 %4895  ;;  %v10464_v39 = vpop.f32.mrf.mxu0 }
 0x451   : > { %12119 = vst [vmem:[#allocation100_spill] sm:$0xff] %v10449_v48  ;;  %v10452_v8 = vpop.f32.mrf.mxu1  ;;  %12120 = vst [vmem:[#allocation101_spill] sm:$0xff] %v10464_v39 }
 0x452   : > { %5509 = vperm.xlu0 %7228, %v5223_v37   ;;  %v10479_v37 = vpop.eup %7980  ;;  %v10488_v0 = vpop.f32.mrf.mxu0 }
 0x453   : > { %v10459_v17 = vpop.f32.mrf.mxu1  ;;  %12124 = vst [vmem:[#allocation105_spill] sm:$0xff] %v10488_v0  ;;  %v7983_v60 = vpop.eup %7982 }
 0x454   : > { %5404 = vperm.xlu1 %7229, %v5202_v32   ;;  %v10469_v38 = vpop.permute.xlu1 %4870  ;;  %v5227_v32 = vld [vmem:[%s11705_s11 + $0x1d8] sm:$0xff]  ;;  %v10520_v5 = vpop.f32.mrf.mxu0 }
 0x455   : > { %12122 = vst [vmem:[#allocation103_spill] sm:$0xff] %v10469_v38  ;;  %v10474_v28 = vpop.f32.mrf.mxu1  ;;  %v12126_v38 = vld [vmem:[#allocation83_spill] sm:$0xff]  ;;  %12131 = vst [vmem:[#allocation108_spill] sm:$0xff] %v10520_v5 }
 0x456   : > { %5519 = vperm.xlu0 %7228, %v5225_v58   ;;  %v2587_v7 = vmul.f32 %v10471_v49, %v12126_v38  ;;  %v12127_v58 = vld [vmem:[#allocation85_spill] sm:$0xff]  ;;  %v10538_v6 = vpop.f32.mrf.mxu0 }
 0x457   : > { %v10483_v22 = vpop.f32.mrf.mxu1  ;;  %v2589_v42 = vmul.f32 %v10479_v37, %v12127_v58  ;;  %12134 = vst [vmem:[#allocation111_spill] sm:$0xff] %v10538_v6 }
 0x458   : > { %12123 = vst [vmem:[#allocation104_spill] sm:$0xff] %v10483_v22  ;;  %5414 = vperm.xlu1 %7229, %v5204_v53   ;;  %v10491_v13 = vpop.permute.xlu1 %4875  ;;  %v10507_v53 = vpop.xlane.xlu0 %2541  ;;  %v4688_v38 = vadd.f32 %v10328_v23, %v2587_v7 }
 0x459   : > { %12125 = vst [vmem:[#allocation106_spill] sm:$0xff] %v10491_v13  ;;  %v10498_v39 = vpop.f32.mrf.mxu1  ;;  %12129 = vst [vmem:[#allocation85_spill] sm:$0xff] %v10507_v53  ;;  %v4690_v58 = vadd.f32 %v10346_v25, %v2589_v42  ;;  %v5229_v13 = vld [vmem:[%s11705_s11 + $0x1e8] sm:$0xff]  ;;  %v5208_v25 = vld [vmem:[%s11705_s11 + $0x140] sm:$0xff]  ;;  %v7985_v7 = vpop.eup %7984 }
 0x45a   : > { %12128 = vst [vmem:[#allocation83_spill] sm:$0xff] %v10498_v39  ;;  %5529 = vperm.xlu0 %7228, %v5227_v32   ;;  %v7987_v42 = vpop.eup %7986  ;;  %v4752_v31 = vadd.f32 %v4688_v38, %v10028_v4  ;;  %v10556_v39 = vpop.f32.mrf.mxu0 }
 0x45b   : > { %v10515_v0 = vpop.f32.mrf.mxu1  ;;  %v4754_v50 = vadd.f32 %v4690_v58, %v10044_v27  ;;  %v7989_v5 = vpop.eup %7988  ;;  %v5210_v58 = vld [vmem:[%s11705_s11 + $0x150] sm:$0xff]  ;;  %12139 = vst [vmem:[#allocation116_spill] sm:$0xff] %v10556_v39  ;;  %v2595_v39 = vmul.f32 %v7983_v60, %v12146_v24  ;;  %v2600_v24 = vmul.f32 %v7987_v42, %v9680_v62 }
 0x45c   : > { %12130 = vst [vmem:[#allocation107_spill] sm:$0xff] %v10515_v0  ;;  %5424 = vperm.xlu1 %7229, %v5206_v33   ;;  %v10523_v32 = vpop.permute.xlu1 %4850  ;;  %v10540_v53 = vpop.xlane.xlu0 %2544 }
 0x45d   : > { %12132 = vst [vmem:[#allocation109_spill] sm:$0xff] %v10523_v32  ;;  %v10526_v23 = vpop.f32.mrf.mxu1  ;;  %12135 = vst [vmem:[#allocation112_spill] sm:$0xff] %v10540_v53  ;;  %v5008_v4 = vadd.f32 %v10523_v32, %v4752_v31 }
 0x45e   : > { %12133 = vst [vmem:[#allocation110_spill] sm:$0xff] %v10526_v23  ;;  %5539 = vperm.xlu0 %7228, %v5229_v13   ;;  %v7991_v13 = vpop.eup %7990  ;;  %v12140_v23 = vld [vmem:[#allocation84_spill] sm:$0xff] }
 0x45f   : > { %v10533_v33 = vpop.f32.mrf.mxu1  ;;  %v7993_v6 = vpop.eup %7992  ;;  %v10560_v31 = vmul.f32 %v10471_v49, %v12140_v23  ;;  %v5212_v49 = vld [vmem:[%s11705_s11 + $0x160] sm:$0xff]  ;;  %v10588_v0 = vmul.f32 %v7991_v13, %v9721_v52 }
 0x460   : > { %5434 = vperm.xlu1 %7229, %v5208_v25   ;;  %v10542_v54 = vpop.permute.xlu1 %4855  ;;  %v7995_v48 = vpop.eup %7994  ;;  %v10601_v62 = vmul.f32 %v7993_v6, %v9748_v44 }
 0x461   : > { %12136 = vst [vmem:[#allocation113_spill] sm:$0xff] %v10542_v54  ;;  %v5010_v27 = vadd.f32 %v10542_v54, %v4754_v50  ;;  %v10547_v38 = vpop.f32.mrf.mxu1  ;;  %v7997_v21 = vpop.eup %7996  ;;  %12141 = vst [vmem:[#allocation84_spill] sm:$0xff] %v10560_v31  ;;  %v12143_v54 = vld [vmem:[#allocation86_spill] sm:$0xff] }
 0x462   : > { %12137 = vst [vmem:[#allocation114_spill] sm:$0xff] %v10547_v38  ;;  %5549 = vperm.xlu0 %7228, %v5231_v36   ;;  %v7999_v32 = vpop.eup %7998  ;;  %v2590_v22 = vmul.f32 %v10479_v37, %v12143_v54  ;;  %v12144_v36 = vld [vmem:[#allocation88_spill] sm:$0xff]  ;;  %v2597_v54 = vmul.f32 %v7985_v7, %v9660_v3  ;;  %v2599_v37 = vmul.f32 %v7987_v42, %v9674_v41 }
 0x463   : > { %v10552_v53 = vpack.c.bf16 %v5010_v27, %v5008_v4  ;;  %v10554_v25 = vpop.f32.mrf.mxu1  ;;  %v2592_v4 = vmul.f32 %v10344_v14, %v12144_v36  ;;  %v12145_v27 = vld [vmem:[#allocation89_spill] sm:$0xff]  ;;  %v8001_v23 = vpop.eup %8000  ;;  %v2598_v14 = vmul.f32 %v7985_v7, %v9665_v43  ;;  %v2601_v36 = vmul.f32 %v7989_v5, %v9701_v20 }
 0x464   : > { %5444 = vperm.xlu1 %7229, %v5210_v58   ;;  %v10562_v50 = vpop.permute.xlu1 %4990  ;;  %v10576_v58 = vpop.xlane.xlu0 %2553  ;;  %v10595_v43 = vmul.f32 %v7991_v13, %v9726_v51  ;;  %v10598_v41 = vmul.f32 %v7993_v6, %v9737_v56  ;;  %v10604_v20 = vmul.f32 %v7995_v48, %v9762_v63  ;;  %v10612_v7 = vmul.f32 %v7997_v21, %v9781_v55  ;;  %v5214_v63 = vld [vmem:[%s11705_s11 + $0x170] sm:$0xff] }
 0x465   : > { %12138 = vst [vmem:[#allocation115_spill] sm:$0xff] %v10552_v53  ;;  %12142 = vst [vmem:[#allocation117_spill] sm:$0xff] %v10562_v50  ;;  %v2594_v53 = vmul.f32 %v10364_v15, %v12145_v27  ;;  %v10571_v38 = vpop.f32.mrf.mxu1  ;;  %v12148_v50 = vld [vmem:[#allocation91_spill] sm:$0xff]  ;;  %v8003_v15 = vpop.eup %8002  ;;  %v10585_v27 = vmul.f32 %v7989_v5, %v9710_v2  ;;  %v10609_v5 = vmul.f32 %v7995_v48, %v9770_v19 }
 0x466   : > { %12147 = vst [vmem:[#allocation86_spill] sm:$0xff] %v10576_v58  ;;  %v2596_v31 = vmul.f32 %v7983_v60, %v12148_v50  ;;  %v10592_v60 = vpop.f32.mrf.mxu0  ;;  %v8005_v3 = vpop.eup %8004  ;;  %v2610_v51 = vmul.f32 %v7997_v21, %v9792_v11  ;;  %v10616_v56 = vmul.f32 %v7999_v32, %v9806_v34  ;;  %v4693_v6 = vadd.f32 %v10371_v46, %v2592_v4  ;;  %v12154_v4 = vld [vmem:[#allocation75_spill] sm:$0xff] }
 0x467   : > { %v10590_v58 = vpop.f32.mrf.mxu1  ;;  %12149 = vst [vmem:[#allocation88_spill] sm:$0xff] %v10592_v60  ;;  %v8007_v52 = vpop.eup %8006  ;;  %v2612_v13 = vmul.f32 %v7999_v32, %v9811_v9  ;;  %v2613_v19 = vmul.f32 %v8001_v23, %v9819_v61  ;;  %v2614_v55 = vmul.f32 %v8001_v23, %v9826_v1  ;;  %v4700_v48 = vadd.f32 %v10434_v26, %v2599_v37  ;;  %v12153_v32 = vld [vmem:[#allocation21_spill] sm:$0xff]  ;;  %v12155_v23 = vld [vmem:[#allocation10_spill] sm:$0xff] }
 0x468   : > { %5454 = vperm.xlu1 %7229, %v5212_v49   ;;  %v10606_v2 = vpop.permute.xlu1 %4995  ;;  %v8009_v42 = vpop.eup %8008  ;;  %v4701_v11 = vadd.f32 %v10441_v35, %v2600_v24  ;;  %v2615_v21 = vmul.f32 %v8003_v15, %v9838_v40  ;;  %v2616_v50 = vmul.f32 %v8003_v15, %v9840_v16  ;;  %v4695_v60 = vadd.f32 %v10388_v57, %v2594_v53  ;;  %v5216_v16 = vld [vmem:[%s11705_s11 + $0x180] sm:$0xff]  ;;  %v12156_v15 = vld [vmem:[#allocation76_spill] sm:$0xff] }
 0x469   : > { %v4048_v44 = vpop.f32.mrf.mxu1  ;;  %v10629_v49 = vpop.f32.mrf.mxu0  ;;  %v4697_v46 = vadd.f32 %v10405_v45, %v2596_v31  ;;  %v2617_v1 = vmul.f32 %v8005_v3, %v9850_v30  ;;  %v2618_v26 = vmul.f32 %v8005_v3, %v9852_v59  ;;  %v10638_v35 = vadd.f32 %v10353_v29, %v2590_v22  ;;  %v12152_v45 = vld [vmem:[#allocation17_spill] sm:$0xff]  ;;  %v12157_v3 = vld [vmem:[#allocation74_spill] sm:$0xff] }
 0x46a   : > { %12150 = vst [vmem:[#allocation89_spill] sm:$0xff] %v10629_v49  ;;  %v2509_v9 = vpop.xlane.xlu0 %2508  ;;  %v10644_v57 = vmul.f32 %v8007_v52, %v9872_v10  ;;  %v10647_v53 = vmul.f32 %v8007_v52, %v12152_v45  ;;  %v10650_v31 = vmul.f32 %v8009_v42, %v12153_v32  ;;  %v8011_v30 = vpop.eup %8010  ;;  %v10653_v59 = vadd.f32 %v4693_v6, %v12154_v4  ;;  %v12158_v45 = vld [vmem:[#allocation78_spill] sm:$0xff] }
 0x46b   : > { %v4050_v34 = vpop.f32.mrf.mxu1  ;;  %v4698_v29 = vadd.f32 %v10420_v47, %v2597_v54  ;;  %v4699_v22 = vadd.f32 %v10425_v12, %v2598_v14  ;;  %v10658_v37 = vmul.f32 %v8009_v42, %v12155_v23  ;;  %v10661_v10 = vadd.f32 %v10398_v18, %v2595_v39  ;;  %v12159_v6 = vld [vmem:[#allocation30_spill] sm:$0xff]  ;;  %v10673_v14 = vpop.f32.mrf.mxu0 }
 0x46c   : > { %5464 = vperm.xlu1 %7229, %v5214_v63   ;;  %v10633_v61 = vpop.permute.xlu1 %4980  ;;  %8012 = vrcp.f32 %v2509_v9  ;;  %v4764_v24 = vadd.f32 %v4700_v48, %v12156_v15  ;;  %v4765_v52 = vadd.f32 %v4701_v11, %v12157_v3  ;;  %v10666_v32 = vadd.f32 %v4695_v60, %v12158_v45  ;;  %12161 = vst [vmem:[#allocation17_spill] sm:$0xff] %v10673_v14  ;;  %v5218_v48 = vld [vmem:[%s11705_s11 + $0x190] sm:$0xff] }
 0x46d   : > { %12151 = vst [vmem:[#allocation90_spill] sm:$0xff] %v10633_v61  ;;  %v4054_v40 = vpop.f32.mrf.mxu1  ;;  %v10669_v4 = vadd.f32 %v4697_v46, %v12159_v6  ;;  %v4715_v47 = vadd.f32 %v4050_v34, %v2614_v55  ;;  %v4702_v18 = vadd.f32 %v10452_v8, %v2601_v36  ;;  %v12162_v60 = vld [vmem:[#allocation69_spill] sm:$0xff]  ;;  %v12164_v55 = vld [vmem:[#allocation72_spill] sm:$0xff]  ;;  %v4713_v8 = vadd.f32 %v10590_v58, %v2612_v13  ;;  %v10704_v13 = vpop.f32.mrf.mxu0 }
 0x46e   : > { %v4716_v39 = vadd.f32 %v4054_v40, %v2615_v21  ;;  %v10680_v11 = vmul.f32 %v8011_v30, %v12162_v60  ;;  %v12163_v46 = vld [vmem:[#allocation5_spill] sm:$0xff]  ;;  %v10686_v34 = vadd.f32 %v4698_v29, %v12164_v55  ;;  %v12166_v21 = vld [vmem:[#allocation58_spill] sm:$0xff]  ;;  %v4711_v15 = vadd.f32 %v10554_v25, %v2610_v51  ;;  %v12168_v29 = vld [vmem:[#allocation60_spill] sm:$0xff]  ;;  %12171 = vst [vmem:[#allocation75_spill] sm:$0xff] %v10704_v13 }
 0x46f   : > { %v4056_v63 = vpop.f32.mrf.mxu1  ;;  %v10683_v9 = vmul.f32 %v8011_v30, %v12163_v46  ;;  %v10693_v40 = vadd.f32 %v12166_v21, %v4764_v24  ;;  %v10696_v23 = vadd.f32 %v12166_v21, %v4765_v52  ;;  %v4714_v3 = vadd.f32 %v4048_v44, %v2613_v19  ;;  %v12172_v25 = vld [vmem:[#allocation71_spill] sm:$0xff]  ;;  %v12179_v21 = vld [vmem:[#allocation24_spill] sm:$0xff] }
 0x470   : > { %v4717_v12 = vadd.f32 %v4056_v63, %v2616_v50  ;;  %5474 = vperm.xlu1 %7229, %v5216_v16   ;;  %v10671_v54 = vpop.permute.xlu1 %4970  ;;  %v12165_v50 = vld [vmem:[#allocation79_spill] sm:$0xff]  ;;  %v12167_v63 = vld [vmem:[#allocation40_spill] sm:$0xff]  ;;  %v4703_v24 = vadd.f32 %v10459_v17, %v10585_v27  ;;  %v10711_v51 = vadd.f32 %v4702_v18, %v12172_v25  ;;  %v4712_v44 = vadd.f32 %v10571_v38, %v10616_v56  ;;  %v12174_v27 = vld [vmem:[#allocation33_spill] sm:$0xff] }
 0x471   : > { %12160 = vst [vmem:[#allocation91_spill] sm:$0xff] %v10671_v54  ;;  %v4058_v42 = vpop.f32.mrf.mxu1  ;;  %v10689_v16 = vadd.f32 %v4699_v22, %v12165_v50  ;;  %v4779_v45 = vadd.f32 %v4715_v47, %v12167_v63  ;;  %v12169_v22 = vld [vmem:[#allocation62_spill] sm:$0xff]  ;;  %v12173_v19 = vld [vmem:[#allocation43_spill] sm:$0xff]  ;;  %v4709_v17 = vadd.f32 %v10533_v33, %v10609_v5  ;;  %v4777_v18 = vadd.f32 %v4713_v8, %v12174_v27  ;;  %v12195_v54 = vld [vmem:[#allocation53_spill] sm:$0xff] }
 0x472   : > { %v4718_v36 = vadd.f32 %v4058_v42, %v2617_v1  ;;  %v4781_v6 = vadd.f32 %v4717_v12, %v12168_v29  ;;  %v10706_v1 = vpop.permute.xlu0 %4985  ;;  %v5220_v47 = vld [vmem:[%s11705_s11 + $0x1a0] sm:$0xff]  ;;  %v4704_v12 = vadd.f32 %v10474_v28, %v10588_v0  ;;  %v12175_v42 = vld [vmem:[#allocation54_spill] sm:$0xff] }
 0x473   : > { %v4060_v30 = vpop.f32.mrf.mxu1  ;;  %v12176_v38 = vld [vmem:[#allocation107_spill] sm:$0xff]  ;;  %v12178_v50 = vld [vmem:[#allocation34_spill] sm:$0xff] }
 0x474   : > { %v4719_v60 = vadd.f32 %v4060_v30, %v2618_v26  ;;  %v4782_v46 = vadd.f32 %v4718_v36, %v12169_v22  ;;  %5484 = vperm.xlu1 %7229, %v5218_v48   ;;  %v10702_v58 = vpop.permute.xlu1 %4975  ;;  %v4780_v26 = vadd.f32 %v4716_v39, %v12173_v19  ;;  %v4707_v56 = vadd.f32 %v12176_v38, %v10601_v62  ;;  %v12177_v39 = vld [vmem:[#allocation114_spill] sm:$0xff]  ;;  %v12181_v29 = vld [vmem:[#allocation95_spill] sm:$0xff]  ;;  %v10741_v62 = vpop.f32.mrf.mxu0  ;;  %v12187_v19 = vld [vmem:[#allocation52_spill] sm:$0xff] }
 0x475   : > { %12170 = vst [vmem:[#allocation21_spill] sm:$0xff] %v10702_v58  ;;  %v10716_v52 = vpop.f32.mrf.mxu1  ;;  %v4710_v55 = vadd.f32 %v12177_v39, %v10612_v7  ;;  %v4778_v36 = vadd.f32 %v4714_v3, %v12178_v50  ;;  %v12180_v28 = vld [vmem:[#allocation50_spill] sm:$0xff]  ;;  %v5035_v33 = vadd.f32 %v12181_v29, %v4779_v45  ;;  %12184 = vst [vmem:[#allocation76_spill] sm:$0xff] %v10741_v62  ;;  %v12185_v7 = vld [vmem:[#allocation104_spill] sm:$0xff] }
 0x476   : > { %v4783_v48 = vadd.f32 %v4719_v60, %v12175_v42  ;;  %v5038_v30 = vadd.f32 %v12179_v21, %v4782_v46  ;;  %v4775_v0 = vadd.f32 %v4711_v15, %v12180_v28  ;;  %v12182_v5 = vld [vmem:[#allocation42_spill] sm:$0xff]  ;;  %v4705_v3 = vadd.f32 %v12185_v7, %v10595_v43  ;;  %v12190_v39 = vld [vmem:[#allocation87_spill] sm:$0xff] }
 0x477   : > { %v10733_v63 = vpop.f32.mrf.mxu1  ;;  %v5037_v8 = vadd.f32 %v12182_v5, %v4781_v6  ;;  %v12186_v46 = vld [vmem:[#allocation110_spill] sm:$0xff]  ;;  %v4776_v27 = vadd.f32 %v4712_v44, %v12187_v19  ;;  %v5036_v15 = vadd.f32 %v12182_v5, %v4780_v26  ;;  %v5222_v6 = vld [vmem:[%s11705_s11 + $0x1b0] sm:$0xff]  ;;  %v5033_v50 = vadd.f32 %v12190_v39, %v4777_v18  ;;  %v12193_v44 = vld [vmem:[#allocation32_spill] sm:$0xff] }
 0x478   : > { %v5039_v60 = vadd.f32 %v12179_v21, %v4783_v48  ;;  %5494 = vperm.xlu1 %7229, %v5220_v47   ;;  %v10739_v22 = vpop.permute.xlu1 %4960  ;;  %v4708_v25 = vadd.f32 %v12186_v46, %v10604_v20  ;;  %v12188_v47 = vld [vmem:[#allocation83_spill] sm:$0xff]  ;;  %v10756_v21 = vpop.permute.xlu0 %4955  ;;  %v12192_v20 = vld [vmem:[#allocation46_spill] sm:$0xff]  ;;  %v4774_v7 = vadd.f32 %v4710_v55, %v12193_v44  ;;  %v5034_v26 = vadd.f32 %v12181_v29, %v4778_v36 }
 0x479   : > { %12183 = vst [vmem:[#allocation10_spill] sm:$0xff] %v10739_v22  ;;  %v4068_v45 = vpop.f32.mrf.mxu1  ;;  %v4706_v42 = vadd.f32 %v12188_v47, %v10598_v41  ;;  %v12189_v48 = vld [vmem:[#allocation31_spill] sm:$0xff]  ;;  %12191 = vst [vmem:[#allocation74_spill] sm:$0xff] %v10756_v21  ;;  %v4771_v28 = vadd.f32 %v4707_v56, %v12192_v20  ;;  %v5086_v5 = vpack.c.bf16 %v5038_v30, %v5036_v15  ;;  %v8013_v19 = vpop.eup %8012  ;;  %v12199_v47 = vld [vmem:[#allocation49_spill] sm:$0xff] }
 0x47a   : > { %v4773_v38 = vadd.f32 %v4709_v17, %v12189_v48  ;;  %v5087_v43 = vpack.c.bf16 %v5039_v60, %v5037_v8  ;;  %v12194_v22 = vld [vmem:[#allocation35_spill] sm:$0xff]  ;;  %v5031_v41 = vadd.f32 %v12195_v54, %v4775_v0  ;;  %v5085_v18 = vpack.c.bf16 %v5035_v33, %v5033_v50  ;;  %v10765_v8 = vpop.f32.mrf.mxu0  ;;  %v12198_v60 = vld [vmem:[#allocation37_spill] sm:$0xff]  ;;  %v12200_v0 = vld [vmem:[#allocation36_spill] sm:$0xff] }
 0x47b   : > { %v4070_v46 = vpop.f32.mrf.mxu1  ;;  %v4767_v14 = vadd.f32 %v4703_v24, %v12194_v22  ;;  %12197 = vst [vmem:[#allocation30_spill] sm:$0xff] %v10765_v8  ;;  %v4769_v56 = vadd.f32 %v4705_v3, %v12198_v60  ;;  %v4772_v55 = vadd.f32 %v4708_v25, %v12199_v47  ;;  %v5032_v36 = vadd.f32 %v12190_v39, %v4776_v27  ;;  %v5224_v24 = vld [vmem:[%s11705_s11 + $0x1c0] sm:$0xff]  ;;  %v12203_v3 = vld [vmem:[#allocation100_spill] sm:$0xff]  ;;  %v12208_v47 = vld [vmem:[#allocation97_spill] sm:$0xff] }
 0x47c   : > { %5504 = vperm.xlu1 %7229, %v5222_v6   ;;  %v10763_v17 = vpop.permute.xlu1 %4965  ;;  %5872 = vmatprep.subr.bf16.mxu0 %v5087_v43  ;;  %v4768_v29 = vadd.f32 %v4704_v12, %v12200_v0  ;;  %v12201_v22 = vld [vmem:[#allocation39_spill] sm:$0xff]  ;;  %v5027_v48 = vadd.f32 %v12203_v3, %v4771_v28  ;;  %v5030_v25 = vadd.f32 %v12195_v54, %v4774_v7  ;;  %v12204_v39 = vld [vmem:[#allocation80_spill] sm:$0xff]  ;;  %v4946_v28 = vpop.permute.xlu0 %4945 }
 0x47d   : > { %12196 = vst [vmem:[#allocation78_spill] sm:$0xff] %v10763_v17  ;;  %7186 = vmatprep.subr.bf16.mxu1 %v5087_v43  ;;  %v4074_v30 = vpop.f32.mrf.mxu1  ;;  %5873 = vmatpush1.bf16.msra.mxu0 %v5086_v5  ;;  %v4770_v15 = vadd.f32 %v4706_v42, %v12201_v22  ;;  %v12202_v33 = vld [vmem:[#allocation47_spill] sm:$0xff]  ;;  %v5084_v27 = vpack.c.bf16 %v5034_v26, %v5032_v36  ;;  %v12211_v0 = vld [vmem:[#allocation92_spill] sm:$0xff] }
 0x47e   : > { %v5029_v6 = vadd.f32 %v12202_v33, %v4773_v38  ;;  %7202 = vmatpush1.bf16.msra.mxu1 %v5086_v5  ;;  %5874 = vmatprep.subr.bf16.mxu0 %v5085_v18  ;;  %v2619_v50 = vmul.f32 %v8013_v19, %v12204_v39  ;;  %v12205_v20 = vld [vmem:[#allocation3_spill] sm:$0xff]  ;;  %v4722_v60 = vadd.f32 %v4068_v45, %v10680_v11  ;;  %v10784_v5 = vpop.f32.mrf.mxu0 }
 0x47f   : > { %7187 = vmatprep.subr.bf16.mxu1 %v5085_v18  ;;  %v4076_v43 = vpop.f32.mrf.mxu1  ;;  %v2620_v44 = vmul.f32 %v8013_v19, %v12205_v20  ;;  %v4724_v12 = vadd.f32 %v4074_v30, %v10644_v57  ;;  %12207 = vst [vmem:[#allocation5_spill] sm:$0xff] %v10784_v5  ;;  %v5025_v54 = vadd.f32 %v12208_v47, %v4769_v56  ;;  %v5226_v57 = vld [vmem:[%s11705_s11 + $0x1d0] sm:$0xff]  ;;  %v12209_v11 = vld [vmem:[#allocation63_spill] sm:$0xff]  ;;  %v12210_v30 = vld [vmem:[#allocation70_spill] sm:$0xff] }
 0x480   : > { %5514 = vperm.xlu1 %7229, %v5224_v24   ;;  %v10782_v42 = vpop.permute.xlu1 %4950  ;;  %v5083_v38 = vpack.c.bf16 %v5031_v41, %v5029_v6  ;;  %v5028_v7 = vadd.f32 %v12202_v33, %v4772_v55  ;;  %v4723_v26 = vadd.f32 %v4070_v46, %v10683_v9  ;;  %v4725_v18 = vadd.f32 %v4076_v43, %v10647_v53  ;;  %v12212_v33 = vld [vmem:[#allocation99_spill] sm:$0xff]  ;;  %v10812_v39 = vpop.f32.mrf.mxu0  ;;  %v12216_v20 = vld [vmem:[#allocation101_spill] sm:$0xff] }
 0x481   : > { %12206 = vst [vmem:[#allocation69_spill] sm:$0xff] %v10782_v42  ;;  %v4078_v19 = vpop.f32.mrf.mxu1  ;;  %5875 = vmatpush1.bf16.msra.mxu0 %v5084_v27  ;;  %v5023_v45 = vadd.f32 %v12209_v11, %v4767_v14  ;;  %v5026_v41 = vadd.f32 %v12203_v3, %v4770_v15  ;;  %v4720_v55 = vadd.f32 %v10716_v52, %v2619_v50  ;;  %v12213_v3 = vld [vmem:[#allocation25_spill] sm:$0xff]  ;;  %v12263_v42 = vld [vmem:[#allocation14_spill] sm:$0xff] }
 0x482   : > { %v4726_v36 = vadd.f32 %v4078_v19, %v10650_v31  ;;  %7203 = vmatpush1.bf16.msra.mxu1 %v5084_v27  ;;  %5876 = vmatprep.subr.bf16.mxu0 %v5083_v38  ;;  %v5082_v56 = vpack.c.bf16 %v5030_v25, %v5028_v7  ;;  %v4721_v9 = vadd.f32 %v10733_v63, %v2620_v44  ;;  %v12214_v25 = vld [vmem:[#allocation96_spill] sm:$0xff] }
 0x483   : > { %7188 = vmatprep.subr.bf16.mxu1 %v5083_v38  ;;  %v4080_v53 = vpop.f32.mrf.mxu1  ;;  %v5081_v46 = vpack.c.bf16 %v5027_v48, %v5025_v54  ;;  %v4786_v24 = vadd.f32 %v4722_v60, %v12210_v30  ;;  %v4788_v22 = vadd.f32 %v4724_v12, %v12211_v0  ;;  %v5022_v6 = vadd.f32 %v12209_v11, %v10711_v51  ;;  %v12217_v51 = vld [vmem:[#allocation106_spill] sm:$0xff]  ;;  %v4936_v12 = vpop.permute.xlu0 %4935  ;;  %v12219_v54 = vld [vmem:[#allocation59_spill] sm:$0xff] }
 0x484   : > { %v4727_v14 = vadd.f32 %v4080_v53, %v10658_v37  ;;  %v4790_v15 = vadd.f32 %v4726_v36, %v12212_v33  ;;  %5524 = vperm.xlu1 %7229, %v5226_v57   ;;  %v4941_v31 = vpop.permute.xlu1 %4940  ;;  %v5024_v52 = vadd.f32 %v12208_v47, %v4768_v29  ;;  %v4787_v63 = vadd.f32 %v4723_v26, %v12213_v3  ;;  %v5228_v37 = vld [vmem:[%s11705_s11 + $0x1e0] sm:$0xff]  ;;  %v12218_v38 = vld [vmem:[#allocation66_spill] sm:$0xff] }
 0x485   : > { %v4789_v27 = vadd.f32 %v4725_v18, %v12214_v25  ;;  %v10807_v48 = vpop.f32.mrf.mxu1  ;;  %5877 = vmatpush1.bf16.msra.mxu0 %v5082_v56  ;;  %v5044_v43 = vadd.f32 %v4941_v31, %v4788_v22  ;;  %v5019_v29 = vadd.f32 %v12217_v51, %v10689_v16  ;;  %v4784_v47 = vadd.f32 %v4720_v55, %v12218_v38  ;;  %v5230_v55 = vld [vmem:[%s11705_s11 + $0x1f0] sm:$0xff] }
 0x486   : > { %12215 = vst [vmem:[#allocation72_spill] sm:$0xff] %v10807_v48  ;;  %v5046_v50 = vadd.f32 %v4946_v28, %v4790_v15  ;;  %v4791_v44 = vadd.f32 %v4727_v14, %v12216_v20  ;;  %7204 = vmatpush1.bf16.msra.mxu1 %v5082_v56  ;;  %5878 = vmatprep.subr.bf16.mxu0 %v5081_v46  ;;  %v12233_v25 = vld [vmem:[#allocation81_spill] sm:$0xff]  ;;  %v12264_v48 = vld [vmem:[#allocation23_spill] sm:$0xff] }
 0x487   : > { %v5080_v60 = vpack.c.bf16 %v5026_v41, %v5024_v52  ;;  %v4785_v7 = vadd.f32 %v4721_v9, %v12219_v54  ;;  %7189 = vmatprep.subr.bf16.mxu1 %v5081_v46  ;;  %v10819_v26 = vpop.f32.mrf.mxu1  ;;  %v5042_v18 = vadd.f32 %v4936_v12, %v4786_v24  ;;  %v5079_v36 = vpack.c.bf16 %v5023_v45, %v10696_v23  ;;  %v10829_v9 = vpop.f32.mrf.mxu0  ;;  %v12223_v46 = vld [vmem:[#allocation28_spill] sm:$0xff]  ;;  %v12224_v23 = vld [vmem:[#allocation103_spill] sm:$0xff]  ;;  %v12236_v20 = vld [vmem:[#allocation29_spill] sm:$0xff] }
 0x488   : > { %12220 = vst [vmem:[#allocation79_spill] sm:$0xff] %v10819_v26  ;;  %v10821_v19 = vpack.c.bf16 %v5046_v50, %v5044_v43  ;;  %v5047_v57 = vadd.f32 %v4946_v28, %v4791_v44  ;;  %5534 = vperm.xlu1 %7229, %v5228_v37   ;;  %v4931_v11 = vpop.permute.xlu1 %4930  ;;  %v5043_v56 = vadd.f32 %v4936_v12, %v4787_v63  ;;  %v12234_v37 = vld [vmem:[#allocation68_spill] sm:$0xff] }
 0x489   : > { %v5045_v53 = vadd.f32 %v4941_v31, %v4789_v27  ;;  %v5040_v16 = vadd.f32 %v4931_v11, %v4784_v47  ;;  %v5041_v41 = vadd.f32 %v4931_v11, %v4785_v7  ;;  %v10824_v30 = vpop.f32.mrf.mxu1  ;;  %5879 = vmatpush1.bf16.msra.mxu0 %v5080_v60  ;;  %v4760_v28 = vadd.f32 %v10661_v10, %v12223_v46  ;;  %v12229_v10 = vld [vmem:[#allocation84_spill] sm:$0xff]  ;;  %v10853_v63 = vpop.f32.mrf.mxu0  ;;  %v12245_v46 = vld [vmem:[#allocation27_spill] sm:$0xff] }
 0x48a   : > { %12221 = vst [vmem:[#allocation58_spill] sm:$0xff] %v10821_v19  ;;  %12222 = vst [vmem:[#allocation40_spill] sm:$0xff] %v10824_v30  ;;  %v5078_v24 = vpack.c.bf16 %v5022_v6, %v10693_v40  ;;  %v5017_v45 = vadd.f32 %v12224_v23, %v10669_v4  ;;  %7205 = vmatpush1.bf16.msra.mxu1 %v5080_v60  ;;  %5880 = vmatprep.subr.bf16.mxu0 %v5079_v36  ;;  %v12230_v31 = vld [vmem:[#allocation64_spill] sm:$0xff]  ;;  %v12231_v6 = vld [vmem:[#allocation73_spill] sm:$0xff] }
 0x48b   : > { %v5018_v0 = vadd.f32 %v12217_v51, %v10686_v34  ;;  %v10838_v22 = vpack.c.bf16 %v5042_v18, %v5040_v16  ;;  %v10840_v14 = vpack.c.bf16 %v5043_v56, %v5041_v41  ;;  %7190 = vmatprep.subr.bf16.mxu1 %v5079_v36  ;;  %v10842_v33 = vpop.f32.mrf.mxu1  ;;  %v10844_v15 = vpack.c.bf16 %v5047_v57, %v5045_v53  ;;  %v12237_v51 = vld [vmem:[#allocation113_spill] sm:$0xff]  ;;  %v10865_v38 = vpop.f32.mrf.mxu0  ;;  %v12240_v18 = vld [vmem:[#allocation94_spill] sm:$0xff]  ;;  %v12243_v16 = vld [vmem:[#allocation115_spill] sm:$0xff] }
 0x48c   : > { %12227 = vst [vmem:[#allocation71_spill] sm:$0xff] %v10842_v33  ;;  %v4689_v40 = vadd.f32 %v12230_v31, %v12229_v10  ;;  %v5015_v4 = vadd.f32 %v12231_v6, %v10666_v32  ;;  %v5077_v52 = vpack.c.bf16 %v5019_v29, %v5017_v45  ;;  %5544 = vperm.xlu1 %7229, %v5230_v55   ;;  %v12241_v36 = vld [vmem:[#allocation26_spill] sm:$0xff]  ;;  %v12242_v56 = vld [vmem:[#allocation41_spill] sm:$0xff]  ;;  %v12249_v31 = vld [vmem:[#allocation112_spill] sm:$0xff] }
 0x48d   : > { %12225 = vst [vmem:[#allocation60_spill] sm:$0xff] %v10838_v22  ;;  %12226 = vst [vmem:[#allocation62_spill] sm:$0xff] %v10840_v14  ;;  %v5016_v3 = vadd.f32 %v12224_v23, %v4760_v28  ;;  %v10851_v34 = vpop.f32.mrf.mxu1  ;;  %5881 = vmatpush1.bf16.msra.mxu0 %v5078_v24  ;;  %v4755_v27 = vadd.f32 %v10638_v35, %v12233_v25  ;;  %v5013_v50 = vadd.f32 %v12234_v37, %v10653_v59  ;;  %v12239_v35 = vld [vmem:[#allocation109_spill] sm:$0xff]  ;;  %v10873_v57 = vpop.f32.mrf.mxu0  ;;  %v12247_v23 = vld [vmem:[#allocation56_spill] sm:$0xff] }
 0x48e   : > { %12228 = vst [vmem:[#allocation43_spill] sm:$0xff] %v10844_v15  ;;  %12232 = vst [vmem:[#allocation33_spill] sm:$0xff] %v10851_v34  ;;  %7206 = vmatpush1.bf16.msra.mxu1 %v5078_v24  ;;  %5882 = vmatprep.subr.bf16.mxu0 %v5077_v52  ;;  %v4753_v44 = vadd.f32 %v4689_v40, %v12236_v20  ;;  %8014 = vrcp.f32 %v12241_v36  ;;  %v12244_v55 = vld [vmem:[#allocation45_spill] sm:$0xff]  ;;  %v12250_v6 = vld [vmem:[#allocation86_spill] sm:$0xff] }
 0x48f   : > { %v5076_v43 = vpack.c.bf16 %v5018_v0, %v5016_v3  ;;  %7191 = vmatprep.subr.bf16.mxu1 %v5077_v52  ;;  %v10859_v32 = vpop.f32.mrf.mxu1  ;;  %v5011_v29 = vadd.f32 %v12237_v51, %v4755_v27  ;;  %v5075_v60 = vpack.c.bf16 %v5015_v4, %v5013_v50  ;;  %8016 = vrcp.f32 %v12242_v56  ;;  %v10883_v41 = vpop.f32.mrf.mxu0  ;;  %v12246_v24 = vld [vmem:[#allocation93_spill] sm:$0xff]  ;;  %v12252_v25 = vld [vmem:[#allocation98_spill] sm:$0xff]  ;;  %v12269_v26 = vld [vmem:[#allocation20_spill] sm:$0xff] }
 0x490   : > { %12235 = vst [vmem:[#allocation54_spill] sm:$0xff] %v10859_v32  ;;  %v5009_v47 = vadd.f32 %v12239_v35, %v4753_v44  ;;  %8018 = vrcp.f32 %v12244_v55  ;;  %v12248_v10 = vld [vmem:[#allocation57_spill] sm:$0xff]  ;;  %v12253_v50 = vld [vmem:[#allocation102_spill] sm:$0xff]  ;;  %v12282_v32 = vld [vmem:[#allocation44_spill] sm:$0xff] }
 0x491   : > { %v10863_v12 = vpop.f32.mrf.mxu1  ;;  %5883 = vmatpush1.bf16.msra.mxu0 %v5076_v43  ;;  %8020 = vrcp.f32 %v12245_v46  ;;  %v10894_v0 = vpop.f32.mrf.mxu0  ;;  %v12251_v4 = vld [vmem:[#allocation85_spill] sm:$0xff]  ;;  %v12254_v46 = vld [vmem:[#allocation16_spill] sm:$0xff] }
 0x492   : > { %12238 = vst [vmem:[#allocation107_spill] sm:$0xff] %v10863_v12  ;;  %7207 = vmatpush1.bf16.msra.mxu1 %v5076_v43  ;;  %5884 = vmatprep.subr.bf16.mxu0 %v5075_v60  ;;  %v5073_v54 = vpack.c.bf16 %v5011_v29, %v5009_v47  ;;  %8022 = vrcp.f32 %v12246_v24  ;;  %v12262_v19 = vld [vmem:[#allocation13_spill] sm:$0xff] }
 0x493   : > { %7192 = vmatprep.subr.bf16.mxu1 %v5075_v60  ;;  %v10868_v59 = vpop.f32.mrf.mxu1  ;;  %8024 = vrcp.f32 %v12247_v23  ;;  %v10904_v3 = vpop.f32.mrf.mxu0  ;;  %v12256_v23 = vld [vmem:[#allocation15_spill] sm:$0xff] }
 0x494   : > { %8026 = vrcp.f32 %v12248_v10 }
 0x495   : > { %v10870_v7 = vpop.f32.mrf.mxu1  ;;  %5885 = vmatpush1.bf16.msra.mxu0 %v12240_v18  ;;  %8028 = vrcp.f32 %v12249_v31  ;;  %v4675_v20 = vpop.f32.mrf.mxu0  ;;  %v12258_v31 = vld [vmem:[#allocation18_spill] sm:$0xff] }
 0x496   : > { %7208 = vmatpush1.bf16.msra.mxu1 %v12240_v18  ;;  %5886 = vmatprep.subr.bf16.mxu0 %v5073_v54  ;;  %8030 = vrcp.f32 %v12250_v6 }
 0x497   : > { %7193 = vmatprep.subr.bf16.mxu1 %v5073_v54  ;;  %v10876_v11 = vpop.f32.mrf.mxu1  ;;  %8032 = vrcp.f32 %v12251_v4  ;;  %v4679_v54 = vpop.f32.mrf.mxu0  ;;  %v12260_v4 = vld [vmem:[#allocation19_spill] sm:$0xff] }
 0x498   : > { %8034 = vrcp.f32 %v12252_v25 }
 0x499   : > { %v10880_v53 = vpop.f32.mrf.mxu1  ;;  %5887 = vmatpush1.bf16.msra.mxu0 %v12243_v16  ;;  %8036 = vrcp.f32 %v12253_v50  ;;  %v4681_v22 = vpop.f32.mrf.mxu0 }
 0x49a   : > { %7209 = vmatpush1.bf16.msra.mxu1 %v12243_v16 }
 0x49b   : > { %v10888_v28 = vpop.f32.mrf.mxu1  ;;  %v8015_v37 = vpop.eup %8014 }
 0x49c   : > { %v8017_v44 = vpop.eup %8016  ;;  %v10909_v24 = vmul.f32 %v8015_v37, %v12254_v46  ;;  %v10912_v10 = vmul.f32 %v8015_v37, %v12256_v23  ;;  %v12265_v46 = vld [vmem:[#allocation55_spill] sm:$0xff]  ;;  %v12266_v37 = vld [vmem:[#allocation65_spill] sm:$0xff]  ;;  %v4683_v12 = vpop.f32.mrf.mxu0 }
 0x49d   : > { %v10892_v45 = vpop.f32.mrf.mxu1  ;;  %v8019_v51 = vpop.eup %8018  ;;  %v10915_v6 = vmul.f32 %v8017_v44, %v12258_v31  ;;  %v10918_v25 = vmul.f32 %v8017_v44, %v12260_v4  ;;  %v12268_v31 = vld [vmem:[#allocation12_spill] sm:$0xff] }
 0x49e   : > { %v8021_v60 = vpop.eup %8020  ;;  %12255 = vst [vmem:[#allocation114_spill] sm:$0xff] %v10909_v24  ;;  %12257 = vst [vmem:[#allocation34_spill] sm:$0xff] %v10912_v10  ;;  %v2637_v15 = vmul.f32 %v8019_v51, %v12262_v19  ;;  %v2638_v21 = vmul.f32 %v8019_v51, %v12263_v42  ;;  %v12270_v4 = vld [vmem:[#allocation8_spill] sm:$0xff]  ;;  %v12272_v42 = vld [vmem:[#allocation38_spill] sm:$0xff] }
 0x49f   : > { %v10898_v40 = vpop.f32.mrf.mxu1  ;;  %v8023_v35 = vpop.eup %8022  ;;  %12259 = vst [vmem:[#allocation24_spill] sm:$0xff] %v10915_v6  ;;  %12261 = vst [vmem:[#allocation50_spill] sm:$0xff] %v10918_v25  ;;  %v2639_v49 = vmul.f32 %v8021_v60, %v12268_v31  ;;  %v2640_v44 = vmul.f32 %v8021_v60, %v12269_v26  ;;  %v12271_v6 = vld [vmem:[#allocation4_spill] sm:$0xff]  ;;  %v12277_v60 = vld [vmem:[#allocation9_spill] sm:$0xff] }
 0x4a0   : > { %v8025_v18 = vpop.eup %8024  ;;  %v10925_v23 = vmul.f32 %v8023_v35, %v12266_v37  ;;  %v12276_v37 = vld [vmem:[#allocation22_spill] sm:$0xff] }
 0x4a1   : > { %v10902_v52 = vpop.f32.mrf.mxu1  ;;  %v8027_v36 = vpop.eup %8026  ;;  %v2646_v17 = vmul.f32 %v8025_v18, %v12264_v48  ;;  %v12273_v48 = vld [vmem:[#allocation11_spill] sm:$0xff] }
 0x4a2   : > { %v8029_v16 = vpop.eup %8028  ;;  %v2648_v30 = vmul.f32 %v8027_v36, %v12265_v46  ;;  %12267 = vst [vmem:[#allocation95_spill] sm:$0xff] %v10925_v23  ;;  %v2647_v62 = vmul.f32 %v8027_v36, %v12270_v4  ;;  %v10933_v33 = vmul.f32 %v8023_v35, %v12273_v48  ;;  %v12275_v46 = vld [vmem:[#allocation6_spill] sm:$0xff]  ;;  %v2645_v23 = vmul.f32 %v8025_v18, %v12276_v37 }
 0x4a3   : > { %v4120_v27 = vpop.f32.mrf.mxu1  ;;  %v8031_v55 = vpop.eup %8030  ;;  %v2644_v58 = vmul.f32 %v8029_v16, %v12271_v6  ;;  %v12278_v6 = vld [vmem:[#allocation82_spill] sm:$0xff] }
 0x4a4   : > { %v8033_v14 = vpop.eup %8032  ;;  %v2649_v51 = vmul.f32 %v8031_v55, %v12272_v42  ;;  %12274 = vst [vmem:[#allocation42_spill] sm:$0xff] %v10933_v33  ;;  %v12280_v42 = vld [vmem:[#allocation48_spill] sm:$0xff] }
 0x4a5   : > { %v4124_v43 = vpop.f32.mrf.mxu1  ;;  %v8035_v24 = vpop.eup %8034  ;;  %v2642_v10 = vmul.f32 %v8033_v14, %v12275_v46  ;;  %v2643_v35 = vmul.f32 %v8029_v16, %v12280_v42  ;;  %v2641_v25 = vmul.f32 %v8033_v14, %v12282_v32  ;;  %v12285_v32 = vld [vmem:[#allocation77_spill] sm:$0xff] }
 0x4a6   : > { %v8037_v26 = vpop.eup %8036  ;;  %v2633_v36 = vmul.f32 %v8035_v24, %v12277_v60 }
 0x4a7   : > { %v4126_v29 = vpop.f32.mrf.mxu1  ;;  %v4744_v60 = vadd.f32 %v4124_v43, %v2643_v35  ;;  %v12296_v35 = vld [vmem:[#allocation21_spill] sm:$0xff] }
 0x4a8   : > { %v4745_v4 = vadd.f32 %v4126_v29, %v2644_v58  ;;  %v4685_v29 = vpop.f32.mrf.mxu0 }
 0x4a9   : > { %v4128_v47 = vpop.f32.mrf.mxu1 }
 0x4aa   : > { %v4746_v48 = vadd.f32 %v4128_v47, %v2645_v23  ;;  %v4739_v47 = vadd.f32 %v10888_v28, %v2638_v21  ;;  %v4808_v21 = vadd.f32 %v4744_v60, %v10883_v41 }
 0x4ab   : > { %v4130_v56 = vpop.f32.mrf.mxu1 }
 0x4ac   : > { %v4747_v19 = vadd.f32 %v4130_v56, %v2646_v17  ;;  %v2650_v17 = vmul.f32 %v8031_v55, %v12278_v6  ;;  %v4743_v56 = vadd.f32 %v4120_v27, %v2642_v10  ;;  %v4809_v27 = vadd.f32 %v4745_v4, %v10894_v0  ;;  %v12292_v4 = vld [vmem:[#allocation5_spill] sm:$0xff] }
 0x4ad   : > { %v4134_v50 = vpop.f32.mrf.mxu1  ;;  %v4740_v0 = vadd.f32 %v10892_v45, %v2639_v49  ;;  %v4738_v10 = vadd.f32 %v10880_v53, %v2637_v15  ;;  %v4803_v49 = vadd.f32 %v4739_v47, %v10812_v39  ;;  %v12287_v15 = vld [vmem:[#allocation50_spill] sm:$0xff]  ;;  %v12305_v47 = vld [vmem:[#allocation40_spill] sm:$0xff] }
 0x4ae   : > { %v4748_v5 = vadd.f32 %v4134_v50, %v2647_v62  ;;  %v4811_v46 = vadd.f32 %v4747_v19, %v4675_v20  ;;  %v12281_v50 = vld [vmem:[#allocation7_spill] sm:$0xff]  ;;  %v4807_v14 = vadd.f32 %v4743_v56, %v10873_v57  ;;  %v12286_v20 = vld [vmem:[#allocation117_spill] sm:$0xff]  ;;  %v12290_v19 = vld [vmem:[#allocation90_spill] sm:$0xff] }
 0x4af   : > { %v4136_v34 = vpop.f32.mrf.mxu1  ;;  %v2635_v37 = vmul.f32 %v8037_v26, %v12281_v50  ;;  %v5065_v57 = vadd.f32 %v12286_v20, %v4809_v27  ;;  %v5064_v23 = vadd.f32 %v12286_v20, %v4808_v21  ;;  %v4802_v6 = vadd.f32 %v4738_v10, %v12292_v4  ;;  %v12295_v56 = vld [vmem:[#allocation75_spill] sm:$0xff]  ;;  %v12310_v21 = vld [vmem:[#allocation72_spill] sm:$0xff]  ;;  %v12313_v10 = vld [vmem:[#allocation10_spill] sm:$0xff] }
 0x4b0   : > { %v4749_v13 = vadd.f32 %v4136_v34, %v2648_v30  ;;  %v12279_v30 = vld [vmem:[#allocation61_spill] sm:$0xff]  ;;  %v4812_v58 = vadd.f32 %v4748_v5, %v4679_v54  ;;  %v5067_v5 = vadd.f32 %v10606_v2, %v4811_v46  ;;  %v5063_v41 = vadd.f32 %v10706_v1, %v4807_v14  ;;  %v12318_v4 = vld [vmem:[#allocation43_spill] sm:$0xff] }
 0x4b1   : > { %v4138_v31 = vpop.f32.mrf.mxu1  ;;  %v2634_v34 = vmul.f32 %v8035_v24, %v12279_v30  ;;  %v4741_v24 = vadd.f32 %v10898_v40, %v2640_v44  ;;  %v12294_v30 = vld [vmem:[#allocation71_spill] sm:$0xff] }
 0x4b2   : > { %v4750_v61 = vadd.f32 %v4138_v31, %v2649_v51  ;;  %v4813_v8 = vadd.f32 %v4749_v13, %v4681_v22  ;;  %v12283_v51 = vld [vmem:[#allocation51_spill] sm:$0xff]  ;;  %v4742_v13 = vadd.f32 %v10902_v52, %v2641_v25  ;;  %v5068_v28 = vadd.f32 %v12285_v32, %v4812_v58  ;;  %v12300_v58 = vld [vmem:[#allocation42_spill] sm:$0xff] }
 0x4b3   : > { %v4140_v33 = vpop.f32.mrf.mxu1  ;;  %v2636_v55 = vmul.f32 %v8037_v26, %v12283_v51  ;;  %v12284_v22 = vld [vmem:[#allocation67_spill] sm:$0xff]  ;;  %v4735_v40 = vadd.f32 %v10868_v59, %v2634_v34  ;;  %v5101_v45 = vpack.c.bf16 %v5067_v5, %v5065_v57  ;;  %v12302_v51 = vld [vmem:[#allocation89_spill] sm:$0xff]  ;;  %v12307_v5 = vld [vmem:[#allocation116_spill] sm:$0xff] }
 0x4b4   : > { %v4751_v18 = vadd.f32 %v4140_v33, %v2650_v17  ;;  %v4814_v62 = vadd.f32 %v4750_v61, %v4683_v12  ;;  %v4810_v61 = vadd.f32 %v4746_v48, %v10904_v3  ;;  %v5069_v12 = vadd.f32 %v12285_v32, %v4813_v8  ;;  %v12291_v31 = vld [vmem:[#allocation107_spill] sm:$0xff]  ;;  %v12293_v17 = vld [vmem:[#allocation34_spill] sm:$0xff]  ;;  %v12312_v57 = vld [vmem:[#allocation108_spill] sm:$0xff] }
 0x4b5   : > { %v4737_v52 = vadd.f32 %v10876_v11, %v2636_v55  ;;  %v4805_v3 = vadd.f32 %v4741_v24, %v10853_v63  ;;  %v4806_v8 = vadd.f32 %v4742_v13, %v10865_v38  ;;  %v4736_v11 = vadd.f32 %v10870_v7, %v2635_v37  ;;  %v12288_v38 = vld [vmem:[#allocation54_spill] sm:$0xff]  ;;  %v12299_v37 = vld [vmem:[#allocation76_spill] sm:$0xff]  ;;  %v12303_v24 = vld [vmem:[#allocation91_spill] sm:$0xff] }
 0x4b6   : > { %v4815_v16 = vadd.f32 %v4751_v18, %v4685_v29  ;;  %v5070_v33 = vadd.f32 %v12284_v22, %v4814_v62  ;;  %v5066_v25 = vadd.f32 %v10606_v2, %v4810_v61  ;;  %v4804_v63 = vadd.f32 %v4740_v0, %v10829_v9  ;;  %v12289_v2 = vld [vmem:[#allocation30_spill] sm:$0xff]  ;;  %v12297_v18 = vld [vmem:[#allocation24_spill] sm:$0xff]  ;;  %v12298_v62 = vld [vmem:[#allocation33_spill] sm:$0xff] }
 0x4b7   : > { %v4733_v53 = vadd.f32 %v12288_v38, %v12287_v15  ;;  %v4801_v44 = vadd.f32 %v4737_v52, %v12289_v2  ;;  %v5061_v39 = vadd.f32 %v12290_v19, %v4805_v3  ;;  %v4734_v26 = vadd.f32 %v12291_v31, %v2633_v36  ;;  %v12306_v61 = vld [vmem:[#allocation17_spill] sm:$0xff]  ;;  %v12309_v0 = vld [vmem:[#allocation95_spill] sm:$0xff]  ;;  %v12311_v52 = vld [vmem:[#allocation88_spill] sm:$0xff] }
 0x4b8   : > { %v5071_v43 = vadd.f32 %v12284_v22, %v4815_v16  ;;  %v5102_v59 = vpack.c.bf16 %v5070_v33, %v5068_v28  ;;  %v5062_v7 = vadd.f32 %v10706_v1, %v4806_v8  ;;  %v5100_v9 = vpack.c.bf16 %v5066_v25, %v5064_v23  ;;  %v12301_v1 = vld [vmem:[#allocation79_spill] sm:$0xff]  ;;  %v12304_v16 = vld [vmem:[#allocation114_spill] sm:$0xff]  ;;  %v12316_v23 = vld [vmem:[#allocation105_spill] sm:$0xff] }
 0x4b9   : > { %v4731_v34 = vadd.f32 %v12294_v30, %v12293_v17  ;;  %v4799_v42 = vadd.f32 %v4735_v40, %v12295_v56  ;;  %v5059_v48 = vadd.f32 %v12296_v35, %v4803_v49  ;;  %v5099_v46 = vpack.c.bf16 %v5063_v41, %v5061_v39  ;;  %v12314_v25 = vld [vmem:[#allocation111_spill] sm:$0xff]  ;;  %v12321_v30 = vld [vmem:[#allocation60_spill] sm:$0xff]  ;;  %v7761_v56 = vld [vmem:[%s11704_s10 + $0xd4] ss:$8 sps:$4 sm:$0xff]  }
 0x4ba   : > { %v5103_v54 = vpack.c.bf16 %v5071_v43, %v5069_v12  ;;  %v4732_v50 = vadd.f32 %v12298_v62, %v12297_v18  ;;  %v4800_v60 = vadd.f32 %v4736_v11, %v12299_v37  ;;  %v5060_v36 = vadd.f32 %v12290_v19, %v4804_v63  ;;  %v12308_v12 = vld [vmem:[#allocation78_spill] sm:$0xff]  ;;  %v7753_v17 = vld [vmem:[%s11704_s10 + $0xc0] ss:$8 sps:$4 sm:$0xff]  }
 0x4bb   : > { %v4729_v29 = vadd.f32 %v12301_v1, %v12300_v58  ;;  %v4797_v55 = vadd.f32 %v4733_v53, %v12302_v51  ;;  %v5057_v27 = vadd.f32 %v12303_v24, %v4801_v44  ;;  %v4730_v13 = vadd.f32 %v12305_v47, %v12304_v16  ;;  %v12317_v53 = vld [vmem:[#allocation69_spill] sm:$0xff]  ;;  %v7762_v18 = vld [vmem:[%s11704_s10 + $0x20] ss:$8 sps:$4 sm:$0xff]   ;;  %v7776_v58 = vld [vmem:[%s11704_s10 + $0x44] ss:$8 sps:$4 sm:$0xff]  }
 0x4bc   : > { %5888 = vmatprep.subr.bf16.mxu0 %v5103_v54  ;;  %7194 = vmatprep.subr.bf16.mxu1 %v5103_v54  ;;  %v4798_v22 = vadd.f32 %v4734_v26, %v12306_v61  ;;  %v5058_v33 = vadd.f32 %v12296_v35, %v4802_v6  ;;  %v5098_v14 = vpack.c.bf16 %v5062_v7, %v5060_v36  ;;  %v12319_v6 = vld [vmem:[#allocation58_spill] sm:$0xff]  ;;  %v7765_v62 = vld [vmem:[%s11704_s10 + $0xe0] ss:$8 sps:$4 sm:$0xff]   ;;  %v7779_v1 = vld [vmem:[%s11704_s10 + $0x104] ss:$8 sps:$4 sm:$0xff]  }
 0x4bd   : > { %5889 = vmatpush2.bf16.msra.mxu0 %v5102_v59  ;;  %7210 = vmatpush2.bf16.msra.mxu1 %v5102_v59  ;;  %v4795_v32 = vadd.f32 %v4731_v34, %v12307_v5  ;;  %v5055_v43 = vadd.f32 %v12308_v12, %v4799_v42  ;;  %v5097_v40 = vpack.c.bf16 %v5059_v48, %v5057_v27  ;;  %v12320_v7 = vld [vmem:[#allocation62_spill] sm:$0xff]  ;;  %v7764_v48 = vld [vmem:[%s11704_s10 + $0x24] ss:$8 sps:$4 sm:$0xff]   ;;  %v7777_v51 = vld [vmem:[%s11704_s10 + $0x100] ss:$8 sps:$4 sm:$0xff]  }
 0x4be   : > { %5890 = vmatprep.subr.bf16.mxu0 %v5101_v45  ;;  %7195 = vmatprep.subr.bf16.mxu1 %v5101_v45  ;;  %v4728_v28 = vadd.f32 %v12310_v21, %v12309_v0  ;;  %v4796_v3 = vadd.f32 %v4732_v50, %v12311_v52  ;;  %v5056_v20 = vadd.f32 %v12303_v24, %v4800_v60  ;;  %v12315_v45 = vld [vmem:[#allocation74_spill] sm:$0xff]  ;;  %v7788_v47 = vld [vmem:[%s11704_s10 + $0x64] ss:$8 sps:$4 sm:$0xff]   ;;  %v7786_v61 = vld [vmem:[%s11704_s10 + $0x60] ss:$8 sps:$4 sm:$0xff]  }
 0x4bf   : > { %v4793_v54 = vadd.f32 %v4729_v29, %v12312_v57  ;;  %v5053_v8 = vadd.f32 %v12313_v10, %v4797_v55  ;;  %v4794_v59 = vadd.f32 %v4730_v13, %v12314_v25  ;;  %v5054_v49 = vadd.f32 %v12308_v12, %v4798_v22  ;;  %v7758_v34 = vld [vmem:[%s11704_s10 + $0x14] ss:$8 sps:$4 sm:$0xff]   ;;  %v7756_v42 = vld [vmem:[%s11704_s10 + $0x10] ss:$8 sps:$4 sm:$0xff]   ;;  %v7774_v29 = vld [vmem:[%s11704_s10 + $0x40] ss:$8 sps:$4 sm:$0xff]  }
 0x4c0   : > { %v5096_v41 = vpack.c.bf16 %v5058_v33, %v5056_v20  ;;  %v5051_v11 = vadd.f32 %v12315_v45, %v4795_v32  ;;  %v4792_v15 = vadd.f32 %v4728_v28, %v12316_v23  ;;  %v5052_v38 = vadd.f32 %v12313_v10, %v4796_v3  ;;  %v7759_v35 = vld [vmem:[%s11704_s10 + $0xd0] ss:$8 sps:$4 sm:$0xff]   ;;  %v7770_v50 = vld [vmem:[%s11704_s10 + $0x34] ss:$8 sps:$4 sm:$0xff]   ;;  %v7791_v13 = vld [vmem:[%s11704_s10 + $0x124] ss:$8 sps:$4 sm:$0xff]  }
 0x4c1   : > { %5891 = vmatpush2.bf16.msra.mxu0 %v5100_v9  ;;  %7211 = vmatpush2.bf16.msra.mxu1 %v5100_v9  ;;  %v5095_v63 = vpack.c.bf16 %v5055_v43, %v5053_v8  ;;  %v5049_v2 = vadd.f32 %v12317_v53, %v4793_v54  ;;  %v5050_v44 = vadd.f32 %v12315_v45, %v4794_v59  ;;  %v7750_v9 = vld [vmem:[%s11704_s10] ss:$8 sps:$4 sm:$0xff]   ;;  %v7773_v37 = vld [vmem:[%s11704_s10 + $0xf4] ss:$8 sps:$4 sm:$0xff]   ;;  %v7768_v60 = vld [vmem:[%s11704_s10 + $0x30] ss:$8 sps:$4 sm:$0xff]  }
 0x4c2   : > { %5892 = vmatprep.subr.bf16.mxu0 %v5099_v46  ;;  %7196 = vmatprep.subr.bf16.mxu1 %v5099_v46  ;;  %v5094_v19 = vpack.c.bf16 %v5054_v49, %v5052_v38  ;;  %v5048_v31 = vadd.f32 %v12317_v53, %v4792_v15  ;;  %v7767_v46 = vld [vmem:[%s11704_s10 + $0xe4] ss:$8 sps:$4 sm:$0xff]   ;;  %v7771_v36 = vld [vmem:[%s11704_s10 + $0xf0] ss:$8 sps:$4 sm:$0xff]   ;;  %v7782_v55 = vld [vmem:[%s11704_s10 + $0x54] ss:$8 sps:$4 sm:$0xff]  }
 0x4c3   : > { %v5093_v39 = vpack.c.bf16 %v5051_v11, %v5049_v2  ;;  %v7785_v24 = vld [vmem:[%s11704_s10 + $0x114] ss:$8 sps:$4 sm:$0xff]   ;;  %v7780_v27 = vld [vmem:[%s11704_s10 + $0x50] ss:$8 sps:$4 sm:$0xff]   ;;  %v7789_v22 = vld [vmem:[%s11704_s10 + $0x120] ss:$8 sps:$4 sm:$0xff]  }
 0x4c4   : > { %v5092_v26 = vpack.c.bf16 %v5050_v44, %v5048_v31  ;;  %v7783_v16 = vld [vmem:[%s11704_s10 + $0x110] ss:$8 sps:$4 sm:$0xff]   ;;  %v7794_v33 = vld [vmem:[%s11704_s10 + $0x74] ss:$8 sps:$4 sm:$0xff]   ;;  %v7800_v12 = vld [vmem:[%s11704_s10 + $0x84] ss:$8 sps:$4 sm:$0xff]   ;;  %v5235_v44 = vpop.permute.xlu1 %5234 }
 0x4c5   : > { %5893 = vmatpush2.bf16.msra.mxu0 %v5098_v14  ;;  %7212 = vmatpush2.bf16.msra.mxu1 %v5098_v14  ;;  %v7797_v14 = vld [vmem:[%s11704_s10 + $0x134] ss:$8 sps:$4 sm:$0xff]   ;;  %v7792_v5 = vld [vmem:[%s11704_s10 + $0x70] ss:$8 sps:$4 sm:$0xff]   ;;  %v7803_v43 = vld [vmem:[%s11704_s10 + $0x144] ss:$8 sps:$4 sm:$0xff]  }
 0x4c6   : > { %5894 = vmatprep.subr.bf16.mxu0 %v5097_v40  ;;  %7197 = vmatprep.subr.bf16.mxu1 %v5097_v40  ;;  %v7795_v32 = vld [vmem:[%s11704_s10 + $0x130] ss:$8 sps:$4 sm:$0xff]   ;;  %v7798_v40 = vld [vmem:[%s11704_s10 + $0x80] ss:$8 sps:$4 sm:$0xff]   ;;  %v7806_v21 = vld [vmem:[%s11704_s10 + $0x94] ss:$8 sps:$4 sm:$0xff]  }
 0x4c7   : > { %v7801_v0 = vld [vmem:[%s11704_s10 + $0x140] ss:$8 sps:$4 sm:$0xff]   ;;  %v7809_v28 = vld [vmem:[%s11704_s10 + $0x154] ss:$8 sps:$4 sm:$0xff]   ;;  %v7804_v52 = vld [vmem:[%s11704_s10 + $0x90] ss:$8 sps:$4 sm:$0xff]  }
 0x4c8   : > { %v7807_v3 = vld [vmem:[%s11704_s10 + $0x150] ss:$8 sps:$4 sm:$0xff]   ;;  %v7812_v20 = vld [vmem:[%s11704_s10 + $0xa4] ss:$8 sps:$4 sm:$0xff]   ;;  %v7810_v54 = vld [vmem:[%s11704_s10 + $0xa0] ss:$8 sps:$4 sm:$0xff]   ;;  %v11186_v31 = vpop.permute.xlu1 %5244 }
 0x4c9   : > { %5895 = vmatpush2.bf16.msra.mxu0 %v5096_v41  ;;  %7213 = vmatpush2.bf16.msra.mxu1 %v5096_v41  ;;  %v7815_v57 = vld [vmem:[%s11704_s10 + $0x164] ss:$8 sps:$4 sm:$0xff]   ;;  %v7813_v10 = vld [vmem:[%s11704_s10 + $0x160] ss:$8 sps:$4 sm:$0xff]   ;;  %v7818_v8 = vld [vmem:[%s11704_s10 + $0xb4] ss:$8 sps:$4 sm:$0xff]  }
 0x4ca   : > { %5896 = vmatprep.subr.bf16.mxu0 %v5095_v63  ;;  %7198 = vmatprep.subr.bf16.mxu1 %v5095_v63  ;;  %v7821_v25 = vld [vmem:[%s11704_s10 + $0x174] ss:$8 sps:$4 sm:$0xff]   ;;  %v7816_v59 = vld [vmem:[%s11704_s10 + $0xb0] ss:$8 sps:$4 sm:$0xff]   ;;  %v7824_v41 = vld [vmem:[%s11704_s10 + $0x184] ss:$8 sps:$4 sm:$0xff]  }
 0x4cb   : > { %v7819_v49 = vld [vmem:[%s11704_s10 + $0x170] ss:$8 sps:$4 sm:$0xff]   ;;  %v7822_v45 = vld [vmem:[%s11704_s10 + $0x180] ss:$8 sps:$4 sm:$0xff]   ;;  %v7827_v11 = vld [vmem:[%s11704_s10 + $0x194] ss:$8 sps:$4 sm:$0xff]  }
 0x4cc   : > { %v7825_v63 = vld [vmem:[%s11704_s10 + $0x190] ss:$8 sps:$4 sm:$0xff]   ;;  %v7830_v23 = vld [vmem:[%s11704_s10 + $0x1a4] ss:$8 sps:$4 sm:$0xff]   ;;  %v7828_v15 = vld [vmem:[%s11704_s10 + $0x1a0] ss:$8 sps:$4 sm:$0xff]  }
 0x4cd   : > { %5897 = vmatpush2.bf16.msra.mxu0 %v5094_v19  ;;  %7214 = vmatpush2.bf16.msra.mxu1 %v5094_v19  ;;  %v7833_v38 = vld [vmem:[%s11704_s10 + $0x1b4] ss:$8 sps:$4 sm:$0xff]   ;;  %v7831_v53 = vld [vmem:[%s11704_s10 + $0x1b0] ss:$8 sps:$4 sm:$0xff]   ;;  %v7836_v2 = vld [vmem:[%s11704_s10 + $0x1c4] ss:$8 sps:$4 sm:$0xff]  }
 0x4ce   : > { %5898 = vmatprep.subr.bf16.mxu0 %v5093_v39  ;;  %7199 = vmatprep.subr.bf16.mxu1 %v5093_v39  ;;  %v7834_v19 = vld [vmem:[%s11704_s10 + $0x1c0] ss:$8 sps:$4 sm:$0xff]   ;;  %v11184_v39 = vpop.permute.xlu0 %5239 }
 0x4d1   : > { %5899 = vmatpush2.bf16.msra.mxu0 %v5092_v26  ;;  %7215 = vmatpush2.bf16.msra.mxu1 %v5092_v26  ;;  %v7839_v26 = vld [vmem:[%s11704_s10 + $0x1d4] ss:$8 sps:$4 sm:$0xff]  }
 0x4d2   : > { %5900 = vmatprep.subr.bf16.mxu0 %v12318_v4  ;;  %7200 = vmatprep.subr.bf16.mxu1 %v12318_v4  ;;  %v11191_v4 = vpop.permute.xlu0 %5249 }
 0x4d5   : > { %5901 = vmatpush2.bf16.msra.mxu0 %v12319_v6  ;;  %7216 = vmatpush2.bf16.msra.mxu1 %v12319_v6  ;;  %v11193_v6 = vpop.permute.xlu1 %5254 }
 0x4d6   : > { %5902 = vmatprep.subr.bf16.mxu0 %v12320_v7  ;;  %7201 = vmatprep.subr.bf16.mxu1 %v12320_v7  ;;  %v7837_v7 = vld [vmem:[%s11704_s10 + $0x1d0] ss:$8 sps:$4 sm:$0xff]  }
 0x4d9   : > { %5903 = vmatpush2.bf16.msra.mxu0 %v12321_v30  ;;  %7217 = vmatpush2.bf16.msra.mxu1 %v12321_v30  ;;  %v11203_v30 = vpop.permute.xlu1 %5264 }
 0x4dc   : > { %5905 = vmatmul.mubr.bf16.vlgmr.msra.gmra.mxu0 %v7750_v9  ;;  %6025 = vmatmul.mubr.bf16.vlgmr.msra.gmra.mxu1 %v7753_v17  ;;  %v7842_v9 = vld [vmem:[%s11704_s10 + $0x1e4] ss:$8 sps:$4 sm:$0xff]   ;;  %v11201_v17 = vpop.permute.xlu0 %5259 }
 0x4dd   : > { %5914 = vmatprep.mubr.bf16.mxu0 %v7758_v34  ;;  %6034 = vmatprep.mubr.bf16.mxu1 %v7761_v56  ;;  %v7840_v34 = vld [vmem:[%s11704_s10 + $0x1e0] ss:$8 sps:$4 sm:$0xff]   ;;  %v7845_v56 = vld [vmem:[%s11704_s10 + $0x1f4] ss:$8 sps:$4 sm:$0xff]  }
 0x4e4   : > { %5915 = vmatmul.mubr.bf16.gmra.mxu0 %v7756_v42  ;;  %6035 = vmatmul.mubr.bf16.gmra.mxu1 %v7759_v35  ;;  %v11211_v42 = vpop.permute.xlu0 %5269  ;;  %v11213_v35 = vpop.permute.xlu1 %5274 }
 0x4e5   : > { %5924 = vmatprep.mubr.bf16.mxu0 %v7764_v48  ;;  %6044 = vmatprep.mubr.bf16.mxu1 %v7767_v46  ;;  %v7843_v48 = vld [vmem:[%s11704_s10 + $0x1f0] ss:$8 sps:$4 sm:$0xff]  }
 0x4e8   : > { %v11218_v46 = vpop.permute.xlu0 %5279 }
 0x4ec   : > { %5925 = vmatmul.mubr.bf16.gmra.mxu0 %v7762_v18  ;;  %6045 = vmatmul.mubr.bf16.gmra.mxu1 %v7765_v62  ;;  %v11220_v18 = vpop.permute.xlu1 %5284  ;;  %v11222_v62 = vpop.permute.xlu0 %5289 }
 0x4ed   : > { %5934 = vmatprep.mubr.bf16.mxu0 %v7770_v50  ;;  %6054 = vmatprep.mubr.bf16.mxu1 %v7773_v37 }
 0x4f0   : > { %v11224_v50 = vpop.permute.xlu1 %5294  ;;  %v11226_v37 = vpop.permute.xlu0 %5299 }
 0x4f4   : > { %5935 = vmatmul.mubr.bf16.gmra.mxu0 %v7768_v60  ;;  %6055 = vmatmul.mubr.bf16.gmra.mxu1 %v7771_v36  ;;  %v11228_v60 = vpop.permute.xlu1 %5304  ;;  %v11230_v36 = vpop.permute.xlu0 %5309 }
 0x4f5   : > { %5944 = vmatprep.mubr.bf16.mxu0 %v7776_v58  ;;  %6064 = vmatprep.mubr.bf16.mxu1 %v7779_v1 }
 0x4f8   : > { %v11232_v58 = vpop.permute.xlu1 %5314  ;;  %v11234_v1 = vpop.permute.xlu0 %5319 }
 0x4fc   : > { %5945 = vmatmul.mubr.bf16.gmra.mxu0 %v7774_v29  ;;  %6065 = vmatmul.mubr.bf16.gmra.mxu1 %v7777_v51  ;;  %v11236_v29 = vpop.permute.xlu1 %5324  ;;  %v11238_v51 = vpop.permute.xlu0 %5329 }
 0x4fd   : > { %5954 = vmatprep.mubr.bf16.mxu0 %v7782_v55  ;;  %6074 = vmatprep.mubr.bf16.mxu1 %v7785_v24 }
 0x500   : > { %v11240_v55 = vpop.permute.xlu1 %5334  ;;  %v11242_v24 = vpop.permute.xlu0 %5339 }
 0x504   : > { %5955 = vmatmul.mubr.bf16.gmra.mxu0 %v7780_v27  ;;  %6075 = vmatmul.mubr.bf16.gmra.mxu1 %v7783_v16  ;;  %v11244_v27 = vpop.permute.xlu1 %5344  ;;  %v11247_v16 = vpop.permute.xlu0 %5349 }
 0x505   : > { %5964 = vmatprep.mubr.bf16.mxu0 %v7788_v47  ;;  %6084 = vmatprep.mubr.bf16.mxu1 %v7791_v13 }
 0x508   : > { %v5355_v47 = vpop.permute.xlu1 %5354 }
 0x50c   : > { %5965 = vmatmul.mubr.bf16.gmra.mxu0 %v7786_v61  ;;  %6085 = vmatmul.mubr.bf16.gmra.mxu1 %v7789_v22  ;;  %v11254_v61 = vstv %s6225_s19 }
 0x50d   : > { %5974 = vmatprep.mubr.bf16.mxu0 %v7794_v33  ;;  %6094 = vmatprep.mubr.bf16.mxu1 %v7797_v14 }
 0x514   : > { %5975 = vmatmul.mubr.bf16.gmra.mxu0 %v7792_v5  ;;  %6095 = vmatmul.mubr.bf16.gmra.mxu1 %v7795_v32  ;;  %v567_v5 = vld [vmem:[%s11252_s23] sm:$0xff] }
 0x515   : > { %5984 = vmatprep.mubr.bf16.mxu0 %v7800_v12  ;;  %6104 = vmatprep.mubr.bf16.mxu1 %v7803_v43  ;;  %v615_v32 = vld [vmem:[%s11252_s23 + $0x180] sm:$0xff] }
 0x51c   : > { %5985 = vmatmul.mubr.bf16.gmra.mxu0 %v7798_v40  ;;  %6105 = vmatmul.mubr.bf16.gmra.mxu1 %v7801_v0 }
 0x51d   : > { %5994 = vmatprep.mubr.bf16.mxu0 %v7806_v21  ;;  %6114 = vmatprep.mubr.bf16.mxu1 %v7809_v28 }
 0x524   : > { %5995 = vmatmul.mubr.bf16.gmra.mxu0 %v7804_v52  ;;  %6115 = vmatmul.mubr.bf16.gmra.mxu1 %v7807_v3  ;;  %v568_v52 = vld [vmem:[%s11252_s23 + $0x8] sm:$0xff] }
 0x525   : > { %6004 = vmatprep.mubr.bf16.mxu0 %v7812_v20  ;;  %6124 = vmatprep.mubr.bf16.mxu1 %v7815_v57  ;;  %v616_v3 = vld [vmem:[%s11252_s23 + $0x188] sm:$0xff] }
 0x52c   : > { %6005 = vmatmul.mubr.bf16.gmra.mxu0 %v7810_v54  ;;  %6125 = vmatmul.mubr.bf16.gmra.mxu1 %v7813_v10  ;;  %v5360_v54 = vpop.permute.xlu0 %5359 }
 0x52d   : > { %6014 = vmatprep.mubr.bf16.mxu0 %v7818_v8  ;;  %6134 = vmatprep.mubr.bf16.mxu1 %v7821_v25 }
 0x534   : > { %6015 = vmatmul.mubr.bf16.gmra.mxu0 %v7816_v59  ;;  %6135 = vmatmul.mubr.bf16.gmra.mxu1 %v7819_v49 }
 0x535   : > { %6144 = vmatprep.mubr.bf16.mxu1 %v7824_v41 }
 0x53c   : > { %6145 = vmatmul.mubr.bf16.gmra.mxu1 %v7822_v45 }
 0x53d   : > { %6154 = vmatprep.mubr.bf16.mxu1 %v7827_v11 }
 0x544   : > { %6155 = vmatmul.mubr.bf16.gmra.mxu1 %v7825_v63  ;;  %v5365_v63 = vpop.permute.xlu1 %5364 }
 0x545   : > { %6164 = vmatprep.mubr.bf16.mxu1 %v7830_v23 }
 0x54c   : > { %6165 = vmatmul.mubr.bf16.gmra.mxu1 %v7828_v15 }
 0x54d   : > { %6174 = vmatprep.mubr.bf16.mxu1 %v7833_v38  ;;  %v569_v38 = vld [vmem:[%s11252_s23 + $0x10] sm:$0xff] }
 0x554   : > { %6175 = vmatmul.mubr.bf16.gmra.mxu1 %v7831_v53  ;;  %v617_v53 = vld [vmem:[%s11252_s23 + $0x190] sm:$0xff] }
 0x555   : > { %6184 = vmatprep.mubr.bf16.mxu1 %v7836_v2 }
 0x55c   : > { %6185 = vmatmul.mubr.bf16.gmra.mxu1 %v7834_v19 }
 0x55d   : > { %6194 = vmatprep.mubr.bf16.mxu1 %v7839_v26 }
 0x564   : > { %6195 = vmatmul.mubr.bf16.gmra.mxu1 %v7837_v7  ;;  %v570_v7 = vld [vmem:[%s11252_s23 + $0x18] sm:$0xff] }
 0x565   : > { %6204 = vmatprep.mubr.bf16.mxu1 %v7842_v9  ;;  %v618_v9 = vld [vmem:[%s11252_s23 + $0x198] sm:$0xff] }
 0x56c   : > { %6205 = vmatmul.mubr.bf16.gmra.mxu1 %v7840_v34 }
 0x56d   : > { %6214 = vmatprep.mubr.bf16.mxu1 %v7845_v56 }
 0x574   : > { %6215 = vmatmul.mubr.bf16.gmra.mxu1 %v7843_v48 }
 0x59c   : > { %v5906_v13 = vpop.f32.mrf.mxu0  ;;  %v6026_v22 = vpop.f32.mrf.mxu1 }
 0x59d   : > { %v5907_v33 = vadd.f32 %v5906_v13, %v5235_v44  ;;  %v6027_v14 = vadd.f32 %v6026_v22, %v5355_v47 }
 0x59e   : > { %v5908_v12 = vpop.f32.mrf.mxu0  ;;  %v6028_v43 = vpop.f32.mrf.mxu1 }
 0x59f   : > { %v6227_v40 = vmul.f32 %v11254_v61, %v5907_v33  ;;  %v6275_v0 = vmul.f32 %v11254_v61, %v6027_v14  ;;  %v5909_v21 = vadd.f32 %v5908_v12, %v5235_v44  ;;  %v6029_v28 = vadd.f32 %v6028_v43, %v5355_v47  ;;  %v571_v14 = vld [vmem:[%s11252_s23 + $0x20] sm:$0xff]  ;;  %v5370_v43 = vpop.permute.xlu0 %5369 }
 0x5a0   : > { %v5910_v20 = vpop.f32.mrf.mxu0  ;;  %v6030_v57 = vpop.f32.mrf.mxu1 }
 0x5a1   : > { %v6355_v10 = vadd.f32 %v6227_v40, %v567_v5  ;;  %v6403_v8 = vadd.f32 %v6275_v0, %v615_v32  ;;  %v6228_v25 = vmul.f32 %v11254_v61, %v5909_v21  ;;  %v6276_v59 = vmul.f32 %v11254_v61, %v6029_v28  ;;  %v619_v5 = vld [vmem:[%s11252_s23 + $0x1a0] sm:$0xff] }
 0x5a2   : > { %v5911_v49 = vadd.f32 %v5910_v20, %v11184_v39  ;;  %v6031_v41 = vadd.f32 %v6030_v57, %v5360_v54  ;;  %v5912_v45 = vpop.f32.mrf.mxu0  ;;  %v6032_v11 = vpop.f32.mrf.mxu1 }
 0x5a3   : > { %6483 = vst [vmem:[%s11263_s26] sm:$0xff] %v6355_v10  ;;  %6531 = vst [vmem:[%s11263_s26 + $0x180] sm:$0xff] %v6403_v8  ;;  %v6356_v23 = vadd.f32 %v6228_v25, %v568_v52  ;;  %v6404_v15 = vadd.f32 %v6276_v59, %v616_v3  ;;  %v5913_v2 = vadd.f32 %v5912_v45, %v11184_v39  ;;  %v572_v8 = vld [vmem:[%s11252_s23 + $0x28] sm:$0xff]  ;;  %v573_v45 = vld [vmem:[%s11252_s23 + $0x30] sm:$0xff] }
 0x5a4   : > { %v6033_v44 = vadd.f32 %v6032_v11, %v5360_v54  ;;  %v6229_v19 = vmul.f32 %v11254_v61, %v5911_v49  ;;  %v6277_v26 = vmul.f32 %v11254_v61, %v6031_v41  ;;  %v5916_v34 = vpop.f32.mrf.mxu0  ;;  %v6036_v56 = vpop.f32.mrf.mxu1  ;;  %v620_v25 = vld [vmem:[%s11252_s23 + $0x1a8] sm:$0xff]  ;;  %v621_v11 = vld [vmem:[%s11252_s23 + $0x1b0] sm:$0xff] }
 0x5a5   : > { %6484 = vst [vmem:[%s11263_s26 + $0x8] sm:$0xff] %v6356_v23  ;;  %6532 = vst [vmem:[%s11263_s26 + $0x188] sm:$0xff] %v6404_v15  ;;  %v6230_v48 = vmul.f32 %v11254_v61, %v5913_v2  ;;  %v5917_v39 = vadd.f32 %v5916_v34, %v11186_v31  ;;  %v6037_v13 = vadd.f32 %v6036_v56, %v5365_v63  ;;  %v5375_v56 = vpop.permute.xlu1 %5374 }
 0x5a6   : > { %v6278_v47 = vmul.f32 %v11254_v61, %v6033_v44  ;;  %v6357_v22 = vadd.f32 %v6229_v19, %v569_v38  ;;  %v6405_v33 = vadd.f32 %v6277_v26, %v617_v53  ;;  %v5918_v32 = vpop.f32.mrf.mxu0  ;;  %v6038_v12 = vpop.f32.mrf.mxu1  ;;  %v574_v26 = vld [vmem:[%s11252_s23 + $0x38] sm:$0xff] }
 0x5a7   : > { %v6358_v40 = vadd.f32 %v6230_v48, %v570_v7  ;;  %v6231_v21 = vmul.f32 %v11254_v61, %v5917_v39  ;;  %v6279_v28 = vmul.f32 %v11254_v61, %v6037_v13  ;;  %v5919_v52 = vadd.f32 %v5918_v32, %v11186_v31  ;;  %v622_v7 = vld [vmem:[%s11252_s23 + $0x1b8] sm:$0xff] }
 0x5a8   : > { %v6406_v0 = vadd.f32 %v6278_v47, %v618_v9  ;;  %6485 = vst [vmem:[%s11263_s26 + $0x10] sm:$0xff] %v6357_v22  ;;  %6533 = vst [vmem:[%s11263_s26 + $0x190] sm:$0xff] %v6405_v33  ;;  %v6039_v3 = vadd.f32 %v6038_v12, %v5365_v63  ;;  %v5920_v20 = vpop.f32.mrf.mxu0  ;;  %v6040_v57 = vpop.f32.mrf.mxu1 }
 0x5a9   : > { %6486 = vst [vmem:[%s11263_s26 + $0x18] sm:$0xff] %v6358_v40  ;;  %v6359_v54 = vadd.f32 %v6231_v21, %v571_v14  ;;  %v6407_v10 = vadd.f32 %v6279_v28, %v619_v5  ;;  %v5921_v59 = vadd.f32 %v5920_v20, %v11191_v4  ;;  %v6041_v49 = vadd.f32 %v6040_v57, %v5370_v43  ;;  %v5380_v5 = vpop.permute.xlu0 %5379  ;;  %v623_v40 = vld [vmem:[%s11252_s23 + $0x1c0] sm:$0xff]  ;;  %v624_v20 = vld [vmem:[%s11252_s23 + $0x1c8] sm:$0xff] }
 0x5aa   : > { %6534 = vst [vmem:[%s11263_s26 + $0x198] sm:$0xff] %v6406_v0  ;;  %v6232_v41 = vmul.f32 %v11254_v61, %v5919_v52  ;;  %v6280_v31 = vmul.f32 %v11254_v61, %v6039_v3  ;;  %v5922_v63 = vpop.f32.mrf.mxu0  ;;  %v6042_v23 = vpop.f32.mrf.mxu1  ;;  %v576_v3 = vld [vmem:[%s11252_s23 + $0x48] sm:$0xff] }
 0x5ab   : > { %6487 = vst [vmem:[%s11263_s26 + $0x20] sm:$0xff] %v6359_v54  ;;  %6535 = vst [vmem:[%s11263_s26 + $0x1a0] sm:$0xff] %v6407_v10  ;;  %v6233_v15 = vmul.f32 %v11254_v61, %v5921_v59  ;;  %v6281_v38 = vmul.f32 %v11254_v61, %v6041_v49  ;;  %v5923_v53 = vadd.f32 %v5922_v63, %v11191_v4  ;;  %v5385_v63 = vpop.permute.xlu1 %5384 }
 0x5ac   : > { %v6043_v2 = vadd.f32 %v6042_v23, %v5370_v43  ;;  %v6360_v44 = vadd.f32 %v6232_v41, %v572_v8  ;;  %v6408_v19 = vadd.f32 %v6280_v31, %v620_v25  ;;  %v5926_v9 = vpop.f32.mrf.mxu0  ;;  %v6046_v34 = vpop.f32.mrf.mxu1  ;;  %v575_v43 = vld [vmem:[%s11252_s23 + $0x40] sm:$0xff]  ;;  %v577_v41 = vld [vmem:[%s11252_s23 + $0x50] sm:$0xff] }
 0x5ad   : > { %v6361_v48 = vadd.f32 %v6233_v15, %v573_v45  ;;  %v6409_v47 = vadd.f32 %v6281_v38, %v621_v11  ;;  %v6234_v39 = vmul.f32 %v11254_v61, %v5923_v53  ;;  %v5927_v4 = vadd.f32 %v5926_v9, %v11193_v6  ;;  %v625_v31 = vld [vmem:[%s11252_s23 + $0x1d0] sm:$0xff] }
 0x5ae   : > { %v6282_v13 = vmul.f32 %v11254_v61, %v6043_v2  ;;  %6488 = vst [vmem:[%s11263_s26 + $0x28] sm:$0xff] %v6360_v44  ;;  %6536 = vst [vmem:[%s11263_s26 + $0x1a8] sm:$0xff] %v6408_v19  ;;  %v6047_v22 = vadd.f32 %v6046_v34, %v5375_v56  ;;  %v5928_v33 = vpop.f32.mrf.mxu0  ;;  %v6048_v14 = vpop.f32.mrf.mxu1  ;;  %v578_v34 = vld [vmem:[%s11252_s23 + $0x58] sm:$0xff] }
 0x5af   : > { %6489 = vst [vmem:[%s11263_s26 + $0x30] sm:$0xff] %v6361_v48  ;;  %6537 = vst [vmem:[%s11263_s26 + $0x1b0] sm:$0xff] %v6409_v47  ;;  %v6362_v32 = vadd.f32 %v6234_v39, %v574_v26  ;;  %v5929_v0 = vadd.f32 %v5928_v33, %v11193_v6  ;;  %v6049_v21 = vadd.f32 %v6048_v14, %v5375_v56  ;;  %v626_v56 = vld [vmem:[%s11252_s23 + $0x1d8] sm:$0xff] }
 0x5b0   : > { %v6410_v12 = vadd.f32 %v6282_v13, %v622_v7  ;;  %v6235_v28 = vmul.f32 %v11254_v61, %v5927_v4  ;;  %v6283_v52 = vmul.f32 %v11254_v61, %v6047_v22  ;;  %v5930_v57 = vpop.f32.mrf.mxu0  ;;  %v6050_v54 = vpop.f32.mrf.mxu1  ;;  %v579_v13 = vld [vmem:[%s11252_s23 + $0x60] sm:$0xff] }
 0x5b1   : > { %6490 = vst [vmem:[%s11263_s26 + $0x38] sm:$0xff] %v6362_v32  ;;  %v6236_v10 = vmul.f32 %v11254_v61, %v5929_v0  ;;  %v6284_v8 = vmul.f32 %v11254_v61, %v6049_v21  ;;  %v5931_v6 = vadd.f32 %v5930_v57, %v11201_v17  ;;  %v6051_v25 = vadd.f32 %v6050_v54, %v5380_v5  ;;  %v627_v4 = vld [vmem:[%s11252_s23 + $0x1e0] sm:$0xff]  ;;  %v580_v0 = vld [vmem:[%s11252_s23 + $0x68] sm:$0xff] }
 0x5b2   : > { %6538 = vst [vmem:[%s11263_s26 + $0x1b8] sm:$0xff] %v6410_v12  ;;  %v6363_v59 = vadd.f32 %v6235_v28, %v575_v43  ;;  %v6411_v49 = vadd.f32 %v6283_v52, %v623_v40  ;;  %v5932_v45 = vpop.f32.mrf.mxu0  ;;  %v6052_v11 = vpop.f32.mrf.mxu1  ;;  %v628_v21 = vld [vmem:[%s11252_s23 + $0x1e8] sm:$0xff] }
 0x5b3   : > { %v6364_v23 = vadd.f32 %v6236_v10, %v576_v3  ;;  %v6412_v15 = vadd.f32 %v6284_v8, %v624_v20  ;;  %v6237_v38 = vmul.f32 %v11254_v61, %v5931_v6  ;;  %v6285_v53 = vmul.f32 %v11254_v61, %v6051_v25  ;;  %v5390_v3 = vpop.permute.xlu0 %5389 }
 0x5b4   : > { %6491 = vst [vmem:[%s11263_s26 + $0x40] sm:$0xff] %v6363_v59  ;;  %6539 = vst [vmem:[%s11263_s26 + $0x1c0] sm:$0xff] %v6411_v49  ;;  %v5933_v2 = vadd.f32 %v5932_v45, %v11201_v17  ;;  %v6053_v44 = vadd.f32 %v6052_v11, %v5380_v5  ;;  %v5936_v19 = vpop.f32.mrf.mxu0  ;;  %v6056_v26 = vpop.f32.mrf.mxu1  ;;  %v629_v45 = vld [vmem:[%s11252_s23 + $0x1f0] sm:$0xff] }
 0x5b5   : > { %6492 = vst [vmem:[%s11263_s26 + $0x48] sm:$0xff] %v6364_v23  ;;  %6540 = vst [vmem:[%s11263_s26 + $0x1c8] sm:$0xff] %v6412_v15  ;;  %v6365_v7 = vadd.f32 %v6237_v38, %v577_v41  ;;  %v6413_v9 = vadd.f32 %v6285_v53, %v625_v31  ;;  %v5937_v48 = vadd.f32 %v5936_v19, %v11203_v30  ;;  %v5395_v59 = vpop.permute.xlu1 %5394  ;;  %v581_v31 = vld [vmem:[%s11252_s23 + $0x70] sm:$0xff]  ;;  %v582_v38 = vld [vmem:[%s11252_s23 + $0x78] sm:$0xff] }
 0x5b6   : > { %v6057_v47 = vadd.f32 %v6056_v26, %v5385_v63  ;;  %v6238_v39 = vmul.f32 %v11254_v61, %v5933_v2  ;;  %v6286_v17 = vmul.f32 %v11254_v61, %v6053_v44  ;;  %v5938_v22 = vpop.f32.mrf.mxu0  ;;  %v6058_v33 = vpop.f32.mrf.mxu1  ;;  %v630_v53 = vld [vmem:[%s11252_s23 + $0x1f8] sm:$0xff] }
 0x5b7   : > { %6493 = vst [vmem:[%s11263_s26 + $0x50] sm:$0xff] %v6365_v7  ;;  %6541 = vst [vmem:[%s11263_s26 + $0x1d0] sm:$0xff] %v6413_v9  ;;  %v6239_v14 = vmul.f32 %v11254_v61, %v5937_v48  ;;  %v5939_v32 = vadd.f32 %v5938_v22, %v11203_v30  ;;  %v6059_v12 = vadd.f32 %v6058_v33, %v5385_v63  ;;  %v631_v48 = vld [vmem:[%s11252_s23 + $0x200] sm:$0xff] }
 0x5b8   : > { %v6287_v5 = vmul.f32 %v11254_v61, %v6057_v47  ;;  %v6366_v43 = vadd.f32 %v6238_v39, %v578_v34  ;;  %v6414_v40 = vadd.f32 %v6286_v17, %v626_v56  ;;  %v5940_v28 = vpop.f32.mrf.mxu0  ;;  %v6060_v52 = vpop.f32.mrf.mxu1  ;;  %v583_v56 = vld [vmem:[%s11252_s23 + $0x80] sm:$0xff] }
 0x5b9   : > { %v6367_v20 = vadd.f32 %v6239_v14, %v579_v13  ;;  %v6240_v54 = vmul.f32 %v11254_v61, %v5939_v32  ;;  %v6288_v10 = vmul.f32 %v11254_v61, %v6059_v12  ;;  %v5941_v30 = vadd.f32 %v5940_v28, %v11211_v42  ;;  %v5400_v17 = vpop.permute.xlu0 %5399 }
 0x5ba   : > { %v6415_v57 = vadd.f32 %v6287_v5, %v627_v4  ;;  %6494 = vst [vmem:[%s11263_s26 + $0x58] sm:$0xff] %v6366_v43  ;;  %6542 = vst [vmem:[%s11263_s26 + $0x1d8] sm:$0xff] %v6414_v40  ;;  %v6061_v8 = vadd.f32 %v6060_v52, %v5390_v3  ;;  %v5942_v6 = vpop.f32.mrf.mxu0  ;;  %v6062_v25 = vpop.f32.mrf.mxu1 }
 0x5bb   : > { %6495 = vst [vmem:[%s11263_s26 + $0x60] sm:$0xff] %v6367_v20  ;;  %v6368_v49 = vadd.f32 %v6240_v54, %v580_v0  ;;  %v6416_v41 = vadd.f32 %v6288_v10, %v628_v21  ;;  %v5943_v11 = vadd.f32 %v5942_v6, %v11211_v42  ;;  %v6063_v63 = vadd.f32 %v6062_v25, %v5390_v3  ;;  %v584_v0 = vld [vmem:[%s11252_s23 + $0x88] sm:$0xff]  ;;  %v585_v20 = vld [vmem:[%s11252_s23 + $0x90] sm:$0xff] }
 0x5bc   : > { %6543 = vst [vmem:[%s11263_s26 + $0x1e0] sm:$0xff] %v6415_v57  ;;  %v6241_v23 = vmul.f32 %v11254_v61, %v5941_v30  ;;  %v6289_v15 = vmul.f32 %v11254_v61, %v6061_v8  ;;  %v5946_v2 = vpop.f32.mrf.mxu0  ;;  %v6066_v44 = vpop.f32.mrf.mxu1  ;;  %v632_v21 = vld [vmem:[%s11252_s23 + $0x208] sm:$0xff]  ;;  %v633_v57 = vld [vmem:[%s11252_s23 + $0x210] sm:$0xff] }
 0x5bd   : > { %6496 = vst [vmem:[%s11263_s26 + $0x68] sm:$0xff] %v6368_v49  ;;  %6544 = vst [vmem:[%s11263_s26 + $0x1e8] sm:$0xff] %v6416_v41  ;;  %v6242_v19 = vmul.f32 %v11254_v61, %v5943_v11  ;;  %v6290_v26 = vmul.f32 %v11254_v61, %v6063_v63  ;;  %v5947_v42 = vadd.f32 %v5946_v2, %v11213_v35  ;;  %v586_v41 = vld [vmem:[%s11252_s23 + $0x98] sm:$0xff]  ;;  %v5405_v63 = vpop.permute.xlu1 %5404 }
 0x5be   : > { %v6067_v7 = vadd.f32 %v6066_v44, %v5395_v59  ;;  %v6369_v9 = vadd.f32 %v6241_v23, %v581_v31  ;;  %v6417_v34 = vadd.f32 %v6289_v15, %v629_v45  ;;  %v5948_v47 = vpop.f32.mrf.mxu0  ;;  %v6068_v39 = vpop.f32.mrf.mxu1  ;;  %v634_v31 = vld [vmem:[%s11252_s23 + $0x218] sm:$0xff] }
 0x5bf   : > { %v6370_v13 = vadd.f32 %v6242_v19, %v582_v38  ;;  %v6418_v4 = vadd.f32 %v6290_v26, %v630_v53  ;;  %v6243_v22 = vmul.f32 %v11254_v61, %v5947_v42  ;;  %v5949_v14 = vadd.f32 %v5948_v47, %v11213_v35  ;;  %v5410_v26 = vpop.permute.xlu0 %5409 }
 0x5c0   : > { %v6291_v33 = vmul.f32 %v11254_v61, %v6067_v7  ;;  %6497 = vst [vmem:[%s11263_s26 + $0x70] sm:$0xff] %v6369_v9  ;;  %6545 = vst [vmem:[%s11263_s26 + $0x1f0] sm:$0xff] %v6417_v34  ;;  %v6069_v5 = vadd.f32 %v6068_v39, %v5395_v59  ;;  %v5950_v32 = vpop.f32.mrf.mxu0  ;;  %v6070_v12 = vpop.f32.mrf.mxu1  ;;  %v587_v9 = vld [vmem:[%s11252_s23 + $0xa0] sm:$0xff] }
 0x5c1   : > { %6498 = vst [vmem:[%s11263_s26 + $0x78] sm:$0xff] %v6370_v13  ;;  %6546 = vst [vmem:[%s11263_s26 + $0x1f8] sm:$0xff] %v6418_v4  ;;  %v6371_v43 = vadd.f32 %v6243_v22, %v583_v56  ;;  %v5951_v28 = vadd.f32 %v5950_v32, %v11218_v46  ;;  %v6071_v52 = vadd.f32 %v6070_v12, %v5400_v17  ;;  %v635_v34 = vld [vmem:[%s11252_s23 + $0x220] sm:$0xff]  ;;  %v636_v13 = vld [vmem:[%s11252_s23 + $0x228] sm:$0xff] }
 0x5c2   : > { %v6419_v40 = vadd.f32 %v6291_v33, %v631_v48  ;;  %v6244_v3 = vmul.f32 %v11254_v61, %v5949_v14  ;;  %v6292_v35 = vmul.f32 %v11254_v61, %v6069_v5  ;;  %v5952_v54 = vpop.f32.mrf.mxu0  ;;  %v6072_v10 = vpop.f32.mrf.mxu1 }
 0x5c3   : > { %6499 = vst [vmem:[%s11263_s26 + $0x80] sm:$0xff] %v6371_v43  ;;  %v6245_v30 = vmul.f32 %v11254_v61, %v5951_v28  ;;  %v6293_v8 = vmul.f32 %v11254_v61, %v6071_v52  ;;  %v5953_v6 = vadd.f32 %v5952_v54, %v11218_v46  ;;  %v6073_v25 = vadd.f32 %v6072_v10, %v5400_v17  ;;  %v588_v17 = vld [vmem:[%s11252_s23 + $0xa8] sm:$0xff]  ;;  %v589_v43 = vld [vmem:[%s11252_s23 + $0xb0] sm:$0xff]  ;;  %v5415_v28 = vpop.permute.xlu1 %5414 }
 0x5c4   : > { %6547 = vst [vmem:[%s11263_s26 + $0x200] sm:$0xff] %v6419_v40  ;;  %v6372_v59 = vadd.f32 %v6244_v3, %v584_v0  ;;  %v6420_v49 = vadd.f32 %v6292_v35, %v632_v21  ;;  %v5956_v45 = vpop.f32.mrf.mxu0  ;;  %v6076_v11 = vpop.f32.mrf.mxu1  ;;  %v637_v40 = vld [vmem:[%s11252_s23 + $0x230] sm:$0xff] }
 0x5c5   : > { %v6373_v23 = vadd.f32 %v6245_v30, %v585_v20  ;;  %v6421_v15 = vadd.f32 %v6293_v8, %v633_v57  ;;  %v6246_v38 = vmul.f32 %v11254_v61, %v5953_v6  ;;  %v6294_v53 = vmul.f32 %v11254_v61, %v6073_v25  ;;  %v590_v25 = vld [vmem:[%s11252_s23 + $0xb8] sm:$0xff] }
 0x5c6   : > { %6500 = vst [vmem:[%s11263_s26 + $0x88] sm:$0xff] %v6372_v59  ;;  %6548 = vst [vmem:[%s11263_s26 + $0x208] sm:$0xff] %v6420_v49  ;;  %v5957_v46 = vadd.f32 %v5956_v45, %v11220_v18  ;;  %v6077_v2 = vadd.f32 %v6076_v11, %v5405_v63  ;;  %v5958_v44 = vpop.f32.mrf.mxu0  ;;  %v6078_v19 = vpop.f32.mrf.mxu1  ;;  %v638_v59 = vld [vmem:[%s11252_s23 + $0x238] sm:$0xff]  ;;  %v591_v45 = vld [vmem:[%s11252_s23 + $0xc0] sm:$0xff] }
 0x5c7   : > { %6501 = vst [vmem:[%s11263_s26 + $0x90] sm:$0xff] %v6373_v23  ;;  %6549 = vst [vmem:[%s11263_s26 + $0x210] sm:$0xff] %v6421_v15  ;;  %v6374_v42 = vadd.f32 %v6246_v38, %v586_v41  ;;  %v6422_v7 = vadd.f32 %v6294_v53, %v634_v31  ;;  %v5959_v56 = vadd.f32 %v5958_v44, %v11220_v18  ;;  %v639_v11 = vld [vmem:[%s11252_s23 + $0x240] sm:$0xff] }
 0x5c8   : > { %v6079_v48 = vadd.f32 %v6078_v19, %v5405_v63  ;;  %v6247_v47 = vmul.f32 %v11254_v61, %v5957_v46  ;;  %v6295_v39 = vmul.f32 %v11254_v61, %v6077_v2  ;;  %v5960_v4 = vpop.f32.mrf.mxu0  ;;  %v6080_v22 = vpop.f32.mrf.mxu1  ;;  %v592_v19 = vld [vmem:[%s11252_s23 + $0xc8] sm:$0xff] }
 0x5c9   : > { %6502 = vst [vmem:[%s11263_s26 + $0x98] sm:$0xff] %v6374_v42  ;;  %6550 = vst [vmem:[%s11263_s26 + $0x218] sm:$0xff] %v6422_v7  ;;  %v6248_v33 = vmul.f32 %v11254_v61, %v5959_v56  ;;  %v5961_v18 = vadd.f32 %v5960_v4, %v11222_v62  ;;  %v6081_v5 = vadd.f32 %v6080_v22, %v5410_v26  ;;  %v5425_v4 = vpop.permute.xlu1 %5424 }
 0x5ca   : > { %v6296_v14 = vmul.f32 %v11254_v61, %v6079_v48  ;;  %v6375_v32 = vadd.f32 %v6247_v47, %v587_v9  ;;  %v6423_v12 = vadd.f32 %v6295_v39, %v635_v34  ;;  %v5962_v0 = vpop.f32.mrf.mxu0  ;;  %v6082_v21 = vpop.f32.mrf.mxu1 }
 0x5cb   : > { %v6376_v52 = vadd.f32 %v6248_v33, %v588_v17  ;;  %v6249_v35 = vmul.f32 %v11254_v61, %v5961_v18  ;;  %v6297_v20 = vmul.f32 %v11254_v61, %v6081_v5  ;;  %v5963_v57 = vadd.f32 %v5962_v0, %v11222_v62  ;;  %v5420_v9 = vpop.permute.xlu0 %5419  ;;  %v641_v18 = vld [vmem:[%s11252_s23 + $0x250] sm:$0xff]  ;;  %v642_v0 = vld [vmem:[%s11252_s23 + $0x258] sm:$0xff] }
 0x5cc   : > { %v6424_v3 = vadd.f32 %v6296_v14, %v636_v13  ;;  %6503 = vst [vmem:[%s11263_s26 + $0xa0] sm:$0xff] %v6375_v32  ;;  %6551 = vst [vmem:[%s11263_s26 + $0x220] sm:$0xff] %v6423_v12  ;;  %v6083_v54 = vadd.f32 %v6082_v21, %v5410_v26  ;;  %v5966_v10 = vpop.f32.mrf.mxu0  ;;  %v6086_v30 = vpop.f32.mrf.mxu1  ;;  %v640_v26 = vld [vmem:[%s11252_s23 + $0x248] sm:$0xff]  ;;  %v593_v14 = vld [vmem:[%s11252_s23 + $0xd0] sm:$0xff] }
 0x5cd   : > { %6504 = vst [vmem:[%s11263_s26 + $0xa8] sm:$0xff] %v6376_v52  ;;  %v6377_v8 = vadd.f32 %v6249_v35, %v589_v43  ;;  %v6425_v6 = vadd.f32 %v6297_v20, %v637_v40  ;;  %v5967_v49 = vadd.f32 %v5966_v10, %v11224_v50  ;;  %v6087_v41 = vadd.f32 %v6086_v30, %v5415_v28  ;;  %v594_v40 = vld [vmem:[%s11252_s23 + $0xd8] sm:$0xff]  ;;  %v643_v10 = vld [vmem:[%s11252_s23 + $0x260] sm:$0xff] }
 0x5ce   : > { %6552 = vst [vmem:[%s11263_s26 + $0x228] sm:$0xff] %v6424_v3  ;;  %v6250_v31 = vmul.f32 %v11254_v61, %v5963_v57  ;;  %v6298_v62 = vmul.f32 %v11254_v61, %v6083_v54  ;;  %v5968_v63 = vpop.f32.mrf.mxu0  ;;  %v6088_v23 = vpop.f32.mrf.mxu1  ;;  %v595_v54 = vld [vmem:[%s11252_s23 + $0xe0] sm:$0xff] }
 0x5cf   : > { %6505 = vst [vmem:[%s11263_s26 + $0xb0] sm:$0xff] %v6377_v8  ;;  %6553 = vst [vmem:[%s11263_s26 + $0x230] sm:$0xff] %v6425_v6  ;;  %v6251_v15 = vmul.f32 %v11254_v61, %v5967_v49  ;;  %v6299_v38 = vmul.f32 %v11254_v61, %v6087_v41  ;;  %v5969_v53 = vadd.f32 %v5968_v63, %v11224_v50  ;;  %v5430_v6 = vpop.permute.xlu0 %5429 }
 0x5d0   : > { %v6089_v46 = vadd.f32 %v6088_v23, %v5415_v28  ;;  %v6378_v2 = vadd.f32 %v6250_v31, %v590_v25  ;;  %v6426_v44 = vadd.f32 %v6298_v62, %v638_v59  ;;  %v5970_v42 = vpop.f32.mrf.mxu0  ;;  %v6090_v7 = vpop.f32.mrf.mxu1 }
 0x5d1   : > { %v6379_v34 = vadd.f32 %v6251_v15, %v591_v45  ;;  %v6427_v56 = vadd.f32 %v6299_v38, %v639_v11  ;;  %v6252_v48 = vmul.f32 %v11254_v61, %v5969_v53  ;;  %v5971_v50 = vadd.f32 %v5970_v42, %v11226_v37  ;;  %v596_v15 = vld [vmem:[%s11252_s23 + $0xe8] sm:$0xff] }
 0x5d2   : > { %v6300_v47 = vmul.f32 %v11254_v61, %v6089_v46  ;;  %6506 = vst [vmem:[%s11263_s26 + $0xb8] sm:$0xff] %v6378_v2  ;;  %6554 = vst [vmem:[%s11263_s26 + $0x238] sm:$0xff] %v6426_v44  ;;  %v6091_v39 = vadd.f32 %v6090_v7, %v5420_v9  ;;  %v5972_v17 = vpop.f32.mrf.mxu0  ;;  %v6092_v13 = vpop.f32.mrf.mxu1  ;;  %v644_v38 = vld [vmem:[%s11252_s23 + $0x268] sm:$0xff]  ;;  %v597_v44 = vld [vmem:[%s11252_s23 + $0xf0] sm:$0xff] }
 0x5d3   : > { %6507 = vst [vmem:[%s11263_s26 + $0xc0] sm:$0xff] %v6379_v34  ;;  %6555 = vst [vmem:[%s11263_s26 + $0x240] sm:$0xff] %v6427_v56  ;;  %v6380_v22 = vadd.f32 %v6252_v48, %v592_v19  ;;  %v5973_v5 = vadd.f32 %v5972_v17, %v11226_v37  ;;  %v6093_v32 = vadd.f32 %v6092_v13, %v5420_v9  ;;  %v645_v19 = vld [vmem:[%s11252_s23 + $0x270] sm:$0xff] }
 0x5d4   : > { %v6428_v33 = vadd.f32 %v6300_v47, %v640_v26  ;;  %v6253_v12 = vmul.f32 %v11254_v61, %v5971_v50  ;;  %v6301_v43 = vmul.f32 %v11254_v61, %v6091_v39  ;;  %v5976_v21 = vpop.f32.mrf.mxu0  ;;  %v6096_v28 = vpop.f32.mrf.mxu1  ;;  %v598_v50 = vld [vmem:[%s11252_s23 + $0xf8] sm:$0xff] }
 0x5d5   : > { %6508 = vst [vmem:[%s11263_s26 + $0xc8] sm:$0xff] %v6380_v22  ;;  %v6254_v52 = vmul.f32 %v11254_v61, %v5973_v5  ;;  %v6302_v3 = vmul.f32 %v11254_v61, %v6093_v32  ;;  %v5977_v37 = vadd.f32 %v5976_v21, %v11228_v60  ;;  %v6097_v35 = vadd.f32 %v6096_v28, %v5425_v4  ;;  %v646_v39 = vld [vmem:[%s11252_s23 + $0x278] sm:$0xff]  ;;  %v599_v21 = vld [vmem:[%s11252_s23 + $0x100] sm:$0xff] }
 0x5d6   : > { %6556 = vst [vmem:[%s11263_s26 + $0x248] sm:$0xff] %v6428_v33  ;;  %v6381_v20 = vadd.f32 %v6253_v12, %v593_v14  ;;  %v6429_v57 = vadd.f32 %v6301_v43, %v641_v18  ;;  %v5978_v30 = vpop.f32.mrf.mxu0  ;;  %v6098_v8 = vpop.f32.mrf.mxu1  ;;  %v647_v28 = vld [vmem:[%s11252_s23 + $0x280] sm:$0xff] }
 0x5d7   : > { %v6382_v25 = vadd.f32 %v6254_v52, %v594_v40  ;;  %v6430_v59 = vadd.f32 %v6302_v3, %v642_v0  ;;  %v6255_v49 = vmul.f32 %v11254_v61, %v5977_v37  ;;  %v6303_v41 = vmul.f32 %v11254_v61, %v6097_v35  ;;  %v5440_v43 = vpop.permute.xlu0 %5439 }
 0x5d8   : > { %6509 = vst [vmem:[%s11263_s26 + $0xd0] sm:$0xff] %v6381_v20  ;;  %6557 = vst [vmem:[%s11263_s26 + $0x250] sm:$0xff] %v6429_v57  ;;  %v5979_v31 = vadd.f32 %v5978_v30, %v11228_v60  ;;  %v6099_v62 = vadd.f32 %v6098_v8, %v5425_v4  ;;  %v5980_v45 = vpop.f32.mrf.mxu0  ;;  %v6100_v11 = vpop.f32.mrf.mxu1  ;;  %v600_v20 = vld [vmem:[%s11252_s23 + $0x108] sm:$0xff] }
 0x5d9   : > { %6510 = vst [vmem:[%s11263_s26 + $0xd8] sm:$0xff] %v6382_v25  ;;  %6558 = vst [vmem:[%s11263_s26 + $0x258] sm:$0xff] %v6430_v59  ;;  %v6383_v63 = vadd.f32 %v6255_v49, %v595_v54  ;;  %v6431_v23 = vadd.f32 %v6303_v41, %v643_v10  ;;  %v5981_v53 = vadd.f32 %v5980_v45, %v11230_v36  ;;  %v5435_v4 = vpop.permute.xlu1 %5434  ;;  %v648_v57 = vld [vmem:[%s11252_s23 + $0x288] sm:$0xff]  ;;  %v601_v49 = vld [vmem:[%s11252_s23 + $0x110] sm:$0xff] }
 0x5da   : > { %v6101_v46 = vadd.f32 %v6100_v11, %v5430_v6  ;;  %v6256_v2 = vmul.f32 %v11254_v61, %v5979_v31  ;;  %v6304_v60 = vmul.f32 %v11254_v61, %v6099_v62  ;;  %v5982_v26 = vpop.f32.mrf.mxu0  ;;  %v6102_v42 = vpop.f32.mrf.mxu1  ;;  %v649_v41 = vld [vmem:[%s11252_s23 + $0x290] sm:$0xff] }
 0x5db   : > { %6511 = vst [vmem:[%s11263_s26 + $0xe0] sm:$0xff] %v6383_v63  ;;  %6559 = vst [vmem:[%s11263_s26 + $0x260] sm:$0xff] %v6431_v23  ;;  %v6257_v7 = vmul.f32 %v11254_v61, %v5981_v53  ;;  %v5983_v34 = vadd.f32 %v5982_v26, %v11230_v36  ;;  %v6103_v56 = vadd.f32 %v6102_v42, %v5430_v6  ;;  %v650_v26 = vld [vmem:[%s11252_s23 + $0x298] sm:$0xff] }
 0x5dc   : > { %v6305_v9 = vmul.f32 %v11254_v61, %v6101_v46  ;;  %v6384_v48 = vadd.f32 %v6256_v2, %v596_v15  ;;  %v6432_v47 = vadd.f32 %v6304_v60, %v644_v38  ;;  %v5986_v17 = vpop.f32.mrf.mxu0  ;;  %v6106_v13 = vpop.f32.mrf.mxu1 }
 0x5dd   : > { %v6385_v22 = vadd.f32 %v6257_v7, %v597_v44  ;;  %v6258_v14 = vmul.f32 %v11254_v61, %v5983_v34  ;;  %v6306_v18 = vmul.f32 %v11254_v61, %v6103_v56  ;;  %v5987_v36 = vadd.f32 %v5986_v17, %v11232_v58  ;;  %v5445_v45 = vpop.permute.xlu1 %5444  ;;  %v603_v34 = vld [vmem:[%s11252_s23 + $0x120] sm:$0xff] }
 0x5de   : > { %v6433_v33 = vadd.f32 %v6305_v9, %v645_v19  ;;  %6512 = vst [vmem:[%s11263_s26 + $0xe8] sm:$0xff] %v6384_v48  ;;  %6560 = vst [vmem:[%s11263_s26 + $0x268] sm:$0xff] %v6432_v47  ;;  %v6107_v5 = vadd.f32 %v6106_v13, %v5435_v4  ;;  %v5988_v32 = vpop.f32.mrf.mxu0  ;;  %v6108_v12 = vpop.f32.mrf.mxu1  ;;  %v602_v19 = vld [vmem:[%s11252_s23 + $0x118] sm:$0xff]  ;;  %v651_v56 = vld [vmem:[%s11252_s23 + $0x2a0] sm:$0xff] }
 0x5df   : > { %6513 = vst [vmem:[%s11263_s26 + $0xf0] sm:$0xff] %v6385_v22  ;;  %v6386_v40 = vadd.f32 %v6258_v14, %v598_v50  ;;  %v6434_v0 = vadd.f32 %v6306_v18, %v646_v39  ;;  %v5989_v52 = vadd.f32 %v5988_v32, %v11232_v58  ;;  %v6109_v3 = vadd.f32 %v6108_v12, %v5435_v4  ;;  %v652_v14 = vld [vmem:[%s11252_s23 + $0x2a8] sm:$0xff] }
 0x5e0   : > { %6561 = vst [vmem:[%s11263_s26 + $0x270] sm:$0xff] %v6433_v33  ;;  %v6259_v37 = vmul.f32 %v11254_v61, %v5987_v36  ;;  %v6307_v35 = vmul.f32 %v11254_v61, %v6107_v5  ;;  %v5990_v54 = vpop.f32.mrf.mxu0  ;;  %v6110_v10 = vpop.f32.mrf.mxu1  ;;  %v604_v33 = vld [vmem:[%s11252_s23 + $0x128] sm:$0xff] }
 0x5e1   : > { %6514 = vst [vmem:[%s11263_s26 + $0xf8] sm:$0xff] %v6386_v40  ;;  %6562 = vst [vmem:[%s11263_s26 + $0x278] sm:$0xff] %v6434_v0  ;;  %v6260_v30 = vmul.f32 %v11254_v61, %v5989_v52  ;;  %v6308_v8 = vmul.f32 %v11254_v61, %v6109_v3  ;;  %v5991_v58 = vadd.f32 %v5990_v54, %v11234_v1  ;;  %v5450_v5 = vpop.permute.xlu0 %5449  ;;  %v5455_v52 = vpop.permute.xlu1 %5454 }
 0x5e2   : > { %v6111_v6 = vadd.f32 %v6110_v10, %v5440_v43  ;;  %v6387_v25 = vadd.f32 %v6259_v37, %v599_v21  ;;  %v6435_v59 = vadd.f32 %v6307_v35, %v647_v28  ;;  %v5992_v31 = vpop.f32.mrf.mxu0  ;;  %v6112_v62 = vpop.f32.mrf.mxu1  ;;  %v605_v35 = vld [vmem:[%s11252_s23 + $0x130] sm:$0xff] }
 0x5e3   : > { %v6388_v11 = vadd.f32 %v6260_v30, %v600_v20  ;;  %v6436_v63 = vadd.f32 %v6308_v8, %v648_v57  ;;  %v6261_v23 = vmul.f32 %v11254_v61, %v5991_v58  ;;  %v5993_v38 = vadd.f32 %v5992_v31, %v11234_v1  ;;  %v653_v20 = vld [vmem:[%s11252_s23 + $0x2b0] sm:$0xff]  ;;  %v606_v8 = vld [vmem:[%s11252_s23 + $0x138] sm:$0xff] }
 0x5e4   : > { %v6309_v15 = vmul.f32 %v11254_v61, %v6111_v6  ;;  %6515 = vst [vmem:[%s11263_s26 + $0x100] sm:$0xff] %v6387_v25  ;;  %6563 = vst [vmem:[%s11263_s26 + $0x280] sm:$0xff] %v6435_v59  ;;  %v6113_v53 = vadd.f32 %v6112_v62, %v5440_v43  ;;  %v5996_v46 = vpop.f32.mrf.mxu0  ;;  %v6116_v2 = vpop.f32.mrf.mxu1  ;;  %v654_v58 = vld [vmem:[%s11252_s23 + $0x2b8] sm:$0xff] }
 0x5e5   : > { %6516 = vst [vmem:[%s11263_s26 + $0x108] sm:$0xff] %v6388_v11  ;;  %6564 = vst [vmem:[%s11263_s26 + $0x288] sm:$0xff] %v6436_v63  ;;  %v6389_v60 = vadd.f32 %v6261_v23, %v601_v49  ;;  %v5997_v42 = vadd.f32 %v5996_v46, %v11236_v29  ;;  %v6117_v7 = vadd.f32 %v6116_v2, %v5445_v45  ;;  %v655_v11 = vld [vmem:[%s11252_s23 + $0x2c0] sm:$0xff] }
 0x5e6   : > { %v6437_v44 = vadd.f32 %v6309_v15, %v649_v41  ;;  %v6262_v9 = vmul.f32 %v11254_v61, %v5993_v38  ;;  %v6310_v1 = vmul.f32 %v11254_v61, %v6113_v53  ;;  %v5998_v48 = vpop.f32.mrf.mxu0  ;;  %v6118_v47 = vpop.f32.mrf.mxu1 }
 0x5e7   : > { %6517 = vst [vmem:[%s11263_s26 + $0x110] sm:$0xff] %v6389_v60  ;;  %v6263_v50 = vmul.f32 %v11254_v61, %v5997_v42  ;;  %v6311_v39 = vmul.f32 %v11254_v61, %v6117_v7  ;;  %v5999_v17 = vadd.f32 %v5998_v48, %v11236_v29  ;;  %v6119_v13 = vadd.f32 %v6118_v47, %v5445_v45  ;;  %v607_v45 = vld [vmem:[%s11252_s23 + $0x140] sm:$0xff]  ;;  %v5460_v15 = vpop.permute.xlu0 %5459  ;;  %v609_v47 = vld [vmem:[%s11252_s23 + $0x150] sm:$0xff] }
 0x5e8   : > { %6565 = vst [vmem:[%s11263_s26 + $0x290] sm:$0xff] %v6437_v44  ;;  %v6390_v4 = vadd.f32 %v6262_v9, %v602_v19  ;;  %v6438_v22 = vadd.f32 %v6310_v1, %v650_v26  ;;  %v6000_v18 = vpop.f32.mrf.mxu0  ;;  %v6120_v36 = vpop.f32.mrf.mxu1  ;;  %v608_v9 = vld [vmem:[%s11252_s23 + $0x148] sm:$0xff] }
 0x5e9   : > { %v6391_v32 = vadd.f32 %v6263_v50, %v603_v34  ;;  %v6439_v12 = vadd.f32 %v6311_v39, %v651_v56  ;;  %v6264_v43 = vmul.f32 %v11254_v61, %v5999_v17  ;;  %v6312_v40 = vmul.f32 %v11254_v61, %v6119_v13  ;;  %v656_v1 = vld [vmem:[%s11252_s23 + $0x2c8] sm:$0xff]  ;;  %v657_v50 = vld [vmem:[%s11252_s23 + $0x2d0] sm:$0xff] }
 0x5ea   : > { %6518 = vst [vmem:[%s11263_s26 + $0x118] sm:$0xff] %v6390_v4  ;;  %6566 = vst [vmem:[%s11263_s26 + $0x298] sm:$0xff] %v6438_v22  ;;  %v6001_v29 = vadd.f32 %v6000_v18, %v11238_v51  ;;  %v6121_v0 = vadd.f32 %v6120_v36, %v5450_v5  ;;  %v6002_v21 = vpop.f32.mrf.mxu0  ;;  %v6122_v28 = vpop.f32.mrf.mxu1  ;;  %v610_v36 = vld [vmem:[%s11252_s23 + $0x158] sm:$0xff] }
 0x5eb   : > { %6519 = vst [vmem:[%s11263_s26 + $0x120] sm:$0xff] %v6391_v32  ;;  %6567 = vst [vmem:[%s11263_s26 + $0x2a0] sm:$0xff] %v6439_v12  ;;  %v6392_v3 = vadd.f32 %v6264_v43, %v604_v33  ;;  %v6440_v37 = vadd.f32 %v6312_v40, %v652_v14  ;;  %v6003_v57 = vadd.f32 %v6002_v21, %v11238_v51  ;;  %v5465_v43 = vpop.permute.xlu1 %5464 }
 0x5ec   : > { %v6123_v54 = vadd.f32 %v6122_v28, %v5450_v5  ;;  %v6265_v10 = vmul.f32 %v11254_v61, %v6001_v29  ;;  %v6313_v30 = vmul.f32 %v11254_v61, %v6121_v0  ;;  %v6006_v6 = vpop.f32.mrf.mxu0  ;;  %v6126_v25 = vpop.f32.mrf.mxu1  ;;  %v658_v5 = vld [vmem:[%s11252_s23 + $0x2d8] sm:$0xff] }
 0x5ed   : > { %6520 = vst [vmem:[%s11263_s26 + $0x128] sm:$0xff] %v6392_v3  ;;  %6568 = vst [vmem:[%s11263_s26 + $0x2a8] sm:$0xff] %v6440_v37  ;;  %v6266_v59 = vmul.f32 %v11254_v61, %v6003_v57  ;;  %v6007_v51 = vadd.f32 %v6006_v6, %v11240_v55  ;;  %v6127_v41 = vadd.f32 %v6126_v25, %v5455_v52  ;;  %v5470_v37 = vpop.permute.xlu0 %5469  ;;  %v611_v57 = vld [vmem:[%s11252_s23 + $0x160] sm:$0xff]  ;;  %v612_v6 = vld [vmem:[%s11252_s23 + $0x168] sm:$0xff] }
 0x5ee   : > { %v6314_v49 = vmul.f32 %v11254_v61, %v6123_v54  ;;  %v6393_v31 = vadd.f32 %v6265_v10, %v605_v35  ;;  %v6441_v62 = vadd.f32 %v6313_v30, %v653_v20  ;;  %v6008_v63 = vpop.f32.mrf.mxu0  ;;  %v6128_v23 = vpop.f32.mrf.mxu1  ;;  %v659_v54 = vld [vmem:[%s11252_s23 + $0x2e0] sm:$0xff]  ;;  %v660_v25 = vld [vmem:[%s11252_s23 + $0x2e8] sm:$0xff] }
 0x5ef   : > { %v6394_v38 = vadd.f32 %v6266_v59, %v606_v8  ;;  %v6267_v46 = vmul.f32 %v11254_v61, %v6007_v51  ;;  %v6315_v2 = vmul.f32 %v11254_v61, %v6127_v41  ;;  %v6009_v60 = vadd.f32 %v6008_v63, %v11240_v55  ;;  %v661_v63 = vld [vmem:[%s11252_s23 + $0x2f0] sm:$0xff] }
 0x5f0   : > { %v6442_v53 = vadd.f32 %v6314_v49, %v654_v58  ;;  %6521 = vst [vmem:[%s11263_s26 + $0x130] sm:$0xff] %v6393_v31  ;;  %6569 = vst [vmem:[%s11263_s26 + $0x2b0] sm:$0xff] %v6441_v62  ;;  %v6129_v44 = vadd.f32 %v6128_v23, %v5455_v52  ;;  %v6010_v19 = vpop.f32.mrf.mxu0  ;;  %v6130_v26 = vpop.f32.mrf.mxu1 }
 0x5f1   : > { %6522 = vst [vmem:[%s11263_s26 + $0x138] sm:$0xff] %v6394_v38  ;;  %v6395_v42 = vadd.f32 %v6267_v46, %v607_v45  ;;  %v6443_v7 = vadd.f32 %v6315_v2, %v655_v11  ;;  %v6011_v34 = vadd.f32 %v6010_v19, %v11242_v24  ;;  %v6131_v56 = vadd.f32 %v6130_v26, %v5460_v15  ;;  %v613_v11 = vld [vmem:[%s11252_s23 + $0x170] sm:$0xff] }
 0x5f2   : > { %6570 = vst [vmem:[%s11263_s26 + $0x2b8] sm:$0xff] %v6442_v53  ;;  %v6268_v48 = vmul.f32 %v11254_v61, %v6009_v60  ;;  %v6316_v55 = vmul.f32 %v11254_v61, %v6129_v44  ;;  %v6012_v39 = vpop.f32.mrf.mxu0  ;;  %v6132_v17 = vpop.f32.mrf.mxu1 }
 0x5f3   : > { %6523 = vst [vmem:[%s11263_s26 + $0x140] sm:$0xff] %v6395_v42  ;;  %6571 = vst [vmem:[%s11263_s26 + $0x2c0] sm:$0xff] %v6443_v7  ;;  %v6269_v13 = vmul.f32 %v11254_v61, %v6011_v34  ;;  %v6317_v4 = vmul.f32 %v11254_v61, %v6131_v56  ;;  %v6013_v22 = vadd.f32 %v6012_v39, %v11242_v24  ;;  %v5475_v60 = vpop.permute.xlu1 %5474  ;;  %v5480_v39 = vpop.permute.xlu0 %5479 }
 0x5f4   : > { %v6133_v33 = vadd.f32 %v6132_v17, %v5460_v15  ;;  %v6396_v14 = vadd.f32 %v6268_v48, %v608_v9  ;;  %v6444_v18 = vadd.f32 %v6316_v55, %v656_v1  ;;  %v6016_v32 = vpop.f32.mrf.mxu0  ;;  %v6136_v12 = vpop.f32.mrf.mxu1  ;;  %v614_v9 = vld [vmem:[%s11252_s23 + $0x178] sm:$0xff]  ;;  %v663_v55 = vld [vmem:[%s11252_s23 + $0x300] sm:$0xff] }
 0x5f5   : > { %v6397_v40 = vadd.f32 %v6269_v13, %v609_v47  ;;  %v6445_v29 = vadd.f32 %v6317_v4, %v657_v50  ;;  %v6270_v0 = vmul.f32 %v11254_v61, %v6013_v22  ;;  %v6017_v24 = vadd.f32 %v6016_v32, %v11244_v27  ;;  %v662_v1 = vld [vmem:[%s11252_s23 + $0x2f8] sm:$0xff]  ;;  %v664_v4 = vld [vmem:[%s11252_s23 + $0x308] sm:$0xff] }
 0x5f6   : > { %v6318_v21 = vmul.f32 %v11254_v61, %v6133_v33  ;;  %6524 = vst [vmem:[%s11263_s26 + $0x148] sm:$0xff] %v6396_v14  ;;  %6572 = vst [vmem:[%s11263_s26 + $0x2c8] sm:$0xff] %v6444_v18  ;;  %v6137_v28 = vadd.f32 %v6136_v12, %v5465_v43  ;;  %v6018_v52 = vpop.f32.mrf.mxu0  ;;  %v6138_v3 = vpop.f32.mrf.mxu1 }
 0x5f7   : > { %6525 = vst [vmem:[%s11263_s26 + $0x150] sm:$0xff] %v6397_v40  ;;  %6573 = vst [vmem:[%s11263_s26 + $0x2d0] sm:$0xff] %v6445_v29  ;;  %v6398_v35 = vadd.f32 %v6270_v0, %v610_v36  ;;  %v6019_v10 = vadd.f32 %v6018_v52, %v11244_v27  ;;  %v6139_v30 = vadd.f32 %v6138_v3, %v5465_v43  ;;  %v665_v36 = vld [vmem:[%s11252_s23 + $0x310] sm:$0xff]  ;;  %v5485_v40 = vpop.permute.xlu1 %5484  ;;  %v666_v29 = vld [vmem:[%s11252_s23 + $0x318] sm:$0xff] }
 0x5f8   : > { %v6446_v20 = vadd.f32 %v6318_v21, %v658_v5  ;;  %v6271_v8 = vmul.f32 %v11254_v61, %v6017_v24  ;;  %v6319_v58 = vmul.f32 %v11254_v61, %v6137_v28  ;;  %v6020_v59 = vpop.f32.mrf.mxu0  ;;  %v6140_v49 = vpop.f32.mrf.mxu1  ;;  %v667_v52 = vld [vmem:[%s11252_s23 + $0x320] sm:$0xff] }
 0x5f9   : > { %6526 = vst [vmem:[%s11263_s26 + $0x158] sm:$0xff] %v6398_v35  ;;  %v6272_v51 = vmul.f32 %v11254_v61, %v6019_v10  ;;  %v6320_v41 = vmul.f32 %v11254_v61, %v6139_v30  ;;  %v6021_v27 = vadd.f32 %v6020_v59, %v11247_v16  ;;  %v6141_v31 = vadd.f32 %v6140_v49, %v5470_v37 }
 0x5fa   : > { %6574 = vst [vmem:[%s11263_s26 + $0x2d8] sm:$0xff] %v6446_v20  ;;  %v6399_v62 = vadd.f32 %v6271_v8, %v611_v57  ;;  %v6447_v45 = vadd.f32 %v6319_v58, %v659_v54  ;;  %v6022_v23 = vpop.f32.mrf.mxu0  ;;  %v6142_v15 = vpop.f32.mrf.mxu1  ;;  %v668_v54 = vld [vmem:[%s11252_s23 + $0x328] sm:$0xff] }
 0x5fb   : > { %v6400_v38 = vadd.f32 %v6272_v51, %v612_v6  ;;  %v6448_v53 = vadd.f32 %v6320_v41, %v660_v25  ;;  %v6273_v46 = vmul.f32 %v11254_v61, %v6021_v27  ;;  %v6321_v2 = vmul.f32 %v11254_v61, %v6141_v31  ;;  %v5490_v57 = vpop.permute.xlu0 %5489  ;;  %v669_v6 = vld [vmem:[%s11252_s23 + $0x330] sm:$0xff]  ;;  %v5495_v41 = vpop.permute.xlu1 %5494  ;;  %v670_v27 = vld [vmem:[%s11252_s23 + $0x338] sm:$0xff] }
 0x5fc   : > { %6527 = vst [vmem:[%s11263_s26 + $0x160] sm:$0xff] %v6399_v62  ;;  %6575 = vst [vmem:[%s11263_s26 + $0x2e0] sm:$0xff] %v6447_v45  ;;  %v6023_v44 = vadd.f32 %v6022_v23, %v11247_v16  ;;  %v6143_v19 = vadd.f32 %v6142_v15, %v5470_v37  ;;  %v6146_v26 = vpop.f32.mrf.mxu1 }
 0x5fd   : > { %6528 = vst [vmem:[%s11263_s26 + $0x168] sm:$0xff] %v6400_v38  ;;  %6576 = vst [vmem:[%s11263_s26 + $0x2e8] sm:$0xff] %v6448_v53  ;;  %v6401_v42 = vadd.f32 %v6273_v46, %v613_v11  ;;  %v6449_v7 = vadd.f32 %v6321_v2, %v661_v63  ;;  %v6147_v34 = vadd.f32 %v6146_v26, %v5475_v60  ;;  %v671_v63 = vld [vmem:[%s11252_s23 + $0x340] sm:$0xff]  ;;  %v672_v2 = vld [vmem:[%s11252_s23 + $0x348] sm:$0xff] }
 0x5fe   : > { %v6274_v56 = vmul.f32 %v11254_v61, %v6023_v44  ;;  %v6322_v48 = vmul.f32 %v11254_v61, %v6143_v19  ;;  %v6148_v47 = vpop.f32.mrf.mxu1 }
 0x5ff   : > { %6529 = vst [vmem:[%s11263_s26 + $0x170] sm:$0xff] %v6401_v42  ;;  %6577 = vst [vmem:[%s11263_s26 + $0x2f0] sm:$0xff] %v6449_v7  ;;  %v6323_v16 = vmul.f32 %v11254_v61, %v6147_v34  ;;  %v6149_v50 = vadd.f32 %v6148_v47, %v5475_v60  ;;  %v5500_v46 = vpop.permute.xlu0 %5499  ;;  %v673_v42 = vld [vmem:[%s11252_s23 + $0x350] sm:$0xff] }
 0x600   : > { %v6402_v17 = vadd.f32 %v6274_v56, %v614_v9  ;;  %v6450_v13 = vadd.f32 %v6322_v48, %v662_v1  ;;  %v6150_v22 = vpop.f32.mrf.mxu1  ;;  %v5505_v56 = vpop.permute.xlu1 %5504  ;;  %v674_v48 = vld [vmem:[%s11252_s23 + $0x358] sm:$0xff] }
 0x601   : > { %v6451_v33 = vadd.f32 %v6323_v16, %v663_v55  ;;  %v6324_v14 = vmul.f32 %v11254_v61, %v6149_v50  ;;  %v6151_v18 = vadd.f32 %v6150_v22, %v5480_v39 }
 0x602   : > { %6530 = vst [vmem:[%s11263_s26 + $0x178] sm:$0xff] %v6402_v17  ;;  %6578 = vst [vmem:[%s11263_s26 + $0x2f8] sm:$0xff] %v6450_v13  ;;  %v6152_v5 = vpop.f32.mrf.mxu1 }
 0x603   : > { %6579 = vst [vmem:[%s11263_s26 + $0x300] sm:$0xff] %v6451_v33  ;;  %v6452_v32 = vadd.f32 %v6324_v14, %v664_v4  ;;  %v6325_v12 = vmul.f32 %v11254_v61, %v6151_v18  ;;  %v6153_v43 = vadd.f32 %v6152_v5, %v5480_v39  ;;  %v675_v39 = vld [vmem:[%s11252_s23 + $0x360] sm:$0xff]  ;;  %v5510_v33 = vpop.permute.xlu0 %5509  ;;  %v676_v14 = vld [vmem:[%s11252_s23 + $0x368] sm:$0xff] }
 0x604   : > { %v6156_v0 = vpop.f32.mrf.mxu1 }
 0x605   : > { %6580 = vst [vmem:[%s11263_s26 + $0x308] sm:$0xff] %v6452_v32  ;;  %v6453_v21 = vadd.f32 %v6325_v12, %v665_v36  ;;  %v6326_v24 = vmul.f32 %v11254_v61, %v6153_v43  ;;  %v6157_v28 = vadd.f32 %v6156_v0, %v5485_v40  ;;  %v677_v12 = vld [vmem:[%s11252_s23 + $0x370] sm:$0xff] }
 0x606   : > { %v6158_v3 = vpop.f32.mrf.mxu1 }
 0x607   : > { %6581 = vst [vmem:[%s11263_s26 + $0x310] sm:$0xff] %v6453_v21  ;;  %v6454_v37 = vadd.f32 %v6326_v24, %v666_v29  ;;  %v6327_v35 = vmul.f32 %v11254_v61, %v6157_v28  ;;  %v6159_v20 = vadd.f32 %v6158_v3, %v5485_v40  ;;  %v5515_v21 = vpop.permute.xlu1 %5514  ;;  %v678_v24 = vld [vmem:[%s11252_s23 + $0x378] sm:$0xff] }
 0x608   : > { %v6160_v10 = vpop.f32.mrf.mxu1 }
 0x609   : > { %6582 = vst [vmem:[%s11263_s26 + $0x318] sm:$0xff] %v6454_v37  ;;  %v6455_v30 = vadd.f32 %v6327_v35, %v667_v52  ;;  %v6328_v8 = vmul.f32 %v11254_v61, %v6159_v20  ;;  %v6161_v58 = vadd.f32 %v6160_v10, %v5490_v57  ;;  %v679_v35 = vld [vmem:[%s11252_s23 + $0x380] sm:$0xff] }
 0x60a   : > { %v6162_v25 = vpop.f32.mrf.mxu1 }
 0x60b   : > { %6583 = vst [vmem:[%s11263_s26 + $0x320] sm:$0xff] %v6455_v30  ;;  %v6456_v59 = vadd.f32 %v6328_v8, %v668_v54  ;;  %v6329_v49 = vmul.f32 %v11254_v61, %v6161_v58  ;;  %v6163_v51 = vadd.f32 %v6162_v25, %v5490_v57  ;;  %v5520_v30 = vpop.permute.xlu0 %5519  ;;  %v680_v8 = vld [vmem:[%s11252_s23 + $0x388] sm:$0xff] }
 0x60c   : > { %v6166_v31 = vpop.f32.mrf.mxu1 }
 0x60d   : > { %6584 = vst [vmem:[%s11263_s26 + $0x328] sm:$0xff] %v6456_v59  ;;  %v6457_v62 = vadd.f32 %v6329_v49, %v669_v6  ;;  %v6330_v45 = vmul.f32 %v11254_v61, %v6163_v51  ;;  %v6167_v11 = vadd.f32 %v6166_v31, %v5495_v41  ;;  %v681_v49 = vld [vmem:[%s11252_s23 + $0x390] sm:$0xff] }
 0x60e   : > { %v6168_v23 = vpop.f32.mrf.mxu1 }
 0x60f   : > { %6585 = vst [vmem:[%s11263_s26 + $0x330] sm:$0xff] %v6457_v62  ;;  %v6458_v15 = vadd.f32 %v6330_v45, %v670_v27  ;;  %v6331_v38 = vmul.f32 %v11254_v61, %v6167_v11  ;;  %v6169_v53 = vadd.f32 %v6168_v23, %v5495_v41  ;;  %v5525_v62 = vpop.permute.xlu1 %5524  ;;  %v682_v45 = vld [vmem:[%s11252_s23 + $0x398] sm:$0xff] }
 0x610   : > { %v6170_v60 = vpop.f32.mrf.mxu1 }
 0x611   : > { %6586 = vst [vmem:[%s11263_s26 + $0x338] sm:$0xff] %v6458_v15  ;;  %v6459_v44 = vadd.f32 %v6331_v38, %v671_v63  ;;  %v6332_v19 = vmul.f32 %v11254_v61, %v6169_v53  ;;  %v6171_v26 = vadd.f32 %v6170_v60, %v5500_v46  ;;  %v683_v38 = vld [vmem:[%s11252_s23 + $0x3a0] sm:$0xff] }
 0x612   : > { %v6172_v7 = vpop.f32.mrf.mxu1 }
 0x613   : > { %6587 = vst [vmem:[%s11263_s26 + $0x340] sm:$0xff] %v6459_v44  ;;  %v6460_v9 = vadd.f32 %v6332_v19, %v672_v2  ;;  %v6333_v1 = vmul.f32 %v11254_v61, %v6171_v26  ;;  %v6173_v34 = vadd.f32 %v6172_v7, %v5500_v46  ;;  %v5530_v44 = vpop.permute.xlu0 %5529  ;;  %v684_v19 = vld [vmem:[%s11252_s23 + $0x3a8] sm:$0xff] }
 0x614   : > { %v6176_v55 = vpop.f32.mrf.mxu1 }
 0x615   : > { %6588 = vst [vmem:[%s11263_s26 + $0x348] sm:$0xff] %v6460_v9  ;;  %v6461_v47 = vadd.f32 %v6333_v1, %v673_v42  ;;  %v6334_v16 = vmul.f32 %v11254_v61, %v6173_v34  ;;  %v6177_v50 = vadd.f32 %v6176_v55, %v5505_v56  ;;  %v685_v1 = vld [vmem:[%s11252_s23 + $0x3b0] sm:$0xff] }
 0x616   : > { %v6178_v17 = vpop.f32.mrf.mxu1 }
 0x617   : > { %6589 = vst [vmem:[%s11263_s26 + $0x350] sm:$0xff] %v6461_v47  ;;  %v6462_v13 = vadd.f32 %v6334_v16, %v674_v48  ;;  %v6335_v4 = vmul.f32 %v11254_v61, %v6177_v50  ;;  %v6179_v22 = vadd.f32 %v6178_v17, %v5505_v56  ;;  %v5535_v47 = vpop.permute.xlu1 %5534  ;;  %v686_v16 = vld [vmem:[%s11252_s23 + $0x3b8] sm:$0xff] }
 0x618   : > { %v6180_v18 = vpop.f32.mrf.mxu1 }
 0x619   : > { %6590 = vst [vmem:[%s11263_s26 + $0x358] sm:$0xff] %v6462_v13  ;;  %v6463_v36 = vadd.f32 %v6335_v4, %v675_v39  ;;  %v6336_v5 = vmul.f32 %v11254_v61, %v6179_v22  ;;  %v6181_v32 = vadd.f32 %v6180_v18, %v5510_v33  ;;  %v687_v4 = vld [vmem:[%s11252_s23 + $0x3c0] sm:$0xff] }
 0x61a   : > { %v6182_v43 = vpop.f32.mrf.mxu1 }
 0x61b   : > { %6591 = vst [vmem:[%s11263_s26 + $0x360] sm:$0xff] %v6463_v36  ;;  %v6464_v40 = vadd.f32 %v6336_v5, %v676_v14  ;;  %v6337_v29 = vmul.f32 %v11254_v61, %v6181_v32  ;;  %v6183_v0 = vadd.f32 %v6182_v43, %v5510_v33  ;;  %v5540_v36 = vpop.permute.xlu0 %5539  ;;  %v688_v5 = vld [vmem:[%s11252_s23 + $0x3c8] sm:$0xff] }
 0x61c   : > { %v6186_v28 = vpop.f32.mrf.mxu1 }
 0x61d   : > { %6592 = vst [vmem:[%s11263_s26 + $0x368] sm:$0xff] %v6464_v40  ;;  %v6465_v52 = vadd.f32 %v6337_v29, %v677_v12  ;;  %v6338_v3 = vmul.f32 %v11254_v61, %v6183_v0  ;;  %v6187_v37 = vadd.f32 %v6186_v28, %v5515_v21  ;;  %v689_v29 = vld [vmem:[%s11252_s23 + $0x3d0] sm:$0xff] }
 0x61e   : > { %v6188_v20 = vpop.f32.mrf.mxu1 }
 0x61f   : > { %6593 = vst [vmem:[%s11263_s26 + $0x370] sm:$0xff] %v6465_v52  ;;  %v6466_v57 = vadd.f32 %v6338_v3, %v678_v24  ;;  %v6339_v54 = vmul.f32 %v11254_v61, %v6187_v37  ;;  %v6189_v10 = vadd.f32 %v6188_v20, %v5515_v21  ;;  %v5545_v52 = vpop.permute.xlu1 %5544  ;;  %v690_v3 = vld [vmem:[%s11252_s23 + $0x3d8] sm:$0xff] }
 0x620   : > { %v6190_v58 = vpop.f32.mrf.mxu1 }
 0x621   : > { %6594 = vst [vmem:[%s11263_s26 + $0x378] sm:$0xff] %v6466_v57  ;;  %v6467_v6 = vadd.f32 %v6339_v54, %v679_v35  ;;  %v6340_v25 = vmul.f32 %v11254_v61, %v6189_v10  ;;  %v6191_v59 = vadd.f32 %v6190_v58, %v5520_v30  ;;  %v691_v54 = vld [vmem:[%s11252_s23 + $0x3e0] sm:$0xff] }
 0x622   : > { %v6192_v51 = vpop.f32.mrf.mxu1 }
 0x623   : > { %6595 = vst [vmem:[%s11263_s26 + $0x380] sm:$0xff] %v6467_v6  ;;  %v6468_v41 = vadd.f32 %v6340_v25, %v680_v8  ;;  %v6341_v27 = vmul.f32 %v11254_v61, %v6191_v59  ;;  %v6193_v31 = vadd.f32 %v6192_v51, %v5520_v30  ;;  %v5550_v6 = vpop.permute.xlu0 %5549  ;;  %v692_v25 = vld [vmem:[%s11252_s23 + $0x3e8] sm:$0xff] }
 0x624   : > { %v6196_v11 = vpop.f32.mrf.mxu1 }
 0x625   : > { %6596 = vst [vmem:[%s11263_s26 + $0x388] sm:$0xff] %v6468_v41  ;;  %v6469_v63 = vadd.f32 %v6341_v27, %v681_v49  ;;  %v6342_v23 = vmul.f32 %v11254_v61, %v6193_v31  ;;  %v6197_v15 = vadd.f32 %v6196_v11, %v5525_v62  ;;  %v693_v27 = vld [vmem:[%s11252_s23 + $0x3f0] sm:$0xff] }
 0x626   : > { %v6198_v53 = vpop.f32.mrf.mxu1 }
 0x627   : > { %6597 = vst [vmem:[%s11263_s26 + $0x390] sm:$0xff] %v6469_v63  ;;  %v6470_v46 = vadd.f32 %v6342_v23, %v682_v45  ;;  %v6343_v2 = vmul.f32 %v11254_v61, %v6197_v15  ;;  %v6199_v60 = vadd.f32 %v6198_v53, %v5525_v62  ;;  %v694_v63 = vld [vmem:[%s11252_s23 + $0x3f8] sm:$0xff] }
 0x628   : > { %v6200_v26 = vpop.f32.mrf.mxu1 }
 0x629   : > { %6598 = vst [vmem:[%s11263_s26 + $0x398] sm:$0xff] %v6470_v46  ;;  %v6471_v42 = vadd.f32 %v6343_v2, %v683_v38  ;;  %v6344_v7 = vmul.f32 %v11254_v61, %v6199_v60  ;;  %v6201_v9 = vadd.f32 %v6200_v26, %v5530_v44 }
 0x62a   : > { %v6202_v34 = vpop.f32.mrf.mxu1 }
 0x62b   : > { %6599 = vst [vmem:[%s11263_s26 + $0x3a0] sm:$0xff] %v6471_v42  ;;  %v6472_v56 = vadd.f32 %v6344_v7, %v684_v19  ;;  %v6345_v48 = vmul.f32 %v11254_v61, %v6201_v9  ;;  %v6203_v55 = vadd.f32 %v6202_v34, %v5530_v44 }
 0x62c   : > { %v6206_v50 = vpop.f32.mrf.mxu1 }
 0x62d   : > { %6600 = vst [vmem:[%s11263_s26 + $0x3a8] sm:$0xff] %v6472_v56  ;;  %v6473_v39 = vadd.f32 %v6345_v48, %v685_v1  ;;  %v6346_v17 = vmul.f32 %v11254_v61, %v6203_v55  ;;  %v6207_v13 = vadd.f32 %v6206_v50, %v5535_v47 }
 0x62e   : > { %v6208_v22 = vpop.f32.mrf.mxu1 }
 0x62f   : > { %6601 = vst [vmem:[%s11263_s26 + $0x3b0] sm:$0xff] %v6473_v39  ;;  %v6474_v33 = vadd.f32 %v6346_v17, %v686_v16  ;;  %v6347_v14 = vmul.f32 %v11254_v61, %v6207_v13  ;;  %v6209_v18 = vadd.f32 %v6208_v22, %v5535_v47 }
 0x630   : > { %v6210_v32 = vpop.f32.mrf.mxu1 }
 0x631   : > { %6602 = vst [vmem:[%s11263_s26 + $0x3b8] sm:$0xff] %v6474_v33  ;;  %v6475_v12 = vadd.f32 %v6347_v14, %v687_v4  ;;  %v6348_v43 = vmul.f32 %v11254_v61, %v6209_v18  ;;  %v6211_v40 = vadd.f32 %v6210_v32, %v5540_v36 }
 0x632   : > { %v6212_v0 = vpop.f32.mrf.mxu1 }
 0x633   : > { %6603 = vst [vmem:[%s11263_s26 + $0x3c0] sm:$0xff] %v6475_v12  ;;  %v6476_v21 = vadd.f32 %v6348_v43, %v688_v5  ;;  %v6349_v24 = vmul.f32 %v11254_v61, %v6211_v40  ;;  %v6213_v28 = vadd.f32 %v6212_v0, %v5540_v36 }
 0x634   : > { %v6216_v37 = vpop.f32.mrf.mxu1 }
 0x635   : > { %6604 = vst [vmem:[%s11263_s26 + $0x3c8] sm:$0xff] %v6476_v21  ;;  %v6477_v35 = vadd.f32 %v6349_v24, %v689_v29  ;;  %v6350_v20 = vmul.f32 %v11254_v61, %v6213_v28  ;;  %v6217_v57 = vadd.f32 %v6216_v37, %v5545_v52 }
 0x636   : > { %v6218_v10 = vpop.f32.mrf.mxu1 }
 0x637   : > { %6605 = vst [vmem:[%s11263_s26 + $0x3d0] sm:$0xff] %v6477_v35  ;;  %v6478_v30 = vadd.f32 %v6350_v20, %v690_v3  ;;  %v6351_v8 = vmul.f32 %v11254_v61, %v6217_v57  ;;  %v6219_v58 = vadd.f32 %v6218_v10, %v5545_v52 }
 0x638   : > { %v6220_v59 = vpop.f32.mrf.mxu1 }
 0x639   : > { %6606 = vst [vmem:[%s11263_s26 + $0x3d8] sm:$0xff] %v6478_v30  ;;  %v6479_v49 = vadd.f32 %v6351_v8, %v691_v54  ;;  %v6352_v51 = vmul.f32 %v11254_v61, %v6219_v58  ;;  %v6221_v41 = vadd.f32 %v6220_v59, %v5550_v6 }
 0x63a   : > { %v6222_v31 = vpop.f32.mrf.mxu1 }
 0x63b   : > { %6607 = vst [vmem:[%s11263_s26 + $0x3e0] sm:$0xff] %v6479_v49  ;;  %v6480_v62 = vadd.f32 %v6352_v51, %v692_v25  ;;  %v6353_v45 = vmul.f32 %v11254_v61, %v6221_v41  ;;  %v6223_v11 = vadd.f32 %v6222_v31, %v5550_v6 }
 0x63d   : > { %6608 = vst [vmem:[%s11263_s26 + $0x3e8] sm:$0xff] %v6480_v62  ;;  %v6481_v23 = vadd.f32 %v6353_v45, %v693_v27  ;;  %v6354_v15 = vmul.f32 %v11254_v61, %v6223_v11 }
 0x63f   : > { %6609 = vst [vmem:[%s11263_s26 + $0x3f0] sm:$0xff] %v6481_v23  ;;  %v6482_v38 = vadd.f32 %v6354_v15, %v694_v63 }
 0x641   : > { %6610 = vst [vmem:[%s11263_s26 + $0x3f8] sm:$0xff] %v6482_v38 }
 0x642 PF: > { %s24_s27 = sadd.s32 1, %s8044_s27  }
 0x643   : > { %p21_p4 = scmp.ge.s32.totalorder %s24_s27, 4  }
 0x645   :  { %23 = sbr.rel (!%p21_p4) target bundleno = 2 (0x2), region = 111 }

</bundles_post_ra>
